<compile_context>
chip_gen: v6e
topology: v6e:2x2x1
jax: 0.10.0
libtpu: 0.0.40
codegen_flags: <defaults>
</compile_context>

<pallas_src>
import functools
import math

import numpy as np
import jax
import jax.numpy as jnp
from jax.experimental import pallas as pl
from jax.experimental.pallas import tpu as pltpu

NUM_HEADS = 4
DEPTH = 156          # fixed by the hard-coded [3:147] joint slice (24 joints x 6 dims)
N_JOINTS = 24
D_JOINT = 6


def _round_up(x, m):
    return (x + m - 1) // m * m


def _build_blend_matrix():
    """24x24 matrix M with row0_new = row0 @ M and col0_new = M^T @ col0 reproducing
    DS_Attention.apply_custom_weighting exactly (the update chain is linear)."""
    m = np.eye(N_JOINTS, dtype=np.float32)
    steps = [(6, 3), (9, 6), (12, 9), (13, 9), (14, 9), (16, 13), (17, 14), (15, 12)]
    for tgt, src in steps:
        m[:, tgt] = 0.5 * (m[:, tgt] + m[:, src])
    return m


# ------------------------- one-time weight re-arrangement -------------------------

def prepare_params(params):
    """Rearranges the module weights (ONCE, outside jit) into the layouts the fused
    kernel consumes directly, removing all per-call slicing / scatter glue."""
    H, D, J, DJ = NUM_HEADS, DEPTH, N_JOINTS, D_JOINT
    dnh = H * D
    wqk = params['qk_proj']                      # (d_model, 2*dnh) bf16
    wv = params['v_proj']                        # (d_model, dnh)   bf16
    lw = params['lin_w']                         # (dnh, d_model)   bf16
    d_model = wqk.shape[0]

    def proj_joint(w):                           # (d_model, dnh) -> (H, DJ, d_model, J)
        w4 = w.reshape(d_model, H, D)[:, :, 3:3 + J * DJ]
        w4 = w4.reshape(d_model, H, J, DJ)
        return jnp.transpose(w4, (1, 3, 0, 2))

    # output-linear rows for the joint columns: (H, DJ, J, d_model)
    lwj = lw.reshape(H, D, d_model)[:, 3:3 + J * DJ, :].reshape(H, J, DJ, d_model)
    lwj = jnp.transpose(lwj, (0, 2, 1, 3))

    # non-joint pass-through of V folded with the matching output-linear rows:
    # (d_model, d_model) so the kernel needs a single extra dot for it.
    nj = jnp.concatenate([jnp.arange(0, 3), jnp.arange(3 + J * DJ, D)])       # 12 cols
    cols = (jnp.arange(H)[:, None] * D + nj[None, :]).reshape(-1)             # (48,)
    w_pass = jnp.dot(wv[:, cols].astype(jnp.float32),
                     lw[cols, :].astype(jnp.float32)).astype(jnp.bfloat16)

    return {
        'wq': proj_joint(wqk[:, :dnh]),          # (H, 6, d_model, 24) bf16
        'wk': proj_joint(wqk[:, dnh:]),
        'wv': proj_joint(wv),
        'lwj': lwj.astype(jnp.bfloat16),         # (H, 6, 24, d_model)
        'w_pass': w_pass,                        # (d_model, d_model)
        'bias': params['lin_b'].reshape(1, d_model).astype(jnp.float32),
        'blend': jnp.asarray(_build_blend_matrix()),
    }


# ------------------------------ fused forward kernel ------------------------------

def _ds_attention_kernel(q_ref, v_ref, wq_ref, wk_ref, wv_ref, lwj_ref,
                         wpass_ref, bias_ref, blend_ref, o_ref, *, scale):
    h = pl.program_id(1)

    qb = q_ref[...].astype(jnp.bfloat16)                     # (TM, d_model)
    vb = v_ref[...].astype(jnp.bfloat16)
    wq = wq_ref[0]                                           # (6, d_model, 24) bf16
    wk = wk_ref[0]
    wv = wv_ref[0]
    lwj = lwj_ref[0]                                         # (6, 24, d_model) bf16

    # pass-through (non-joint V columns) + bias: initialize the resident out block.
    @pl.when(h == 0)
    def _():
        o_ref[...] = bias_ref[...] + jnp.dot(
            vb, wpass_ref[...], preferred_element_type=jnp.float32)

    # per-joint-dim projections (MXU); scores accumulated with VPU outer products.
    tm = qb.shape[0]
    s = jnp.zeros((tm, N_JOINTS, N_JOINTS), jnp.float32)
    v_planes = []
    for d in range(D_JOINT):
        qd = jnp.dot(qb, wq[d], preferred_element_type=jnp.float32)      # (TM, 24)
        kd = jnp.dot(qb, wk[d], preferred_element_type=jnp.float32)      # (TM, 24)
        vd = jnp.dot(vb, wv[d], preferred_element_type=jnp.float32)      # (TM, 24)
        s += qd[:, :, None] * kd[:, None, :]
        v_planes.append(vd)
    s = s * scale

    # softmax (f32, probs never leave VMEM / vregs)
    s = s - jnp.max(s, axis=-1, keepdims=True)
    p = jnp.exp(s)
    p = p * pl.reciprocal(jnp.sum(p, axis=-1, keepdims=True), approx=True)

    # custom weighting: one blend matmul for row 0 and one for column 0 + select
    blend = blend_ref[...]
    r0 = jnp.dot(p[:, 0, :], blend, preferred_element_type=jnp.float32)  # (TM, 24)
    c0 = jnp.dot(p[:, :, 0], blend, preferred_element_type=jnp.float32)  # (TM, 24)
    ii = jax.lax.broadcasted_iota(jnp.int32, p.shape, 1)
    jj = jax.lax.broadcasted_iota(jnp.int32, p.shape, 2)
    p = jnp.where(ii == 0, r0[:, None, :], p)
    p = jnp.where(jnp.logical_and(jj == 0, ii > 0), c0[:, :, None], p)

    # weighted values + this head's slice of the output linear, accumulated into out
    contrib = jnp.zeros((tm, o_ref.shape[-1]), jnp.float32)
    for d in range(D_JOINT):
        ad = jnp.sum(p * v_planes[d][:, None, :], axis=-1)               # (TM, 24)
        contrib += jnp.dot(ad.astype(jnp.bfloat16), lwj[d],
                           preferred_element_type=jnp.float32)
    o_ref[...] += contrib


def ds_attention_forward(prepared, query, key, value):
    """DS_Attention.forward.  NOTE: like the PyTorch module, `key` is unused —
    both q and k come from `query` via qk_proj_weight."""
    del key
    B, N, d_model = query.shape
    M = B * N
    q2 = query.reshape(M, d_model).astype(jnp.float32)
    v2 = value.reshape(M, d_model).astype(jnp.float32)

    TM = min(128, _round_up(M, 8))
    Mp = _round_up(M, TM)
    if Mp != M:
        q2 = jnp.pad(q2, ((0, Mp - M), (0, 0)))
        v2 = jnp.pad(v2, ((0, Mp - M), (0, 0)))

    kernel = functools.partial(_ds_attention_kernel, scale=1.0 / math.sqrt(D_JOINT))
    row = pl.BlockSpec((TM, d_model), lambda i, h: (i, 0))

    def per_head(shp):
        return pl.BlockSpec((1,) + shp, lambda i, h: (h, 0, 0, 0))

    def full2d(shp):
        return pl.BlockSpec(shp, lambda i, h: (0, 0))

    out = pl.pallas_call(
        kernel,
        out_shape=jax.ShapeDtypeStruct((Mp, d_model), jnp.float32),
        grid=(Mp // TM, NUM_HEADS),
        in_specs=[
            row, row,
            per_head((D_JOINT, d_model, N_JOINTS)),   # wq
            per_head((D_JOINT, d_model, N_JOINTS)),   # wk
            per_head((D_JOINT, d_model, N_JOINTS)),   # wv
            per_head((D_JOINT, N_JOINTS, d_model)),   # lwj
            full2d((d_model, d_model)),               # w_pass
            full2d((1, d_model)),                     # bias
            full2d((N_JOINTS, N_JOINTS)),             # blend
        ],
        out_specs=pl.BlockSpec((TM, d_model), lambda i, h: (i, 0)),
        compiler_params=pltpu.CompilerParams(
            dimension_semantics=("parallel", "arbitrary")),
    )(q2, v2, prepared['wq'], prepared['wk'], prepared['wv'],
      prepared['lwj'], prepared['w_pass'], prepared['bias'], prepared['blend'])

    if Mp != M:
        out = out[:M]
    return out.reshape(B, N, d_model)


# --------------------------- pure-JAX reference (check) ---------------------------

def _apply_custom_weighting_ref(a):
    a = a.at[..., 0, 6].set((a[..., 0, 6] + a[..., 0, 3]) / 2)
    a = a.at[..., 6, 0].set((a[..., 6, 0] + a[..., 3, 0]) / 2)
    a = a.at[..., 0, 9].set((a[..., 0, 9] + a[..., 0, 6]) / 2)
    a = a.at[..., 9, 0].set((a[..., 9, 0] + a[..., 6, 0]) / 2)
    for idx in (12, 13, 14):
        a = a.at[..., 0, idx].set((a[..., 0, idx] + a[..., 0, 9]) / 2)
        a = a.at[..., idx, 0].set((a[..., idx, 0] + a[..., 9, 0]) / 2)
    for src, tgt in ((13, 16), (14, 17), (12, 15)):
        a = a.at[..., 0, tgt].set((a[..., 0, tgt] + a[..., 0, src]) / 2)
        a = a.at[..., tgt, 0].set((a[..., tgt, 0] + a[..., src, 0]) / 2)
    return a


def ds_attention_reference(params, query, key, value):
    del key
    B, N, d_model = query.shape
    H, D = NUM_HEADS, DEPTH
    dnh = H * D
    wqk = params['qk_proj'].astype(jnp.float32)
    wv = params['v_proj'].astype(jnp.float32)
    wl = params['lin_w'].astype(jnp.float32)
    bl = params['lin_b'].astype(jnp.float32)
    comb = jnp.einsum('bnf,fx->bnx', query.astype(jnp.float32), wqk)
    q, k = comb[..., :dnh], comb[..., dnh:]
    v = jnp.einsum('bnf,fx->bnx', value.astype(jnp.float32), wv)
    split = lambda x: x.reshape(B, N, H, D).transpose(0, 2, 1, 3)
    qh, kh, vh = split(q), split(k), split(v)
    to_j = lambda x: x[..., 3:147].reshape(B, H, N, N_JOINTS, D_JOINT)
    qj, kj, vj = to_j(qh), to_j(kh), to_j(vh)
    s = jnp.einsum('bhnid,bhnjd->bhnij', qj, kj) / math.sqrt(float(D_JOINT))
    p = jax.nn.softmax(s, axis=-1)
    p = _apply_custom_weighting_ref(p)
    attn = jnp.einsum('bhnij,bhnjd->bhnid', p, vj).reshape(B, H, N, 144)
    vh = vh.at[..., 3:147].set(attn)
    merged = vh.transpose(0, 2, 1, 3).reshape(B, N, dnh)
    return jnp.einsum('bnf,fo->bno', merged, wl) + bl


# --------------------------------- params / main ----------------------------------

def init_params(rng, d_model):
    dnh = NUM_HEADS * DEPTH
    k1, k2, k3, k4 = jax.random.split(rng, 4)

    def xavier(k, fi, fo):
        lim = math.sqrt(6.0 / (fi + fo))
        return jax.random.uniform(k, (fi, fo), jnp.float32, -lim, lim)

    bound = 1.0 / math.sqrt(dnh)
    return {
        # weights stored once in bf16 (MXU operand dtype); accumulation stays f32.
        'qk_proj': xavier(k1, d_model, 2 * dnh).astype(jnp.bfloat16),
        'v_proj': xavier(k2, d_model, dnh).astype(jnp.bfloat16),
        'lin_w': jax.random.uniform(k3, (dnh, d_model), jnp.float32,
                                    -bound, bound).astype(jnp.bfloat16),
        'lin_b': jax.random.uniform(k4, (d_model,), jnp.float32, -bound, bound),
    }


if __name__ == "__main__":
    B, N, D_MODEL = 2, 8, 32

    root = jax.random.PRNGKey(0)
    kp, kq, kk, kv = jax.random.split(root, 4)
    params = init_params(kp, D_MODEL)
    prepared = prepare_params(params)   # one-time weight rearrangement, outside jit
    query = jax.random.normal(kq, (B, N, D_MODEL), jnp.float32)
    key_in = jax.random.normal(kk, (B, N, D_MODEL), jnp.float32)  # unused by the module
    value = jax.random.normal(kv, (B, N, D_MODEL), jnp.float32)

    fwd = jax.jit(ds_attention_forward)
    out = fwd(prepared, query, key_in, value)
    jax.block_until_ready(out)

    ref = ds_attention_reference(params, query, key_in, value)
    assert out.shape == (B, N, D_MODEL)
    assert bool(jnp.all(jnp.isfinite(out)))
    err = float(jnp.max(jnp.abs(out - ref)))
    assert err < 2e-2, f"max abs error vs reference: {err}"
    print("KERNEL_OK")
</pallas_src>

<mosaic_0001>
module attributes {stable_mosaic.version = 11 : i64} {
  func.func @_ds_attention_kernel(%arg0: i32, %arg1: i32, %arg2: memref<16x32xf32, #tpu.memory_space<vmem>>, %arg3: memref<16x32xf32, #tpu.memory_space<vmem>>, %arg4: memref<1x6x32x24xbf16, #tpu.memory_space<vmem>>, %arg5: memref<1x6x32x24xbf16, #tpu.memory_space<vmem>>, %arg6: memref<1x6x32x24xbf16, #tpu.memory_space<vmem>>, %arg7: memref<1x6x24x32xbf16, #tpu.memory_space<vmem>>, %arg8: memref<32x32xbf16, #tpu.memory_space<vmem>>, %arg9: memref<1x32xf32, #tpu.memory_space<vmem>>, %arg10: memref<24x24xf32, #tpu.memory_space<vmem>>, %arg11: memref<16x32xf32, #tpu.memory_space<vmem>>) attributes {dimension_semantics = [#tpu.dimension_semantics<parallel>, #tpu.dimension_semantics<arbitrary>], iteration_bounds = array<i64: 1, 4>, scalar_prefetch = 0 : i64, scratch_operands = 0 : i64, tpu.core_type = #tpu.core_type<tc>, window_params = [{transform_indices = @transform_0, window_bounds = array<i64: 16, 32>}, {transform_indices = @transform_1, window_bounds = array<i64: 16, 32>}, {transform_indices = @transform_2, window_bounds = array<i64: 1, 6, 32, 24>}, {transform_indices = @transform_3, window_bounds = array<i64: 1, 6, 32, 24>}, {transform_indices = @transform_4, window_bounds = array<i64: 1, 6, 32, 24>}, {transform_indices = @transform_5, window_bounds = array<i64: 1, 6, 24, 32>}, {pipeline_mode = #tpu.pipeline_mode<synchronous>, transform_indices = @transform_6, window_bounds = array<i64: 32, 32>}, {pipeline_mode = #tpu.pipeline_mode<synchronous>, transform_indices = @transform_7, window_bounds = array<i64: 1, 32>}, {pipeline_mode = #tpu.pipeline_mode<synchronous>, transform_indices = @transform_8, window_bounds = array<i64: 24, 24>}, {transform_indices = @transform_9, window_bounds = array<i64: 16, 32>}]} {
    %c0 = arith.constant 0 : index
    %c0_0 = arith.constant 0 : index
    %0 = vector.load %arg2[%c0, %c0_0] : memref<16x32xf32, #tpu.memory_space<vmem>>, vector<16x32xf32>
    %1 = arith.truncf %0 : vector<16x32xf32> to vector<16x32xbf16>
    %c0_1 = arith.constant 0 : index
    %c0_2 = arith.constant 0 : index
    %2 = vector.load %arg3[%c0_1, %c0_2] : memref<16x32xf32, #tpu.memory_space<vmem>>, vector<16x32xf32>
    %3 = arith.truncf %2 : vector<16x32xf32> to vector<16x32xbf16>
    %c0_3 = arith.constant 0 : index
    %c0_4 = arith.constant 0 : index
    %c0_5 = arith.constant 0 : index
    %c0_6 = arith.constant 0 : index
    %4 = vector.load %arg4[%c0_3, %c0_4, %c0_5, %c0_6] : memref<1x6x32x24xbf16, #tpu.memory_space<vmem>>, vector<1x6x32x24xbf16>
    %5 = vector.shape_cast %4 : vector<1x6x32x24xbf16> to vector<6x32x24xbf16>
    %c0_7 = arith.constant 0 : index
    %c0_8 = arith.constant 0 : index
    %c0_9 = arith.constant 0 : index
    %c0_10 = arith.constant 0 : index
    %6 = vector.load %arg5[%c0_7, %c0_8, %c0_9, %c0_10] : memref<1x6x32x24xbf16, #tpu.memory_space<vmem>>, vector<1x6x32x24xbf16>
    %7 = vector.shape_cast %6 : vector<1x6x32x24xbf16> to vector<6x32x24xbf16>
    %c0_11 = arith.constant 0 : index
    %c0_12 = arith.constant 0 : index
    %c0_13 = arith.constant 0 : index
    %c0_14 = arith.constant 0 : index
    %8 = vector.load %arg6[%c0_11, %c0_12, %c0_13, %c0_14] : memref<1x6x32x24xbf16, #tpu.memory_space<vmem>>, vector<1x6x32x24xbf16>
    %9 = vector.shape_cast %8 : vector<1x6x32x24xbf16> to vector<6x32x24xbf16>
    %c0_15 = arith.constant 0 : index
    %c0_16 = arith.constant 0 : index
    %c0_17 = arith.constant 0 : index
    %c0_18 = arith.constant 0 : index
    %10 = vector.load %arg7[%c0_15, %c0_16, %c0_17, %c0_18] : memref<1x6x24x32xbf16, #tpu.memory_space<vmem>>, vector<1x6x24x32xbf16>
    %11 = vector.shape_cast %10 : vector<1x6x24x32xbf16> to vector<6x24x32xbf16>
    %c0_i32 = arith.constant 0 : i32
    %12 = arith.cmpi eq, %arg1, %c0_i32 : i32
    %13 = arith.extui %12 : i1 to i32
    %c0_i32_19 = arith.constant 0 : i32
    %14 = arith.cmpi ne, %13, %c0_i32_19 : i32
    scf.if %14 {
      %c0_65 = arith.constant 0 : index
      %c0_66 = arith.constant 0 : index
      %200 = vector.load %arg9[%c0_65, %c0_66] : memref<1x32xf32, #tpu.memory_space<vmem>>, vector<1x32xf32>
      %c0_67 = arith.constant 0 : index
      %c0_68 = arith.constant 0 : index
      %201 = vector.load %arg8[%c0_67, %c0_68] : memref<32x32xbf16, #tpu.memory_space<vmem>>, vector<32x32xbf16>
      %cst_69 = arith.constant dense<0.000000e+00> : vector<16x32xf32>
      %202 = tpu.matmul %3, %201, %cst_69 {dimension_numbers = #tpu.dot_dimension_numbers<[1], [0], [0], [1], [0, 0, 1, 1], [], []>} : vector<16x32xbf16>, vector<32x32xbf16>, vector<16x32xf32> -> vector<16x32xf32>
      %203 = vector.broadcast %200 : vector<1x32xf32> to vector<16x32xf32>
      %204 = arith.addf %203, %202 : vector<16x32xf32>
      %c0_70 = arith.constant 0 : index
      %c0_71 = arith.constant 0 : index
      %205 = vector.load %arg11[%c0_70, %c0_71] : memref<16x32xf32, #tpu.memory_space<vmem>>, vector<16x32xf32>
      tpu.vector_store %arg11[%c0_70, %c0_71], %204 {strides = array<i32>} : memref<16x32xf32, #tpu.memory_space<vmem>>, vector<16x32xf32>,
    } else {
    }
    %cst = arith.constant 0.000000e+00 : f32
    %15 = vector.broadcast %cst : f32 to vector<16x24x24xf32>
    %16 = vector.extract_strided_slice %5 {offsets = [0, 0, 0], sizes = [1, 32, 24], strides = [1, 1, 1]} : vector<6x32x24xbf16> to vector<1x32x24xbf16>
    %17 = vector.shape_cast %16 : vector<1x32x24xbf16> to vector<32x24xbf16>
    %cst_20 = arith.constant dense<0.000000e+00> : vector<16x24xf32>
    %18 = tpu.matmul %1, %17, %cst_20 {dimension_numbers = #tpu.dot_dimension_numbers<[1], [0], [0], [1], [0, 0, 1, 1], [], []>} : vector<16x32xbf16>, vector<32x24xbf16>, vector<16x24xf32> -> vector<16x24xf32>
    %19 = vector.extract_strided_slice %7 {offsets = [0, 0, 0], sizes = [1, 32, 24], strides = [1, 1, 1]} : vector<6x32x24xbf16> to vector<1x32x24xbf16>
    %20 = vector.shape_cast %19 : vector<1x32x24xbf16> to vector<32x24xbf16>
    %cst_21 = arith.constant dense<0.000000e+00> : vector<16x24xf32>
    %21 = tpu.matmul %1, %20, %cst_21 {dimension_numbers = #tpu.dot_dimension_numbers<[1], [0], [0], [1], [0, 0, 1, 1], [], []>} : vector<16x32xbf16>, vector<32x24xbf16>, vector<16x24xf32> -> vector<16x24xf32>
    %22 = vector.extract_strided_slice %9 {offsets = [0, 0, 0], sizes = [1, 32, 24], strides = [1, 1, 1]} : vector<6x32x24xbf16> to vector<1x32x24xbf16>
    %23 = vector.shape_cast %22 : vector<1x32x24xbf16> to vector<32x24xbf16>
    %cst_22 = arith.constant dense<0.000000e+00> : vector<16x24xf32>
    %24 = tpu.matmul %3, %23, %cst_22 {dimension_numbers = #tpu.dot_dimension_numbers<[1], [0], [0], [1], [0, 0, 1, 1], [], []>} : vector<16x32xbf16>, vector<32x24xbf16>, vector<16x24xf32> -> vector<16x24xf32>
    %25 = vector.shape_cast %18 : vector<16x24xf32> to vector<16x24x1xf32>
    %26 = vector.shape_cast %21 : vector<16x24xf32> to vector<16x1x24xf32>
    %27 = vector.broadcast %25 : vector<16x24x1xf32> to vector<16x24x24xf32>
    %28 = vector.broadcast %26 : vector<16x1x24xf32> to vector<16x24x24xf32>
    %29 = arith.mulf %27, %28 : vector<16x24x24xf32>
    %30 = arith.addf %15, %29 : vector<16x24x24xf32>
    %31 = vector.extract_strided_slice %5 {offsets = [1, 0, 0], sizes = [1, 32, 24], strides = [1, 1, 1]} : vector<6x32x24xbf16> to vector<1x32x24xbf16>
    %32 = vector.shape_cast %31 : vector<1x32x24xbf16> to vector<32x24xbf16>
    %cst_23 = arith.constant dense<0.000000e+00> : vector<16x24xf32>
    %33 = tpu.matmul %1, %32, %cst_23 {dimension_numbers = #tpu.dot_dimension_numbers<[1], [0], [0], [1], [0, 0, 1, 1], [], []>} : vector<16x32xbf16>, vector<32x24xbf16>, vector<16x24xf32> -> vector<16x24xf32>
    %34 = vector.extract_strided_slice %7 {offsets = [1, 0, 0], sizes = [1, 32, 24], strides = [1, 1, 1]} : vector<6x32x24xbf16> to vector<1x32x24xbf16>
    %35 = vector.shape_cast %34 : vector<1x32x24xbf16> to vector<32x24xbf16>
    %cst_24 = arith.constant dense<0.000000e+00> : vector<16x24xf32>
    %36 = tpu.matmul %1, %35, %cst_24 {dimension_numbers = #tpu.dot_dimension_numbers<[1], [0], [0], [1], [0, 0, 1, 1], [], []>} : vector<16x32xbf16>, vector<32x24xbf16>, vector<16x24xf32> -> vector<16x24xf32>
    %37 = vector.extract_strided_slice %9 {offsets = [1, 0, 0], sizes = [1, 32, 24], strides = [1, 1, 1]} : vector<6x32x24xbf16> to vector<1x32x24xbf16>
    %38 = vector.shape_cast %37 : vector<1x32x24xbf16> to vector<32x24xbf16>
    %cst_25 = arith.constant dense<0.000000e+00> : vector<16x24xf32>
    %39 = tpu.matmul %3, %38, %cst_25 {dimension_numbers = #tpu.dot_dimension_numbers<[1], [0], [0], [1], [0, 0, 1, 1], [], []>} : vector<16x32xbf16>, vector<32x24xbf16>, vector<16x24xf32> -> vector<16x24xf32>
    %40 = vector.shape_cast %33 : vector<16x24xf32> to vector<16x24x1xf32>
    %41 = vector.shape_cast %36 : vector<16x24xf32> to vector<16x1x24xf32>
    %42 = vector.broadcast %40 : vector<16x24x1xf32> to vector<16x24x24xf32>
    %43 = vector.broadcast %41 : vector<16x1x24xf32> to vector<16x24x24xf32>
    %44 = arith.mulf %42, %43 : vector<16x24x24xf32>
    %45 = arith.addf %30, %44 : vector<16x24x24xf32>
    %46 = vector.extract_strided_slice %5 {offsets = [2, 0, 0], sizes = [1, 32, 24], strides = [1, 1, 1]} : vector<6x32x24xbf16> to vector<1x32x24xbf16>
    %47 = vector.shape_cast %46 : vector<1x32x24xbf16> to vector<32x24xbf16>
    %cst_26 = arith.constant dense<0.000000e+00> : vector<16x24xf32>
    %48 = tpu.matmul %1, %47, %cst_26 {dimension_numbers = #tpu.dot_dimension_numbers<[1], [0], [0], [1], [0, 0, 1, 1], [], []>} : vector<16x32xbf16>, vector<32x24xbf16>, vector<16x24xf32> -> vector<16x24xf32>
    %49 = vector.extract_strided_slice %7 {offsets = [2, 0, 0], sizes = [1, 32, 24], strides = [1, 1, 1]} : vector<6x32x24xbf16> to vector<1x32x24xbf16>
    %50 = vector.shape_cast %49 : vector<1x32x24xbf16> to vector<32x24xbf16>
    %cst_27 = arith.constant dense<0.000000e+00> : vector<16x24xf32>
    %51 = tpu.matmul %1, %50, %cst_27 {dimension_numbers = #tpu.dot_dimension_numbers<[1], [0], [0], [1], [0, 0, 1, 1], [], []>} : vector<16x32xbf16>, vector<32x24xbf16>, vector<16x24xf32> -> vector<16x24xf32>
    %52 = vector.extract_strided_slice %9 {offsets = [2, 0, 0], sizes = [1, 32, 24], strides = [1, 1, 1]} : vector<6x32x24xbf16> to vector<1x32x24xbf16>
    %53 = vector.shape_cast %52 : vector<1x32x24xbf16> to vector<32x24xbf16>
    %cst_28 = arith.constant dense<0.000000e+00> : vector<16x24xf32>
    %54 = tpu.matmul %3, %53, %cst_28 {dimension_numbers = #tpu.dot_dimension_numbers<[1], [0], [0], [1], [0, 0, 1, 1], [], []>} : vector<16x32xbf16>, vector<32x24xbf16>, vector<16x24xf32> -> vector<16x24xf32>
    %55 = vector.shape_cast %48 : vector<16x24xf32> to vector<16x24x1xf32>
    %56 = vector.shape_cast %51 : vector<16x24xf32> to vector<16x1x24xf32>
    %57 = vector.broadcast %55 : vector<16x24x1xf32> to vector<16x24x24xf32>
    %58 = vector.broadcast %56 : vector<16x1x24xf32> to vector<16x24x24xf32>
    %59 = arith.mulf %57, %58 : vector<16x24x24xf32>
    %60 = arith.addf %45, %59 : vector<16x24x24xf32>
    %61 = vector.extract_strided_slice %5 {offsets = [3, 0, 0], sizes = [1, 32, 24], strides = [1, 1, 1]} : vector<6x32x24xbf16> to vector<1x32x24xbf16>
    %62 = vector.shape_cast %61 : vector<1x32x24xbf16> to vector<32x24xbf16>
    %cst_29 = arith.constant dense<0.000000e+00> : vector<16x24xf32>
    %63 = tpu.matmul %1, %62, %cst_29 {dimension_numbers = #tpu.dot_dimension_numbers<[1], [0], [0], [1], [0, 0, 1, 1], [], []>} : vector<16x32xbf16>, vector<32x24xbf16>, vector<16x24xf32> -> vector<16x24xf32>
    %64 = vector.extract_strided_slice %7 {offsets = [3, 0, 0], sizes = [1, 32, 24], strides = [1, 1, 1]} : vector<6x32x24xbf16> to vector<1x32x24xbf16>
    %65 = vector.shape_cast %64 : vector<1x32x24xbf16> to vector<32x24xbf16>
    %cst_30 = arith.constant dense<0.000000e+00> : vector<16x24xf32>
    %66 = tpu.matmul %1, %65, %cst_30 {dimension_numbers = #tpu.dot_dimension_numbers<[1], [0], [0], [1], [0, 0, 1, 1], [], []>} : vector<16x32xbf16>, vector<32x24xbf16>, vector<16x24xf32> -> vector<16x24xf32>
    %67 = vector.extract_strided_slice %9 {offsets = [3, 0, 0], sizes = [1, 32, 24], strides = [1, 1, 1]} : vector<6x32x24xbf16> to vector<1x32x24xbf16>
    %68 = vector.shape_cast %67 : vector<1x32x24xbf16> to vector<32x24xbf16>
    %cst_31 = arith.constant dense<0.000000e+00> : vector<16x24xf32>
    %69 = tpu.matmul %3, %68, %cst_31 {dimension_numbers = #tpu.dot_dimension_numbers<[1], [0], [0], [1], [0, 0, 1, 1], [], []>} : vector<16x32xbf16>, vector<32x24xbf16>, vector<16x24xf32> -> vector<16x24xf32>
    %70 = vector.shape_cast %63 : vector<16x24xf32> to vector<16x24x1xf32>
    %71 = vector.shape_cast %66 : vector<16x24xf32> to vector<16x1x24xf32>
    %72 = vector.broadcast %70 : vector<16x24x1xf32> to vector<16x24x24xf32>
    %73 = vector.broadcast %71 : vector<16x1x24xf32> to vector<16x24x24xf32>
    %74 = arith.mulf %72, %73 : vector<16x24x24xf32>
    %75 = arith.addf %60, %74 : vector<16x24x24xf32>
    %76 = vector.extract_strided_slice %5 {offsets = [4, 0, 0], sizes = [1, 32, 24], strides = [1, 1, 1]} : vector<6x32x24xbf16> to vector<1x32x24xbf16>
    %77 = vector.shape_cast %76 : vector<1x32x24xbf16> to vector<32x24xbf16>
    %cst_32 = arith.constant dense<0.000000e+00> : vector<16x24xf32>
    %78 = tpu.matmul %1, %77, %cst_32 {dimension_numbers = #tpu.dot_dimension_numbers<[1], [0], [0], [1], [0, 0, 1, 1], [], []>} : vector<16x32xbf16>, vector<32x24xbf16>, vector<16x24xf32> -> vector<16x24xf32>
    %79 = vector.extract_strided_slice %7 {offsets = [4, 0, 0], sizes = [1, 32, 24], strides = [1, 1, 1]} : vector<6x32x24xbf16> to vector<1x32x24xbf16>
    %80 = vector.shape_cast %79 : vector<1x32x24xbf16> to vector<32x24xbf16>
    %cst_33 = arith.constant dense<0.000000e+00> : vector<16x24xf32>
    %81 = tpu.matmul %1, %80, %cst_33 {dimension_numbers = #tpu.dot_dimension_numbers<[1], [0], [0], [1], [0, 0, 1, 1], [], []>} : vector<16x32xbf16>, vector<32x24xbf16>, vector<16x24xf32> -> vector<16x24xf32>
    %82 = vector.extract_strided_slice %9 {offsets = [4, 0, 0], sizes = [1, 32, 24], strides = [1, 1, 1]} : vector<6x32x24xbf16> to vector<1x32x24xbf16>
    %83 = vector.shape_cast %82 : vector<1x32x24xbf16> to vector<32x24xbf16>
    %cst_34 = arith.constant dense<0.000000e+00> : vector<16x24xf32>
    %84 = tpu.matmul %3, %83, %cst_34 {dimension_numbers = #tpu.dot_dimension_numbers<[1], [0], [0], [1], [0, 0, 1, 1], [], []>} : vector<16x32xbf16>, vector<32x24xbf16>, vector<16x24xf32> -> vector<16x24xf32>
    %85 = vector.shape_cast %78 : vector<16x24xf32> to vector<16x24x1xf32>
    %86 = vector.shape_cast %81 : vector<16x24xf32> to vector<16x1x24xf32>
    %87 = vector.broadcast %85 : vector<16x24x1xf32> to vector<16x24x24xf32>
    %88 = vector.broadcast %86 : vector<16x1x24xf32> to vector<16x24x24xf32>
    %89 = arith.mulf %87, %88 : vector<16x24x24xf32>
    %90 = arith.addf %75, %89 : vector<16x24x24xf32>
    %91 = vector.extract_strided_slice %5 {offsets = [5, 0, 0], sizes = [1, 32, 24], strides = [1, 1, 1]} : vector<6x32x24xbf16> to vector<1x32x24xbf16>
    %92 = vector.shape_cast %91 : vector<1x32x24xbf16> to vector<32x24xbf16>
    %cst_35 = arith.constant dense<0.000000e+00> : vector<16x24xf32>
    %93 = tpu.matmul %1, %92, %cst_35 {dimension_numbers = #tpu.dot_dimension_numbers<[1], [0], [0], [1], [0, 0, 1, 1], [], []>} : vector<16x32xbf16>, vector<32x24xbf16>, vector<16x24xf32> -> vector<16x24xf32>
    %94 = vector.extract_strided_slice %7 {offsets = [5, 0, 0], sizes = [1, 32, 24], strides = [1, 1, 1]} : vector<6x32x24xbf16> to vector<1x32x24xbf16>
    %95 = vector.shape_cast %94 : vector<1x32x24xbf16> to vector<32x24xbf16>
    %cst_36 = arith.constant dense<0.000000e+00> : vector<16x24xf32>
    %96 = tpu.matmul %1, %95, %cst_36 {dimension_numbers = #tpu.dot_dimension_numbers<[1], [0], [0], [1], [0, 0, 1, 1], [], []>} : vector<16x32xbf16>, vector<32x24xbf16>, vector<16x24xf32> -> vector<16x24xf32>
    %97 = vector.extract_strided_slice %9 {offsets = [5, 0, 0], sizes = [1, 32, 24], strides = [1, 1, 1]} : vector<6x32x24xbf16> to vector<1x32x24xbf16>
    %98 = vector.shape_cast %97 : vector<1x32x24xbf16> to vector<32x24xbf16>
    %cst_37 = arith.constant dense<0.000000e+00> : vector<16x24xf32>
    %99 = tpu.matmul %3, %98, %cst_37 {dimension_numbers = #tpu.dot_dimension_numbers<[1], [0], [0], [1], [0, 0, 1, 1], [], []>} : vector<16x32xbf16>, vector<32x24xbf16>, vector<16x24xf32> -> vector<16x24xf32>
    %100 = vector.shape_cast %93 : vector<16x24xf32> to vector<16x24x1xf32>
    %101 = vector.shape_cast %96 : vector<16x24xf32> to vector<16x1x24xf32>
    %102 = vector.broadcast %100 : vector<16x24x1xf32> to vector<16x24x24xf32>
    %103 = vector.broadcast %101 : vector<16x1x24xf32> to vector<16x24x24xf32>
    %104 = arith.mulf %102, %103 : vector<16x24x24xf32>
    %105 = arith.addf %90, %104 : vector<16x24x24xf32>
    %cst_38 = arith.constant 0.408248305 : f32
    %106 = vector.broadcast %cst_38 : f32 to vector<16x24x24xf32>
    %107 = arith.mulf %105, %106 : vector<16x24x24xf32>
    %cst_39 = arith.constant dense<0xFF800000> : vector<16x24xf32>
    %108 = vector.multi_reduction <maximumf>, %107, %cst_39 [2] : vector<16x24x24xf32> to vector<16x24xf32>
    %109 = vector.shape_cast %108 : vector<16x24xf32> to vector<16x24x1xf32>
    %110 = vector.broadcast %109 : vector<16x24x1xf32> to vector<16x24x24xf32>
    %111 = arith.subf %107, %110 : vector<16x24x24xf32>
    %112 = math.exp %111 : vector<16x24x24xf32>
    %cst_40 = arith.constant dense<0.000000e+00> : vector<16x24xf32>
    %113 = vector.multi_reduction <add>, %112, %cst_40 [2] : vector<16x24x24xf32> to vector<16x24xf32>
    %114 = vector.shape_cast %113 : vector<16x24xf32> to vector<16x24x1xf32>
    %115 = tpu.reciprocal %114 {approx = true} : vector<16x24x1xf32> -> vector<16x24x1xf32>
    %116 = vector.broadcast %115 : vector<16x24x1xf32> to vector<16x24x24xf32>
    %117 = arith.mulf %112, %116 : vector<16x24x24xf32>
    %c0_41 = arith.constant 0 : index
    %c0_42 = arith.constant 0 : index
    %118 = vector.load %arg10[%c0_41, %c0_42] : memref<24x24xf32, #tpu.memory_space<vmem>>, vector<24x24xf32>
    %119 = vector.extract_strided_slice %117 {offsets = [0, 0, 0], sizes = [16, 1, 24], strides = [1, 1, 1]} : vector<16x24x24xf32> to vector<16x1x24xf32>
    %120 = vector.shape_cast %119 : vector<16x1x24xf32> to vector<16x24xf32>
    %cst_43 = arith.constant dense<0.000000e+00> : vector<16x24xf32>
    %121 = tpu.matmul %120, %118, %cst_43 {dimension_numbers = #tpu.dot_dimension_numbers<[1], [0], [0], [1], [0, 0, 1, 1], [], []>} : vector<16x24xf32>, vector<24x24xf32>, vector<16x24xf32> -> vector<16x24xf32>
    %122 = vector.extract_strided_slice %117 {offsets = [0, 0, 0], sizes = [16, 24, 1], strides = [1, 1, 1]} : vector<16x24x24xf32> to vector<16x24x1xf32>
    %123 = vector.shape_cast %122 : vector<16x24x1xf32> to vector<16x24xf32>
    %cst_44 = arith.constant dense<0.000000e+00> : vector<16x24xf32>
    %124 = tpu.matmul %123, %118, %cst_44 {dimension_numbers = #tpu.dot_dimension_numbers<[1], [0], [0], [1], [0, 0, 1, 1], [], []>} : vector<16x24xf32>, vector<24x24xf32>, vector<16x24xf32> -> vector<16x24xf32>
    %125 = tpu.iota {dimensions = array<i32: 1>} : vector<16x24x24xi32>
    %126 = tpu.iota {dimensions = array<i32: 2>} : vector<16x24x24xi32>
    %c0_i32_45 = arith.constant 0 : i32
    %127 = vector.broadcast %c0_i32_45 : i32 to vector<16x24x24xi32>
    %128 = arith.cmpi eq, %125, %127 : vector<16x24x24xi32>
    %129 = vector.shape_cast %121 : vector<16x24xf32> to vector<16x1x24xf32>
    %130 = vector.shape_cast %129 : vector<16x1x24xf32> to vector<16x1x24xf32>
    %131 = vector.broadcast %130 : vector<16x1x24xf32> to vector<16x24x24xf32>
    %132 = arith.select %128, %131, %117 : vector<16x24x24xi1>, vector<16x24x24xf32>
    %c0_i32_46 = arith.constant 0 : i32
    %133 = vector.broadcast %c0_i32_46 : i32 to vector<16x24x24xi32>
    %134 = arith.cmpi eq, %126, %133 : vector<16x24x24xi32>
    %c0_i32_47 = arith.constant 0 : i32
    %135 = vector.broadcast %c0_i32_47 : i32 to vector<16x24x24xi32>
    %136 = arith.cmpi sgt, %125, %135 : vector<16x24x24xi32>
    %137 = arith.andi %134, %136 : vector<16x24x24xi1>
    %138 = vector.shape_cast %124 : vector<16x24xf32> to vector<16x24x1xf32>
    %139 = vector.shape_cast %138 : vector<16x24x1xf32> to vector<16x24x1xf32>
    %140 = vector.broadcast %139 : vector<16x24x1xf32> to vector<16x24x24xf32>
    %141 = arith.select %137, %140, %132 : vector<16x24x24xi1>, vector<16x24x24xf32>
    %cst_48 = arith.constant 0.000000e+00 : f32
    %142 = vector.broadcast %cst_48 : f32 to vector<16x32xf32>
    %143 = vector.shape_cast %24 : vector<16x24xf32> to vector<16x1x24xf32>
    %144 = vector.broadcast %143 : vector<16x1x24xf32> to vector<16x24x24xf32>
    %145 = arith.mulf %141, %144 : vector<16x24x24xf32>
    %cst_49 = arith.constant dense<0.000000e+00> : vector<16x24xf32>
    %146 = vector.multi_reduction <add>, %145, %cst_49 [2] : vector<16x24x24xf32> to vector<16x24xf32>
    %147 = arith.truncf %146 : vector<16x24xf32> to vector<16x24xbf16>
    %148 = vector.extract_strided_slice %11 {offsets = [0, 0, 0], sizes = [1, 24, 32], strides = [1, 1, 1]} : vector<6x24x32xbf16> to vector<1x24x32xbf16>
    %149 = vector.shape_cast %148 : vector<1x24x32xbf16> to vector<24x32xbf16>
    %cst_50 = arith.constant dense<0.000000e+00> : vector<16x32xf32>
    %150 = tpu.matmul %147, %149, %cst_50 {dimension_numbers = #tpu.dot_dimension_numbers<[1], [0], [0], [1], [0, 0, 1, 1], [], []>} : vector<16x24xbf16>, vector<24x32xbf16>, vector<16x32xf32> -> vector<16x32xf32>
    %151 = arith.addf %142, %150 : vector<16x32xf32>
    %152 = vector.shape_cast %39 : vector<16x24xf32> to vector<16x1x24xf32>
    %153 = vector.broadcast %152 : vector<16x1x24xf32> to vector<16x24x24xf32>
    %154 = arith.mulf %141, %153 : vector<16x24x24xf32>
    %cst_51 = arith.constant dense<0.000000e+00> : vector<16x24xf32>
    %155 = vector.multi_reduction <add>, %154, %cst_51 [2] : vector<16x24x24xf32> to vector<16x24xf32>
    %156 = arith.truncf %155 : vector<16x24xf32> to vector<16x24xbf16>
    %157 = vector.extract_strided_slice %11 {offsets = [1, 0, 0], sizes = [1, 24, 32], strides = [1, 1, 1]} : vector<6x24x32xbf16> to vector<1x24x32xbf16>
    %158 = vector.shape_cast %157 : vector<1x24x32xbf16> to vector<24x32xbf16>
    %cst_52 = arith.constant dense<0.000000e+00> : vector<16x32xf32>
    %159 = tpu.matmul %156, %158, %cst_52 {dimension_numbers = #tpu.dot_dimension_numbers<[1], [0], [0], [1], [0, 0, 1, 1], [], []>} : vector<16x24xbf16>, vector<24x32xbf16>, vector<16x32xf32> -> vector<16x32xf32>
    %160 = arith.addf %151, %159 : vector<16x32xf32>
    %161 = vector.shape_cast %54 : vector<16x24xf32> to vector<16x1x24xf32>
    %162 = vector.broadcast %161 : vector<16x1x24xf32> to vector<16x24x24xf32>
    %163 = arith.mulf %141, %162 : vector<16x24x24xf32>
    %cst_53 = arith.constant dense<0.000000e+00> : vector<16x24xf32>
    %164 = vector.multi_reduction <add>, %163, %cst_53 [2] : vector<16x24x24xf32> to vector<16x24xf32>
    %165 = arith.truncf %164 : vector<16x24xf32> to vector<16x24xbf16>
    %166 = vector.extract_strided_slice %11 {offsets = [2, 0, 0], sizes = [1, 24, 32], strides = [1, 1, 1]} : vector<6x24x32xbf16> to vector<1x24x32xbf16>
    %167 = vector.shape_cast %166 : vector<1x24x32xbf16> to vector<24x32xbf16>
    %cst_54 = arith.constant dense<0.000000e+00> : vector<16x32xf32>
    %168 = tpu.matmul %165, %167, %cst_54 {dimension_numbers = #tpu.dot_dimension_numbers<[1], [0], [0], [1], [0, 0, 1, 1], [], []>} : vector<16x24xbf16>, vector<24x32xbf16>, vector<16x32xf32> -> vector<16x32xf32>
    %169 = arith.addf %160, %168 : vector<16x32xf32>
    %170 = vector.shape_cast %69 : vector<16x24xf32> to vector<16x1x24xf32>
    %171 = vector.broadcast %170 : vector<16x1x24xf32> to vector<16x24x24xf32>
    %172 = arith.mulf %141, %171 : vector<16x24x24xf32>
    %cst_55 = arith.constant dense<0.000000e+00> : vector<16x24xf32>
    %173 = vector.multi_reduction <add>, %172, %cst_55 [2] : vector<16x24x24xf32> to vector<16x24xf32>
    %174 = arith.truncf %173 : vector<16x24xf32> to vector<16x24xbf16>
    %175 = vector.extract_strided_slice %11 {offsets = [3, 0, 0], sizes = [1, 24, 32], strides = [1, 1, 1]} : vector<6x24x32xbf16> to vector<1x24x32xbf16>
    %176 = vector.shape_cast %175 : vector<1x24x32xbf16> to vector<24x32xbf16>
    %cst_56 = arith.constant dense<0.000000e+00> : vector<16x32xf32>
    %177 = tpu.matmul %174, %176, %cst_56 {dimension_numbers = #tpu.dot_dimension_numbers<[1], [0], [0], [1], [0, 0, 1, 1], [], []>} : vector<16x24xbf16>, vector<24x32xbf16>, vector<16x32xf32> -> vector<16x32xf32>
    %178 = arith.addf %169, %177 : vector<16x32xf32>
    %179 = vector.shape_cast %84 : vector<16x24xf32> to vector<16x1x24xf32>
    %180 = vector.broadcast %179 : vector<16x1x24xf32> to vector<16x24x24xf32>
    %181 = arith.mulf %141, %180 : vector<16x24x24xf32>
    %cst_57 = arith.constant dense<0.000000e+00> : vector<16x24xf32>
    %182 = vector.multi_reduction <add>, %181, %cst_57 [2] : vector<16x24x24xf32> to vector<16x24xf32>
    %183 = arith.truncf %182 : vector<16x24xf32> to vector<16x24xbf16>
    %184 = vector.extract_strided_slice %11 {offsets = [4, 0, 0], sizes = [1, 24, 32], strides = [1, 1, 1]} : vector<6x24x32xbf16> to vector<1x24x32xbf16>
    %185 = vector.shape_cast %184 : vector<1x24x32xbf16> to vector<24x32xbf16>
    %cst_58 = arith.constant dense<0.000000e+00> : vector<16x32xf32>
    %186 = tpu.matmul %183, %185, %cst_58 {dimension_numbers = #tpu.dot_dimension_numbers<[1], [0], [0], [1], [0, 0, 1, 1], [], []>} : vector<16x24xbf16>, vector<24x32xbf16>, vector<16x32xf32> -> vector<16x32xf32>
    %187 = arith.addf %178, %186 : vector<16x32xf32>
    %188 = vector.shape_cast %99 : vector<16x24xf32> to vector<16x1x24xf32>
    %189 = vector.broadcast %188 : vector<16x1x24xf32> to vector<16x24x24xf32>
    %190 = arith.mulf %141, %189 : vector<16x24x24xf32>
    %cst_59 = arith.constant dense<0.000000e+00> : vector<16x24xf32>
    %191 = vector.multi_reduction <add>, %190, %cst_59 [2] : vector<16x24x24xf32> to vector<16x24xf32>
    %192 = arith.truncf %191 : vector<16x24xf32> to vector<16x24xbf16>
    %193 = vector.extract_strided_slice %11 {offsets = [5, 0, 0], sizes = [1, 24, 32], strides = [1, 1, 1]} : vector<6x24x32xbf16> to vector<1x24x32xbf16>
    %194 = vector.shape_cast %193 : vector<1x24x32xbf16> to vector<24x32xbf16>
    %cst_60 = arith.constant dense<0.000000e+00> : vector<16x32xf32>
    %195 = tpu.matmul %192, %194, %cst_60 {dimension_numbers = #tpu.dot_dimension_numbers<[1], [0], [0], [1], [0, 0, 1, 1], [], []>} : vector<16x24xbf16>, vector<24x32xbf16>, vector<16x32xf32> -> vector<16x32xf32>
    %196 = arith.addf %187, %195 : vector<16x32xf32>
    %c0_61 = arith.constant 0 : index
    %c0_62 = arith.constant 0 : index
    %197 = vector.load %arg11[%c0_61, %c0_62] : memref<16x32xf32, #tpu.memory_space<vmem>>, vector<16x32xf32>
    %198 = arith.addf %197, %196 : vector<16x32xf32>
    %c0_63 = arith.constant 0 : index
    %c0_64 = arith.constant 0 : index
    %199 = vector.load %arg11[%c0_63, %c0_64] : memref<16x32xf32, #tpu.memory_space<vmem>>, vector<16x32xf32>
    tpu.vector_store %arg11[%c0_63, %c0_64], %198 {strides = array<i32>} : memref<16x32xf32, #tpu.memory_space<vmem>>, vector<16x32xf32>,
    return
  }
  func.func @transform_0(%arg0: i32, %arg1: i32) -> (i32, i32) {
    %c0_i32 = arith.constant 0 : i32
    %c0_i32_0 = arith.constant 0 : i32
    return %arg0, %c0_i32 : i32, i32
  }
  func.func @transform_1(%arg0: i32, %arg1: i32) -> (i32, i32) {
    %c0_i32 = arith.constant 0 : i32
    %c0_i32_0 = arith.constant 0 : i32
    return %arg0, %c0_i32 : i32, i32
  }
  func.func @transform_2(%arg0: i32, %arg1: i32) -> (i32, i32, i32, i32) {
    %c0_i32 = arith.constant 0 : i32
    %c0_i32_0 = arith.constant 0 : i32
    %c0_i32_1 = arith.constant 0 : i32
    %c0_i32_2 = arith.constant 0 : i32
    return %arg1, %c0_i32, %c0_i32_0, %c0_i32_1 : i32, i32, i32, i32
  }
  func.func @transform_3(%arg0: i32, %arg1: i32) -> (i32, i32, i32, i32) {
    %c0_i32 = arith.constant 0 : i32
    %c0_i32_0 = arith.constant 0 : i32
    %c0_i32_1 = arith.constant 0 : i32
    %c0_i32_2 = arith.constant 0 : i32
    return %arg1, %c0_i32, %c0_i32_0, %c0_i32_1 : i32, i32, i32, i32
  }
  func.func @transform_4(%arg0: i32, %arg1: i32) -> (i32, i32, i32, i32) {
    %c0_i32 = arith.constant 0 : i32
    %c0_i32_0 = arith.constant 0 : i32
    %c0_i32_1 = arith.constant 0 : i32
    %c0_i32_2 = arith.constant 0 : i32
    return %arg1, %c0_i32, %c0_i32_0, %c0_i32_1 : i32, i32, i32, i32
  }
  func.func @transform_5(%arg0: i32, %arg1: i32) -> (i32, i32, i32, i32) {
    %c0_i32 = arith.constant 0 : i32
    %c0_i32_0 = arith.constant 0 : i32
    %c0_i32_1 = arith.constant 0 : i32
    %c0_i32_2 = arith.constant 0 : i32
    return %arg1, %c0_i32, %c0_i32_0, %c0_i32_1 : i32, i32, i32, i32
  }
  func.func @transform_6(%arg0: i32, %arg1: i32) -> (i32, i32) {
    %c0_i32 = arith.constant 0 : i32
    %c0_i32_0 = arith.constant 0 : i32
    %c0_i32_1 = arith.constant 0 : i32
    return %c0_i32, %c0_i32_0 : i32, i32
  }
  func.func @transform_7(%arg0: i32, %arg1: i32) -> (i32, i32) {
    %c0_i32 = arith.constant 0 : i32
    %c0_i32_0 = arith.constant 0 : i32
    %c0_i32_1 = arith.constant 0 : i32
    return %c0_i32, %c0_i32_0 : i32, i32
  }
  func.func @transform_8(%arg0: i32, %arg1: i32) -> (i32, i32) {
    %c0_i32 = arith.constant 0 : i32
    %c0_i32_0 = arith.constant 0 : i32
    %c0_i32_1 = arith.constant 0 : i32
    return %c0_i32, %c0_i32_0 : i32, i32
  }
  func.func @transform_9(%arg0: i32, %arg1: i32) -> (i32, i32) {
    %c0_i32 = arith.constant 0 : i32
    %c0_i32_0 = arith.constant 0 : i32
    return %arg0, %c0_i32 : i32, i32
  }
}

</mosaic_0001>

<bundles_post_ra>
// kernel: ds_attention_forward.1
= control target key start
LH: loop header
LB: loop body
LE: loop exit
PB: predicated region body
PF: predicated region fallthrough
CT: control target
= control target key end

     0   :  { %14 = vsyncpa [#allocation3], 0  ;;  %s11973_s30 = smov 0   ;;  %s11975_s10 = smov 0   ;;  %s17209_s0 = inlined_call_operand.vmem [shape: f32[16,32], index: 0, kind: input, shape index: {}]   ;;  %s17210_s1 = inlined_call_operand.vmem [shape: f32[16,32], index: 1, kind: input, shape index: {}]   ;;  %s17211_s2 = inlined_call_operand.vmem [shape: bf16[4,6,32,24], index: 2, kind: input, shape index: {}]   ;;  %s17212_s3 = inlined_call_operand.vmem [shape: bf16[4,6,32,24], index: 3, kind: input, shape index: {}]   ;;  %s17213_s4 = inlined_call_operand.vmem [shape: bf16[4,6,32,24], index: 4, kind: input, shape index: {}]   ;;  %s17214_s5 = inlined_call_operand.vmem [shape: bf16[4,6,24,32], index: 5, kind: input, shape index: {}]   ;;  %s17215_s6 = inlined_call_operand.vmem [shape: bf16[32,32], index: 6, kind: input, shape index: {}]   ;;  %s17216_s7 = inlined_call_operand.vmem [shape: f32[1,32], index: 7, kind: input, shape index: {}]   ;;  %s17217_s8 = inlined_call_operand.vmem [shape: f32[24,24], index: 8, kind: input, shape index: {}]   ;;  %s17218_s9 = inlined_call_operand.hbm [shape: f32[16,32], index: 9, kind: output, shape index: {}]  }
   0x1   :  { %s11977_s11 = smov 0  }
   0x2 LB: > { %s11227_s12 = sadd.s32 4294967295, %s11912_s11   ;;  %s29_s13 = sadd.s32 1, %s11908_s10  ;;  %s11912_s11 = sphi %s11977_s11, %s20_s11   ;;  %s11908_s10 = sphi %s11975_s10, %s18014_s10   ;;  %s11904_s30 = sphi %s11973_s30, %s18013_s30  }
   0x3   : > { %p30_p0 = scmp.ge.s32.totalorder %s29_s13, 4  ;;  %p11232_p1 = scmp.ge.s32.totalorder %s11912_s11, 1 }
   0x4   : > { %p352_p2 = scmp.lt.s32.totalorder %s11912_s11, 5 }
   0x5   : > { %s18016_s13 = smov (%p30_p0, %s29_s13), 0 }
   0x6   : > { %p353_p3 = pnand %p11232_p1, %p352_p2 }
   0x8   : > { %356 = sbr.rel (%p353_p3) target bundleno = 2875 (0xb3b), region = 56 }
   0xd   : > { %p420_p4 = scmp.lt.s32.totalorder %s11904_s30, 3  ;;  %v442_v0 = vld [vmem:[%s17209_s0] sm:$0xff]  ;;  %v443_v1 = vld [vmem:[%s17209_s0 + $0x8] sm:$0xff]  ;;  %p11237_p5 = scmp.ne.s32.totalorder %s11904_s30, 0 }
   0xe   : > { %v445_v2 = vld [vmem:[%s17210_s1] sm:$0xff]  ;;  %v12004_v3 = vpack.c.bf16 %v443_v1, %v442_v0  ;;  %v446_v4 = vld [vmem:[%s17210_s1 + $0x8] sm:$0xff] }
   0xf   : > { %s12010_s22 = scalar_select %p420_p4, %s11904_s30, 3  ;;  %v12012_v5 = vpack.c.bf16 %v446_v4, %v445_v2 }
  0x10   : > { %17433 = vst [vmem:[#allocation5_spill] sm:$0xff] %v12004_v3 }
  0x11   : > { %17434 = vst [vmem:[#allocation6_spill] sm:$0xff] %v12012_v5  ;;  %s12015_s23 = smul.u32 96, %s12010_s22 }
  0x12   : > { %s11626_s27 = smul.u32 72, %s12010_s22 }
  0x13   : > { %s424_s26 = scalar_lea.vmem %s17211_s2, %s12015_s23  ;;  %s12056_s14 = scalar_lea.vmem %s17212_s3, %s12015_s23 }
  0x14   : > { %v12022_v6 = vld [vmem:[%s424_s26] sm:$0xf]  ;;  %v12024_v7 = vld [vmem:[%s424_s26 + $0x4] sm:$0xf]  ;;  %v12026_v8 = vld [vmem:[%s424_s26 + $0x8] sm:$0xf]  ;;  %s12125_s17 = scalar_lea.vmem %s17213_s4, %s12015_s23  ;;  %s439_s20 = scalar_lea.vmem %s17214_s5, %s11626_s27 }
  0x15   : > { %v12028_v9 = vld [vmem:[%s424_s26 + $0xc] sm:$0xf]  ;;  %v12030_v10 = vld [vmem:[%s424_s26 + $0x10] sm:$0xf]  ;;  %v12032_v11 = vld [vmem:[%s424_s26 + $0x14] sm:$0xf] }
  0x16   : > { %v12034_v12 = vld [vmem:[%s424_s26 + $0x18] sm:$0xf]  ;;  %v12036_v13 = vld [vmem:[%s424_s26 + $0x1c] sm:$0xf]  ;;  %v12038_v14 = vld [vmem:[%s424_s26 + $0x20] sm:$0xf] }
  0x17   : > { %v12040_v15 = vld [vmem:[%s424_s26 + $0x24] sm:$0xf]  ;;  %v12042_v16 = vld [vmem:[%s424_s26 + $0x28] sm:$0xf]  ;;  %v12044_v17 = vld [vmem:[%s424_s26 + $0x2c] sm:$0xf] }
  0x18   : > { %v12046_v18 = vld [vmem:[%s424_s26 + $0x30] sm:$0xf]  ;;  %v12048_v19 = vld [vmem:[%s424_s26 + $0x34] sm:$0xf]  ;;  %v12050_v20 = vld [vmem:[%s424_s26 + $0x38] sm:$0xf] }
  0x19   : > { %v12058_v21 = vld [vmem:[%s424_s26 + $0x3c] sm:$0xf]  ;;  %v12060_v22 = vld [vmem:[%s424_s26 + $0x40] sm:$0xf]  ;;  %v12062_v23 = vld [vmem:[%s424_s26 + $0x44] sm:$0xf] }
  0x1a   : > { %v12064_v24 = vld [vmem:[%s424_s26 + $0x48] sm:$0xf]  ;;  %v12066_v25 = vld [vmem:[%s424_s26 + $0x4c] sm:$0xf]  ;;  %v12068_v26 = vld [vmem:[%s424_s26 + $0x50] sm:$0xf] }
  0x1b   : > { %17435 = vst [vmem:[#allocation7_spill] sm:$0xff] %v12068_v26  ;;  %v12070_v27 = vld [vmem:[%s424_s26 + $0x54] sm:$0xf]  ;;  %v12072_v28 = vld [vmem:[%s424_s26 + $0x58] sm:$0xf] }
  0x1c   : > { %17436 = vst [vmem:[#allocation8_spill] sm:$0xff] %v12070_v27  ;;  %17437 = vst [vmem:[#allocation9_spill] sm:$0xff] %v12072_v28  ;;  %v12074_v29 = vld [vmem:[%s424_s26 + $0x5c] sm:$0xf]  ;;  %v12077_v30 = vld [vmem:[%s12056_s14] sm:$0xf] }
  0x1d   : > { %17438 = vst [vmem:[#allocation10_spill] sm:$0xff] %v12074_v29  ;;  %v12080_v31 = vld [vmem:[%s12056_s14 + $0x4] sm:$0xf]  ;;  %v12083_v32 = vld [vmem:[%s12056_s14 + $0x8] sm:$0xf] }
  0x1e   : > { %v12086_v33 = vld [vmem:[%s12056_s14 + $0xc] sm:$0xf]  ;;  %v12089_v34 = vld [vmem:[%s12056_s14 + $0x10] sm:$0xf]  ;;  %v12092_v35 = vld [vmem:[%s12056_s14 + $0x14] sm:$0xf] }
  0x1f   : > { %v12095_v36 = vld [vmem:[%s12056_s14 + $0x18] sm:$0xf]  ;;  %v12098_v37 = vld [vmem:[%s12056_s14 + $0x1c] sm:$0xf]  ;;  %v12101_v38 = vld [vmem:[%s12056_s14 + $0x20] sm:$0xf] }
  0x20   : > { %v12104_v39 = vld [vmem:[%s12056_s14 + $0x24] sm:$0xf]  ;;  %v12107_v40 = vld [vmem:[%s12056_s14 + $0x28] sm:$0xf]  ;;  %v12110_v41 = vld [vmem:[%s12056_s14 + $0x2c] sm:$0xf] }
  0x21   : > { %v12113_v42 = vld [vmem:[%s12056_s14 + $0x30] sm:$0xf]  ;;  %v12116_v43 = vld [vmem:[%s12056_s14 + $0x34] sm:$0xf]  ;;  %v12119_v44 = vld [vmem:[%s12056_s14 + $0x38] sm:$0xf] }
  0x22   : > { %v12128_v45 = vld [vmem:[%s12056_s14 + $0x3c] sm:$0xf]  ;;  %v12131_v46 = vld [vmem:[%s12056_s14 + $0x40] sm:$0xf]  ;;  %v12134_v47 = vld [vmem:[%s12056_s14 + $0x44] sm:$0xf] }
  0x23   : > { %17439 = vst [vmem:[#allocation11_spill] sm:$0xff] %v12131_v46  ;;  %17440 = vst [vmem:[#allocation12_spill] sm:$0xff] %v12134_v47  ;;  %v12137_v48 = vld [vmem:[%s12056_s14 + $0x48] sm:$0xf]  ;;  %v12140_v49 = vld [vmem:[%s12056_s14 + $0x4c] sm:$0xf] }
  0x24   : > { %17441 = vst [vmem:[#allocation13_spill] sm:$0xff] %v12137_v48  ;;  %17442 = vst [vmem:[#allocation14_spill] sm:$0xff] %v12140_v49  ;;  %v12143_v50 = vld [vmem:[%s12056_s14 + $0x50] sm:$0xf]  ;;  %v12146_v51 = vld [vmem:[%s12056_s14 + $0x54] sm:$0xf] }
  0x25   : > { %17443 = vst [vmem:[#allocation15_spill] sm:$0xff] %v12143_v50  ;;  %17444 = vst [vmem:[#allocation16_spill] sm:$0xff] %v12146_v51  ;;  %v12149_v52 = vld [vmem:[%s12056_s14 + $0x58] sm:$0xf]  ;;  %v12152_v53 = vld [vmem:[%s12056_s14 + $0x5c] sm:$0xf] }
  0x26   : > { %17445 = vst [vmem:[#allocation17_spill] sm:$0xff] %v12149_v52  ;;  %17446 = vst [vmem:[#allocation18_spill] sm:$0xff] %v12152_v53  ;;  %v12155_v54 = vld [vmem:[%s12125_s17] sm:$0xf]  ;;  %v12158_v55 = vld [vmem:[%s12125_s17 + $0x4] sm:$0xf] }
  0x27   : > { %v12161_v56 = vld [vmem:[%s12125_s17 + $0x8] sm:$0xf]  ;;  %v12164_v57 = vld [vmem:[%s12125_s17 + $0xc] sm:$0xf]  ;;  %v12167_v58 = vld [vmem:[%s12125_s17 + $0x10] sm:$0xf] }
  0x28   : > { %v12170_v59 = vld [vmem:[%s12125_s17 + $0x14] sm:$0xf]  ;;  %v12173_v60 = vld [vmem:[%s12125_s17 + $0x18] sm:$0xf]  ;;  %v12176_v61 = vld [vmem:[%s12125_s17 + $0x1c] sm:$0xf] }
  0x29   : > { %v12179_v62 = vld [vmem:[%s12125_s17 + $0x20] sm:$0xf]  ;;  %v12182_v63 = vld [vmem:[%s12125_s17 + $0x24] sm:$0xf]  ;;  %v12185_v0 = vld [vmem:[%s12125_s17 + $0x28] sm:$0xf] }
  0x2a   : > { %v12188_v1 = vld [vmem:[%s12125_s17 + $0x2c] sm:$0xf]  ;;  %v12191_v2 = vld [vmem:[%s12125_s17 + $0x30] sm:$0xf]  ;;  %v12194_v4 = vld [vmem:[%s12125_s17 + $0x34] sm:$0xf] }
  0x2b   : > { %17447 = vst [vmem:[#allocation19_spill] sm:$0xff] %v12191_v2  ;;  %v12197_v50 = vld [vmem:[%s12125_s17 + $0x38] sm:$0xf]  ;;  %v12205_v51 = vld [vmem:[%s12125_s17 + $0x3c] sm:$0xf] }
  0x2c   : > { %v12208_v52 = vld [vmem:[%s12125_s17 + $0x40] sm:$0xf]  ;;  %v12211_v53 = vld [vmem:[%s12125_s17 + $0x44] sm:$0xf]  ;;  %v12214_v26 = vld [vmem:[%s12125_s17 + $0x48] sm:$0xf] }
  0x2d   : > { %17448 = vst [vmem:[#allocation20_spill] sm:$0xff] %v12208_v52  ;;  %17449 = vst [vmem:[#allocation21_spill] sm:$0xff] %v12211_v53  ;;  %v12217_v27 = vld [vmem:[%s12125_s17 + $0x4c] sm:$0xf]  ;;  %v12220_v28 = vld [vmem:[%s12125_s17 + $0x50] sm:$0xf] }
  0x2e   : > { %17450 = vst [vmem:[#allocation22_spill] sm:$0xff] %v12214_v26  ;;  %17451 = vst [vmem:[#allocation23_spill] sm:$0xff] %v12217_v27  ;;  %v12223_v29 = vld [vmem:[%s12125_s17 + $0x54] sm:$0xf]  ;;  %v12226_v46 = vld [vmem:[%s12125_s17 + $0x58] sm:$0xf] }
  0x2f   : > { %17452 = vst [vmem:[#allocation24_spill] sm:$0xff] %v12220_v28  ;;  %17453 = vst [vmem:[#allocation25_spill] sm:$0xff] %v12223_v29  ;;  %v12229_v47 = vld [vmem:[%s12125_s17 + $0x5c] sm:$0xf]  ;;  %v12231_v48 = vld [vmem:[%s439_s20] sm:$0xf] }
  0x30   : > { %17454 = vst [vmem:[#allocation26_spill] sm:$0xff] %v12226_v46  ;;  %17455 = vst [vmem:[#allocation27_spill] sm:$0xff] %v12229_v47  ;;  %v12233_v49 = vld [vmem:[%s439_s20 + $0x4] sm:$0xf]  ;;  %v12235_v2 = vld [vmem:[%s439_s20 + $0x8] sm:$0xf] }
  0x31   : > { %17456 = vst [vmem:[#allocation28_spill] sm:$0xff] %v12231_v48  ;;  %17457 = vst [vmem:[#allocation29_spill] sm:$0xff] %v12233_v49  ;;  %v12237_v52 = vld [vmem:[%s439_s20 + $0xc] sm:$0xf]  ;;  %v12239_v53 = vld [vmem:[%s439_s20 + $0x10] sm:$0xf] }
  0x32   : > { %17458 = vst [vmem:[#allocation30_spill] sm:$0xff] %v12235_v2  ;;  %17459 = vst [vmem:[#allocation31_spill] sm:$0xff] %v12237_v52  ;;  %v12241_v26 = vld [vmem:[%s439_s20 + $0x14] sm:$0xf]  ;;  %v12243_v27 = vld [vmem:[%s439_s20 + $0x18] sm:$0xf] }
  0x33   : > { %17460 = vst [vmem:[#allocation32_spill] sm:$0xff] %v12239_v53  ;;  %17461 = vst [vmem:[#allocation33_spill] sm:$0xff] %v12241_v26  ;;  %v12245_v28 = vld [vmem:[%s439_s20 + $0x1c] sm:$0xf]  ;;  %v12247_v29 = vld [vmem:[%s439_s20 + $0x20] sm:$0xf] }
  0x34   : > { %17462 = vst [vmem:[#allocation34_spill] sm:$0xff] %v12243_v27  ;;  %17463 = vst [vmem:[#allocation35_spill] sm:$0xff] %v12245_v28  ;;  %v12249_v46 = vld [vmem:[%s439_s20 + $0x24] sm:$0xf]  ;;  %v12251_v47 = vld [vmem:[%s439_s20 + $0x28] sm:$0xf] }
  0x35   : > { %17464 = vst [vmem:[#allocation36_spill] sm:$0xff] %v12247_v29  ;;  %17465 = vst [vmem:[#allocation37_spill] sm:$0xff] %v12249_v46  ;;  %v12253_v48 = vld [vmem:[%s439_s20 + $0x2c] sm:$0xf]  ;;  %v12255_v49 = vld [vmem:[%s439_s20 + $0x30] sm:$0xf] }
  0x36   : > { %17466 = vst [vmem:[#allocation38_spill] sm:$0xff] %v12251_v47  ;;  %17467 = vst [vmem:[#allocation39_spill] sm:$0xff] %v12253_v48  ;;  %v12257_v2 = vld [vmem:[%s439_s20 + $0x34] sm:$0xf]  ;;  %v12259_v52 = vld [vmem:[%s439_s20 + $0x38] sm:$0xf] }
  0x37   : > { %17468 = vst [vmem:[#allocation40_spill] sm:$0xff] %v12255_v49  ;;  %17469 = vst [vmem:[#allocation41_spill] sm:$0xff] %v12257_v2  ;;  %v12261_v53 = vld [vmem:[%s439_s20 + $0x3c] sm:$0xf]  ;;  %v12263_v26 = vld [vmem:[%s439_s20 + $0x40] sm:$0xf] }
  0x38   : > { %17470 = vst [vmem:[#allocation42_spill] sm:$0xff] %v12259_v52  ;;  %17471 = vst [vmem:[#allocation43_spill] sm:$0xff] %v12261_v53  ;;  %v12265_v27 = vld [vmem:[%s439_s20 + $0x44] sm:$0xf]  ;;  %541 = sbr.rel (%p11237_p5) target bundleno = 270 (0x10e), region = 60 }
  0x39   : > { %17472 = vst [vmem:[#allocation44_spill] sm:$0xff] %v12263_v26  ;;  %17473 = vst [vmem:[#allocation45_spill] sm:$0xff] %v12265_v27 }
  0x3d   : > { %v11666_v46 = vld [vmem:[%s17215_s6 + $0x8] sm:$0xff]   ;;  %v11914_v47 = vmov 0.0   ;;  %v11667_v49 = vld [vmem:[%s17215_s6] sm:$0xff]   ;;  %vm11915_vm0 = vmmov 0   ;;  %vm559_vm1 = vcmask 261120  }
  0x3e   : > { %11407 = vmatprep.subr.bf16.mxu0 %v11914_v47  ;;  %11411 = vmatprep.mubr.msk.bf16.mxu0 %vm11915_vm0, %v11914_v47  ;;  %v11241_v53 = vld [vmem:[%s17216_s7] ss:$0 sm:$0xff] }
  0x3f   : > { %11408 = vmatpush3.bf16.msra.mxu0 %v11666_v46 }
  0x40   : > { %11409 = vmatprep.subr.bf16.mxu0 %v11914_v47 }
  0x43   : > { %11410 = vmatpush3.bf16.msra.mxu0 %v11667_v49 }
  0x46   : > { %11412 = vmatmul.mubr.msk.bf16.vlgmr.msra.gmra.mxu0 %vm559_vm1, %v12012_v5 }
 0x106   : > { %v597_v26 = vpop.f32.mrf.mxu0 }
 0x107   : > { %v610_v27 = vadd.f32 %v11241_v53, %v597_v26 }
 0x108   : > { %v11413_v2 = vpop.f32.mrf.mxu0 }
 0x109   : > { %612 = vst.msk [vmem:[#allocation2] sm:$0xff] %vm559_vm1, %v610_v27 }
 0x10a   : > { %v600_v46 = vpop.f32.mrf.mxu0 }
 0x10b   : > { %v611_v52 = vadd.f32 %v11241_v53, %v600_v46 }
 0x10c   : > { %v11414_v48 = vpop.f32.mrf.mxu0 }
 0x10d   : > { %613 = vst.msk [vmem:[#allocation2 + $0x8] sm:$0xff] %vm559_vm1, %v611_v52 }
 0x10e PF: > { %v11243_v47 = vcombine.low %v12026_v8, %v12028_v9  ;;  %v17220_v49 = vmov 0.0   ;;  %vm11917_vm2 = vmmov 0   ;;  %v11246_v26 = vcombine.low %v12083_v32, %v12086_v33  ;;  %s11920_s16 = smov [#allocation2]   ;;  %p17184_p6 = scmp.eq.s32.totalorder %s11227_s12, 3 }
 0x10f   : > { %11415 = vmatprep.subr.bf16.mxu0 %v17220_v49  ;;  %11419 = vmatprep.mubr.msk.bf16.mxu0 %vm11917_vm2, %v17220_v49  ;;  %v11242_v27 = vcombine.low %v12022_v6, %v12024_v7  ;;  %v11245_v8 = vcombine.low %v12077_v30, %v12080_v31  ;;  %vm626_vm3 = vcmask 261120   ;;  %v11249_v9 = vcombine.low %v12161_v56, %v12164_v57  ;;  %s11108_s17 = sshll.u32 %s11920_s16, 4  ;;  %s11109_s17 = int_to_ptr.vmem [resolvable:$true] %s11108_s17 }
 0x110   : > { %11416 = vmatpush3.bf16.msra.mxu0 %v11243_v47  ;;  %11423 = vmatprep.subr.bf16.mxu1 %v17220_v49  ;;  %v11252_v6 = vcombine.low %v12034_v12, %v12036_v13  ;;  %v11248_v7 = vcombine.low %v12155_v54, %v12158_v55  ;;  %v11251_v30 = vcombine.low %v12030_v10, %v12032_v11  ;;  %vm4719_vm4 = vcmask 195584   ;;  %s11862_s19 = scalar_lea.vmem %s11109_s17, 256  ;;  %p11869_p10 = scmp.lt.s32.totalorder %s11109_s17, %s11109_s17 }
 0x111   : > { %11417 = vmatprep.subr.bf16.mxu0 %v17220_v49  ;;  %11424 = vmatpush3.bf16.msra.mxu1 %v11246_v26  ;;  %v11255_v12 = vcombine.low %v12095_v36, %v12098_v37  ;;  %v11254_v10 = vcombine.low %v12089_v34, %v12092_v35  ;;  %v11261_v11 = vcombine.low %v12042_v16, %v12044_v17  ;;  %vm5268_vm5 = vcmask 1041409   ;;  %p11863_p7 = scmp.ne.s32.totalorder %s11109_s17, %s11862_s19  ;;  %p11870_p11 = scmp.lt.s32.totalorder %s11862_s19, %s11862_s19 }
 0x112   : > { %11425 = vmatprep.subr.bf16.mxu1 %v17220_v49  ;;  %11427 = vmatprep.mubr.msk.bf16.mxu1 %vm11917_vm2, %v17220_v49  ;;  %v11260_v13 = vcombine.low %v12038_v14, %v12040_v15  ;;  %v11258_v16 = vcombine.low %v12173_v60, %v12176_v61  ;;  %v11257_v14 = vcombine.low %v12167_v58, %v12170_v59  ;;  %vm5271_vm6 = vcmask 1042434  }
 0x113   : > { %v11264_v15 = vcombine.low %v12107_v40, %v12110_v41  ;;  %v11263_v17 = vcombine.low %v12101_v38, %v12104_v39  ;;  %v11270_v31 = vcombine.low %v12050_v20, %v12058_v21  ;;  %v11269_v32 = vcombine.low %v12046_v18, %v12048_v19  ;;  %p11864_p8 = pnand %p11863_p7, %p17184_p6  ;;  %p11871_p12 = por %p11870_p11, %p11869_p10 }
 0x114   : > { %11418 = vmatpush3.bf16.msra.mxu0 %v11242_v27  ;;  %v17219_v20 = vlaneseq  ;;  %v11267_v26 = vcombine.low %v12185_v0, %v12188_v1  ;;  %v11273_v1 = vcombine.low %v12119_v44, %v12128_v45  ;;  %vm5274_vm7 = vcmask 1043459  }
 0x115   : > { %11426 = vmatpush3.bf16.msra.mxu1 %v11245_v8  ;;  %11431 = vmatprep.subr.bf16.mxu0 %v17220_v49  ;;  %vm5277_vm8 = vcmask 1044484   ;;  %vm5280_vm9 = vcmask 1045509   ;;  %vm5283_vm10 = vcmask 1046534   ;;  %vm5286_vm11 = vcmask 1047559   ;;  %p11865_p9 = pneg %p11864_p8 }
 0x116   : > { %11439 = vmatprep.subr.bf16.mxu1 %v17220_v49  ;;  %v12375_v21 = vshrl.u32 %v17219_v20, 7  ;;  %vm5568_vm12 = vcmask 130112   ;;  %vm5575_vm13 = vcmask 195712  }
 0x117   : > { %11420 = vmatmul.mubr.msk.bf16.vlgmr.msra.gmra.mxu0 %vm626_vm3, %v12004_v3  ;;  %p11872_p13 = pnand %p11871_p12, %p11865_p9 }
 0x118   : > { %11428 = vmatmul.mubr.msk.bf16.vlgmr.msra.gmra.mxu1 %vm626_vm3, %v12004_v3  ;;  %11432 = vmatpush3.bf16.msra.mxu0 %v11249_v9  ;;  %17474 = vst [vmem:[#allocation46_spill] sm:$0xff] %v12375_v21  ;;  %v12378_v33 = vsub.s32 0, %v12375_v21  ;;  %v12382_v18 = vsub.s32 1, %v12375_v21  ;;  %v12392_v52 = vsub.s32 2, %v12375_v21  ;;  %v12398_v56 = vsub.s32 3, %v12375_v21 }
 0x119   : > { %11440 = vmatpush3.bf16.msra.mxu1 %v11252_v6  ;;  %11443 = vmatprep.mubr.msk.bf16.mxu1 %vm11917_vm2, %v17220_v49  ;;  %v12404_v60 = vsub.s32 4, %v12375_v21  ;;  %v12408_v2 = vsub.s32 5, %v12375_v21  ;;  %v12412_v47 = vsub.s32 6, %v12375_v21  ;;  %v12418_v8 = vsub.s32 7, %v12375_v21 }
 0x11a   : > { %11441 = vmatprep.subr.bf16.mxu1 %v17220_v49  ;;  %11433 = vmatprep.subr.bf16.mxu0 %v17220_v49  ;;  %17475 = vst [vmem:[#allocation47_spill] sm:$0xff] %v12378_v33  ;;  %17476 = vst [vmem:[#allocation48_spill] sm:$0xff] %v12382_v18  ;;  %v11266_v9 = vcombine.low %v12179_v62, %v12182_v63  ;;  %v11272_v63 = vcombine.low %v12113_v42, %v12116_v43 }
 0x11b   : > { %11435 = vmatprep.mubr.msk.bf16.mxu0 %vm11917_vm2, %v17220_v49  ;;  %17477 = vst [vmem:[#allocation49_spill] sm:$0xff] %v12392_v52  ;;  %17478 = vst [vmem:[#allocation50_spill] sm:$0xff] %v12398_v56  ;;  %v11279_v43 = vcombine.low %v12064_v24, %v12066_v25 }
 0x11c   : > { %11434 = vmatpush3.bf16.msra.mxu0 %v11248_v7  ;;  %17479 = vst [vmem:[#allocation51_spill] sm:$0xff] %v12404_v60  ;;  %17480 = vst [vmem:[#allocation52_spill] sm:$0xff] %v12408_v2 }
 0x11d   : > { %11442 = vmatpush3.bf16.msra.mxu1 %v11251_v30  ;;  %11447 = vmatprep.subr.bf16.mxu0 %v17220_v49  ;;  %17481 = vst [vmem:[#allocation53_spill] sm:$0xff] %v12412_v47  ;;  %17482 = vst [vmem:[#allocation54_spill] sm:$0xff] %v12418_v8 }
 0x11e   : > { %11455 = vmatprep.subr.bf16.mxu1 %v17220_v49 }
 0x11f   : > { %11436 = vmatmul.mubr.msk.bf16.vlgmr.msra.gmra.mxu0 %vm626_vm3, %v12012_v5 }
 0x120   : > { %11444 = vmatmul.mubr.msk.bf16.vlgmr.msra.gmra.mxu1 %vm626_vm3, %v12004_v3  ;;  %11448 = vmatpush3.bf16.msra.mxu0 %v11255_v12 }
 0x121   : > { %11449 = vmatprep.subr.bf16.mxu0 %v17220_v49  ;;  %11451 = vmatprep.mubr.msk.bf16.mxu0 %vm11917_vm2, %v17220_v49 }
 0x122   : > { %11459 = vmatprep.mubr.msk.bf16.mxu1 %vm11917_vm2, %v17220_v49  ;;  %11456 = vmatpush3.bf16.msra.mxu1 %v11258_v16 }
 0x123   : > { %11457 = vmatprep.subr.bf16.mxu1 %v17220_v49 }
 0x124   : > { %11450 = vmatpush3.bf16.msra.mxu0 %v11254_v10 }
 0x125   : > { %11463 = vmatprep.subr.bf16.mxu0 %v17220_v49 }
 0x126   : > { %11458 = vmatpush3.bf16.msra.mxu1 %v11257_v14 }
 0x127   : > { %11452 = vmatmul.mubr.msk.bf16.vlgmr.msra.gmra.mxu0 %vm626_vm3, %v12004_v3  ;;  %11471 = vmatprep.subr.bf16.mxu1 %v17220_v49 }
 0x128   : > { %11464 = vmatpush3.bf16.msra.mxu0 %v11261_v11  ;;  %11467 = vmatprep.mubr.msk.bf16.mxu0 %vm11917_vm2, %v17220_v49 }
 0x129   : > { %11465 = vmatprep.subr.bf16.mxu0 %v17220_v49  ;;  %11460 = vmatmul.mubr.msk.bf16.vlgmr.msra.gmra.mxu1 %vm626_vm3, %v12012_v5 }
 0x12a   : > { %11472 = vmatpush3.bf16.msra.mxu1 %v11264_v15  ;;  %11475 = vmatprep.mubr.msk.bf16.mxu1 %vm11917_vm2, %v17220_v49 }
 0x12b   : > { %11473 = vmatprep.subr.bf16.mxu1 %v17220_v49 }
 0x12c   : > { %11466 = vmatpush3.bf16.msra.mxu0 %v11260_v13  ;;  %v11278_v13 = vcombine.low %v12060_v22, %v12062_v23 }
 0x12d   : > { %11479 = vmatprep.subr.bf16.mxu0 %v17220_v49 }
 0x12e   : > { %11474 = vmatpush3.bf16.msra.mxu1 %v11263_v17 }
 0x12f   : > { %11468 = vmatmul.mubr.msk.bf16.vlgmr.msra.gmra.mxu0 %vm626_vm3, %v12004_v3  ;;  %11487 = vmatprep.subr.bf16.mxu1 %v17220_v49 }
 0x130   : > { %11483 = vmatprep.mubr.msk.bf16.mxu0 %vm11917_vm2, %v17220_v49  ;;  %11480 = vmatpush3.bf16.msra.mxu0 %v11267_v26  ;;  %v11276_v26 = vcombine.low %v12197_v50, %v12205_v51 }
 0x131   : > { %11476 = vmatmul.mubr.msk.bf16.vlgmr.msra.gmra.mxu1 %vm626_vm3, %v12004_v3  ;;  %11481 = vmatprep.subr.bf16.mxu0 %v17220_v49 }
 0x132   : > { %11488 = vmatpush3.bf16.msra.mxu1 %v11270_v31  ;;  %11491 = vmatprep.mubr.msk.bf16.mxu1 %vm11917_vm2, %v17220_v49 }
 0x133   : > { %11489 = vmatprep.subr.bf16.mxu1 %v17220_v49 }
 0x134   : > { %11482 = vmatpush3.bf16.msra.mxu0 %v11266_v9 }
 0x135   : > { %11495 = vmatprep.subr.bf16.mxu0 %v17220_v49 }
 0x136   : > { %11490 = vmatpush3.bf16.msra.mxu1 %v11269_v32 }
 0x137   : > { %11503 = vmatprep.subr.bf16.mxu1 %v17220_v49  ;;  %11484 = vmatmul.mubr.msk.bf16.vlgmr.msra.gmra.mxu0 %vm626_vm3, %v12012_v5 }
 0x138   : > { %11496 = vmatpush3.bf16.msra.mxu0 %v11273_v1  ;;  %11499 = vmatprep.mubr.msk.bf16.mxu0 %vm11917_vm2, %v17220_v49  ;;  %v17485_v1 = vld [vmem:[#allocation19_spill] sm:$0xff] }
 0x139   : > { %11492 = vmatmul.mubr.msk.bf16.vlgmr.msra.gmra.mxu1 %vm626_vm3, %v12004_v3  ;;  %11497 = vmatprep.subr.bf16.mxu0 %v17220_v49 }
 0x13a   : > { %11507 = vmatprep.mubr.msk.bf16.mxu1 %vm11917_vm2, %v17220_v49  ;;  %11504 = vmatpush3.bf16.msra.mxu1 %v11276_v26 }
 0x13b   : > { %11505 = vmatprep.subr.bf16.mxu1 %v17220_v49 }
 0x13c   : > { %11498 = vmatpush3.bf16.msra.mxu0 %v11272_v63 }
 0x13d   : > { %11511 = vmatprep.subr.bf16.mxu0 %v17220_v49 }
 0x13f   : > { %11500 = vmatmul.mubr.msk.bf16.vlgmr.msra.gmra.mxu0 %vm626_vm3, %v12004_v3 }
 0x140   : > { %11515 = vmatprep.mubr.msk.bf16.mxu0 %vm11917_vm2, %v17220_v49  ;;  %11512 = vmatpush3.bf16.msra.mxu0 %v11279_v43 }
 0x141   : > { %11513 = vmatprep.subr.bf16.mxu0 %v17220_v49 }
 0x144   : > { %11514 = vmatpush3.bf16.msra.mxu0 %v11278_v13  ;;  %v17490_v13 = vld [vmem:[#allocation12_spill] sm:$0xff] }
 0x145   : > { %11527 = vmatprep.subr.bf16.mxu0 %v17220_v49 }
 0x147   : > { %11516 = vmatmul.mubr.msk.bf16.vlgmr.msra.gmra.mxu0 %vm626_vm3, %v12004_v3 }
 0x148   : > { %11531 = vmatprep.mubr.msk.bf16.mxu0 %vm11917_vm2, %v17220_v49 }
 0x1d7   : > { %v664_v34 = vpop.f32.mrf.mxu0 }
 0x1d8   : > { %v783_v35 = vrot.slane %v664_v34, %v12378_v33  ;;  %v12384_v19 = vpop.f32.mrf.mxu1  ;;  %v798_v39 = vrot.slane %v664_v34, %v12382_v18  ;;  %v813_v55 = vrot.slane %v664_v34, %v12392_v52  ;;  %v828_v59 = vrot.slane %v664_v34, %v12398_v56 }
 0x1d9   : > { %v11421_v36 = vpop.f32.mrf.mxu0  ;;  %v843_v61 = vrot.slane %v664_v34, %v12404_v60  ;;  %v858_v46 = vrot.slane %v664_v34, %v12408_v2  ;;  %v873_v27 = vrot.slane %v664_v34, %v12412_v47  ;;  %v888_v6 = vrot.slane %v664_v34, %v12418_v8 }
 0x1da   : > { %793 = vbcast.lane.b32.xlu1 %v783_v35, 272  ;;  %785 = vbcast.lane.b32.xlu0 %v783_v35, 256  ;;  %v11429_v37 = vpop.f32.mrf.mxu1 }
 0x1db   : > { %v12386_v38 = vpop.f32.mrf.mxu0 }
 0x1dc   : > { %v12389_v40 = vpop.f32.mrf.mxu1  ;;  %v903_v45 = vrot.slane %v12386_v38, %v12378_v33  ;;  %v918_v42 = vrot.slane %v12386_v38, %v12382_v18  ;;  %v933_v25 = vrot.slane %v12386_v38, %v12392_v52  ;;  %v948_v22 = vrot.slane %v12386_v38, %v12398_v56 }
 0x1dd   : > { %v11422_v41 = vpop.f32.mrf.mxu0  ;;  %v963_v23 = vrot.slane %v12386_v38, %v12404_v60  ;;  %v978_v17 = vrot.slane %v12386_v38, %v12408_v2  ;;  %v993_v31 = vrot.slane %v12386_v38, %v12412_v47  ;;  %v1008_v32 = vrot.slane %v12386_v38, %v12418_v8 }
 0x1de   : > { %800 = vbcast.lane.b32.xlu1 %v798_v39, 256  ;;  %789 = vbcast.lane.b32.xlu0 %v783_v35, 264  ;;  %v11430_v48 = vpop.f32.mrf.mxu1 }
 0x1df   : > { %v12425_v0 = vpop.f32.mrf.mxu0 }
 0x1e0   : > { %v12394_v53 = vpop.f32.mrf.mxu1  ;;  %17483 = vst [vmem:[#allocation55_spill] sm:$0xff] %v12425_v0 }
 0x1e1   : > { %v11437_v7 = vpop.f32.mrf.mxu0  ;;  %v1458_v34 = vrot.slane %v12394_v53, %v12378_v33  ;;  %v1473_v35 = vrot.slane %v12394_v53, %v12382_v18  ;;  %v1488_v36 = vrot.slane %v12394_v53, %v12392_v52  ;;  %v1503_v37 = vrot.slane %v12394_v53, %v12398_v56 }
 0x1e2   : > { %808 = vbcast.lane.b32.xlu1 %v798_v39, 272  ;;  %804 = vbcast.lane.b32.xlu0 %v798_v39, 264  ;;  %v11445_v54 = vpop.f32.mrf.mxu1  ;;  %v11275_v7 = vcombine.low %v17485_v1, %v12194_v4  ;;  %v1563_v50 = vrot.slane %v12394_v53, %v12418_v8  ;;  %v17495_v1 = vld [vmem:[#allocation9_spill] sm:$0xff] }
 0x1e3   : > { %v12433_v62 = vpop.f32.mrf.mxu0  ;;  %v1518_v54 = vrot.slane %v12394_v53, %v12404_v60 }
 0x1e4   : > { %v12400_v57 = vpop.f32.mrf.mxu1  ;;  %17484 = vst [vmem:[#allocation56_spill] sm:$0xff] %v12433_v62  ;;  %11506 = vmatpush3.bf16.msra.mxu1 %v11275_v7  ;;  %v11918_v62 = vmov 1966171168  }
 0x1e5   : > { %v11438_v44 = vpop.f32.mrf.mxu0  ;;  %11519 = vmatprep.subr.bf16.mxu1 %v17220_v49  ;;  %v1668_v28 = vrot.slane %v12400_v57, %v12412_v47 }
 0x1e6   : > { %819 = vbcast.lane.b32.xlu1 %v813_v55, 264  ;;  %815 = vbcast.lane.b32.xlu0 %v813_v55, 256  ;;  %v11446_v58 = vpop.f32.mrf.mxu1 }
 0x1e7   : > { %v12440_v30 = vpop.f32.mrf.mxu0  ;;  %11508 = vmatmul.mubr.msk.bf16.vlgmr.msra.gmra.mxu1 %vm626_vm3, %v12012_v5 }
 0x1e8   : > { %11523 = vmatprep.mubr.msk.bf16.mxu1 %vm11917_vm2, %v17220_v49 }
 0x1e9   : > { %v11453_v12 = vpop.f32.mrf.mxu0  ;;  %v12522_v51 = vpop.f32.mrf.mxu1 }
 0x1ea   : > { %830 = vbcast.lane.b32.xlu1 %v828_v59, 256  ;;  %823 = vbcast.lane.b32.xlu0 %v813_v55, 272  ;;  %17486 = vst [vmem:[#allocation19_spill] sm:$0xff] %v12522_v51  ;;  %v17488_v12 = vld [vmem:[#allocation13_spill] sm:$0xff] }
 0x1eb   : > { %v12451_v10 = vpop.f32.mrf.mxu0 }
 0x1ed   : > { %v11454_v11 = vpop.f32.mrf.mxu0 }
 0x1ee   : > { %838 = vbcast.lane.b32.xlu1 %v828_v59, 272  ;;  %834 = vbcast.lane.b32.xlu0 %v828_v59, 264  ;;  %v1533_v59 = vrot.slane %v12394_v53, %v12408_v2  ;;  %v11461_v11 = vpop.f32.mrf.mxu1 }
 0x1ef   : > { %v12456_v16 = vpop.f32.mrf.mxu0 }
 0x1f0   : > { %v2133_v0 = vrot.slane %v12456_v16, %v12378_v33 }
 0x1f1   : > { %v11469_v24 = vpop.f32.mrf.mxu0 }
 0x1f2   : > { %849 = vbcast.lane.b32.xlu1 %v843_v61, 264  ;;  %845 = vbcast.lane.b32.xlu0 %v843_v61, 256  ;;  %v17491_v24 = vld [vmem:[#allocation11_spill] sm:$0xff] }
 0x1f3   : > { %v12461_v14 = vpop.f32.mrf.mxu0 }
 0x1f5   : > { %v11470_v15 = vpop.f32.mrf.mxu0 }
 0x1f6   : > { %860 = vbcast.lane.b32.xlu1 %v858_v46, 256  ;;  %853 = vbcast.lane.b32.xlu0 %v843_v61, 272 }
 0x1fa   : > { %868 = vbcast.lane.b32.xlu1 %v858_v46, 272  ;;  %864 = vbcast.lane.b32.xlu0 %v858_v46, 264 }
 0x1fe   : > { %879 = vbcast.lane.b32.xlu1 %v873_v27, 264  ;;  %875 = vbcast.lane.b32.xlu0 %v873_v27, 256 }
 0x202   : > { %890 = vbcast.lane.b32.xlu1 %v888_v6, 256  ;;  %883 = vbcast.lane.b32.xlu0 %v873_v27, 272 }
 0x206   : > { %898 = vbcast.lane.b32.xlu1 %v888_v6, 272  ;;  %894 = vbcast.lane.b32.xlu0 %v888_v6, 264  ;;  %v1548_v6 = vrot.slane %v12394_v53, %v12412_v47  ;;  %v12535_v53 = vpop.f32.mrf.mxu1 }
 0x20a   : > { %909 = vbcast.lane.b32.xlu1 %v903_v45, 264  ;;  %905 = vbcast.lane.b32.xlu0 %v903_v45, 256 }
 0x20e   : > { %920 = vbcast.lane.b32.xlu1 %v918_v42, 256  ;;  %913 = vbcast.lane.b32.xlu0 %v903_v45, 272  ;;  %v17487_v45 = vld [vmem:[#allocation14_spill] sm:$0xff] }
 0x20f   : > { %17489 = vst [vmem:[#allocation14_spill] sm:$0xff] %v12535_v53 }
 0x212   : > { %928 = vbcast.lane.b32.xlu1 %v918_v42, 272  ;;  %924 = vbcast.lane.b32.xlu0 %v918_v42, 264  ;;  %v11282_v42 = vcombine.low %v17488_v12, %v17487_v45 }
 0x214   : > { %11520 = vmatpush3.bf16.msra.mxu1 %v11282_v42  ;;  %v1608_v42 = vrot.slane %v12400_v57, %v12392_v52 }
 0x215   : > { %11521 = vmatprep.subr.bf16.mxu1 %v17220_v49 }
 0x216   : > { %939 = vbcast.lane.b32.xlu1 %v933_v25, 264  ;;  %935 = vbcast.lane.b32.xlu0 %v933_v25, 256 }
 0x21a   : > { %950 = vbcast.lane.b32.xlu1 %v948_v22, 256  ;;  %943 = vbcast.lane.b32.xlu0 %v933_v25, 272  ;;  %v11281_v25 = vcombine.low %v17491_v24, %v17490_v13  ;;  %v17497_v13 = vld [vmem:[#allocation8_spill] sm:$0xff]  ;;  %v17498_v24 = vld [vmem:[#allocation7_spill] sm:$0xff] }
 0x21c   : > { %11522 = vmatpush3.bf16.msra.mxu1 %v11281_v25  ;;  %v11287_v25 = vcombine.low %v17498_v24, %v17497_v13 }
 0x21d   : > { %11535 = vmatprep.subr.bf16.mxu1 %v17220_v49 }
 0x21e   : > { %958 = vbcast.lane.b32.xlu1 %v948_v22, 272  ;;  %954 = vbcast.lane.b32.xlu0 %v948_v22, 264 }
 0x21f   : > { %11524 = vmatmul.mubr.msk.bf16.vlgmr.msra.gmra.mxu1 %vm626_vm3, %v12004_v3 }
 0x220   : > { %11539 = vmatprep.mubr.msk.bf16.mxu1 %vm11917_vm2, %v17220_v49 }
 0x222   : > { %969 = vbcast.lane.b32.xlu1 %v963_v23, 264  ;;  %965 = vbcast.lane.b32.xlu0 %v963_v23, 256 }
 0x226   : > { %980 = vbcast.lane.b32.xlu1 %v978_v17, 256  ;;  %973 = vbcast.lane.b32.xlu0 %v963_v23, 272  ;;  %v1578_v23 = vrot.slane %v12400_v57, %v12378_v33 }
 0x22a   : > { %988 = vbcast.lane.b32.xlu1 %v978_v17, 272  ;;  %984 = vbcast.lane.b32.xlu0 %v978_v17, 264  ;;  %v11462_v17 = vpop.f32.mrf.mxu1 }
 0x22e   : > { %999 = vbcast.lane.b32.xlu1 %v993_v31, 264  ;;  %995 = vbcast.lane.b32.xlu0 %v993_v31, 256 }
 0x232   : > { %1010 = vbcast.lane.b32.xlu1 %v1008_v32, 256  ;;  %1003 = vbcast.lane.b32.xlu0 %v993_v31, 272  ;;  %v12546_v31 = vpop.f32.mrf.mxu1 }
 0x233   : > { %17492 = vst [vmem:[#allocation13_spill] sm:$0xff] %v12546_v31 }
 0x236   : > { %1018 = vbcast.lane.b32.xlu1 %v1008_v32, 272  ;;  %1014 = vbcast.lane.b32.xlu0 %v1008_v32, 264 }
 0x23a   : > { %1464 = vbcast.lane.b32.xlu1 %v1458_v34, 264  ;;  %1460 = vbcast.lane.b32.xlu0 %v1458_v34, 256 }
 0x23e   : > { %1475 = vbcast.lane.b32.xlu1 %v1473_v35, 256  ;;  %1468 = vbcast.lane.b32.xlu0 %v1458_v34, 272 }
 0x242   : > { %1483 = vbcast.lane.b32.xlu1 %v1473_v35, 272  ;;  %1479 = vbcast.lane.b32.xlu0 %v1473_v35, 264  ;;  %v1593_v35 = vrot.slane %v12400_v57, %v12382_v18 }
 0x246   : > { %1494 = vbcast.lane.b32.xlu1 %v1488_v36, 264  ;;  %1490 = vbcast.lane.b32.xlu0 %v1488_v36, 256 }
 0x24a   : > { %1505 = vbcast.lane.b32.xlu1 %v1503_v37, 256  ;;  %1498 = vbcast.lane.b32.xlu0 %v1488_v36, 272  ;;  %v11477_v36 = vpop.f32.mrf.mxu1 }
 0x24b   : > { %v1623_v36 = vrot.slane %v12400_v57, %v12398_v56 }
 0x24c   : > { %v12485_v38 = vpop.permute.xlu1 %793  ;;  %v12487_v39 = vpop.permute.xlu0 %785 }
 0x24e   : > { %1513 = vbcast.lane.b32.xlu1 %v1503_v37, 272  ;;  %1509 = vbcast.lane.b32.xlu0 %v1503_v37, 264  ;;  %v12559_v37 = vpop.f32.mrf.mxu1 }
 0x24f   : > { %17493 = vst [vmem:[#allocation12_spill] sm:$0xff] %v12559_v37  ;;  %v1024_v37 = vunpack.c.l.s4 %v11918_v62 }
 0x250   : > { %v12489_v41 = vpop.permute.xlu1 %800  ;;  %v12491_v48 = vpop.permute.xlu0 %789 }
 0x251   : > { %v11478_v26 = vpop.f32.mrf.mxu1 }
 0x252   : > { %1524 = vbcast.lane.b32.xlu1 %v1518_v54, 264  ;;  %1520 = vbcast.lane.b32.xlu0 %v1518_v54, 256 }
 0x254   : > { %v12495_v55 = vpop.permute.xlu1 %808  ;;  %v12497_v58 = vpop.permute.xlu0 %804 }
 0x256   : > { %1535 = vbcast.lane.b32.xlu1 %v1533_v59, 256  ;;  %1528 = vbcast.lane.b32.xlu0 %v1518_v54, 272 }
 0x258   : > { %v12501_v61 = vpop.permute.xlu1 %819  ;;  %v12503_v46 = vpop.permute.xlu0 %815 }
 0x25a   : > { %1543 = vbcast.lane.b32.xlu1 %v1533_v59, 272  ;;  %1539 = vbcast.lane.b32.xlu0 %v1533_v59, 264 }
 0x25c   : > { %v12507_v27 = vpop.permute.xlu1 %830  ;;  %v12509_v9 = vpop.permute.xlu0 %823 }
 0x25e   : > { %1554 = vbcast.lane.b32.xlu1 %v1548_v6, 264  ;;  %1550 = vbcast.lane.b32.xlu0 %v1548_v6, 256 }
 0x260   : > { %v12516_v63 = vpop.permute.xlu1 %838  ;;  %v12518_v44 = vpop.permute.xlu0 %834 }
 0x262   : > { %1565 = vbcast.lane.b32.xlu1 %v1563_v50, 256  ;;  %1558 = vbcast.lane.b32.xlu0 %v1548_v6, 272  ;;  %v17494_v6 = vld [vmem:[#allocation10_spill] sm:$0xff] }
 0x263   : > { %v11288_v7 = vcombine.low %v17495_v1, %v17494_v6 }
 0x264   : > { %v12527_v43 = vpop.permute.xlu1 %849  ;;  %v12529_v4 = vpop.permute.xlu0 %845 }
 0x265   : > { %11536 = vmatpush3.bf16.msra.mxu1 %v11288_v7 }
 0x266   : > { %1573 = vbcast.lane.b32.xlu1 %v1563_v50, 272  ;;  %1569 = vbcast.lane.b32.xlu0 %v1563_v50, 264  ;;  %v12567_v50 = vpop.f32.mrf.mxu1 }
 0x267   : > { %17496 = vst [vmem:[#allocation11_spill] sm:$0xff] %v12567_v50  ;;  %11537 = vmatprep.subr.bf16.mxu1 %v17220_v49 }
 0x268   : > { %v12540_v15 = vpop.permute.xlu1 %860  ;;  %v12542_v22 = vpop.permute.xlu0 %853 }
 0x269   : > { %v11493_v11 = vpop.f32.mrf.mxu1  ;;  %11538 = vmatpush3.bf16.msra.mxu1 %v11287_v25  ;;  %v1653_v25 = vrot.slane %v12400_v57, %v12408_v2 }
 0x26a   : > { %1584 = vbcast.lane.b32.xlu1 %v1578_v23, 264  ;;  %1580 = vbcast.lane.b32.xlu0 %v1578_v23, 256 }
 0x26b   : > { %11551 = vmatprep.subr.bf16.mxu1 %v17220_v49 }
 0x26c   : > { %v12549_v32 = vpop.permute.xlu1 %868  ;;  %v12551_v34 = vpop.permute.xlu0 %864  ;;  %11540 = vmatmul.mubr.msk.bf16.vlgmr.msra.gmra.mxu1 %vm626_vm3, %v12004_v3 }
 0x26d   : > { %11555 = vmatprep.mubr.msk.bf16.mxu1 %vm11917_vm2, %v17220_v49 }
 0x26e   : > { %1595 = vbcast.lane.b32.xlu1 %v1593_v35, 256  ;;  %1588 = vbcast.lane.b32.xlu0 %v1578_v23, 272  ;;  %v12578_v23 = vpop.f32.mrf.mxu1 }
 0x26f   : > { %17499 = vst [vmem:[#allocation10_spill] sm:$0xff] %v12578_v23 }
 0x270   : > { %v12561_v54 = vpop.permute.xlu1 %879  ;;  %v12563_v59 = vpop.permute.xlu0 %875 }
 0x271   : > { %v11494_v26 = vpop.f32.mrf.mxu1 }
 0x272   : > { %1603 = vbcast.lane.b32.xlu1 %v1593_v35, 272  ;;  %1599 = vbcast.lane.b32.xlu0 %v1593_v35, 264 }
 0x274   : > { %v12569_v45 = vpop.permute.xlu1 %890  ;;  %v12571_v12 = vpop.permute.xlu0 %883 }
 0x276   : > { %1614 = vbcast.lane.b32.xlu1 %v1608_v42, 264  ;;  %1610 = vbcast.lane.b32.xlu0 %v1608_v42, 256 }
 0x278   : > { %v12580_v17 = vpop.permute.xlu1 %898  ;;  %v12582_v35 = vpop.permute.xlu0 %894 }
 0x27a   : > { %1625 = vbcast.lane.b32.xlu1 %v1623_v36, 256  ;;  %1618 = vbcast.lane.b32.xlu0 %v1608_v42, 272  ;;  %v1638_v42 = vrot.slane %v12400_v57, %v12404_v60 }
 0x27c   : > { %v12587_v6 = vpop.permute.xlu1 %909  ;;  %v12589_v1 = vpop.permute.xlu0 %905 }
 0x27e   : > { %1633 = vbcast.lane.b32.xlu1 %v1623_v36, 272  ;;  %1629 = vbcast.lane.b32.xlu0 %v1623_v36, 264 }
 0x280   : > { %v12595_v7 = vpop.permute.xlu1 %920  ;;  %v12597_v11 = vpop.permute.xlu0 %913 }
 0x282   : > { %1644 = vbcast.lane.b32.xlu1 %v1638_v42, 264  ;;  %1640 = vbcast.lane.b32.xlu0 %v1638_v42, 256 }
 0x284   : > { %v12601_v13 = vpop.permute.xlu1 %928  ;;  %v12603_v24 = vpop.permute.xlu0 %924 }
 0x285   : > { %17500 = vst [vmem:[#allocation9_spill] sm:$0xff] %v12601_v13  ;;  %17501 = vst [vmem:[#allocation8_spill] sm:$0xff] %v12603_v24  ;;  %v2193_v13 = vrot.slane %v12456_v16, %v12404_v60 }
 0x286   : > { %1655 = vbcast.lane.b32.xlu1 %v1653_v25, 256  ;;  %1648 = vbcast.lane.b32.xlu0 %v1638_v42, 272  ;;  %v1683_v42 = vrot.slane %v12400_v57, %v12418_v8  ;;  %v1025_v57 = vunpack.c.0.s8 %v1024_v37 }
 0x288   : > { %v12607_v26 = vpop.permute.xlu1 %939  ;;  %v12609_v36 = vpop.permute.xlu0 %935 }
 0x289   : > { %17502 = vst [vmem:[#allocation7_spill] sm:$0xff] %v12607_v26  ;;  %17503 = vst [vmem:[#allocation57_spill] sm:$0xff] %v12609_v36 }
 0x28a   : > { %1663 = vbcast.lane.b32.xlu1 %v1653_v25, 272  ;;  %1659 = vbcast.lane.b32.xlu0 %v1653_v25, 264 }
 0x28c   : > { %v12611_v20 = vpop.permute.xlu1 %950  ;;  %v12613_v49 = vpop.permute.xlu0 %943 }
 0x28d   : > { %17504 = vst [vmem:[#allocation58_spill] sm:$0xff] %v12611_v20  ;;  %17505 = vst [vmem:[#allocation59_spill] sm:$0xff] %v12613_v49 }
 0x28e   : > { %1674 = vbcast.lane.b32.xlu1 %v1668_v28, 264  ;;  %1670 = vbcast.lane.b32.xlu0 %v1668_v28, 256 }
 0x290   : > { %v12617_v29 = vpop.permute.xlu1 %958  ;;  %v12619_v53 = vpop.permute.xlu0 %954 }
 0x291   : > { %17506 = vst [vmem:[#allocation60_spill] sm:$0xff] %v12617_v29  ;;  %17507 = vst [vmem:[#allocation61_spill] sm:$0xff] %v12619_v53 }
 0x292   : > { %1685 = vbcast.lane.b32.xlu1 %v1683_v42, 256  ;;  %1678 = vbcast.lane.b32.xlu0 %v1668_v28, 272 }
 0x294   : > { %v12623_v51 = vpop.permute.xlu1 %969  ;;  %v12625_v25 = vpop.permute.xlu0 %965 }
 0x295   : > { %17508 = vst [vmem:[#allocation62_spill] sm:$0xff] %v12623_v51  ;;  %17509 = vst [vmem:[#allocation63_spill] sm:$0xff] %v12625_v25  ;;  %v2148_v25 = vrot.slane %v12456_v16, %v12382_v18 }
 0x296   : > { %1693 = vbcast.lane.b32.xlu1 %v1683_v42, 272  ;;  %1689 = vbcast.lane.b32.xlu0 %v1683_v42, 264  ;;  %v12640_v42 = vsub.s32 %v1025_v57, %v12375_v21 }
 0x298   : > { %v12629_v23 = vpop.permute.xlu1 %980  ;;  %v12631_v31 = vpop.permute.xlu0 %973  ;;  %17514 = vst [vmem:[#allocation68_spill] sm:$0xff] %v12640_v42  ;;  %v1029_v37 = vrot.slane %v12384_v19, %v12640_v42 }
 0x299   : > { %17510 = vst [vmem:[#allocation64_spill] sm:$0xff] %v12629_v23  ;;  %17511 = vst [vmem:[#allocation65_spill] sm:$0xff] %v12631_v31 }
 0x29a   : > { %2139 = vbcast.lane.b32.xlu1 %v2133_v0, 264  ;;  %2135 = vbcast.lane.b32.xlu0 %v2133_v0, 256  ;;  %v1037_v57 = vcombine.high %v1029_v37, %v1029_v37  ;;  %v1045_v21 = vrot.slane %v1029_v37, %v12640_v42 }
 0x29c   : > { %v12633_v50 = vpop.permute.xlu1 %988  ;;  %v12635_v28 = vpop.permute.xlu0 %984  ;;  %v1123_v53 = vrot.slane %v1045_v21, %v12378_v33 }
 0x29d   : > { %17512 = vst [vmem:[#allocation66_spill] sm:$0xff] %v12633_v50  ;;  %17513 = vst [vmem:[#allocation67_spill] sm:$0xff] %v12635_v28  ;;  %v1704_v28 = vrot.slane %v12440_v30, %v12640_v42 }
 0x29e   : > { %2150 = vbcast.lane.b32.xlu1 %v2148_v25, 256  ;;  %2143 = vbcast.lane.b32.xlu0 %v2133_v0, 272  ;;  %v2163_v0 = vrot.slane %v12456_v16, %v12392_v52 }
 0x2a0   : > { %v12642_v62 = vpop.permute.xlu1 %999  ;;  %v12644_v23 = vpop.permute.xlu0 %995 }
 0x2a1   : > { %17515 = vst [vmem:[#allocation69_spill] sm:$0xff] %v12642_v62  ;;  %17516 = vst [vmem:[#allocation70_spill] sm:$0xff] %v12644_v23  ;;  %v1712_v23 = vcombine.high %v1704_v28, %v1704_v28 }
 0x2a2   : > { %2158 = vbcast.lane.b32.xlu1 %v2148_v25, 272  ;;  %2154 = vbcast.lane.b32.xlu0 %v2148_v25, 264  ;;  %v1720_v25 = vrot.slane %v1704_v28, %v12640_v42  ;;  %v1200_v28 = vmul.f32 %v1123_v53, %v12487_v39  ;;  %v1202_v39 = vmul.f32 %v1123_v53, %v12485_v38 }
 0x2a3   : > { %v1734_v29 = vrot.slane %v1712_v23, %v12640_v42  ;;  %v2208_v38 = vrot.slane %v12456_v16, %v12408_v2 }
 0x2a4   : > { %v12650_v50 = vpop.permute.xlu1 %1010  ;;  %v12652_v31 = vpop.permute.xlu0 %1003  ;;  %v1798_v37 = vrot.slane %v1720_v25, %v12378_v33 }
 0x2a5   : > { %17517 = vst [vmem:[#allocation71_spill] sm:$0xff] %v12650_v50  ;;  %17518 = vst [vmem:[#allocation72_spill] sm:$0xff] %v12652_v31  ;;  %v2178_v50 = vrot.slane %v12456_v16, %v12398_v56  ;;  %v1059_v31 = vrot.slane %v1037_v57, %v12640_v42  ;;  %v1802_v23 = vrot.slane %v1734_v29, %v12378_v33 }
 0x2a6   : > { %2169 = vbcast.lane.b32.xlu1 %v2163_v0, 264  ;;  %2165 = vbcast.lane.b32.xlu0 %v2163_v0, 256 }
 0x2a8   : > { %v12658_v62 = vpop.permute.xlu1 %1018  ;;  %v12660_v51 = vpop.permute.xlu0 %1014 }
 0x2a9   : > { %17519 = vst [vmem:[#allocation73_spill] sm:$0xff] %v12658_v62  ;;  %17520 = vst [vmem:[#allocation74_spill] sm:$0xff] %v12660_v51  ;;  %v1201_v62 = vmul.f32 %v1123_v53, %v12491_v48 }
 0x2aa   : > { %2180 = vbcast.lane.b32.xlu1 %v2178_v50, 256  ;;  %2173 = vbcast.lane.b32.xlu0 %v2163_v0, 272  ;;  %v1127_v0 = vrot.slane %v1059_v31, %v12378_v33 }
 0x2ac   : > { %v1465_v49 = vpop.permute.xlu1 %1464  ;;  %v1461_v20 = vpop.permute.xlu0 %1460  ;;  %v1204_v53 = vmul.f32 %v1127_v0, %v12497_v58 }
 0x2ad   : > { %v1876_v51 = vmul.f32 %v1798_v37, %v1465_v49  ;;  %v1875_v3 = vmul.f32 %v1798_v37, %v1461_v20  ;;  %v1203_v49 = vmul.f32 %v1127_v0, %v12489_v41  ;;  %v1205_v41 = vmul.f32 %v1127_v0, %v12495_v55 }
 0x2ae   : > { %2188 = vbcast.lane.b32.xlu1 %v2178_v50, 272  ;;  %2184 = vbcast.lane.b32.xlu0 %v2178_v50, 264  ;;  %v1067_v50 = vcombine.high %v1045_v21, %v1045_v21 }
 0x2af   : > { %v12671_v36 = vadd.f32 %v1876_v51, %v1201_v62  ;;  %v12673_v57 = vadd.f32 %v1875_v3, %v1200_v28  ;;  %v1742_v51 = vcombine.high %v1720_v25, %v1720_v25  ;;  %v1022_v28 = vcombine.high %v12384_v19, %v12384_v19 }
 0x2b0   : > { %v1476_v26 = vpop.permute.xlu1 %1475  ;;  %v1469_v24 = vpop.permute.xlu0 %1468  ;;  %v1131_v25 = vrot.slane %v1067_v50, %v12378_v33  ;;  %v1744_v19 = vcombine.high %v1734_v29, %v1734_v29 }
 0x2b1   : > { %17521 = vst [vmem:[#allocation75_spill] sm:$0xff] %v12671_v36  ;;  %17522 = vst [vmem:[#allocation76_spill] sm:$0xff] %v12673_v57  ;;  %v1878_v20 = vmul.f32 %v1802_v23, %v1476_v26  ;;  %v1877_v48 = vmul.f32 %v1798_v37, %v1469_v24  ;;  %v1069_v26 = vcombine.high %v1059_v31, %v1059_v31 }
 0x2b2   : > { %2199 = vbcast.lane.b32.xlu1 %v2193_v13, 264  ;;  %2195 = vbcast.lane.b32.xlu0 %v2193_v13, 256  ;;  %v1697_v37 = vcombine.high %v12440_v30, %v12440_v30  ;;  %v1207_v58 = vmul.f32 %v1131_v25, %v12501_v61  ;;  %v1206_v31 = vmul.f32 %v1131_v25, %v12503_v46 }
 0x2b3   : > { %v12680_v62 = vadd.f32 %v1878_v20, %v1203_v49  ;;  %v12682_v3 = vadd.f32 %v1877_v48, %v1202_v39  ;;  %v1806_v20 = vrot.slane %v1742_v51, %v12378_v33  ;;  %v1135_v30 = vrot.slane %v1069_v26, %v12378_v33 }
 0x2b4   : > { %v1484_v57 = vpop.permute.xlu1 %1483  ;;  %v1480_v36 = vpop.permute.xlu0 %1479  ;;  %v1711_v29 = vrot.slane %v1697_v37, %v12640_v42  ;;  %v1810_v50 = vrot.slane %v1744_v19, %v12378_v33  ;;  %v2223_v46 = vrot.slane %v12456_v16, %v12412_v47 }
 0x2b5   : > { %v1880_v21 = vmul.f32 %v1802_v23, %v1484_v57  ;;  %v1879_v24 = vmul.f32 %v1802_v23, %v1480_v36  ;;  %v1036_v57 = vrot.slane %v1022_v28, %v12640_v42  ;;  %v1208_v28 = vmul.f32 %v1131_v25, %v12509_v9 }
 0x2b6   : > { %2210 = vbcast.lane.b32.xlu1 %v2208_v38, 256  ;;  %2203 = vbcast.lane.b32.xlu0 %v2193_v13, 272  ;;  %v1713_v26 = vcombine.high %v1711_v29, %v1711_v29  ;;  %v12714_v37 = vrot.slane %v1711_v29, %v12640_v42  ;;  %v1211_v9 = vmul.f32 %v1135_v30, %v12516_v63  ;;  %v12737_v63 = vpop.f32.mrf.mxu0 }
 0x2b7   : > { %v12693_v39 = vadd.f32 %v1880_v21, %v1205_v41  ;;  %v12695_v49 = vadd.f32 %v1879_v24, %v1204_v53  ;;  %v1209_v41 = vmul.f32 %v1135_v30, %v12507_v27  ;;  %v1052_v24 = vrot.slane %v1036_v57, %v12640_v42  ;;  %17523 = vst [vmem:[#allocation77_spill] sm:$0xff] %v12737_v63 }
 0x2b8   : > { %v1495_v55 = vpop.permute.xlu1 %1494  ;;  %v1491_v48 = vpop.permute.xlu0 %1490  ;;  %v2238_v27 = vrot.slane %v12456_v16, %v12418_v8  ;;  %v1210_v25 = vmul.f32 %v1135_v30, %v12518_v44  ;;  %v1814_v16 = vrot.slane %v12714_v37, %v12378_v33 }
 0x2b9   : > { %v1882_v36 = vmul.f32 %v1806_v20, %v1495_v55  ;;  %v1881_v0 = vmul.f32 %v1806_v20, %v1491_v48 }
 0x2ba   : > { %2218 = vbcast.lane.b32.xlu1 %v2208_v38, 272  ;;  %2214 = vbcast.lane.b32.xlu0 %v2208_v38, 264  ;;  %v1038_v38 = vcombine.high %v1036_v57, %v1036_v57  ;;  %v12729_v57 = vrot.slane %v1713_v26, %v12640_v42 }
 0x2bb   : > { %v12703_v13 = vadd.f32 %v1882_v36, %v1207_v58  ;;  %v12705_v23 = vadd.f32 %v1881_v0, %v1206_v31  ;;  %v1139_v0 = vrot.slane %v1052_v24, %v12378_v33 }
 0x2bc   : > { %v1506_v51 = vpop.permute.xlu1 %1505  ;;  %v1499_v61 = vpop.permute.xlu0 %1498  ;;  %v12725_v36 = vrot.slane %v1038_v38, %v12640_v42  ;;  %v1818_v26 = vrot.slane %v12729_v57, %v12378_v33 }
 0x2bd   : > { %v1884_v53 = vmul.f32 %v1810_v50, %v1506_v51  ;;  %v1883_v21 = vmul.f32 %v1806_v20, %v1499_v61  ;;  %v1212_v61 = vmul.f32 %v1139_v0, %v12529_v4  ;;  %v2253_v4 = vrot.slane %v12461_v14, %v12378_v33 }
 0x2be   : > { %2229 = vbcast.lane.b32.xlu1 %v2223_v46, 264  ;;  %2225 = vbcast.lane.b32.xlu0 %v2223_v46, 256 }
 0x2bf   : > { %v12716_v19 = vadd.f32 %v1884_v53, %v1209_v41  ;;  %v12718_v55 = vadd.f32 %v1883_v21, %v1208_v28  ;;  %v11485_v28 = vpop.f32.mrf.mxu0  ;;  %v1143_v53 = vrot.slane %v12725_v36, %v12378_v33 }
 0x2c0   : > { %v1514_v48 = vpop.permute.xlu1 %1513  ;;  %v1510_v58 = vpop.permute.xlu0 %1509 }
 0x2c1   : > { %v1886_v20 = vmul.f32 %v1810_v50, %v1514_v48  ;;  %v1885_v31 = vmul.f32 %v1810_v50, %v1510_v58  ;;  %v1213_v50 = vmul.f32 %v1139_v0, %v12527_v43  ;;  %v12749_v48 = vpop.f32.mrf.mxu0 }
 0x2c2   : > { %2240 = vbcast.lane.b32.xlu1 %v2238_v27, 256  ;;  %2233 = vbcast.lane.b32.xlu0 %v2223_v46, 272  ;;  %17524 = vst [vmem:[#allocation78_spill] sm:$0xff] %v12749_v48 }
 0x2c3   : > { %v12731_v29 = vadd.f32 %v1886_v20, %v1211_v9  ;;  %v12733_v51 = vadd.f32 %v1885_v31, %v1210_v25  ;;  %v1215_v9 = vmul.f32 %v1143_v53, %v12540_v15  ;;  %v11486_v31 = vpop.f32.mrf.mxu0  ;;  %v2268_v15 = vrot.slane %v12461_v14, %v12382_v18 }
 0x2c4   : > { %v1525_v44 = vpop.permute.xlu1 %1524  ;;  %v1521_v30 = vpop.permute.xlu0 %1520 }
 0x2c5   : > { %v1888_v41 = vmul.f32 %v1814_v16, %v1525_v44  ;;  %v1887_v46 = vmul.f32 %v1814_v16, %v1521_v30  ;;  %v1068_v44 = vcombine.high %v1052_v24, %v1052_v24  ;;  %v1743_v30 = vcombine.high %v12714_v37, %v12714_v37 }
 0x2c6   : > { %2248 = vbcast.lane.b32.xlu1 %v2238_v27, 272  ;;  %2244 = vbcast.lane.b32.xlu0 %v2238_v27, 264  ;;  %v1214_v27 = vmul.f32 %v1139_v0, %v12542_v22  ;;  %v1217_v22 = vmul.f32 %v1143_v53, %v12549_v32  ;;  %v1216_v24 = vmul.f32 %v1143_v53, %v12551_v34 }
 0x2c7   : > { %v12743_v21 = vadd.f32 %v1888_v41, %v1213_v50  ;;  %v12745_v38 = vadd.f32 %v1887_v46, %v1212_v61  ;;  %v12761_v41 = vpop.f32.mrf.mxu0  ;;  %v1147_v37 = vrot.slane %v1068_v44, %v12378_v33  ;;  %v1745_v32 = vcombine.high %v12729_v57, %v12729_v57 }
 0x2c8   : > { %v1536_v43 = vpop.permute.xlu1 %1535  ;;  %v1529_v58 = vpop.permute.xlu0 %1528  ;;  %17525 = vst [vmem:[#allocation79_spill] sm:$0xff] %v12761_v41 }
 0x2c9   : > { %v1890_v25 = vmul.f32 %v1818_v26, %v1536_v43  ;;  %v1889_v20 = vmul.f32 %v1814_v16, %v1529_v58  ;;  %v11501_v43 = vpop.f32.mrf.mxu0  ;;  %v1070_v58 = vcombine.high %v12725_v36, %v12725_v36  ;;  %v1218_v31 = vmul.f32 %v1147_v37, %v12563_v59 }
 0x2ca   : > { %2259 = vbcast.lane.b32.xlu1 %v2253_v4, 264  ;;  %2255 = vbcast.lane.b32.xlu0 %v2253_v4, 256  ;;  %v1220_v43 = vmul.f32 %v1147_v37, %v12571_v12 }
 0x2cb   : > { %v12757_v50 = vadd.f32 %v1890_v25, %v1215_v9  ;;  %v12759_v61 = vadd.f32 %v1889_v20, %v1214_v27  ;;  %v1822_v25 = vrot.slane %v1743_v30, %v12378_v33  ;;  %v12777_v34 = vpop.f32.mrf.mxu0  ;;  %v1219_v20 = vmul.f32 %v1147_v37, %v12561_v54 }
 0x2cc   : > { %v1544_v46 = vpop.permute.xlu1 %1543  ;;  %v1540_v28 = vpop.permute.xlu0 %1539  ;;  %17526 = vst [vmem:[#allocation80_spill] sm:$0xff] %v12777_v34  ;;  %v1753_v30 = vrot.slane %v12451_v10, %v12640_v42  ;;  %v1151_v57 = vrot.slane %v1070_v58, %v12378_v33  ;;  %v1826_v54 = vrot.slane %v1745_v32, %v12378_v33  ;;  %v2298_v37 = vrot.slane %v12461_v14, %v12398_v56 }
 0x2cd   : > { %v1892_v0 = vmul.f32 %v1818_v26, %v1544_v46  ;;  %v1891_v16 = vmul.f32 %v1818_v26, %v1540_v28  ;;  %v1078_v46 = vrot.slane %v12389_v40, %v12640_v42 }
 0x2ce   : > { %2270 = vbcast.lane.b32.xlu1 %v2268_v15, 256  ;;  %2263 = vbcast.lane.b32.xlu0 %v2253_v4, 272  ;;  %v11502_v4 = vpop.f32.mrf.mxu0  ;;  %v12799_v32 = vrot.slane %v1753_v30, %v12640_v42 }
 0x2cf   : > { %v12770_v9 = vadd.f32 %v1892_v0, %v1217_v22  ;;  %v12772_v27 = vadd.f32 %v1891_v16, %v1216_v24  ;;  %v2283_v0 = vrot.slane %v12461_v14, %v12392_v52  ;;  %v1221_v16 = vmul.f32 %v1151_v57, %v12569_v45  ;;  %v17529_v4 = vld [vmem:[#allocation22_spill] sm:$0xff] }
 0x2d0   : > { %v1555_v53 = vpop.permute.xlu1 %1554  ;;  %v1551_v26 = vpop.permute.xlu0 %1550  ;;  %v12796_v58 = vrot.slane %v1078_v46, %v12640_v42 }
 0x2d1   : > { %v1894_v36 = vmul.f32 %v1822_v25, %v1555_v53  ;;  %v1893_v44 = vmul.f32 %v1822_v25, %v1551_v26 }
 0x2d2   : > { %2278 = vbcast.lane.b32.xlu1 %v2268_v15, 272  ;;  %2274 = vbcast.lane.b32.xlu0 %v2268_v15, 264  ;;  %v1086_v15 = vcombine.high %v1078_v46, %v1078_v46 }
 0x2d3   : > { %v12786_v28 = vadd.f32 %v1894_v36, %v1219_v20  ;;  %v12788_v22 = vadd.f32 %v1893_v44, %v1218_v31  ;;  %v1761_v20 = vcombine.high %v1753_v30, %v1753_v30  ;;  %v12805_v44 = vpop.f32.mrf.mxu0 }
 0x2d4   : > { %v1566_v59 = vpop.permute.xlu1 %1565  ;;  %v1559_v24 = vpop.permute.xlu0 %1558  ;;  %17527 = vst [vmem:[#allocation81_spill] sm:$0xff] %v12805_v44 }
 0x2d5   : > { %v1896_v53 = vmul.f32 %v1826_v54, %v1566_v59  ;;  %v1895_v26 = vmul.f32 %v1822_v25, %v1559_v24  ;;  %v17528_v25 = vld [vmem:[#allocation23_spill] sm:$0xff]  ;;  %v1223_v59 = vmul.f32 %v1151_v57, %v12580_v17  ;;  %v1222_v24 = vmul.f32 %v1151_v57, %v12582_v35 }
 0x2d6   : > { %2289 = vbcast.lane.b32.xlu1 %v2283_v0, 264  ;;  %2285 = vbcast.lane.b32.xlu0 %v2283_v0, 256  ;;  %v11285_v46 = vcombine.low %v17529_v4, %v17528_v25  ;;  %v1830_v25 = vrot.slane %v12799_v32, %v12378_v33 }
 0x2d7   : > { %v12801_v31 = vadd.f32 %v1896_v53, %v1221_v16  ;;  %v12803_v36 = vadd.f32 %v1895_v26, %v1220_v43  ;;  %v11517_v16 = vpop.f32.mrf.mxu0  ;;  %v12814_v43 = vrot.slane %v1086_v15, %v12640_v42  ;;  %v1155_v53 = vrot.slane %v12796_v58, %v12378_v33  ;;  %v17532_v15 = vld [vmem:[#allocation20_spill] sm:$0xff] }
 0x2d8   : > { %v1574_v45 = vpop.permute.xlu1 %1573  ;;  %v1570_v12 = vpop.permute.xlu0 %1569  ;;  %v12819_v26 = vrot.slane %v1761_v20, %v12640_v42  ;;  %11528 = vmatpush3.bf16.msra.mxu0 %v11285_v46  ;;  %v17533_v16 = vmov 0.0  }
 0x2d9   : > { %v1898_v30 = vmul.f32 %v1826_v54, %v1574_v45  ;;  %v1897_v48 = vmul.f32 %v1826_v54, %v1570_v12  ;;  %v12827_v57 = vpop.f32.mrf.mxu0  ;;  %v17531_v54 = vld [vmem:[#allocation21_spill] sm:$0xff]  ;;  %11529 = vmatprep.subr.bf16.mxu0 %v17533_v16  ;;  %v1225_v20 = vmul.f32 %v1155_v53, %v12587_v6 }
 0x2da   : > { %2300 = vbcast.lane.b32.xlu1 %v2298_v37, 256  ;;  %2293 = vbcast.lane.b32.xlu0 %v2283_v0, 272  ;;  %17530 = vst [vmem:[#allocation23_spill] sm:$0xff] %v12827_v57  ;;  %v11284_v45 = vcombine.low %v17532_v15, %v17531_v54  ;;  %v1224_v0 = vmul.f32 %v1155_v53, %v12589_v1  ;;  %v17534_v15 = vld [vmem:[#allocation18_spill] sm:$0xff] }
 0x2db   : > { %v12823_v17 = vadd.f32 %v1898_v30, %v1223_v59  ;;  %v12825_v35 = vadd.f32 %v1897_v48, %v1222_v24  ;;  %v11518_v59 = vpop.f32.mrf.mxu0  ;;  %v1159_v48 = vrot.slane %v12814_v43, %v12378_v33  ;;  %v1834_v30 = vrot.slane %v12819_v26, %v12378_v33 }
 0x2dc   : > { %v1585_v12 = vpop.permute.xlu1 %1584  ;;  %v1581_v4 = vpop.permute.xlu0 %1580  ;;  %11530 = vmatpush3.bf16.msra.mxu0 %v11284_v45  ;;  %v2313_v1 = vrot.slane %v12461_v14, %v12404_v60  ;;  %v1791_v45 = vcombine.high %v12799_v32, %v12799_v32  ;;  %v17538_v32 = vld [vmem:[#allocation9_spill] sm:$0xff] }
 0x2dd   : > { %v1900_v63 = vmul.f32 %v1830_v25, %v1585_v12  ;;  %v1899_v34 = vmul.f32 %v1830_v25, %v1581_v4  ;;  %11543 = vmatprep.subr.bf16.mxu0 %v17533_v16  ;;  %v1227_v4 = vmul.f32 %v1159_v48, %v12595_v7  ;;  %v1071_v7 = vcombine.high %v12389_v40, %v12389_v40 }
 0x2de   : > { %2308 = vbcast.lane.b32.xlu1 %v2298_v37, 272  ;;  %2304 = vbcast.lane.b32.xlu0 %v2298_v37, 264  ;;  %v17535_v37 = vld [vmem:[#allocation17_spill] sm:$0xff]  ;;  %v1118_v40 = vcombine.high %v12814_v43, %v12814_v43  ;;  %v17541_v43 = vld [vmem:[#allocation7_spill] sm:$0xff] }
 0x2df   : > { %v12836_v46 = vadd.f32 %v1900_v63, %v1225_v20  ;;  %v12838_v24 = vadd.f32 %v1899_v34, %v1224_v0  ;;  %v11291_v12 = vcombine.low %v17535_v37, %v17534_v15  ;;  %v1226_v63 = vmul.f32 %v1155_v53, %v12597_v11  ;;  %11532 = vmatmul.mubr.msk.bf16.vlgmr.msra.gmra.mxu0 %vm626_vm3, %v12012_v5  ;;  %v17539_v37 = vld [vmem:[#allocation8_spill] sm:$0xff] }
 0x2e0   : > { %v1596_v54 = vpop.permute.xlu1 %1595  ;;  %v1589_v6 = vpop.permute.xlu0 %1588  ;;  %v1116_v0 = vcombine.high %v12796_v58, %v12796_v58  ;;  %v2328_v58 = vrot.slane %v12461_v14, %v12408_v2  ;;  %11547 = vmatprep.mubr.msk.bf16.mxu0 %vm11917_vm2, %v17533_v16  ;;  %v1229_v15 = vmul.f32 %v1159_v48, %v17538_v32 }
 0x2e1   : > { %v1902_v34 = vmul.f32 %v1834_v30, %v1596_v54  ;;  %v1901_v20 = vmul.f32 %v1830_v25, %v1589_v6  ;;  %11544 = vmatpush3.bf16.msra.mxu0 %v11291_v12  ;;  %v17536_v25 = vld [vmem:[#allocation16_spill] sm:$0xff]  ;;  %v17537_v54 = vld [vmem:[#allocation15_spill] sm:$0xff]  ;;  %v1746_v12 = vcombine.high %v12451_v10, %v12451_v10 }
 0x2e2   : > { %2319 = vbcast.lane.b32.xlu1 %v2313_v1, 264  ;;  %2315 = vbcast.lane.b32.xlu0 %v2313_v1, 256  ;;  %v11290_v6 = vcombine.low %v17537_v54, %v17536_v25  ;;  %v1793_v25 = vcombine.high %v12819_v26, %v12819_v26 }
 0x2e3   : > { %v12853_v59 = vadd.f32 %v1902_v34, %v1227_v4  ;;  %v12855_v57 = vadd.f32 %v1901_v20, %v1226_v63  ;;  %v1228_v4 = vmul.f32 %v1159_v48, %v17539_v37  ;;  %11545 = vmatprep.subr.bf16.mxu0 %v17533_v16  ;;  %v1163_v20 = vrot.slane %v1116_v0, %v12378_v33  ;;  %v17542_v0 = vld [vmem:[#allocation57_spill] sm:$0xff] }
 0x2e4   : > { %v1604_v11 = vpop.permute.xlu1 %1603  ;;  %v1600_v53 = vpop.permute.xlu0 %1599  ;;  %v1167_v16 = vrot.slane %v1118_v40, %v12378_v33  ;;  %v1760_v26 = vrot.slane %v1746_v12, %v12640_v42 }
 0x2e5   : > { %v1904_v63 = vmul.f32 %v1834_v30, %v1604_v11  ;;  %v1903_v34 = vmul.f32 %v1834_v30, %v1600_v53  ;;  %v1838_v30 = vrot.slane %v1791_v45, %v12378_v33  ;;  %11546 = vmatpush3.bf16.msra.mxu0 %v11290_v6  ;;  %v1231_v32 = vmul.f32 %v1163_v20, %v17541_v43 }
 0x2e6   : > { %2330 = vbcast.lane.b32.xlu1 %v2328_v58, 256  ;;  %2323 = vbcast.lane.b32.xlu0 %v2313_v1, 272  ;;  %v1230_v37 = vmul.f32 %v1163_v20, %v17542_v0  ;;  %v1085_v1 = vrot.slane %v1071_v7, %v12640_v42  ;;  %v1842_v6 = vrot.slane %v1793_v25, %v12378_v33 }
 0x2e7   : > { %v12877_v54 = vadd.f32 %v1904_v63, %v1229_v15  ;;  %v12879_v48 = vadd.f32 %v1903_v34, %v1228_v4  ;;  %v17545_v4 = vld [vmem:[#allocation5_spill] sm:$0xff]  ;;  %v2343_v7 = vrot.slane %v12461_v14, %v12412_v47  ;;  %v1762_v25 = vcombine.high %v1760_v26, %v1760_v26 }
 0x2e8   : > { %v1615_v11 = vpop.permute.xlu1 %1614  ;;  %v1611_v53 = vpop.permute.xlu0 %1610  ;;  %11548 = vmatmul.mubr.msk.bf16.vlgmr.msra.gmra.mxu0 %vm626_vm3, %v17545_v4  ;;  %v1776_v0 = vrot.slane %v1760_v26, %v12640_v42 }
 0x2e9   : > { %17540 = vst [vmem:[#allocation22_spill] sm:$0xff] %v12879_v48  ;;  %v1906_v5 = vmul.f32 %v1838_v30, %v1615_v11  ;;  %v1905_v10 = vmul.f32 %v1838_v30, %v1611_v53  ;;  %v17546_v11 = vld [vmem:[#allocation58_spill] sm:$0xff]  ;;  %v17547_v53 = vld [vmem:[#allocation59_spill] sm:$0xff]  ;;  %v1790_v26 = vrot.slane %v1762_v25, %v12640_v42 }
 0x2ea   : > { %2338 = vbcast.lane.b32.xlu1 %v2328_v58, 272  ;;  %2334 = vbcast.lane.b32.xlu0 %v2328_v58, 264  ;;  %v1233_v40 = vmul.f32 %v1167_v16, %v17546_v11  ;;  %v1232_v58 = vmul.f32 %v1163_v20, %v17547_v53  ;;  %v2358_v11 = vrot.slane %v12461_v14, %v12418_v8  ;;  %v17550_v20 = vld [vmem:[#allocation60_spill] sm:$0xff] }
 0x2eb   : > { %v12887_v15 = vadd.f32 %v1906_v5, %v1231_v32  ;;  %v12889_v45 = vadd.f32 %v1905_v10, %v1230_v37  ;;  %v1087_v5 = vcombine.high %v1085_v1, %v1085_v1  ;;  %v1101_v32 = vrot.slane %v1085_v1, %v12640_v42 }
 0x2ec   : > { %v1626_v63 = vpop.permute.xlu1 %1625  ;;  %v1619_v34 = vpop.permute.xlu0 %1618  ;;  %v1846_v14 = vrot.slane %v1776_v0, %v12378_v33 }
 0x2ed   : > { %17543 = vst [vmem:[#allocation21_spill] sm:$0xff] %v12887_v15  ;;  %17544 = vst [vmem:[#allocation20_spill] sm:$0xff] %v12889_v45  ;;  %v1908_v43 = vmul.f32 %v1842_v6, %v1626_v63  ;;  %v1907_v12 = vmul.f32 %v1838_v30, %v1619_v34  ;;  %v1235_v63 = vmul.f32 %v1167_v16, %v17550_v20  ;;  %v17551_v30 = vld [vmem:[#allocation61_spill] sm:$0xff]  ;;  %v17554_v20 = vld [vmem:[#allocation62_spill] sm:$0xff] }
 0x2ee   : > { %2349 = vbcast.lane.b32.xlu1 %v2343_v7, 264  ;;  %2345 = vbcast.lane.b32.xlu0 %v2343_v7, 256  ;;  %v1234_v34 = vmul.f32 %v1167_v16, %v17551_v30  ;;  %v1115_v44 = vrot.slane %v1087_v5, %v12640_v42  ;;  %v1171_v45 = vrot.slane %v1101_v32, %v12378_v33 }
 0x2ef   : > { %v12900_v37 = vadd.f32 %v1908_v43, %v1233_v40  ;;  %v12902_v10 = vadd.f32 %v1907_v12, %v1232_v58 }
 0x2f0   : > { %v1634_v4 = vpop.permute.xlu1 %1633  ;;  %v1630_v41 = vpop.permute.xlu0 %1629  ;;  %v1237_v16 = vmul.f32 %v1171_v45, %v17554_v20  ;;  %v1175_v25 = vrot.slane %v1115_v44, %v12378_v33  ;;  %v17559_v20 = vld [vmem:[#allocation64_spill] sm:$0xff] }
 0x2f1   : > { %17548 = vst [vmem:[#allocation18_spill] sm:$0xff] %v12900_v37  ;;  %17549 = vst [vmem:[#allocation17_spill] sm:$0xff] %v12902_v10  ;;  %v1910_v53 = vmul.f32 %v1842_v6, %v1634_v4  ;;  %v1909_v1 = vmul.f32 %v1842_v6, %v1630_v41  ;;  %v17555_v4 = vld [vmem:[#allocation63_spill] sm:$0xff]  ;;  %v1792_v37 = vcombine.high %v1776_v0, %v1776_v0 }
 0x2f2   : > { %2360 = vbcast.lane.b32.xlu1 %v2358_v11, 256  ;;  %2353 = vbcast.lane.b32.xlu0 %v2343_v7, 272  ;;  %v1236_v41 = vmul.f32 %v1171_v45, %v17555_v4  ;;  %v17556_v7 = vld [vmem:[#allocation11_spill] sm:$0xff]  ;;  %v17560_v4 = vld [vmem:[#allocation65_spill] sm:$0xff] }
 0x2f3   : > { %v12911_v40 = vadd.f32 %v1910_v53, %v1235_v63  ;;  %v12913_v58 = vadd.f32 %v1909_v1, %v1234_v34  ;;  %v2808_v30 = vrot.slane %v17556_v7, %v12378_v33  ;;  %v1850_v53 = vrot.slane %v1790_v26, %v12378_v33 }
 0x2f4   : > { %v1645_v43 = vpop.permute.xlu1 %1644  ;;  %v1641_v12 = vpop.permute.xlu0 %1640 }
 0x2f5   : > { %17552 = vst [vmem:[#allocation16_spill] sm:$0xff] %v12911_v40  ;;  %17553 = vst [vmem:[#allocation15_spill] sm:$0xff] %v12913_v58  ;;  %v1912_v6 = vmul.f32 %v1846_v14, %v1645_v43  ;;  %v1911_v5 = vmul.f32 %v1846_v14, %v1641_v12  ;;  %v1239_v40 = vmul.f32 %v1175_v25, %v17559_v20  ;;  %v17563_v20 = vld [vmem:[#allocation67_spill] sm:$0xff] }
 0x2f6   : > { %2368 = vbcast.lane.b32.xlu1 %v2358_v11, 272  ;;  %2364 = vbcast.lane.b32.xlu0 %v2358_v11, 264  ;;  %v1238_v43 = vmul.f32 %v1171_v45, %v17560_v4  ;;  %v1117_v11 = vcombine.high %v1101_v32, %v1101_v32  ;;  %v1240_v48 = vmul.f32 %v1175_v25, %v17563_v20  ;;  %v17569_v20 = vld [vmem:[#allocation71_spill] sm:$0xff] }
 0x2f7   : > { %v12921_v63 = vadd.f32 %v1912_v6, %v1237_v16  ;;  %v12923_v34 = vadd.f32 %v1911_v5, %v1236_v41  ;;  %v2823_v5 = vrot.slane %v17556_v7, %v12382_v18 }
 0x2f8   : > { %v1656_v1 = vpop.permute.xlu1 %1655  ;;  %v1649_v58 = vpop.permute.xlu0 %1648  ;;  %v1179_v32 = vrot.slane %v1117_v11, %v12378_v33 }
 0x2f9   : > { %17557 = vst [vmem:[#allocation9_spill] sm:$0xff] %v12921_v63  ;;  %17558 = vst [vmem:[#allocation8_spill] sm:$0xff] %v12923_v34  ;;  %v1914_v12 = vmul.f32 %v1850_v53, %v1656_v1  ;;  %v1913_v10 = vmul.f32 %v1846_v14, %v1649_v58  ;;  %v17562_v34 = vld [vmem:[#allocation66_spill] sm:$0xff]  ;;  %v1119_v58 = vcombine.high %v1115_v44, %v1115_v44  ;;  %v17566_v44 = vld [vmem:[#allocation13_spill] sm:$0xff] }
 0x2fa   : > { %2814 = vbcast.lane.b32.xlu1 %v2808_v30, 264  ;;  %2810 = vbcast.lane.b32.xlu0 %v2808_v30, 256  ;;  %v1241_v63 = vmul.f32 %v1175_v25, %v17562_v34  ;;  %v1794_v14 = vcombine.high %v1790_v26, %v1790_v26 }
 0x2fb   : > { %v12928_v15 = vadd.f32 %v1914_v12, %v1239_v40  ;;  %v12930_v16 = vadd.f32 %v1913_v10, %v1238_v43  ;;  %v1854_v40 = vrot.slane %v1792_v37, %v12378_v33  ;;  %v17564_v12 = vld [vmem:[#allocation69_spill] sm:$0xff]  ;;  %v1183_v11 = vrot.slane %v1119_v58, %v12378_v33 }
 0x2fc   : > { %v1664_v41 = vpop.permute.xlu1 %1663  ;;  %v1660_v6 = vpop.permute.xlu0 %1659  ;;  %v1243_v34 = vmul.f32 %v1179_v32, %v17564_v12  ;;  %v1858_v37 = vrot.slane %v1794_v14, %v12378_v33 }
 0x2fd   : > { %17561 = vst [vmem:[#allocation7_spill] sm:$0xff] %v12930_v16  ;;  %v1916_v45 = vmul.f32 %v1850_v53, %v1664_v41  ;;  %v1915_v1 = vmul.f32 %v1850_v53, %v1660_v6  ;;  %v17565_v16 = vld [vmem:[#allocation70_spill] sm:$0xff] }
 0x2fe   : > { %2825 = vbcast.lane.b32.xlu1 %v2823_v5, 256  ;;  %2818 = vbcast.lane.b32.xlu0 %v2808_v30, 272  ;;  %v1242_v25 = vmul.f32 %v1179_v32, %v17565_v16  ;;  %v2379_v30 = vrot.slane %v17566_v44, %v12640_v42  ;;  %v2838_v16 = vrot.slane %v17556_v7, %v12392_v52 }
 0x2ff   : > { %v12937_v0 = vadd.f32 %v1916_v45, %v1241_v63  ;;  %v12939_v10 = vadd.f32 %v1915_v1, %v1240_v48  ;;  %v1245_v45 = vmul.f32 %v1183_v11, %v17569_v20  ;;  %v17570_v1 = vld [vmem:[#allocation72_spill] sm:$0xff] }
 0x300   : > { %v1675_v4 = vpop.permute.xlu1 %1674  ;;  %v1671_v43 = vpop.permute.xlu0 %1670  ;;  %v1244_v58 = vmul.f32 %v1179_v32, %v17570_v1  ;;  %v2395_v12 = vrot.slane %v2379_v30, %v12640_v42 }
 0x301   : > { %v1918_v41 = vmul.f32 %v1854_v40, %v1675_v4  ;;  %v1917_v53 = vmul.f32 %v1854_v40, %v1671_v43  ;;  %v2387_v43 = vcombine.high %v2379_v30, %v2379_v30 }
 0x302   : > { %2833 = vbcast.lane.b32.xlu1 %v2823_v5, 272  ;;  %2829 = vbcast.lane.b32.xlu0 %v2823_v5, 264  ;;  %v2473_v30 = vrot.slane %v2395_v12, %v12378_v33 }
 0x303   : > { %v12947_v48 = vadd.f32 %v1918_v41, %v1243_v34  ;;  %v12949_v63 = vadd.f32 %v1917_v53, %v1242_v25  ;;  %v2853_v53 = vrot.slane %v17556_v7, %v12398_v56 }
 0x304   : > { %v1686_v26 = vpop.permute.xlu1 %1685  ;;  %v1679_v6 = vpop.permute.xlu0 %1678 }
 0x305   : > { %17567 = vst [vmem:[#allocation57_spill] sm:$0xff] %v12947_v48  ;;  %17568 = vst [vmem:[#allocation5_spill] sm:$0xff] %v12949_v63  ;;  %v1920_v4 = vmul.f32 %v1858_v37, %v1686_v26  ;;  %v1919_v5 = vmul.f32 %v1854_v40, %v1679_v6  ;;  %v17572_v63 = vld [vmem:[#allocation73_spill] sm:$0xff]  ;;  %v17573_v48 = vld [vmem:[#allocation74_spill] sm:$0xff]  ;;  %v2409_v6 = vrot.slane %v2387_v43, %v12640_v42 }
 0x306   : > { %2844 = vbcast.lane.b32.xlu1 %v2838_v16, 264  ;;  %2840 = vbcast.lane.b32.xlu0 %v2838_v16, 256  ;;  %v1247_v20 = vmul.f32 %v1183_v11, %v17572_v63  ;;  %v1246_v32 = vmul.f32 %v1183_v11, %v17573_v48  ;;  %v17574_v63 = vld [vmem:[#allocation75_spill] sm:$0xff]  ;;  %v17575_v48 = vld [vmem:[#allocation76_spill] sm:$0xff] }
 0x307   : > { %v12957_v34 = vadd.f32 %v1920_v4, %v1245_v45  ;;  %v12959_v25 = vadd.f32 %v1919_v5, %v1244_v58 }
 0x308   : > { %v1694_v14 = vpop.permute.xlu1 %1693  ;;  %v1690_v41 = vpop.permute.xlu0 %1689 }
 0x309   : > { %17571 = vst [vmem:[#allocation58_spill] sm:$0xff] %v12959_v25  ;;  %v1922_v26 = vmul.f32 %v1858_v37, %v1694_v14  ;;  %v1921_v40 = vmul.f32 %v1858_v37, %v1690_v41  ;;  %v2868_v41 = vrot.slane %v17556_v7, %v12404_v60 }
 0x30a   : > { %2855 = vbcast.lane.b32.xlu1 %v2853_v53, 256  ;;  %2848 = vbcast.lane.b32.xlu0 %v2838_v16, 272  ;;  %v2477_v16 = vrot.slane %v2409_v6, %v12378_v33 }
 0x30b   : > { %v12967_v45 = vadd.f32 %v1922_v26, %v1247_v20  ;;  %v12969_v1 = vadd.f32 %v1921_v40, %v1246_v32  ;;  %v2417_v26 = vcombine.high %v2395_v12, %v2395_v12 }
 0x30c   : > { %v2140_v58 = vpop.permute.xlu1 %2139  ;;  %v2136_v4 = vpop.permute.xlu0 %2135 }
 0x30d   : > { %v2551_v5 = vmul.f32 %v2473_v30, %v2140_v58  ;;  %v2550_v25 = vmul.f32 %v2473_v30, %v2136_v4  ;;  %v2883_v4 = vrot.slane %v17556_v7, %v12408_v2 }
 0x30e   : > { %2863 = vbcast.lane.b32.xlu1 %v2853_v53, 272  ;;  %2859 = vbcast.lane.b32.xlu0 %v2853_v53, 264 }
 0x30f   : > { %v12972_v11 = vadd.f32 %v2551_v5, %v17574_v63  ;;  %v12975_v37 = vadd.f32 %v2550_v25, %v17575_v48  ;;  %v2372_v48 = vcombine.high %v17566_v44, %v17566_v44 }
 0x310   : > { %v2151_v43 = vpop.permute.xlu1 %2150  ;;  %v2144_v14 = vpop.permute.xlu0 %2143 }
 0x311   : > { %v2553_v20 = vmul.f32 %v2477_v16, %v2151_v43  ;;  %v2552_v32 = vmul.f32 %v2473_v30, %v2144_v14  ;;  %v2419_v30 = vcombine.high %v2409_v6, %v2409_v6 }
 0x312   : > { %2874 = vbcast.lane.b32.xlu1 %v2868_v41, 264  ;;  %2870 = vbcast.lane.b32.xlu0 %v2868_v41, 256 }
 0x313   : > { %v12981_v53 = vadd.f32 %v2553_v20, %v12680_v62  ;;  %v12984_v40 = vadd.f32 %v2552_v32, %v12682_v3  ;;  %v2481_v3 = vrot.slane %v2417_v26, %v12378_v33  ;;  %v2898_v26 = vrot.slane %v17556_v7, %v12412_v47 }
 0x314   : > { %v2159_v25 = vpop.permute.xlu1 %2158  ;;  %v2155_v58 = vpop.permute.xlu0 %2154 }
 0x315   : > { %v2555_v5 = vmul.f32 %v2477_v16, %v2159_v25  ;;  %v2554_v63 = vmul.f32 %v2477_v16, %v2155_v58  ;;  %v2386_v16 = vrot.slane %v2372_v48, %v12640_v42 }
 0x316   : > { %2885 = vbcast.lane.b32.xlu1 %v2883_v4, 256  ;;  %2878 = vbcast.lane.b32.xlu0 %v2868_v41, 272 }
 0x317   : > { %v12991_v12 = vadd.f32 %v2555_v5, %v12693_v39  ;;  %v12994_v62 = vadd.f32 %v2554_v63, %v12695_v49  ;;  %v2485_v39 = vrot.slane %v2419_v30, %v12378_v33  ;;  %v2402_v5 = vrot.slane %v2386_v16, %v12640_v42 }
 0x318   : > { %v2170_v43 = vpop.permute.xlu1 %2169  ;;  %v2166_v14 = vpop.permute.xlu0 %2165  ;;  %v2913_v30 = vrot.slane %v17556_v7, %v12418_v8 }
 0x319   : > { %v2557_v20 = vmul.f32 %v2481_v3, %v2170_v43  ;;  %v2556_v32 = vmul.f32 %v2481_v3, %v2166_v14 }
 0x31a   : > { %2893 = vbcast.lane.b32.xlu1 %v2883_v4, 272  ;;  %2889 = vbcast.lane.b32.xlu0 %v2883_v4, 264  ;;  %v2388_v4 = vcombine.high %v2386_v16, %v2386_v16 }
 0x31b   : > { %v12999_v44 = vadd.f32 %v2557_v20, %v12703_v13  ;;  %v13002_v6 = vadd.f32 %v2556_v32, %v12705_v23 }
 0x31c   : > { %v2181_v49 = vpop.permute.xlu1 %2180  ;;  %v2174_v41 = vpop.permute.xlu0 %2173 }
 0x31d   : > { %v2559_v25 = vmul.f32 %v2485_v39, %v2181_v49  ;;  %v2558_v58 = vmul.f32 %v2481_v3, %v2174_v41  ;;  %v2416_v3 = vrot.slane %v2388_v4, %v12640_v42  ;;  %v17577_v4 = vld [vmem:[#allocation10_spill] sm:$0xff] }
 0x31e   : > { %2904 = vbcast.lane.b32.xlu1 %v2898_v26, 264  ;;  %2900 = vbcast.lane.b32.xlu0 %v2898_v26, 256 }
 0x31f   : > { %v13009_v13 = vadd.f32 %v2559_v25, %v12716_v19  ;;  %v13012_v23 = vadd.f32 %v2558_v58, %v12718_v55  ;;  %v2489_v55 = vrot.slane %v2402_v5, %v12378_v33  ;;  %v13024_v25 = vpop.f32.mrf.mxu1 }
 0x320   : > { %v2189_v63 = vpop.permute.xlu1 %2188  ;;  %v2185_v48 = vpop.permute.xlu0 %2184  ;;  %17576 = vst [vmem:[#allocation59_spill] sm:$0xff] %v13024_v25 }
 0x321   : > { %v2561_v43 = vmul.f32 %v2485_v39, %v2189_v63  ;;  %v2560_v14 = vmul.f32 %v2485_v39, %v2185_v48  ;;  %v2928_v63 = vrot.slane %v17577_v4, %v12378_v33 }
 0x322   : > { %2915 = vbcast.lane.b32.xlu1 %v2913_v30, 256  ;;  %2908 = vbcast.lane.b32.xlu0 %v2898_v26, 272 }
 0x323   : > { %v13018_v20 = vadd.f32 %v2561_v43, %v12731_v29  ;;  %v13021_v19 = vadd.f32 %v2560_v14, %v12733_v51  ;;  %v2493_v29 = vrot.slane %v2416_v3, %v12378_v33  ;;  %v11509_v51 = vpop.f32.mrf.mxu1 }
 0x324   : > { %v2200_v32 = vpop.permute.xlu1 %2199  ;;  %v2196_v16 = vpop.permute.xlu0 %2195 }
 0x325   : > { %v2563_v49 = vmul.f32 %v2489_v55, %v2200_v32  ;;  %v2562_v41 = vmul.f32 %v2489_v55, %v2196_v16  ;;  %v13035_v14 = vpop.f32.mrf.mxu1 }
 0x326   : > { %2923 = vbcast.lane.b32.xlu1 %v2913_v30, 272  ;;  %2919 = vbcast.lane.b32.xlu0 %v2913_v30, 264  ;;  %17578 = vst [vmem:[#allocation60_spill] sm:$0xff] %v13035_v14  ;;  %v2418_v30 = vcombine.high %v2402_v5, %v2402_v5 }
 0x327   : > { %v13027_v7 = vadd.f32 %v2563_v49, %v12743_v21  ;;  %v13030_v39 = vadd.f32 %v2562_v41, %v12745_v38  ;;  %v11510_v32 = vpop.f32.mrf.mxu1  ;;  %v2943_v41 = vrot.slane %v17577_v4, %v12382_v18 }
 0x328   : > { %v2211_v26 = vpop.permute.xlu1 %2210  ;;  %v2204_v58 = vpop.permute.xlu0 %2203 }
 0x329   : > { %v2565_v48 = vmul.f32 %v2493_v29, %v2211_v26  ;;  %v2564_v43 = vmul.f32 %v2489_v55, %v2204_v58  ;;  %v13045_v55 = vpop.f32.mrf.mxu1  ;;  %v2420_v58 = vcombine.high %v2416_v3, %v2416_v3 }
 0x32a   : > { %2934 = vbcast.lane.b32.xlu1 %v2928_v63, 264  ;;  %2930 = vbcast.lane.b32.xlu0 %v2928_v63, 256  ;;  %17579 = vst [vmem:[#allocation61_spill] sm:$0xff] %v13045_v55 }
 0x32b   : > { %v13038_v21 = vadd.f32 %v2565_v48, %v12757_v50  ;;  %v13041_v38 = vadd.f32 %v2564_v43, %v12759_v61  ;;  %v2497_v61 = vrot.slane %v2418_v30, %v12378_v33  ;;  %v11525_v48 = vpop.f32.mrf.mxu1  ;;  %v2501_v3 = vrot.slane %v2420_v58, %v12378_v33 }
 0x32c   : > { %v2219_v16 = vpop.permute.xlu1 %2218  ;;  %v2215_v49 = vpop.permute.xlu0 %2214  ;;  %v2973_v58 = vrot.slane %v17577_v4, %v12398_v56 }
 0x32d   : > { %v2567_v51 = vmul.f32 %v2493_v29, %v2219_v16  ;;  %v2566_v26 = vmul.f32 %v2493_v29, %v2215_v49  ;;  %v13054_v16 = vpop.f32.mrf.mxu1  ;;  %v17581_v29 = vld [vmem:[#allocation12_spill] sm:$0xff] }
 0x32e   : > { %2945 = vbcast.lane.b32.xlu1 %v2943_v41, 256  ;;  %2938 = vbcast.lane.b32.xlu0 %v2928_v63, 272  ;;  %17580 = vst [vmem:[#allocation62_spill] sm:$0xff] %v13054_v16  ;;  %v2428_v63 = vrot.slane %v17581_v29, %v12640_v42 }
 0x32f   : > { %v13048_v5 = vadd.f32 %v2567_v51, %v12770_v9  ;;  %v13051_v50 = vadd.f32 %v2566_v26, %v12772_v27  ;;  %v11526_v30 = vpop.f32.mrf.mxu1  ;;  %v2958_v26 = vrot.slane %v17577_v4, %v12392_v52 }
 0x330   : > { %v2230_v43 = vpop.permute.xlu1 %2229  ;;  %v2226_v32 = vpop.permute.xlu0 %2225 }
 0x331   : > { %v2569_v14 = vmul.f32 %v2497_v61, %v2230_v43  ;;  %v2568_v25 = vmul.f32 %v2497_v61, %v2226_v32  ;;  %v2444_v32 = vrot.slane %v2428_v63, %v12640_v42  ;;  %v13084_v55 = vpop.f32.mrf.mxu1 }
 0x332   : > { %2953 = vbcast.lane.b32.xlu1 %v2943_v41, 272  ;;  %2949 = vbcast.lane.b32.xlu0 %v2943_v41, 264  ;;  %v2436_v41 = vcombine.high %v2428_v63, %v2428_v63  ;;  %17582 = vst [vmem:[#allocation63_spill] sm:$0xff] %v13084_v55 }
 0x333   : > { %v13059_v9 = vadd.f32 %v2569_v14, %v12786_v28  ;;  %v13062_v27 = vadd.f32 %v2568_v25, %v12788_v22 }
 0x334   : > { %v2241_v49 = vpop.permute.xlu1 %2240  ;;  %v2234_v51 = vpop.permute.xlu0 %2233 }
 0x335   : > { %v2571_v48 = vmul.f32 %v2501_v3, %v2241_v49  ;;  %v2570_v43 = vmul.f32 %v2497_v61, %v2234_v51  ;;  %v2458_v61 = vrot.slane %v2436_v41, %v12640_v42  ;;  %v2505_v49 = vrot.slane %v2444_v32, %v12378_v33  ;;  %v11541_v41 = vpop.f32.mrf.mxu1 }
 0x336   : > { %2964 = vbcast.lane.b32.xlu1 %v2958_v26, 264  ;;  %2960 = vbcast.lane.b32.xlu0 %v2958_v26, 256  ;;  %v3003_v41 = vrot.slane %v17577_v4, %v12408_v2 }
 0x337   : > { %v13069_v28 = vadd.f32 %v2571_v48, %v12801_v31  ;;  %v13072_v22 = vadd.f32 %v2570_v43, %v12803_v36 }
 0x338   : > { %v2249_v25 = vpop.permute.xlu1 %2248  ;;  %v2245_v14 = vpop.permute.xlu0 %2244 }
 0x339   : > { %v2573_v30 = vmul.f32 %v2501_v3, %v2249_v25  ;;  %v2572_v16 = vmul.f32 %v2501_v3, %v2245_v14 }
 0x33a   : > { %2975 = vbcast.lane.b32.xlu1 %v2973_v58, 256  ;;  %2968 = vbcast.lane.b32.xlu0 %v2958_v26, 272 }
 0x33b   : > { %v13079_v63 = vadd.f32 %v2573_v30, %v12823_v17  ;;  %v13082_v31 = vadd.f32 %v2572_v16, %v12825_v35  ;;  %v2509_v17 = vrot.slane %v2458_v61, %v12378_v33  ;;  %v2988_v16 = vrot.slane %v17577_v4, %v12404_v60 }
 0x33c   : > { %v2260_v36 = vpop.permute.xlu1 %2259  ;;  %v2256_v51 = vpop.permute.xlu0 %2255 }
 0x33d   : > { %v2575_v48 = vmul.f32 %v2505_v49, %v2260_v36  ;;  %v2574_v43 = vmul.f32 %v2505_v49, %v2256_v51  ;;  %v13095_v36 = vpop.f32.mrf.mxu1 }
 0x33e   : > { %2983 = vbcast.lane.b32.xlu1 %v2973_v58, 272  ;;  %2979 = vbcast.lane.b32.xlu0 %v2973_v58, 264  ;;  %17583 = vst [vmem:[#allocation11_spill] sm:$0xff] %v13095_v36  ;;  %v2466_v58 = vcombine.high %v2444_v32, %v2444_v32  ;;  %v2468_v32 = vcombine.high %v2458_v61, %v2458_v61  ;;  %v17588_v61 = vld [vmem:[#allocation20_spill] sm:$0xff] }
 0x33f   : > { %v13087_v3 = vadd.f32 %v2575_v48, %v12836_v46  ;;  %v13090_v26 = vadd.f32 %v2574_v43, %v12838_v24  ;;  %v11542_v51 = vpop.f32.mrf.mxu1 }
 0x340   : > { %v2271_v25 = vpop.permute.xlu1 %2270  ;;  %v2264_v35 = vpop.permute.xlu0 %2263 }
 0x341   : > { %v2577_v14 = vmul.f32 %v2509_v17, %v2271_v25  ;;  %v2576_v30 = vmul.f32 %v2505_v49, %v2264_v35  ;;  %v2421_v49 = vcombine.high %v17581_v29, %v17581_v29  ;;  %v17585_v35 = vld [vmem:[#allocation22_spill] sm:$0xff]  ;;  %v17586_v29 = vld [vmem:[#allocation21_spill] sm:$0xff] }
 0x342   : > { %2994 = vbcast.lane.b32.xlu1 %v2988_v16, 264  ;;  %2990 = vbcast.lane.b32.xlu0 %v2988_v16, 256 }
 0x343   : > { %v13098_v46 = vadd.f32 %v2577_v14, %v12853_v59  ;;  %v13101_v24 = vadd.f32 %v2576_v30, %v12855_v57  ;;  %v2513_v14 = vrot.slane %v2466_v58, %v12378_v33  ;;  %v3018_v58 = vrot.slane %v17577_v4, %v12412_v47 }
 0x344   : > { %v2279_v48 = vpop.permute.xlu1 %2278  ;;  %v2275_v43 = vpop.permute.xlu0 %2274 }
 0x345   : > { %17584 = vst [vmem:[#allocation64_spill] sm:$0xff] %v13101_v24  ;;  %v2579_v55 = vmul.f32 %v2509_v17, %v2279_v48  ;;  %v2578_v25 = vmul.f32 %v2509_v17, %v2275_v43  ;;  %v2435_v17 = vrot.slane %v2421_v49, %v12640_v42 }
 0x346   : > { %3005 = vbcast.lane.b32.xlu1 %v3003_v41, 256  ;;  %2998 = vbcast.lane.b32.xlu0 %v2988_v16, 272 }
 0x347   : > { %v13108_v59 = vadd.f32 %v2579_v55, %v12877_v54  ;;  %v13111_v57 = vadd.f32 %v2578_v25, %v17585_v35  ;;  %v2517_v54 = vrot.slane %v2468_v32, %v12378_v33  ;;  %v2451_v49 = vrot.slane %v2435_v17, %v12640_v42 }
 0x348   : > { %v2290_v30 = vpop.permute.xlu1 %2289  ;;  %v2286_v51 = vpop.permute.xlu0 %2285 }
 0x349   : > { %v2581_v36 = vmul.f32 %v2513_v14, %v2290_v30  ;;  %v2580_v24 = vmul.f32 %v2513_v14, %v2286_v51  ;;  %v17590_v30 = vld [vmem:[#allocation18_spill] sm:$0xff]  ;;  %v17592_v51 = vld [vmem:[#allocation17_spill] sm:$0xff] }
 0x34a   : > { %3013 = vbcast.lane.b32.xlu1 %v3003_v41, 272  ;;  %3009 = vbcast.lane.b32.xlu0 %v3003_v41, 264  ;;  %v2437_v41 = vcombine.high %v2435_v17, %v2435_v17  ;;  %v17596_v17 = vld [vmem:[#allocation15_spill] sm:$0xff] }
 0x34b   : > { %v13116_v48 = vadd.f32 %v2581_v36, %v17586_v29  ;;  %v13119_v16 = vadd.f32 %v2580_v24, %v17588_v61  ;;  %v3033_v61 = vrot.slane %v17577_v4, %v12418_v8  ;;  %v17598_v4 = vld [vmem:[#allocation81_spill] sm:$0xff] }
 0x34c   : > { %v2301_v55 = vpop.permute.xlu1 %2300  ;;  %v2294_v43 = vpop.permute.xlu0 %2293 }
 0x34d   : > { %17587 = vst [vmem:[#allocation65_spill] sm:$0xff] %v13116_v48  ;;  %17589 = vst [vmem:[#allocation66_spill] sm:$0xff] %v13119_v16  ;;  %v2583_v25 = vmul.f32 %v2517_v54, %v2301_v55  ;;  %v2582_v35 = vmul.f32 %v2513_v14, %v2294_v43  ;;  %v2465_v14 = vrot.slane %v2437_v41, %v12640_v42  ;;  %v17594_v55 = vld [vmem:[#allocation16_spill] sm:$0xff] }
 0x34e   : > { %3024 = vbcast.lane.b32.xlu1 %v3018_v58, 264  ;;  %3020 = vbcast.lane.b32.xlu0 %v3018_v58, 256  ;;  %v17600_v41 = vld [vmem:[#allocation8_spill] sm:$0xff] }
 0x34f   : > { %v13126_v36 = vadd.f32 %v2583_v25, %v17590_v30  ;;  %v13129_v24 = vadd.f32 %v2582_v35, %v17592_v51  ;;  %v2521_v35 = vrot.slane %v2451_v49, %v12378_v33 }
 0x350   : > { %v2309_v29 = vpop.permute.xlu1 %2308  ;;  %v2305_v32 = vpop.permute.xlu0 %2304 }
 0x351   : > { %17591 = vst [vmem:[#allocation67_spill] sm:$0xff] %v13126_v36  ;;  %17593 = vst [vmem:[#allocation69_spill] sm:$0xff] %v13129_v24  ;;  %v2585_v16 = vmul.f32 %v2517_v54, %v2309_v29  ;;  %v2584_v48 = vmul.f32 %v2517_v54, %v2305_v32  ;;  %v3483_v54 = vrot.slane %v17598_v4, %v12378_v33 }
 0x352   : > { %3035 = vbcast.lane.b32.xlu1 %v3033_v61, 256  ;;  %3028 = vbcast.lane.b32.xlu0 %v3018_v58, 272  ;;  %v17599_v58 = vld [vmem:[#allocation9_spill] sm:$0xff] }
 0x353   : > { %v13135_v43 = vadd.f32 %v2585_v16, %v17594_v55  ;;  %v13138_v25 = vadd.f32 %v2584_v48, %v17596_v17  ;;  %v2525_v48 = vrot.slane %v2465_v14, %v12378_v33 }
 0x354   : > { %v2320_v30 = vpop.permute.xlu1 %2319  ;;  %v2316_v51 = vpop.permute.xlu0 %2315 }
 0x355   : > { %17595 = vst [vmem:[#allocation70_spill] sm:$0xff] %v13135_v43  ;;  %17597 = vst [vmem:[#allocation13_spill] sm:$0xff] %v13138_v25  ;;  %v2587_v24 = vmul.f32 %v2521_v35, %v2320_v30  ;;  %v2586_v36 = vmul.f32 %v2521_v35, %v2316_v51  ;;  %v2467_v30 = vcombine.high %v2451_v49, %v2451_v49  ;;  %v17602_v51 = vld [vmem:[#allocation7_spill] sm:$0xff] }
 0x356   : > { %3043 = vbcast.lane.b32.xlu1 %v3033_v61, 272  ;;  %3039 = vbcast.lane.b32.xlu0 %v3033_v61, 264 }
 0x357   : > { %v13144_v29 = vadd.f32 %v2587_v24, %v17599_v58  ;;  %v13147_v16 = vadd.f32 %v2586_v36, %v17600_v41  ;;  %v3498_v36 = vrot.slane %v17598_v4, %v12382_v18 }
 0x358   : > { %v2331_v32 = vpop.permute.xlu1 %2330  ;;  %v2324_v55 = vpop.permute.xlu0 %2323 }
 0x359   : > { %17601 = vst [vmem:[#allocation71_spill] sm:$0xff] %v13147_v16  ;;  %v2589_v17 = vmul.f32 %v2525_v48, %v2331_v32  ;;  %v2588_v25 = vmul.f32 %v2521_v35, %v2324_v55  ;;  %v2469_v32 = vcombine.high %v2465_v14, %v2465_v14  ;;  %v3513_v14 = vrot.slane %v17598_v4, %v12392_v52 }
 0x35a   : > { %3489 = vbcast.lane.b32.xlu1 %v3483_v54, 264  ;;  %3485 = vbcast.lane.b32.xlu0 %v3483_v54, 256 }
 0x35b   : > { %v13151_v61 = vadd.f32 %v2589_v17, %v12928_v15  ;;  %v13154_v43 = vadd.f32 %v2588_v25, %v17602_v51  ;;  %v2529_v15 = vrot.slane %v2467_v30, %v12378_v33 }
 0x35c   : > { %v2339_v24 = vpop.permute.xlu1 %2338  ;;  %v2335_v58 = vpop.permute.xlu0 %2334 }
 0x35d   : > { %v2591_v41 = vmul.f32 %v2525_v48, %v2339_v24  ;;  %v2590_v16 = vmul.f32 %v2525_v48, %v2335_v58  ;;  %v17605_v24 = vld [vmem:[#allocation79_spill] sm:$0xff]  ;;  %v17606_v58 = vld [vmem:[#allocation57_spill] sm:$0xff] }
 0x35e   : > { %3500 = vbcast.lane.b32.xlu1 %v3498_v36, 256  ;;  %3493 = vbcast.lane.b32.xlu0 %v3483_v54, 272  ;;  %v3054_v48 = vrot.slane %v17605_v24, %v12640_v42 }
 0x35f   : > { %v13159_v35 = vadd.f32 %v2591_v41, %v12937_v0  ;;  %v13162_v49 = vadd.f32 %v2590_v16, %v12939_v10  ;;  %v17608_v0 = vld [vmem:[#allocation5_spill] sm:$0xff]  ;;  %v2533_v10 = vrot.slane %v2469_v32, %v12378_v33 }
 0x360   : > { %v2350_v25 = vpop.permute.xlu1 %2349  ;;  %v2346_v55 = vpop.permute.xlu0 %2345 }
 0x361   : > { %17603 = vst [vmem:[#allocation72_spill] sm:$0xff] %v13159_v35  ;;  %17604 = vst [vmem:[#allocation73_spill] sm:$0xff] %v13162_v49  ;;  %v2593_v17 = vmul.f32 %v2529_v15, %v2350_v25  ;;  %v2592_v51 = vmul.f32 %v2529_v15, %v2346_v55  ;;  %v3070_v49 = vrot.slane %v3054_v48, %v12640_v42 }
 0x362   : > { %3508 = vbcast.lane.b32.xlu1 %v3498_v36, 272  ;;  %3504 = vbcast.lane.b32.xlu0 %v3498_v36, 264  ;;  %v3062_v36 = vcombine.high %v3054_v48, %v3054_v48 }
 0x363   : > { %v13168_v54 = vadd.f32 %v2593_v17, %v17606_v58  ;;  %v13171_v41 = vadd.f32 %v2592_v51, %v17608_v0  ;;  %v17610_v58 = vld [vmem:[#allocation58_spill] sm:$0xff] }
 0x364   : > { %v2361_v16 = vpop.permute.xlu1 %2360  ;;  %v2354_v30 = vpop.permute.xlu0 %2353 }
 0x365   : > { %17607 = vst [vmem:[#allocation74_spill] sm:$0xff] %v13168_v54  ;;  %17609 = vst [vmem:[#allocation75_spill] sm:$0xff] %v13171_v41  ;;  %v2595_v25 = vmul.f32 %v2533_v10, %v2361_v16  ;;  %v2594_v55 = vmul.f32 %v2529_v15, %v2354_v30  ;;  %v3528_v41 = vrot.slane %v17598_v4, %v12398_v56 }
 0x366   : > { %3519 = vbcast.lane.b32.xlu1 %v3513_v14, 264  ;;  %3515 = vbcast.lane.b32.xlu0 %v3513_v14, 256  ;;  %v3084_v15 = vrot.slane %v3062_v36, %v12640_v42  ;;  %v3148_v16 = vrot.slane %v3070_v49, %v12378_v33 }
 0x367   : > { %v13178_v17 = vadd.f32 %v2595_v25, %v12957_v34  ;;  %v13181_v51 = vadd.f32 %v2594_v55, %v17610_v58 }
 0x368   : > { %v2369_v0 = vpop.permute.xlu1 %2368  ;;  %v2365_v32 = vpop.permute.xlu0 %2364  ;;  %v3152_v36 = vrot.slane %v3084_v15, %v12378_v33 }
 0x369   : > { %v2597_v54 = vmul.f32 %v2533_v10, %v2369_v0  ;;  %v2596_v35 = vmul.f32 %v2533_v10, %v2365_v32  ;;  %v3092_v32 = vcombine.high %v3070_v49, %v3070_v49 }
 0x36a   : > { %3530 = vbcast.lane.b32.xlu1 %v3528_v41, 256  ;;  %3523 = vbcast.lane.b32.xlu0 %v3513_v14, 272 }
 0x36b   : > { %v13188_v48 = vadd.f32 %v2597_v54, %v12967_v45  ;;  %v13191_v34 = vadd.f32 %v2596_v35, %v12969_v1  ;;  %v3543_v1 = vrot.slane %v17598_v4, %v12404_v60 }
 0x36c   : > { %v2815_v30 = vpop.permute.xlu1 %2814  ;;  %v2811_v25 = vpop.permute.xlu0 %2810 }
 0x36d   : > { %v3226_v55 = vmul.f32 %v3148_v16, %v2815_v30  ;;  %v3225_v58 = vmul.f32 %v3148_v16, %v2811_v25  ;;  %v3558_v25 = vrot.slane %v17598_v4, %v12408_v2 }
 0x36e   : > { %3538 = vbcast.lane.b32.xlu1 %v3528_v41, 272  ;;  %3534 = vbcast.lane.b32.xlu0 %v3528_v41, 264 }
 0x36f   : > { %v13194_v10 = vadd.f32 %v3226_v55, %v12972_v11  ;;  %v13197_v14 = vadd.f32 %v3225_v58, %v12975_v37 }
 0x370   : > { %v2826_v0 = vpop.permute.xlu1 %2825  ;;  %v2819_v45 = vpop.permute.xlu0 %2818 }
 0x371   : > { %v3228_v35 = vmul.f32 %v3152_v36, %v2826_v0  ;;  %v3227_v54 = vmul.f32 %v3148_v16, %v2819_v45  ;;  %v3047_v0 = vcombine.high %v17605_v24, %v17605_v24  ;;  %v3094_v16 = vcombine.high %v3084_v15, %v3084_v15 }
 0x372   : > { %3549 = vbcast.lane.b32.xlu1 %v3543_v1, 264  ;;  %3545 = vbcast.lane.b32.xlu0 %v3543_v1, 256 }
 0x373   : > { %v13203_v41 = vadd.f32 %v3228_v35, %v12981_v53  ;;  %v13206_v11 = vadd.f32 %v3227_v54, %v12984_v40  ;;  %v3156_v40 = vrot.slane %v3092_v32, %v12378_v33  ;;  %v3573_v32 = vrot.slane %v17598_v4, %v12412_v47 }
 0x374   : > { %v2834_v37 = vpop.permute.xlu1 %2833  ;;  %v2830_v30 = vpop.permute.xlu0 %2829 }
 0x375   : > { %17611 = vst [vmem:[#allocation76_spill] sm:$0xff] %v13206_v11  ;;  %v3230_v55 = vmul.f32 %v3152_v36, %v2834_v37  ;;  %v3229_v58 = vmul.f32 %v3152_v36, %v2830_v30  ;;  %v3061_v36 = vrot.slane %v3047_v0, %v12640_v42  ;;  %v3588_v0 = vrot.slane %v17598_v4, %v12418_v8 }
 0x376   : > { %3560 = vbcast.lane.b32.xlu1 %v3558_v25, 256  ;;  %3553 = vbcast.lane.b32.xlu0 %v3543_v1, 272 }
 0x377   : > { %v13213_v49 = vadd.f32 %v3230_v55, %v12991_v12  ;;  %v13216_v53 = vadd.f32 %v3229_v58, %v12994_v62  ;;  %v3160_v12 = vrot.slane %v3094_v16, %v12378_v33  ;;  %v3077_v55 = vrot.slane %v3061_v36, %v12640_v42 }
 0x378   : > { %v2845_v45 = vpop.permute.xlu1 %2844  ;;  %v2841_v35 = vpop.permute.xlu0 %2840 }
 0x379   : > { %v3232_v54 = vmul.f32 %v3156_v40, %v2845_v45  ;;  %v3231_v11 = vmul.f32 %v3156_v40, %v2841_v35 }
 0x37a   : > { %3568 = vbcast.lane.b32.xlu1 %v3558_v25, 272  ;;  %3564 = vbcast.lane.b32.xlu0 %v3558_v25, 264  ;;  %v3063_v25 = vcombine.high %v3061_v36, %v3061_v36 }
 0x37b   : > { %v13221_v24 = vadd.f32 %v3232_v54, %v12999_v44  ;;  %v13224_v15 = vadd.f32 %v3231_v11, %v13002_v6 }
 0x37c   : > { %v2856_v62 = vpop.permute.xlu1 %2855  ;;  %v2849_v1 = vpop.permute.xlu0 %2848 }
 0x37d   : > { %v3234_v37 = vmul.f32 %v3160_v12, %v2856_v62  ;;  %v3233_v30 = vmul.f32 %v3156_v40, %v2849_v1  ;;  %v3091_v40 = vrot.slane %v3063_v25, %v12640_v42 }
 0x37e   : > { %3579 = vbcast.lane.b32.xlu1 %v3573_v32, 264  ;;  %3575 = vbcast.lane.b32.xlu0 %v3573_v32, 256 }
 0x37f   : > { %v13231_v44 = vadd.f32 %v3234_v37, %v13009_v13  ;;  %v13234_v6 = vadd.f32 %v3233_v30, %v13012_v23  ;;  %v3164_v23 = vrot.slane %v3077_v55, %v12378_v33 }
 0x380   : > { %v2864_v11 = vpop.permute.xlu1 %2863  ;;  %v2860_v58 = vpop.permute.xlu0 %2859 }
 0x381   : > { %v3236_v16 = vmul.f32 %v3160_v12, %v2864_v11  ;;  %v3235_v45 = vmul.f32 %v3160_v12, %v2860_v58  ;;  %v3093_v58 = vcombine.high %v3077_v55, %v3077_v55 }
 0x382   : > { %3590 = vbcast.lane.b32.xlu1 %v3588_v0, 256  ;;  %3583 = vbcast.lane.b32.xlu0 %v3573_v32, 272 }
 0x383   : > { %v13240_v35 = vadd.f32 %v3236_v16, %v13018_v20  ;;  %v13243_v13 = vadd.f32 %v3235_v45, %v13021_v19  ;;  %v3168_v20 = vrot.slane %v3091_v40, %v12378_v33  ;;  %v17612_v19 = vld [vmem:[#allocation23_spill] sm:$0xff] }
 0x384   : > { %v2875_v54 = vpop.permute.xlu1 %2874  ;;  %v2871_v36 = vpop.permute.xlu0 %2870  ;;  %v3603_v30 = vrot.slane %v17612_v19, %v12378_v33  ;;  %v3618_v45 = vrot.slane %v17612_v19, %v12382_v18 }
 0x385   : > { %v3238_v62 = vmul.f32 %v3164_v23, %v2875_v54  ;;  %v3237_v1 = vmul.f32 %v3164_v23, %v2871_v36 }
 0x386   : > { %3598 = vbcast.lane.b32.xlu1 %v3588_v0, 272  ;;  %3594 = vbcast.lane.b32.xlu0 %v3588_v0, 264 }
 0x387   : > { %v13247_v4 = vadd.f32 %v3238_v62, %v13027_v7  ;;  %v13250_v12 = vadd.f32 %v3237_v1, %v13030_v39  ;;  %v3095_v62 = vcombine.high %v3091_v40, %v3091_v40  ;;  %v3633_v40 = vrot.slane %v17612_v19, %v12392_v52 }
 0x388   : > { %v2886_v32 = vpop.permute.xlu1 %2885  ;;  %v2879_v37 = vpop.permute.xlu0 %2878 }
 0x389   : > { %v3240_v25 = vmul.f32 %v3168_v20, %v2886_v32  ;;  %v3239_v11 = vmul.f32 %v3164_v23, %v2879_v37 }
 0x38a   : > { %3609 = vbcast.lane.b32.xlu1 %v3603_v30, 264  ;;  %3605 = vbcast.lane.b32.xlu0 %v3603_v30, 256 }
 0x38b   : > { %v13256_v0 = vadd.f32 %v3240_v25, %v13038_v21  ;;  %v13259_v7 = vadd.f32 %v3239_v11, %v13041_v38  ;;  %v3172_v21 = vrot.slane %v3093_v58, %v12378_v33  ;;  %v17613_v25 = vld [vmem:[#allocation80_spill] sm:$0xff] }
 0x38c   : > { %v2894_v39 = vpop.permute.xlu1 %2893  ;;  %v2890_v16 = vpop.permute.xlu0 %2889 }
 0x38d   : > { %v3242_v54 = vmul.f32 %v3168_v20, %v2894_v39  ;;  %v3241_v36 = vmul.f32 %v3168_v20, %v2890_v16  ;;  %v3103_v20 = vrot.slane %v17613_v25, %v12640_v42 }
 0x38e   : > { %3620 = vbcast.lane.b32.xlu1 %v3618_v45, 256  ;;  %3613 = vbcast.lane.b32.xlu0 %v3603_v30, 272 }
 0x38f   : > { %v13264_v23 = vadd.f32 %v3242_v54, %v13048_v5  ;;  %v13267_v55 = vadd.f32 %v3241_v36, %v13051_v50  ;;  %v3176_v50 = vrot.slane %v3095_v62, %v12378_v33  ;;  %v3119_v54 = vrot.slane %v3103_v20, %v12640_v42 }
 0x390   : > { %v2905_v38 = vpop.permute.xlu1 %2904  ;;  %v2901_v1 = vpop.permute.xlu0 %2900 }
 0x391   : > { %v3244_v32 = vmul.f32 %v3172_v21, %v2905_v38  ;;  %v3243_v37 = vmul.f32 %v3172_v21, %v2901_v1  ;;  %v3648_v38 = vrot.slane %v17612_v19, %v12398_v56 }
 0x392   : > { %3628 = vbcast.lane.b32.xlu1 %v3618_v45, 272  ;;  %3624 = vbcast.lane.b32.xlu0 %v3618_v45, 264  ;;  %v3111_v45 = vcombine.high %v3103_v20, %v3103_v20 }
 0x393   : > { %v13273_v30 = vadd.f32 %v3244_v32, %v13059_v9  ;;  %v13276_v5 = vadd.f32 %v3243_v37, %v13062_v27  ;;  %v3180_v37 = vrot.slane %v3119_v54, %v12378_v33 }
 0x394   : > { %v2916_v11 = vpop.permute.xlu1 %2915  ;;  %v2909_v58 = vpop.permute.xlu0 %2908 }
 0x395   : > { %v3246_v39 = vmul.f32 %v3176_v50, %v2916_v11  ;;  %v3245_v16 = vmul.f32 %v3172_v21, %v2909_v58  ;;  %v3133_v21 = vrot.slane %v3111_v45, %v12640_v42 }
 0x396   : > { %3639 = vbcast.lane.b32.xlu1 %v3633_v40, 264  ;;  %3635 = vbcast.lane.b32.xlu0 %v3633_v40, 256 }
 0x397   : > { %v13283_v9 = vadd.f32 %v3246_v39, %v13069_v28  ;;  %v13286_v27 = vadd.f32 %v3245_v16, %v13072_v22  ;;  %v3184_v16 = vrot.slane %v3133_v21, %v12378_v33 }
 0x398   : > { %v2924_v36 = vpop.permute.xlu1 %2923  ;;  %v2920_v62 = vpop.permute.xlu0 %2919 }
 0x399   : > { %v3248_v1 = vmul.f32 %v3176_v50, %v2924_v36  ;;  %v3247_v32 = vmul.f32 %v3176_v50, %v2920_v62 }
 0x39a   : > { %3650 = vbcast.lane.b32.xlu1 %v3648_v38, 256  ;;  %3643 = vbcast.lane.b32.xlu0 %v3633_v40, 272 }
 0x39b   : > { %v13293_v20 = vadd.f32 %v3248_v1, %v13079_v63  ;;  %v13296_v28 = vadd.f32 %v3247_v32, %v13082_v31  ;;  %v3663_v31 = vrot.slane %v17612_v19, %v12404_v60  ;;  %v3141_v1 = vcombine.high %v3119_v54, %v3119_v54 }
 0x39c   : > { %v2935_v22 = vpop.permute.xlu1 %2934  ;;  %v2931_v11 = vpop.permute.xlu0 %2930 }
 0x39d   : > { %v3250_v58 = vmul.f32 %v3180_v37, %v2935_v22  ;;  %v3249_v39 = vmul.f32 %v3180_v37, %v2931_v11 }
 0x39e   : > { %3658 = vbcast.lane.b32.xlu1 %v3648_v38, 272  ;;  %3654 = vbcast.lane.b32.xlu0 %v3648_v38, 264 }
 0x39f   : > { %v13299_v50 = vadd.f32 %v3250_v58, %v13087_v3  ;;  %v13302_v40 = vadd.f32 %v3249_v39, %v13090_v26  ;;  %v17615_v3 = vld [vmem:[#allocation64_spill] sm:$0xff]  ;;  %v13313_v26 = vpop.f32.mrf.mxu0  ;;  %v3678_v58 = vrot.slane %v17612_v19, %v12408_v2 }
 0x3a0   : > { %v2946_v45 = vpop.permute.xlu1 %2945  ;;  %v2939_v63 = vpop.permute.xlu0 %2938  ;;  %17616 = vst [vmem:[#allocation12_spill] sm:$0xff] %v13313_v26 }
 0x3a1   : > { %17614 = vst [vmem:[#allocation10_spill] sm:$0xff] %v13302_v40  ;;  %v3252_v36 = vmul.f32 %v3184_v16, %v2946_v45  ;;  %v3251_v62 = vmul.f32 %v3180_v37, %v2939_v63  ;;  %v11533_v45 = vpop.f32.mrf.mxu0  ;;  %v3096_v37 = vcombine.high %v17613_v25, %v17613_v25 }
 0x3a2   : > { %3669 = vbcast.lane.b32.xlu1 %v3663_v31, 264  ;;  %3665 = vbcast.lane.b32.xlu0 %v3663_v31, 256 }
 0x3a3   : > { %v13308_v38 = vadd.f32 %v3252_v36, %v13098_v46  ;;  %v13311_v32 = vadd.f32 %v3251_v62, %v17615_v3  ;;  %v3143_v46 = vcombine.high %v3133_v21, %v3133_v21  ;;  %v3188_v36 = vrot.slane %v3141_v1, %v12378_v33  ;;  %v13326_v62 = vpop.f32.mrf.mxu0  ;;  %v17619_v21 = vld [vmem:[#allocation65_spill] sm:$0xff] }
 0x3a4   : > { %v2954_v22 = vpop.permute.xlu1 %2953  ;;  %v2950_v11 = vpop.permute.xlu0 %2949  ;;  %17618 = vst [vmem:[#allocation21_spill] sm:$0xff] %v13326_v62  ;;  %v3110_v25 = vrot.slane %v3096_v37, %v12640_v42 }
 0x3a5   : > { %v3254_v39 = vmul.f32 %v3184_v16, %v2954_v22  ;;  %v3253_v40 = vmul.f32 %v3184_v16, %v2950_v11  ;;  %v11534_v45 = vpop.f32.mrf.mxu0 }
 0x3a6   : > { %3680 = vbcast.lane.b32.xlu1 %v3678_v58, 256  ;;  %3673 = vbcast.lane.b32.xlu0 %v3663_v31, 272  ;;  %v3112_v37 = vcombine.high %v3110_v25, %v3110_v25 }
 0x3a7   : > { %v13320_v54 = vadd.f32 %v3254_v39, %v13108_v59  ;;  %v13323_v63 = vadd.f32 %v3253_v40, %v13111_v57  ;;  %v17621_v59 = vld [vmem:[#allocation66_spill] sm:$0xff]  ;;  %v3192_v57 = vrot.slane %v3143_v46, %v12378_v33 }
 0x3a8   : > { %v2965_v3 = vpop.permute.xlu1 %2964  ;;  %v2961_v22 = vpop.permute.xlu0 %2960 }
 0x3a9   : > { %17617 = vst [vmem:[#allocation22_spill] sm:$0xff] %v13323_v63  ;;  %v3256_v16 = vmul.f32 %v3188_v36, %v2965_v3  ;;  %v3255_v11 = vmul.f32 %v3188_v36, %v2961_v22  ;;  %v13336_v40 = vpop.f32.mrf.mxu0  ;;  %v3693_v3 = vrot.slane %v17612_v19, %v12412_v47 }
 0x3aa   : > { %3688 = vbcast.lane.b32.xlu1 %v3678_v58, 272  ;;  %3684 = vbcast.lane.b32.xlu0 %v3678_v58, 264  ;;  %17623 = vst [vmem:[#allocation17_spill] sm:$0xff] %v13336_v40 }
 0x3ab   : > { %v13330_v31 = vadd.f32 %v3256_v16, %v17619_v21  ;;  %v13333_v39 = vadd.f32 %v3255_v11, %v17621_v59  ;;  %v11549_v58 = vpop.f32.mrf.mxu0  ;;  %v3126_v16 = vrot.slane %v3110_v25, %v12640_v42  ;;  %v17624_v21 = vld [vmem:[#allocation67_spill] sm:$0xff]  ;;  %v17626_v59 = vld [vmem:[#allocation69_spill] sm:$0xff]  ;;  %v3140_v25 = vrot.slane %v3112_v37, %v12640_v42 }
 0x3ac   : > { %v2976_v1 = vpop.permute.xlu1 %2975  ;;  %v2969_v62 = vpop.permute.xlu0 %2968 }
 0x3ad   : > { %17620 = vst [vmem:[#allocation20_spill] sm:$0xff] %v13330_v31  ;;  %17622 = vst [vmem:[#allocation18_spill] sm:$0xff] %v13333_v39  ;;  %v3258_v22 = vmul.f32 %v3192_v57, %v2976_v1  ;;  %v3257_v45 = vmul.f32 %v3188_v36, %v2969_v62  ;;  %v13347_v26 = vpop.f32.mrf.mxu0  ;;  %v3708_v1 = vrot.slane %v17612_v19, %v12418_v8  ;;  %v17629_v31 = vld [vmem:[#allocation70_spill] sm:$0xff]  ;;  %v17631_v19 = vld [vmem:[#allocation63_spill] sm:$0xff] }
 0x3ae   : > { %3699 = vbcast.lane.b32.xlu1 %v3693_v3, 264  ;;  %3695 = vbcast.lane.b32.xlu0 %v3693_v3, 256  ;;  %17628 = vst [vmem:[#allocation81_spill] sm:$0xff] %v13347_v26 }
 0x3af   : > { %v13342_v11 = vadd.f32 %v3258_v22, %v17624_v21  ;;  %v13345_v46 = vadd.f32 %v3257_v45, %v17626_v59  ;;  %v11550_v58 = vpop.f32.mrf.mxu0  ;;  %v17630_v21 = vld [vmem:[#allocation13_spill] sm:$0xff]  ;;  %v3196_v59 = vrot.slane %v3126_v16, %v12378_v33 }
 0x3b0   : > { %v2984_v40 = vpop.permute.xlu1 %2983  ;;  %v2980_v39 = vpop.permute.xlu0 %2979 }
 0x3b1   : > { %17625 = vst [vmem:[#allocation16_spill] sm:$0xff] %v13342_v11  ;;  %17627 = vst [vmem:[#allocation15_spill] sm:$0xff] %v13345_v46  ;;  %v3260_v36 = vmul.f32 %v3192_v57, %v2984_v40  ;;  %v3259_v62 = vmul.f32 %v3192_v57, %v2980_v39  ;;  %v4158_v39 = vrot.slane %v17631_v19, %v12378_v33  ;;  %v17632_v40 = vld [vmem:[#allocation71_spill] sm:$0xff] }
 0x3b2   : > { %3710 = vbcast.lane.b32.xlu1 %v3708_v1, 256  ;;  %3703 = vbcast.lane.b32.xlu0 %v3693_v3, 272  ;;  %v3200_v3 = vrot.slane %v3140_v25, %v12378_v33 }
 0x3b3   : > { %v13353_v22 = vadd.f32 %v3260_v36, %v17629_v31  ;;  %v13356_v45 = vadd.f32 %v3259_v62, %v17630_v21 }
 0x3b4   : > { %v2995_v26 = vpop.permute.xlu1 %2994  ;;  %v2991_v46 = vpop.permute.xlu0 %2990 }
 0x3b5   : > { %v3262_v11 = vmul.f32 %v3196_v59, %v2995_v26  ;;  %v3261_v63 = vmul.f32 %v3196_v59, %v2991_v46  ;;  %v3142_v26 = vcombine.high %v3126_v16, %v3126_v16 }
 0x3b6   : > { %3718 = vbcast.lane.b32.xlu1 %v3708_v1, 272  ;;  %3714 = vbcast.lane.b32.xlu0 %v3708_v1, 264 }
 0x3b7   : > { %v13362_v57 = vadd.f32 %v3262_v11, %v13144_v29  ;;  %v13365_v31 = vadd.f32 %v3261_v63, %v17632_v40  ;;  %v4173_v63 = vrot.slane %v17631_v19, %v12382_v18 }
 0x3b8   : > { %v3006_v37 = vpop.permute.xlu1 %3005  ;;  %v2999_v36 = vpop.permute.xlu0 %2998 }
 0x3b9   : > { %v3264_v62 = vmul.f32 %v3200_v3, %v3006_v37  ;;  %v3263_v58 = vmul.f32 %v3196_v59, %v2999_v36  ;;  %v17635_v37 = vld [vmem:[#allocation72_spill] sm:$0xff]  ;;  %v17636_v36 = vld [vmem:[#allocation73_spill] sm:$0xff] }
 0x3ba   : > { %4164 = vbcast.lane.b32.xlu1 %v4158_v39, 264  ;;  %4160 = vbcast.lane.b32.xlu0 %v4158_v39, 256 }
 0x3bb   : > { %v13369_v46 = vadd.f32 %v3264_v62, %v13151_v61  ;;  %v13372_v1 = vadd.f32 %v3263_v58, %v13154_v43  ;;  %v3204_v61 = vrot.slane %v3142_v26, %v12378_v33  ;;  %v3144_v62 = vcombine.high %v3140_v25, %v3140_v25 }
 0x3bc   : > { %v3014_v29 = vpop.permute.xlu1 %3013  ;;  %v3010_v11 = vpop.permute.xlu0 %3009  ;;  %v4188_v25 = vrot.slane %v17631_v19, %v12392_v52 }
 0x3bd   : > { %17633 = vst [vmem:[#allocation9_spill] sm:$0xff] %v13369_v46  ;;  %17634 = vst [vmem:[#allocation8_spill] sm:$0xff] %v13372_v1  ;;  %v3266_v21 = vmul.f32 %v3200_v3, %v3014_v29  ;;  %v3265_v40 = vmul.f32 %v3200_v3, %v3010_v11  ;;  %v17638_v29 = vld [vmem:[#allocation61_spill] sm:$0xff]  ;;  %v17639_v11 = vld [vmem:[#allocation74_spill] sm:$0xff] }
 0x3be   : > { %4175 = vbcast.lane.b32.xlu1 %v4173_v63, 256  ;;  %4168 = vbcast.lane.b32.xlu0 %v4158_v39, 272  ;;  %v3729_v3 = vrot.slane %v17638_v29, %v12640_v42 }
 0x3bf   : > { %v13377_v59 = vadd.f32 %v3266_v21, %v17635_v37  ;;  %v13380_v16 = vadd.f32 %v3265_v40, %v17636_v36  ;;  %v17641_v21 = vld [vmem:[#allocation75_spill] sm:$0xff]  ;;  %v3208_v40 = vrot.slane %v3144_v62, %v12378_v33 }
 0x3c0   : > { %v3025_v43 = vpop.permute.xlu1 %3024  ;;  %v3021_v58 = vpop.permute.xlu0 %3020 }
 0x3c1   : > { %17637 = vst [vmem:[#allocation7_spill] sm:$0xff] %v13380_v16  ;;  %v3268_v1 = vmul.f32 %v3204_v61, %v3025_v43  ;;  %v3267_v46 = vmul.f32 %v3204_v61, %v3021_v58  ;;  %v3745_v16 = vrot.slane %v3729_v3, %v12640_v42 }
 0x3c2   : > { %4183 = vbcast.lane.b32.xlu1 %v4173_v63, 272  ;;  %4179 = vbcast.lane.b32.xlu0 %v4173_v63, 264  ;;  %v3737_v63 = vcombine.high %v3729_v3, %v3729_v3 }
 0x3c3   : > { %v13386_v39 = vadd.f32 %v3268_v1, %v17639_v11  ;;  %v13389_v37 = vadd.f32 %v3267_v46, %v17641_v21  ;;  %v4203_v21 = vrot.slane %v17631_v19, %v12398_v56 }
 0x3c4   : > { %v3036_v36 = vpop.permute.xlu1 %3035  ;;  %v3029_v26 = vpop.permute.xlu0 %3028 }
 0x3c5   : > { %17640 = vst [vmem:[#allocation79_spill] sm:$0xff] %v13386_v39  ;;  %17642 = vst [vmem:[#allocation57_spill] sm:$0xff] %v13389_v37  ;;  %v3270_v43 = vmul.f32 %v3208_v40, %v3036_v36  ;;  %v3269_v58 = vmul.f32 %v3204_v61, %v3029_v26  ;;  %v3759_v61 = vrot.slane %v3737_v63, %v12640_v42 }
 0x3c6   : > { %4194 = vbcast.lane.b32.xlu1 %v4188_v25, 264  ;;  %4190 = vbcast.lane.b32.xlu0 %v4188_v25, 256  ;;  %v3823_v36 = vrot.slane %v3745_v16, %v12378_v33 }
 0x3c7   : > { %v13396_v1 = vadd.f32 %v3270_v43, %v13178_v17  ;;  %v13399_v46 = vadd.f32 %v3269_v58, %v13181_v51  ;;  %v3827_v63 = vrot.slane %v3759_v61, %v12378_v33 }
 0x3c8   : > { %v3044_v11 = vpop.permute.xlu1 %3043  ;;  %v3040_v62 = vpop.permute.xlu0 %3039 }
 0x3c9   : > { %v3272_v37 = vmul.f32 %v3208_v40, %v3044_v11  ;;  %v3271_v39 = vmul.f32 %v3208_v40, %v3040_v62  ;;  %v3767_v62 = vcombine.high %v3745_v16, %v3745_v16 }
 0x3ca   : > { %4205 = vbcast.lane.b32.xlu1 %v4203_v21, 256  ;;  %4198 = vbcast.lane.b32.xlu0 %v4188_v25, 272 }
 0x3cb   : > { %v13406_v3 = vadd.f32 %v3272_v37, %v13188_v48  ;;  %v13409_v17 = vadd.f32 %v3271_v39, %v13191_v34  ;;  %v4218_v34 = vrot.slane %v17631_v19, %v12404_v60 }
 0x3cc   : > { %v3490_v51 = vpop.permute.xlu1 %3489  ;;  %v3486_v26 = vpop.permute.xlu0 %3485 }
 0x3cd   : > { %v3901_v43 = vmul.f32 %v3823_v36, %v3490_v51  ;;  %v3900_v58 = vmul.f32 %v3823_v36, %v3486_v26 }
 0x3ce   : > { %4213 = vbcast.lane.b32.xlu1 %v4203_v21, 272  ;;  %4209 = vbcast.lane.b32.xlu0 %v4203_v21, 264 }
 0x3cf   : > { %v13412_v40 = vadd.f32 %v3901_v43, %v13194_v10  ;;  %v13415_v25 = vadd.f32 %v3900_v58, %v13197_v14  ;;  %v17644_v10 = vld [vmem:[#allocation76_spill] sm:$0xff]  ;;  %v4233_v43 = vrot.slane %v17631_v19, %v12408_v2 }
 0x3d0   : > { %v3501_v11 = vpop.permute.xlu1 %3500  ;;  %v3494_v48 = vpop.permute.xlu0 %3493 }
 0x3d1   : > { %17643 = vst [vmem:[#allocation5_spill] sm:$0xff] %v13415_v25  ;;  %v3903_v39 = vmul.f32 %v3827_v63, %v3501_v11  ;;  %v3902_v37 = vmul.f32 %v3823_v36, %v3494_v48  ;;  %v3722_v11 = vcombine.high %v17638_v29, %v17638_v29  ;;  %v3769_v36 = vcombine.high %v3759_v61, %v3759_v61 }
 0x3d2   : > { %4224 = vbcast.lane.b32.xlu1 %v4218_v34, 264  ;;  %4220 = vbcast.lane.b32.xlu0 %v4218_v34, 256  ;;  %v3831_v48 = vrot.slane %v3767_v62, %v12378_v33 }
 0x3d3   : > { %v13421_v21 = vadd.f32 %v3903_v39, %v13203_v41  ;;  %v13424_v51 = vadd.f32 %v3902_v37, %v17644_v10 }
 0x3d4   : > { %v3509_v14 = vpop.permute.xlu1 %3508  ;;  %v3505_v26 = vpop.permute.xlu0 %3504 }
 0x3d5   : > { %17645 = vst [vmem:[#allocation58_spill] sm:$0xff] %v13424_v51  ;;  %v3905_v58 = vmul.f32 %v3827_v63, %v3509_v14  ;;  %v3904_v25 = vmul.f32 %v3827_v63, %v3505_v26  ;;  %v3736_v63 = vrot.slane %v3722_v11, %v12640_v42  ;;  %v4263_v11 = vrot.slane %v17631_v19, %v12418_v8 }
 0x3d6   : > { %4235 = vbcast.lane.b32.xlu1 %v4233_v43, 256  ;;  %4228 = vbcast.lane.b32.xlu0 %v4218_v34, 272  ;;  %v4248_v34 = vrot.slane %v17631_v19, %v12412_v47 }
 0x3d7   : > { %v13431_v16 = vadd.f32 %v3905_v58, %v13213_v49  ;;  %v13434_v41 = vadd.f32 %v3904_v25, %v13216_v53  ;;  %v3835_v49 = vrot.slane %v3769_v36, %v12378_v33  ;;  %v3738_v26 = vcombine.high %v3736_v63, %v3736_v63 }
 0x3d8   : > { %v3520_v39 = vpop.permute.xlu1 %3519  ;;  %v3516_v37 = vpop.permute.xlu0 %3515 }
 0x3d9   : > { %v3907_v10 = vmul.f32 %v3831_v48, %v3520_v39  ;;  %v3906_v51 = vmul.f32 %v3831_v48, %v3516_v37 }
 0x3da   : > { %4243 = vbcast.lane.b32.xlu1 %v4233_v43, 272  ;;  %4239 = vbcast.lane.b32.xlu0 %v4233_v43, 264  ;;  %v3752_v43 = vrot.slane %v3736_v63, %v12640_v42 }
 0x3db   : > { %v13439_v29 = vadd.f32 %v3907_v10, %v13221_v24  ;;  %v13442_v61 = vadd.f32 %v3906_v51, %v13224_v15 }
 0x3dc   : > { %v3531_v53 = vpop.permute.xlu1 %3530  ;;  %v3524_v25 = vpop.permute.xlu0 %3523 }
 0x3dd   : > { %v3909_v62 = vmul.f32 %v3835_v49, %v3531_v53  ;;  %v3908_v14 = vmul.f32 %v3831_v48, %v3524_v25  ;;  %v3766_v48 = vrot.slane %v3738_v26, %v12640_v42 }
 0x3de   : > { %4254 = vbcast.lane.b32.xlu1 %v4248_v34, 264  ;;  %4250 = vbcast.lane.b32.xlu0 %v4248_v34, 256 }
 0x3df   : > { %v13449_v24 = vadd.f32 %v3909_v62, %v13231_v44  ;;  %v13452_v15 = vadd.f32 %v3908_v14, %v13234_v6  ;;  %v3839_v6 = vrot.slane %v3752_v43, %v12378_v33 }
 0x3e0   : > { %v3539_v51 = vpop.permute.xlu1 %3538  ;;  %v3535_v58 = vpop.permute.xlu0 %3534 }
 0x3e1   : > { %v3911_v36 = vmul.f32 %v3835_v49, %v3539_v51  ;;  %v3910_v39 = vmul.f32 %v3835_v49, %v3535_v58  ;;  %v3768_v58 = vcombine.high %v3752_v43, %v3752_v43 }
 0x3e2   : > { %4265 = vbcast.lane.b32.xlu1 %v4263_v11, 256  ;;  %4258 = vbcast.lane.b32.xlu0 %v4248_v34, 272 }
 0x3e3   : > { %v13458_v37 = vadd.f32 %v3911_v36, %v13240_v35  ;;  %v13461_v44 = vadd.f32 %v3910_v39, %v13243_v13  ;;  %v3843_v35 = vrot.slane %v3766_v48, %v12378_v33  ;;  %v17646_v13 = vld [vmem:[#allocation11_spill] sm:$0xff] }
 0x3e4   : > { %v3550_v10 = vpop.permute.xlu1 %3549  ;;  %v3546_v63 = vpop.permute.xlu0 %3545  ;;  %v4278_v14 = vrot.slane %v17646_v13, %v12378_v33  ;;  %v4293_v39 = vrot.slane %v17646_v13, %v12382_v18  ;;  %v17659_v18 = vld [vmem:[#allocation79_spill] sm:$0xff] }
 0x3e5   : > { %v3913_v53 = vmul.f32 %v3839_v6, %v3550_v10  ;;  %v3912_v25 = vmul.f32 %v3839_v6, %v3546_v63 }
 0x3e6   : > { %4273 = vbcast.lane.b32.xlu1 %v4263_v11, 272  ;;  %4269 = vbcast.lane.b32.xlu0 %v4263_v11, 264 }
 0x3e7   : > { %v13465_v19 = vadd.f32 %v3913_v53, %v13247_v4  ;;  %v13468_v49 = vadd.f32 %v3912_v25, %v13250_v12  ;;  %v3770_v53 = vcombine.high %v3766_v48, %v3766_v48  ;;  %v4308_v48 = vrot.slane %v17646_v13, %v12392_v52 }
 0x3e8   : > { %v3561_v34 = vpop.permute.xlu1 %3560  ;;  %v3554_v62 = vpop.permute.xlu0 %3553 }
 0x3e9   : > { %v3915_v26 = vmul.f32 %v3843_v35, %v3561_v34  ;;  %v3914_v51 = vmul.f32 %v3839_v6, %v3554_v62 }
 0x3ea   : > { %4284 = vbcast.lane.b32.xlu1 %v4278_v14, 264  ;;  %4280 = vbcast.lane.b32.xlu0 %v4278_v14, 256 }
 0x3eb   : > { %v13474_v11 = vadd.f32 %v3915_v26, %v13256_v0  ;;  %v13477_v4 = vadd.f32 %v3914_v51, %v13259_v7  ;;  %v3847_v0 = vrot.slane %v3768_v58, %v12378_v33  ;;  %v17647_v26 = vld [vmem:[#allocation62_spill] sm:$0xff] }
 0x3ec   : > { %v3569_v12 = vpop.permute.xlu1 %3568  ;;  %v3565_v36 = vpop.permute.xlu0 %3564 }
 0x3ed   : > { %v3917_v10 = vmul.f32 %v3843_v35, %v3569_v12  ;;  %v3916_v63 = vmul.f32 %v3843_v35, %v3565_v36  ;;  %v3778_v35 = vrot.slane %v17647_v26, %v12640_v42 }
 0x3ee   : > { %4295 = vbcast.lane.b32.xlu1 %v4293_v39, 256  ;;  %4288 = vbcast.lane.b32.xlu0 %v4278_v14, 272 }
 0x3ef   : > { %v13482_v6 = vadd.f32 %v3917_v10, %v13264_v23  ;;  %v13485_v43 = vadd.f32 %v3916_v63, %v13267_v55  ;;  %v3851_v55 = vrot.slane %v3770_v53, %v12378_v33  ;;  %v3794_v10 = vrot.slane %v3778_v35, %v12640_v42 }
 0x3f0   : > { %v3580_v7 = vpop.permute.xlu1 %3579  ;;  %v3576_v25 = vpop.permute.xlu0 %3575 }
 0x3f1   : > { %v3919_v34 = vmul.f32 %v3847_v0, %v3580_v7  ;;  %v3918_v62 = vmul.f32 %v3847_v0, %v3576_v25  ;;  %v4323_v7 = vrot.slane %v17646_v13, %v12398_v56 }
 0x3f2   : > { %4303 = vbcast.lane.b32.xlu1 %v4293_v39, 272  ;;  %4299 = vbcast.lane.b32.xlu0 %v4293_v39, 264  ;;  %v3786_v39 = vcombine.high %v3778_v35, %v3778_v35 }
 0x3f3   : > { %v13491_v14 = vadd.f32 %v3919_v34, %v13273_v30  ;;  %v13494_v23 = vadd.f32 %v3918_v62, %v13276_v5  ;;  %v3855_v62 = vrot.slane %v3794_v10, %v12378_v33 }
 0x3f4   : > { %v3591_v51 = vpop.permute.xlu1 %3590  ;;  %v3584_v58 = vpop.permute.xlu0 %3583 }
 0x3f5   : > { %v3921_v12 = vmul.f32 %v3851_v55, %v3591_v51  ;;  %v3920_v36 = vmul.f32 %v3847_v0, %v3584_v58  ;;  %v3808_v0 = vrot.slane %v3786_v39, %v12640_v42 }
 0x3f6   : > { %4314 = vbcast.lane.b32.xlu1 %v4308_v48, 264  ;;  %4310 = vbcast.lane.b32.xlu0 %v4308_v48, 256 }
 0x3f7   : > { %v13501_v30 = vadd.f32 %v3921_v12, %v13283_v9  ;;  %v13504_v5 = vadd.f32 %v3920_v36, %v13286_v27  ;;  %v3859_v39 = vrot.slane %v3808_v0, %v12378_v33 }
 0x3f8   : > { %v3599_v63 = vpop.permute.xlu1 %3598  ;;  %v3595_v53 = vpop.permute.xlu0 %3594 }
 0x3f9   : > { %v3923_v25 = vmul.f32 %v3851_v55, %v3599_v63  ;;  %v3922_v34 = vmul.f32 %v3851_v55, %v3595_v53 }
 0x3fa   : > { %4325 = vbcast.lane.b32.xlu1 %v4323_v7, 256  ;;  %4318 = vbcast.lane.b32.xlu0 %v4308_v48, 272  ;;  %v17648_v48 = vld [vmem:[#allocation10_spill] sm:$0xff] }
 0x3fb   : > { %v13511_v35 = vadd.f32 %v3923_v25, %v13293_v20  ;;  %v13514_v9 = vadd.f32 %v3922_v34, %v13296_v28  ;;  %v4338_v28 = vrot.slane %v17646_v13, %v12404_v60  ;;  %v3816_v34 = vcombine.high %v3794_v10, %v3794_v10 }
 0x3fc   : > { %v3610_v27 = vpop.permute.xlu1 %3609  ;;  %v3606_v51 = vpop.permute.xlu0 %3605 }
 0x3fd   : > { %v3925_v58 = vmul.f32 %v3855_v62, %v3610_v27  ;;  %v3924_v12 = vmul.f32 %v3855_v62, %v3606_v51 }
 0x3fe   : > { %4333 = vbcast.lane.b32.xlu1 %v4323_v7, 272  ;;  %4329 = vbcast.lane.b32.xlu0 %v4323_v7, 264 }
 0x3ff   : > { %v13517_v55 = vadd.f32 %v3925_v58, %v13299_v50  ;;  %v13520_v36 = vadd.f32 %v3924_v12, %v17648_v48  ;;  %v4353_v58 = vrot.slane %v17646_v13, %v12408_v2 }
 0x400   : > { %v3621_v63 = vpop.permute.xlu1 %3620  ;;  %v3614_v20 = vpop.permute.xlu0 %3613 }
 0x401   : > { %v3927_v53 = vmul.f32 %v3859_v39, %v3621_v63  ;;  %v3926_v25 = vmul.f32 %v3855_v62, %v3614_v20  ;;  %v3771_v63 = vcombine.high %v17647_v26, %v17647_v26  ;;  %v3818_v62 = vcombine.high %v3808_v0, %v3808_v0  ;;  %v17650_v26 = vld [vmem:[#allocation20_spill] sm:$0xff]  ;;  %v17651_v0 = vld [vmem:[#allocation18_spill] sm:$0xff] }
 0x402   : > { %4344 = vbcast.lane.b32.xlu1 %v4338_v28, 264  ;;  %4340 = vbcast.lane.b32.xlu0 %v4338_v28, 256 }
 0x403   : > { %v13526_v7 = vadd.f32 %v3927_v53, %v13308_v38  ;;  %v13529_v50 = vadd.f32 %v3926_v25, %v13311_v32  ;;  %v17649_v38 = vld [vmem:[#allocation22_spill] sm:$0xff]  ;;  %v3863_v32 = vrot.slane %v3816_v34, %v12378_v33  ;;  %v4368_v34 = vrot.slane %v17646_v13, %v12412_v47 }
 0x404   : > { %v3629_v27 = vpop.permute.xlu1 %3628  ;;  %v3625_v51 = vpop.permute.xlu0 %3624 }
 0x405   : > { %v3929_v12 = vmul.f32 %v3859_v39, %v3629_v27  ;;  %v3928_v48 = vmul.f32 %v3859_v39, %v3625_v51  ;;  %v3785_v39 = vrot.slane %v3771_v63, %v12640_v42 }
 0x406   : > { %4355 = vbcast.lane.b32.xlu1 %v4353_v58, 256  ;;  %4348 = vbcast.lane.b32.xlu0 %v4338_v28, 272 }
 0x407   : > { %v13536_v10 = vadd.f32 %v3929_v12, %v13320_v54  ;;  %v13539_v20 = vadd.f32 %v3928_v48, %v17649_v38  ;;  %v3867_v54 = vrot.slane %v3818_v62, %v12378_v33  ;;  %v3801_v63 = vrot.slane %v3785_v39, %v12640_v42 }
 0x408   : > { %v3640_v53 = vpop.permute.xlu1 %3639  ;;  %v3636_v25 = vpop.permute.xlu0 %3635 }
 0x409   : > { %v3931_v60 = vmul.f32 %v3863_v32, %v3640_v53  ;;  %v3930_v2 = vmul.f32 %v3863_v32, %v3636_v25  ;;  %v17652_v53 = vld [vmem:[#allocation16_spill] sm:$0xff]  ;;  %v17653_v25 = vld [vmem:[#allocation15_spill] sm:$0xff] }
 0x40a   : > { %4363 = vbcast.lane.b32.xlu1 %v4353_v58, 272  ;;  %4359 = vbcast.lane.b32.xlu0 %v4353_v58, 264  ;;  %v3787_v58 = vcombine.high %v3785_v39, %v3785_v39 }
 0x40b   : > { %v13544_v27 = vadd.f32 %v3931_v60, %v17650_v26  ;;  %v13547_v28 = vadd.f32 %v3930_v2, %v17651_v0  ;;  %v4383_v0 = vrot.slane %v17646_v13, %v12418_v8 }
 0x40c   : > { %v3651_v51 = vpop.permute.xlu1 %3650  ;;  %v3644_v12 = vpop.permute.xlu0 %3643 }
 0x40d   : > { %v3933_v48 = vmul.f32 %v3867_v54, %v3651_v51  ;;  %v3932_v38 = vmul.f32 %v3863_v32, %v3644_v12  ;;  %v3815_v32 = vrot.slane %v3787_v58, %v12640_v42  ;;  %v3871_v12 = vrot.slane %v3801_v63, %v12378_v33 }
 0x40e   : > { %4374 = vbcast.lane.b32.xlu1 %v4368_v34, 264  ;;  %4370 = vbcast.lane.b32.xlu0 %v4368_v34, 256  ;;  %v3817_v58 = vcombine.high %v3801_v63, %v3801_v63 }
 0x40f   : > { %v13554_v60 = vadd.f32 %v3933_v48, %v17652_v53  ;;  %v13557_v2 = vadd.f32 %v3932_v38, %v17653_v25 }
 0x410   : > { %v3659_v26 = vpop.permute.xlu1 %3658  ;;  %v3655_v62 = vpop.permute.xlu0 %3654 }
 0x411   : > { %v3935_v56 = vmul.f32 %v3867_v54, %v3659_v26  ;;  %v3934_v47 = vmul.f32 %v3867_v54, %v3655_v62  ;;  %v17654_v26 = vld [vmem:[#allocation9_spill] sm:$0xff] }
 0x412   : > { %4385 = vbcast.lane.b32.xlu1 %v4383_v0, 256  ;;  %4378 = vbcast.lane.b32.xlu0 %v4368_v34, 272 }
 0x413   : > { %v13563_v51 = vadd.f32 %v3935_v56, %v13353_v22  ;;  %v13566_v39 = vadd.f32 %v3934_v47, %v13356_v45  ;;  %v3875_v56 = vrot.slane %v3815_v32, %v12378_v33 }
 0x414   : > { %v3670_v48 = vpop.permute.xlu1 %3669  ;;  %v3666_v38 = vpop.permute.xlu0 %3665 }
 0x415   : > { %v3937_v53 = vmul.f32 %v3871_v12, %v3670_v48  ;;  %v3936_v25 = vmul.f32 %v3871_v12, %v3666_v38  ;;  %v17655_v48 = vld [vmem:[#allocation8_spill] sm:$0xff] }
 0x416   : > { %4393 = vbcast.lane.b32.xlu1 %v4383_v0, 272  ;;  %4389 = vbcast.lane.b32.xlu0 %v4383_v0, 264 }
 0x417   : > { %v13570_v13 = vadd.f32 %v3937_v53, %v13362_v57  ;;  %v13573_v54 = vadd.f32 %v3936_v25, %v13365_v31  ;;  %v17657_v25 = vld [vmem:[#allocation7_spill] sm:$0xff] }
 0x418   : > { %v3681_v22 = vpop.permute.xlu1 %3680  ;;  %v3674_v34 = vpop.permute.xlu0 %3673 }
 0x419   : > { %v3939_v47 = vmul.f32 %v3875_v56, %v3681_v22  ;;  %v3938_v45 = vmul.f32 %v3871_v12, %v3674_v34  ;;  %v3879_v22 = vrot.slane %v3817_v58, %v12378_v33  ;;  %v3819_v12 = vcombine.high %v3815_v32, %v3815_v32 }
 0x41b   : > { %v13577_v62 = vadd.f32 %v3939_v47, %v17654_v26  ;;  %v13580_v38 = vadd.f32 %v3938_v45, %v17655_v48  ;;  %v17658_v45 = vld [vmem:[#allocation17_spill] sm:$0xff] }
 0x41c   : > { %v3689_v0 = vpop.permute.xlu1 %3688  ;;  %v3685_v8 = vpop.permute.xlu0 %3684  ;;  %v4404_v48 = vrot.slane %v17658_v45, %v12640_v42 }
 0x41d   : > { %17656 = vst [vmem:[#allocation23_spill] sm:$0xff] %v13580_v38  ;;  %v3941_v57 = vmul.f32 %v3875_v56, %v3689_v0  ;;  %v3940_v53 = vmul.f32 %v3875_v56, %v3685_v8  ;;  %v17661_v8 = vld [vmem:[#allocation57_spill] sm:$0xff] }
 0x41e   : > { %v4420_v32 = vrot.slane %v4404_v48, %v12640_v42 }
 0x41f   : > { %v13583_v31 = vadd.f32 %v3941_v57, %v13377_v59  ;;  %v13586_v52 = vadd.f32 %v3940_v53, %v17657_v25  ;;  %v3883_v59 = vrot.slane %v3819_v12, %v12378_v33  ;;  %v4412_v53 = vcombine.high %v4404_v48, %v4404_v48 }
 0x420   : > { %v3700_v63 = vpop.permute.xlu1 %3699  ;;  %v3696_v34 = vpop.permute.xlu0 %3695 }
 0x421   : > { %v3943_v47 = vmul.f32 %v3879_v22, %v3700_v63  ;;  %v3942_v26 = vmul.f32 %v3879_v22, %v3696_v34 }
 0x423   : > { %v13592_v38 = vadd.f32 %v3943_v47, %v17659_v18  ;;  %v13595_v56 = vadd.f32 %v3942_v26, %v17661_v8  ;;  %v4434_v26 = vrot.slane %v4412_v53, %v12640_v42  ;;  %v4498_v8 = vrot.slane %v4420_v32, %v12378_v33 }
 0x424   : > { %v3711_v0 = vpop.permute.xlu1 %3710  ;;  %v3704_v57 = vpop.permute.xlu0 %3703 }
 0x425   : > { %17660 = vst [vmem:[#allocation80_spill] sm:$0xff] %v13592_v38  ;;  %17662 = vst [vmem:[#allocation64_spill] sm:$0xff] %v13595_v56  ;;  %v3945_v58 = vmul.f32 %v3883_v59, %v3711_v0  ;;  %v3944_v25 = vmul.f32 %v3879_v22, %v3704_v57 }
 0x427   : > { %v13600_v63 = vadd.f32 %v3945_v58, %v13396_v1  ;;  %v13603_v34 = vadd.f32 %v3944_v25, %v13399_v46  ;;  %v4502_v46 = vrot.slane %v4434_v26, %v12378_v33  ;;  %v17666_v25 = vld [vmem:[#allocation5_spill] sm:$0xff] }
 0x428   : > { %v3719_v18 = vpop.permute.xlu1 %3718  ;;  %v3715_v47 = vpop.permute.xlu0 %3714 }
 0x429   : > { %17663 = vst [vmem:[#allocation65_spill] sm:$0xff] %v13600_v63  ;;  %17664 = vst [vmem:[#allocation66_spill] sm:$0xff] %v13603_v34  ;;  %v3947_v12 = vmul.f32 %v3883_v59, %v3719_v18  ;;  %v3946_v56 = vmul.f32 %v3883_v59, %v3715_v47  ;;  %v4442_v47 = vcombine.high %v4420_v32, %v4420_v32 }
 0x42a   : > { %v4444_v32 = vcombine.high %v4434_v26, %v4434_v26 }
 0x42b   : > { %v13608_v38 = vadd.f32 %v3947_v12, %v13406_v3  ;;  %v13611_v48 = vadd.f32 %v3946_v56, %v13409_v17  ;;  %v17667_v56 = vld [vmem:[#allocation58_spill] sm:$0xff] }
 0x42c   : > { %v4165_v22 = vpop.permute.xlu1 %4164  ;;  %v4161_v1 = vpop.permute.xlu0 %4160 }
 0x42d   : > { %17665 = vst [vmem:[#allocation67_spill] sm:$0xff] %v13611_v48  ;;  %v4576_v0 = vmul.f32 %v4498_v8, %v4165_v22  ;;  %v4575_v57 = vmul.f32 %v4498_v8, %v4161_v1 }
 0x42f   : > { %v4624_v58 = vadd.f32 %v4576_v0, %v13412_v40  ;;  %v4623_v53 = vadd.f32 %v4575_v57, %v17666_v25 }
 0x430   : > { %v4176_v34 = vpop.permute.xlu1 %4175  ;;  %v4169_v63 = vpop.permute.xlu0 %4168 }
 0x431   : > { %v4578_v59 = vmul.f32 %v4502_v46, %v4176_v34  ;;  %v4577_v18 = vmul.f32 %v4498_v8, %v4169_v63  ;;  %v13616_v3 = vmul.f32 0.4082483, %v4623_v53  ;;  %v13624_v25 = vmul.f32 0.4082483, %v4624_v58 }
 0x432   : > { %v4397_v63 = vcombine.high %v17658_v45, %v17658_v45  ;;  %v4506_v8 = vrot.slane %v4442_v47, %v12378_v33 }
 0x433   : > { %v4626_v17 = vadd.f32 %v4578_v59, %v13421_v21  ;;  %v4625_v12 = vadd.f32 %v4577_v18, %v17667_v56  ;;  %v4720_v22 = vsel %vm4719_vm4, %v13616_v3, -inf  ;;  %v4723_v45 = vsel %vm4719_vm4, %v13624_v25, -inf }
 0x434   : > { %v4184_v1 = vpop.permute.xlu1 %4183  ;;  %v4180_v48 = vpop.permute.xlu0 %4179  ;;  %v4510_v56 = vrot.slane %v4444_v32, %v12378_v33 }
 0x435   : > { %v4580_v40 = vmul.f32 %v4502_v46, %v4184_v1  ;;  %v4579_v0 = vmul.f32 %v4502_v46, %v4180_v48  ;;  %4721 = vmax.xlane.f32.xlu0 %v4720_v22  ;;  %v13622_v57 = vmul.f32 0.4082483, %v4625_v12  ;;  %v13633_v46 = vmul.f32 0.4082483, %v4626_v17 }
 0x437   : > { %v4628_v21 = vadd.f32 %v4580_v40, %v13431_v16  ;;  %v4627_v34 = vadd.f32 %v4579_v0, %v13434_v41  ;;  %v4726_v53 = vsel %vm4719_vm4, %v13622_v57, -inf  ;;  %v4411_v16 = vrot.slane %v4397_v63, %v12640_v42 }
 0x438   : > { %v4195_v59 = vpop.permute.xlu1 %4194  ;;  %v4191_v48 = vpop.permute.xlu0 %4190  ;;  %v4729_v22 = vsel %vm4719_vm4, %v13633_v46, -inf }
 0x439   : > { %v4582_v18 = vmul.f32 %v4506_v8, %v4195_v59  ;;  %v4581_v58 = vmul.f32 %v4506_v8, %v4191_v48  ;;  %4727 = vmax.xlane.f32.xlu0 %v4726_v53  ;;  %v13637_v26 = vmul.f32 0.4082483, %v4627_v34  ;;  %v13645_v1 = vmul.f32 0.4082483, %v4628_v21 }
 0x43a   : > { %4724 = vmax.xlane.f32.xlu1 %v4723_v45 }
 0x43b   : > { %v4630_v41 = vadd.f32 %v4582_v18, %v13439_v29  ;;  %v4629_v47 = vadd.f32 %v4581_v58, %v13442_v61  ;;  %v4732_v34 = vsel %vm4719_vm4, %v13637_v26, -inf  ;;  %v4413_v29 = vcombine.high %v4411_v16, %v4411_v16 }
 0x43c   : > { %v4206_v12 = vpop.permute.xlu1 %4205  ;;  %v4199_v17 = vpop.permute.xlu0 %4198  ;;  %v4427_v61 = vrot.slane %v4411_v16, %v12640_v42  ;;  %v4735_v21 = vsel %vm4719_vm4, %v13645_v1, -inf }
 0x43d   : > { %v4584_v40 = vmul.f32 %v4510_v56, %v4206_v12  ;;  %v4583_v0 = vmul.f32 %v4506_v8, %v4199_v17  ;;  %4730 = vmax.xlane.f32.xlu0 %v4729_v22  ;;  %v13649_v63 = vmul.f32 0.4082483, %v4629_v47  ;;  %v13656_v8 = vmul.f32 0.4082483, %v4630_v41 }
 0x43e   : > { %4733 = vmax.xlane.f32.xlu1 %v4732_v34  ;;  %v4514_v12 = vrot.slane %v4427_v61, %v12378_v33 }
 0x43f   : > { %v4632_v32 = vadd.f32 %v4584_v40, %v13449_v24  ;;  %v4631_v53 = vadd.f32 %v4583_v0, %v13452_v15  ;;  %v4738_v45 = vsel %vm4719_vm4, %v13649_v63, -inf  ;;  %v4441_v24 = vrot.slane %v4413_v29, %v12640_v42 }
 0x440   : > { %v4214_v59 = vpop.permute.xlu1 %4213  ;;  %v4210_v48 = vpop.permute.xlu0 %4209 }
 0x441   : > { %v4586_v18 = vmul.f32 %v4510_v56, %v4214_v59  ;;  %v4585_v58 = vmul.f32 %v4510_v56, %v4210_v48  ;;  %4736 = vmax.xlane.f32.xlu0 %v4735_v21  ;;  %v13660_v47 = vmul.f32 0.4082483, %v4631_v53  ;;  %v4741_v56 = vsel %vm4719_vm4, %v13656_v8, -inf }
 0x442   : > { %4739 = vmax.xlane.f32.xlu1 %v4738_v45  ;;  %v13668_v22 = vmul.f32 0.4082483, %v4632_v32  ;;  %v4518_v53 = vrot.slane %v4441_v24, %v12378_v33 }
 0x443   : > { %v4634_v15 = vadd.f32 %v4586_v18, %v13458_v37  ;;  %v4633_v16 = vadd.f32 %v4585_v58, %v13461_v44  ;;  %v4744_v34 = vsel %vm4719_vm4, %v13660_v47, -inf }
 0x444   : > { %v4225_v17 = vpop.permute.xlu1 %4224  ;;  %v4221_v41 = vpop.permute.xlu0 %4220  ;;  %v4747_v32 = vsel %vm4719_vm4, %v13668_v22, -inf }
 0x445   : > { %v4588_v40 = vmul.f32 %v4514_v12, %v4225_v17  ;;  %v4587_v0 = vmul.f32 %v4514_v12, %v4221_v41  ;;  %4742 = vmax.xlane.f32.xlu0 %v4741_v56  ;;  %v13672_v29 = vmul.f32 0.4082483, %v4633_v16  ;;  %v13679_v21 = vmul.f32 0.4082483, %v4634_v15 }
 0x446   : > { %4745 = vmax.xlane.f32.xlu1 %v4744_v34 }
 0x447   : > { %v4636_v37 = vadd.f32 %v4588_v40, %v13465_v19  ;;  %v4635_v44 = vadd.f32 %v4587_v0, %v13468_v49  ;;  %v4750_v45 = vsel %vm4719_vm4, %v13672_v29, -inf  ;;  %v4443_v19 = vcombine.high %v4427_v61, %v4427_v61 }
 0x448   : > { %v4236_v59 = vpop.permute.xlu1 %4235  ;;  %v4229_v48 = vpop.permute.xlu0 %4228  ;;  %v4753_v15 = vsel %vm4719_vm4, %v13679_v21, -inf }
 0x449   : > { %v4590_v18 = vmul.f32 %v4518_v53, %v4236_v59  ;;  %v4589_v58 = vmul.f32 %v4514_v12, %v4229_v48  ;;  %4748 = vmax.xlane.f32.xlu0 %v4747_v32  ;;  %v13683_v16 = vmul.f32 0.4082483, %v4635_v44  ;;  %v13689_v40 = vmul.f32 0.4082483, %v4636_v37 }
 0x44a   : > { %4751 = vmax.xlane.f32.xlu1 %v4750_v45  ;;  %v4522_v61 = vrot.slane %v4443_v19, %v12378_v33  ;;  %v4445_v59 = vcombine.high %v4441_v24, %v4441_v24 }
 0x44b   : > { %v4638_v49 = vadd.f32 %v4590_v18, %v13474_v11  ;;  %v4637_v17 = vadd.f32 %v4589_v58, %v13477_v4  ;;  %v4756_v34 = vsel %vm4719_vm4, %v13683_v16, -inf  ;;  %v4759_v37 = vsel %vm4719_vm4, %v13689_v40, -inf }
 0x44c   : > { %v4244_v41 = vpop.permute.xlu1 %4243  ;;  %v4240_v56 = vpop.permute.xlu0 %4239 }
 0x44d   : > { %v4592_v12 = vmul.f32 %v4518_v53, %v4244_v41  ;;  %v4591_v0 = vmul.f32 %v4518_v53, %v4240_v56  ;;  %4754 = vmax.xlane.f32.xlu0 %v4753_v15  ;;  %v13693_v44 = vmul.f32 0.4082483, %v4637_v17  ;;  %v13700_v53 = vmul.f32 0.4082483, %v4638_v49 }
 0x44e   : > { %4757 = vmax.xlane.f32.xlu1 %v4756_v34  ;;  %v4526_v41 = vrot.slane %v4445_v59, %v12378_v33 }
 0x44f   : > { %v4640_v11 = vadd.f32 %v4592_v12, %v13482_v6  ;;  %v4639_v4 = vadd.f32 %v4591_v0, %v13485_v43  ;;  %v4762_v45 = vsel %vm4719_vm4, %v13693_v44, -inf  ;;  %v17668_v6 = vld [vmem:[#allocation81_spill] sm:$0xff]  ;;  %v4765_v15 = vsel %vm4719_vm4, %v13700_v53, -inf }
 0x450   : > { %v4255_v48 = vpop.permute.xlu1 %4254  ;;  %v4251_v32 = vpop.permute.xlu0 %4250  ;;  %v4453_v43 = vrot.slane %v17668_v6, %v12640_v42 }
 0x451   : > { %v4594_v18 = vmul.f32 %v4522_v61, %v4255_v48  ;;  %v4593_v58 = vmul.f32 %v4522_v61, %v4251_v32  ;;  %4760 = vmax.xlane.f32.xlu0 %v4759_v37  ;;  %v13704_v17 = vmul.f32 0.4082483, %v4639_v4  ;;  %v13713_v12 = vmul.f32 0.4082483, %v4640_v11 }
 0x452   : > { %4763 = vmax.xlane.f32.xlu1 %v4762_v45 }
 0x453   : > { %v4642_v24 = vadd.f32 %v4594_v18, %v13491_v14  ;;  %v4641_v19 = vadd.f32 %v4593_v58, %v13494_v23  ;;  %v4768_v4 = vsel %vm4719_vm4, %v13704_v17, -inf  ;;  %v4461_v14 = vcombine.high %v4453_v43, %v4453_v43 }
 0x454   : > { %v4266_v49 = vpop.permute.xlu1 %4265  ;;  %v4259_v56 = vpop.permute.xlu0 %4258  ;;  %v4469_v23 = vrot.slane %v4453_v43, %v12640_v42  ;;  %v4771_v11 = vsel %vm4719_vm4, %v13713_v12, -inf }
 0x455   : > { %v4596_v0 = vmul.f32 %v4526_v41, %v4266_v49  ;;  %v4595_v34 = vmul.f32 %v4522_v61, %v4259_v56  ;;  %4766 = vmax.xlane.f32.xlu0 %v4765_v15  ;;  %v13717_v48 = vmul.f32 0.4082483, %v4641_v19  ;;  %v13724_v61 = vmul.f32 0.4082483, %v4642_v24 }
 0x456   : > { %4769 = vmax.xlane.f32.xlu1 %v4768_v4 }
 0x457   : > { %v4644_v59 = vadd.f32 %v4596_v0, %v13501_v30  ;;  %v4643_v32 = vadd.f32 %v4595_v34, %v13504_v5  ;;  %v4774_v19 = vsel %vm4719_vm4, %v13717_v48, -inf  ;;  %v4483_v30 = vrot.slane %v4461_v14, %v12640_v42 }
 0x458   : > { %v4274_v37 = vpop.permute.xlu1 %4273  ;;  %v4270_v18 = vpop.permute.xlu0 %4269  ;;  %v4530_v5 = vrot.slane %v4469_v23, %v12378_v33 }
 0x459   : > { %v4598_v58 = vmul.f32 %v4526_v41, %v4274_v37  ;;  %v4597_v45 = vmul.f32 %v4526_v41, %v4270_v18  ;;  %4772 = vmax.xlane.f32.xlu0 %v4771_v11  ;;  %v13728_v49 = vmul.f32 0.4082483, %v4643_v32  ;;  %v4777_v41 = vsel %vm4719_vm4, %v13724_v61, -inf }
 0x45a   : > { %4775 = vmax.xlane.f32.xlu1 %v4774_v19  ;;  %v13736_v0 = vmul.f32 0.4082483, %v4644_v59  ;;  %v4534_v37 = vrot.slane %v4483_v30, %v12378_v33 }
 0x45b   : > { %v4646_v43 = vadd.f32 %v4598_v58, %v13511_v35  ;;  %v4645_v56 = vadd.f32 %v4597_v45, %v13514_v9  ;;  %v4780_v32 = vsel %vm4719_vm4, %v13728_v49, -inf }
 0x45c   : > { %v4285_v15 = vpop.permute.xlu1 %4284  ;;  %v4281_v24 = vpop.permute.xlu0 %4280  ;;  %v4783_v59 = vsel %vm4719_vm4, %v13736_v0, -inf }
 0x45d   : > { %v4600_v34 = vmul.f32 %v4530_v5, %v4285_v15  ;;  %v4599_v4 = vmul.f32 %v4530_v5, %v4281_v24  ;;  %4778 = vmax.xlane.f32.xlu0 %v4777_v41  ;;  %v13740_v14 = vmul.f32 0.4082483, %v4645_v56  ;;  %v13747_v58 = vmul.f32 0.4082483, %v4646_v43 }
 0x45e   : > { %4781 = vmax.xlane.f32.xlu1 %v4780_v32 }
 0x45f   : > { %v4648_v35 = vadd.f32 %v4600_v34, %v13517_v55  ;;  %v4647_v9 = vadd.f32 %v4599_v4, %v13520_v36  ;;  %v4786_v56 = vsel %vm4719_vm4, %v13740_v14, -inf  ;;  %v4491_v55 = vcombine.high %v4469_v23, %v4469_v23 }
 0x460   : > { %v4296_v18 = vpop.permute.xlu1 %4295  ;;  %v4289_v11 = vpop.permute.xlu0 %4288  ;;  %v4789_v43 = vsel %vm4719_vm4, %v13747_v58, -inf }
 0x461   : > { %v4602_v45 = vmul.f32 %v4534_v37, %v4296_v18  ;;  %v4601_v19 = vmul.f32 %v4530_v5, %v4289_v11  ;;  %4784 = vmax.xlane.f32.xlu0 %v4783_v59  ;;  %v13751_v15 = vmul.f32 0.4082483, %v4647_v9  ;;  %v13757_v4 = vmul.f32 0.4082483, %v4648_v35 }
 0x462   : > { %4787 = vmax.xlane.f32.xlu1 %v4786_v56  ;;  %v4538_v35 = vrot.slane %v4491_v55, %v12378_v33 }
 0x463   : > { %v4650_v36 = vadd.f32 %v4602_v45, %v13526_v7  ;;  %v4649_v24 = vadd.f32 %v4601_v19, %v13529_v50  ;;  %v4792_v9 = vsel %vm4719_vm4, %v13751_v15, -inf  ;;  %v4446_v7 = vcombine.high %v17668_v6, %v17668_v6 }
 0x464   : > { %v4304_v41 = vpop.permute.xlu1 %4303  ;;  %v4300_v34 = vpop.permute.xlu0 %4299  ;;  %v4493_v50 = vcombine.high %v4483_v30, %v4483_v30 }
 0x465   : > { %v4604_v5 = vmul.f32 %v4534_v37, %v4304_v41  ;;  %v4603_v32 = vmul.f32 %v4534_v37, %v4300_v34  ;;  %4790 = vmax.xlane.f32.xlu0 %v4789_v43  ;;  %v13761_v18 = vmul.f32 0.4082483, %v4649_v24  ;;  %v4795_v37 = vsel %vm4719_vm4, %v13757_v4, -inf }
 0x466   : > { %4793 = vmax.xlane.f32.xlu1 %v4792_v9  ;;  %v13770_v19 = vmul.f32 0.4082483, %v4650_v36  ;;  %v4542_v41 = vrot.slane %v4493_v50, %v12378_v33 }
 0x467   : > { %v4652_v23 = vadd.f32 %v4604_v5, %v13536_v10  ;;  %v4651_v11 = vadd.f32 %v4603_v32, %v13539_v20  ;;  %v4798_v6 = vsel %vm4719_vm4, %v13761_v18, -inf  ;;  %v4460_v10 = vrot.slane %v4446_v7, %v12640_v42 }
 0x468   : > { %v4315_v59 = vpop.permute.xlu1 %4314  ;;  %v4311_v45 = vpop.permute.xlu0 %4310  ;;  %v4801_v43 = vsel %vm4719_vm4, %v13770_v19, -inf }
 0x469   : > { %v4606_v56 = vmul.f32 %v4538_v35, %v4315_v59  ;;  %v4605_v24 = vmul.f32 %v4538_v35, %v4311_v45  ;;  %4796 = vmax.xlane.f32.xlu0 %v4795_v37  ;;  %v13774_v30 = vmul.f32 0.4082483, %v4651_v11  ;;  %v13782_v5 = vmul.f32 0.4082483, %v4652_v23 }
 0x46a   : > { %4799 = vmax.xlane.f32.xlu1 %v4798_v6 }
 0x46b   : > { %v4654_v20 = vadd.f32 %v4606_v56, %v13544_v27  ;;  %v4653_v55 = vadd.f32 %v4605_v24, %v13547_v28  ;;  %v4804_v11 = vsel %vm4719_vm4, %v13774_v30, -inf  ;;  %v4462_v27 = vcombine.high %v4460_v10, %v4460_v10 }
 0x46c   : > { %v4326_v34 = vpop.permute.xlu1 %4325  ;;  %v4319_v36 = vpop.permute.xlu0 %4318  ;;  %v4476_v28 = vrot.slane %v4460_v10, %v12640_v42  ;;  %v4807_v23 = vsel %vm4719_vm4, %v13782_v5, -inf }
 0x46d   : > { %v4608_v32 = vmul.f32 %v4542_v41, %v4326_v34  ;;  %v4607_v9 = vmul.f32 %v4538_v35, %v4319_v36  ;;  %4802 = vmax.xlane.f32.xlu0 %v4801_v43  ;;  %v13786_v7 = vmul.f32 0.4082483, %v4653_v55  ;;  %v13793_v35 = vmul.f32 0.4082483, %v4654_v20 }
 0x46e   : > { %4805 = vmax.xlane.f32.xlu1 %v4804_v11  ;;  %v4546_v34 = vrot.slane %v4476_v28, %v12378_v33 }
 0x46f   : > { %v4656_v50 = vadd.f32 %v4608_v32, %v13554_v60  ;;  %v4655_v59 = vadd.f32 %v4607_v9, %v13557_v2  ;;  %v4810_v6 = vsel %vm4719_vm4, %v13786_v7, -inf  ;;  %v4490_v60 = vrot.slane %v4462_v27, %v12640_v42 }
 0x470   : > { %v4334_v45 = vpop.permute.xlu1 %4333  ;;  %v4330_v37 = vpop.permute.xlu0 %4329 }
 0x471   : > { %v4610_v56 = vmul.f32 %v4542_v41, %v4334_v45  ;;  %v4609_v24 = vmul.f32 %v4542_v41, %v4330_v37  ;;  %4808 = vmax.xlane.f32.xlu0 %v4807_v23  ;;  %v13797_v55 = vmul.f32 0.4082483, %v4655_v59  ;;  %v4813_v41 = vsel %vm4719_vm4, %v13793_v35, -inf }
 0x472   : > { %4811 = vmax.xlane.f32.xlu1 %v4810_v6  ;;  %v13805_v43 = vmul.f32 0.4082483, %v4656_v50  ;;  %v4550_v59 = vrot.slane %v4490_v60, %v12378_v33 }
 0x473   : > { %v4658_v2 = vadd.f32 %v4610_v56, %v13563_v51  ;;  %v4657_v10 = vadd.f32 %v4609_v24, %v13566_v39  ;;  %v4816_v11 = vsel %vm4719_vm4, %v13797_v55, -inf }
 0x474   : > { %v4345_v36 = vpop.permute.xlu1 %4344  ;;  %v4341_v20 = vpop.permute.xlu0 %4340  ;;  %v4819_v50 = vsel %vm4719_vm4, %v13805_v43, -inf }
 0x475   : > { %v4612_v32 = vmul.f32 %v4546_v34, %v4345_v36  ;;  %v4611_v9 = vmul.f32 %v4546_v34, %v4341_v20  ;;  %4814 = vmax.xlane.f32.xlu0 %v4813_v41  ;;  %v13809_v27 = vmul.f32 0.4082483, %v4657_v10  ;;  %v13816_v23 = vmul.f32 0.4082483, %v4658_v2  ;;  %v17669_v36 = vld [vmem:[#allocation23_spill] sm:$0xff] }
 0x476   : > { %4817 = vmax.xlane.f32.xlu1 %v4816_v11 }
 0x477   : > { %v4660_v51 = vadd.f32 %v4612_v32, %v13570_v13  ;;  %v4659_v39 = vadd.f32 %v4611_v9, %v13573_v54  ;;  %v4822_v6 = vsel %vm4719_vm4, %v13809_v27, -inf  ;;  %v4492_v13 = vcombine.high %v4476_v28, %v4476_v28 }
 0x478   : > { %v4356_v45 = vpop.permute.xlu1 %4355  ;;  %v4349_v37 = vpop.permute.xlu0 %4348  ;;  %v4825_v2 = vsel %vm4719_vm4, %v13816_v23, -inf }
 0x479   : > { %v4614_v56 = vmul.f32 %v4550_v59, %v4356_v45  ;;  %v4613_v24 = vmul.f32 %v4546_v34, %v4349_v37  ;;  %4820 = vmax.xlane.f32.xlu0 %v4819_v50  ;;  %v13820_v10 = vmul.f32 0.4082483, %v4659_v39  ;;  %v13826_v9 = vmul.f32 0.4082483, %v4660_v51 }
 0x47a   : > { %4823 = vmax.xlane.f32.xlu1 %v4822_v6  ;;  %v4554_v37 = vrot.slane %v4492_v13, %v12378_v33  ;;  %v4494_v50 = vcombine.high %v4490_v60, %v4490_v60  ;;  %v17671_v13 = vld [vmem:[#allocation64_spill] sm:$0xff] }
 0x47b   : > { %v4662_v54 = vadd.f32 %v4614_v56, %v13577_v62  ;;  %v4661_v20 = vadd.f32 %v4613_v24, %v17669_v36  ;;  %v4828_v39 = vsel %vm4719_vm4, %v13820_v10, -inf  ;;  %v4831_v51 = vsel %vm4719_vm4, %v13826_v9, -inf }
 0x47c   : > { %v4364_v41 = vpop.permute.xlu1 %4363  ;;  %v4360_v32 = vpop.permute.xlu0 %4359 }
 0x47d   : > { %v4616_v34 = vmul.f32 %v4550_v59, %v4364_v41  ;;  %v4615_v11 = vmul.f32 %v4550_v59, %v4360_v32  ;;  %4826 = vmax.xlane.f32.xlu0 %v4825_v2  ;;  %v13830_v45 = vmul.f32 0.4082483, %v4661_v20  ;;  %v13837_v59 = vmul.f32 0.4082483, %v4662_v54 }
 0x47e   : > { %4829 = vmax.xlane.f32.xlu1 %v4828_v39  ;;  %v4558_v32 = vrot.slane %v4494_v50, %v12378_v33 }
 0x47f   : > { %v4664_v62 = vadd.f32 %v4616_v34, %v13583_v31  ;;  %v4663_v28 = vadd.f32 %v4615_v11, %v13586_v52  ;;  %v4834_v20 = vsel %vm4719_vm4, %v13830_v45, -inf  ;;  %v17670_v52 = vld [vmem:[#allocation80_spill] sm:$0xff]  ;;  %v4837_v54 = vsel %vm4719_vm4, %v13837_v59, -inf }
 0x480   : > { %v4375_v56 = vpop.permute.xlu1 %4374  ;;  %v4371_v24 = vpop.permute.xlu0 %4370 }
 0x481   : > { %v4618_v6 = vmul.f32 %v4554_v37, %v4375_v56  ;;  %v4617_v36 = vmul.f32 %v4554_v37, %v4371_v24  ;;  %4832 = vmax.xlane.f32.xlu0 %v4831_v51  ;;  %v13841_v41 = vmul.f32 0.4082483, %v4663_v28  ;;  %v13848_v11 = vmul.f32 0.4082483, %v4664_v62  ;;  %v17672_v51 = vld [vmem:[#allocation65_spill] sm:$0xff] }
 0x482   : > { %4835 = vmax.xlane.f32.xlu1 %v4834_v20 }
 0x483   : > { %v4666_v31 = vadd.f32 %v4618_v6, %v17670_v52  ;;  %v4665_v60 = vadd.f32 %v4617_v36, %v17671_v13  ;;  %v4840_v28 = vsel %vm4719_vm4, %v13841_v41, -inf  ;;  %v17673_v36 = vld [vmem:[#allocation66_spill] sm:$0xff]  ;;  %v4843_v13 = vsel %vm4719_vm4, %v13848_v11, -inf }
 0x484   : > { %v4386_v2 = vpop.permute.xlu1 %4385  ;;  %v4379_v34 = vpop.permute.xlu0 %4378 }
 0x485   : > { %v4620_v39 = vmul.f32 %v4558_v32, %v4386_v2  ;;  %v4619_v56 = vmul.f32 %v4554_v37, %v4379_v34  ;;  %4838 = vmax.xlane.f32.xlu0 %v4837_v54  ;;  %v13852_v24 = vmul.f32 0.4082483, %v4665_v60  ;;  %v13858_v62 = vmul.f32 0.4082483, %v4666_v31 }
 0x486   : > { %4841 = vmax.xlane.f32.xlu1 %v4840_v28 }
 0x487   : > { %v4668_v6 = vadd.f32 %v4620_v39, %v17672_v51  ;;  %v4667_v50 = vadd.f32 %v4619_v56, %v17673_v36  ;;  %v4846_v34 = vsel %vm4719_vm4, %v13852_v24, -inf  ;;  %v17674_v39 = vld [vmem:[#allocation67_spill] sm:$0xff]  ;;  %v4849_v28 = vsel %vm4719_vm4, %v13858_v62, -inf }
 0x488   : > { %v4394_v20 = vpop.permute.xlu1 %4393  ;;  %v4390_v52 = vpop.permute.xlu0 %4389 }
 0x489   : > { %v4622_v2 = vmul.f32 %v4558_v32, %v4394_v20  ;;  %v4621_v37 = vmul.f32 %v4558_v32, %v4390_v52  ;;  %4844 = vmax.xlane.f32.xlu0 %v4843_v13  ;;  %v13862_v60 = vmul.f32 0.4082483, %v4667_v50  ;;  %v13868_v51 = vmul.f32 0.4082483, %v4668_v6 }
 0x48a   : > { %4847 = vmax.xlane.f32.xlu1 %v4846_v34 }
 0x48b   : > { %v4670_v54 = vadd.f32 %v4622_v2, %v13608_v38  ;;  %v4669_v56 = vadd.f32 %v4621_v37, %v17674_v39  ;;  %v4852_v31 = vsel %vm4719_vm4, %v13862_v60, -inf  ;;  %v4855_v36 = vsel %vm4719_vm4, %v13868_v51, -inf }
 0x48d   : > { %4850 = vmax.xlane.f32.xlu0 %v4849_v28  ;;  %v13872_v32 = vmul.f32 0.4082483, %v4669_v56  ;;  %v13876_v50 = vmul.f32 0.4082483, %v4670_v54 }
 0x48e   : > { %4853 = vmax.xlane.f32.xlu1 %v4852_v31 }
 0x48f   : > { %v4858_v38 = vsel %vm4719_vm4, %v13872_v32, -inf  ;;  %v4861_v6 = vsel %vm4719_vm4, %v13876_v50, -inf }
 0x491   : > { %4856 = vmax.xlane.f32.xlu0 %v4855_v36 }
 0x492   : > { %4859 = vmax.xlane.f32.xlu1 %v4858_v38 }
 0x495   : > { %4862 = vmax.xlane.f32.xlu0 %v4861_v6 }
 0x4be   : > { %v4722_v20 = vpop.xlane.xlu0 %4721 }
 0x4bf   : > { %v4864_v52 = vsub.f32 %v13616_v3, %v4722_v20 }
 0x4c1   : > { %v4912_v13 = vmul.f32 1.442695, %v4864_v52 }
 0x4c2   : > { %v4728_v2 = vpop.xlane.xlu0 %4727 }
 0x4c3   : > { %11670 = vpow2.f32 %v4912_v13  ;;  %v4866_v37 = vsub.f32 %v13622_v57, %v4728_v2  ;;  %v4725_v34 = vpop.xlane.xlu1 %4724 }
 0x4c4   : > { %v4865_v54 = vsub.f32 %v13624_v25, %v4725_v34 }
 0x4c5   : > { %v4916_v39 = vmul.f32 1.442695, %v4866_v37 }
 0x4c6   : > { %v4914_v56 = vmul.f32 1.442695, %v4865_v54  ;;  %v4731_v28 = vpop.xlane.xlu0 %4730 }
 0x4c7   : > { %11672 = vpow2.f32 %v4916_v39  ;;  %v4867_v31 = vsub.f32 %v13633_v46, %v4731_v28  ;;  %v4734_v36 = vpop.xlane.xlu1 %4733 }
 0x4c8   : > { %11674 = vpow2.f32 %v4914_v56  ;;  %v4868_v38 = vsub.f32 %v13637_v26, %v4734_v36 }
 0x4c9   : > { %v4918_v6 = vmul.f32 1.442695, %v4867_v31 }
 0x4ca   : > { %v4920_v3 = vmul.f32 1.442695, %v4868_v38  ;;  %v4737_v20 = vpop.xlane.xlu0 %4736 }
 0x4cb   : > { %11676 = vpow2.f32 %v4918_v6  ;;  %v4869_v52 = vsub.f32 %v13645_v1, %v4737_v20  ;;  %v4740_v57 = vpop.xlane.xlu1 %4739 }
 0x4cc   : > { %11678 = vpow2.f32 %v4920_v3  ;;  %v4870_v25 = vsub.f32 %v13649_v63, %v4740_v57 }
 0x4cd   : > { %v4922_v13 = vmul.f32 1.442695, %v4869_v52 }
 0x4ce   : > { %v4924_v2 = vmul.f32 1.442695, %v4870_v25  ;;  %v4743_v37 = vpop.xlane.xlu0 %4742 }
 0x4cf   : > { %11680 = vpow2.f32 %v4922_v13  ;;  %v4871_v46 = vsub.f32 %v13656_v8, %v4743_v37  ;;  %v4746_v34 = vpop.xlane.xlu1 %4745 }
 0x4d0   : > { %v13890_v54 = vpop.eup %11670  ;;  %11682 = vpow2.f32 %v4924_v2  ;;  %v4872_v26 = vsub.f32 %v13660_v47, %v4746_v34 }
 0x4d1   : > { %v4926_v39 = vmul.f32 1.442695, %v4871_v46  ;;  %v5008_v1 = vsel %vm4719_vm4, %v13890_v54, 0.0 }
 0x4d2   : > { %v4928_v56 = vmul.f32 1.442695, %v4872_v26  ;;  %v4749_v28 = vpop.xlane.xlu0 %4748  ;;  %5009 = vadd.xlane.f32.xlu1 %v5008_v1 }
 0x4d3   : > { %11684 = vpow2.f32 %v4926_v39  ;;  %v4873_v63 = vsub.f32 %v13668_v22, %v4749_v28  ;;  %v4752_v31 = vpop.xlane.xlu1 %4751 }
 0x4d4   : > { %v13896_v36 = vpop.eup %11672  ;;  %11686 = vpow2.f32 %v4928_v56  ;;  %v4874_v8 = vsub.f32 %v13672_v29, %v4752_v31 }
 0x4d5   : > { %v13899_v38 = vpop.eup %11674  ;;  %v4930_v6 = vmul.f32 1.442695, %v4873_v63  ;;  %v5014_v47 = vsel %vm4719_vm4, %v13896_v36, 0.0 }
 0x4d6   : > { %v4932_v3 = vmul.f32 1.442695, %v4874_v8  ;;  %v4755_v20 = vpop.xlane.xlu0 %4754  ;;  %5015 = vadd.xlane.f32.xlu1 %v5014_v47  ;;  %v5011_v52 = vsel %vm4719_vm4, %v13899_v38, 0.0 }
 0x4d7   : > { %11688 = vpow2.f32 %v4930_v6  ;;  %v4875_v22 = vsub.f32 %v13679_v21, %v4755_v20  ;;  %v4758_v57 = vpop.xlane.xlu1 %4757  ;;  %5012 = vadd.xlane.f32.xlu0 %v5011_v52 }
 0x4d8   : > { %v13906_v25 = vpop.eup %11676  ;;  %11690 = vpow2.f32 %v4932_v3  ;;  %v4876_v29 = vsub.f32 %v13683_v16, %v4758_v57 }
 0x4d9   : > { %v13909_v13 = vpop.eup %11678  ;;  %v4934_v2 = vmul.f32 1.442695, %v4875_v22  ;;  %v5017_v37 = vsel %vm4719_vm4, %v13906_v25, 0.0 }
 0x4da   : > { %v4936_v46 = vmul.f32 1.442695, %v4876_v29  ;;  %v4761_v34 = vpop.xlane.xlu0 %4760  ;;  %v5020_v26 = vsel %vm4719_vm4, %v13909_v13, 0.0 }
 0x4db   : > { %11692 = vpow2.f32 %v4934_v2  ;;  %v4877_v21 = vsub.f32 %v13689_v40, %v4761_v34  ;;  %v4764_v39 = vpop.xlane.xlu1 %4763  ;;  %5021 = vadd.xlane.f32.xlu1 %v5020_v26  ;;  %5018 = vadd.xlane.f32.xlu0 %v5017_v37 }
 0x4dc   : > { %v13916_v1 = vpop.eup %11680  ;;  %11694 = vpow2.f32 %v4936_v46  ;;  %v4878_v16 = vsub.f32 %v13693_v44, %v4764_v39 }
 0x4dd   : > { %v13919_v56 = vpop.eup %11682  ;;  %v4938_v28 = vmul.f32 1.442695, %v4877_v21  ;;  %v5023_v63 = vsel %vm4719_vm4, %v13916_v1, 0.0 }
 0x4de   : > { %v4940_v31 = vmul.f32 1.442695, %v4878_v16  ;;  %v4767_v8 = vpop.xlane.xlu0 %4766  ;;  %v5026_v6 = vsel %vm4719_vm4, %v13919_v56, 0.0 }
 0x4df   : > { %11696 = vpow2.f32 %v4938_v28  ;;  %v4879_v40 = vsub.f32 %v13700_v53, %v4767_v8  ;;  %v4770_v47 = vpop.xlane.xlu1 %4769  ;;  %5027 = vadd.xlane.f32.xlu1 %v5026_v6  ;;  %5024 = vadd.xlane.f32.xlu0 %v5023_v63 }
 0x4e0   : > { %v13926_v3 = vpop.eup %11684  ;;  %11698 = vpow2.f32 %v4940_v31  ;;  %v4880_v44 = vsub.f32 %v13704_v17, %v4770_v47 }
 0x4e1   : > { %v13929_v20 = vpop.eup %11686  ;;  %v4942_v52 = vmul.f32 1.442695, %v4879_v40  ;;  %v5029_v22 = vsel %vm4719_vm4, %v13926_v3, 0.0 }
 0x4e2   : > { %v4944_v57 = vmul.f32 1.442695, %v4880_v44  ;;  %v4773_v29 = vpop.xlane.xlu0 %4772  ;;  %v5032_v2 = vsel %vm4719_vm4, %v13929_v20, 0.0 }
 0x4e3   : > { %11700 = vpow2.f32 %v4942_v52  ;;  %v4881_v53 = vsub.f32 %v13713_v12, %v4773_v29  ;;  %v4776_v37 = vpop.xlane.xlu1 %4775  ;;  %5033 = vadd.xlane.f32.xlu1 %v5032_v2  ;;  %5030 = vadd.xlane.f32.xlu0 %v5029_v22  ;;  %v11919_v29 = vmov 0  }
 0x4e4   : > { %v13936_v46 = vpop.eup %11688  ;;  %11702 = vpow2.f32 %v4944_v57  ;;  %v4882_v17 = vsub.f32 %v13717_v48, %v4776_v37  ;;  %11668 = vset.pattern.permute.xlu1 %v11919_v29  ;;  %11669 = vset.pattern.permute.xlu0 %v11919_v29 }
 0x4e5   : > { %v13939_v34 = vpop.eup %11690  ;;  %v4946_v26 = vmul.f32 1.442695, %v4881_v53  ;;  %v5035_v21 = vsel %vm4719_vm4, %v13936_v46, 0.0 }
 0x4e6   : > { %v4948_v39 = vmul.f32 1.442695, %v4882_v17  ;;  %v4779_v16 = vpop.xlane.xlu0 %4778  ;;  %v5038_v28 = vsel %vm4719_vm4, %v13939_v34, 0.0 }
 0x4e7   : > { %11704 = vpow2.f32 %v4946_v26  ;;  %v4883_v12 = vsub.f32 %v13724_v61, %v4779_v16  ;;  %v4782_v63 = vpop.xlane.xlu1 %4781  ;;  %5039 = vadd.xlane.f32.xlu1 %v5038_v28  ;;  %5036 = vadd.xlane.f32.xlu0 %v5035_v21 }
 0x4e8   : > { %v13946_v31 = vpop.eup %11692  ;;  %11706 = vpow2.f32 %v4948_v39  ;;  %v4884_v48 = vsub.f32 %v13728_v49, %v4782_v63 }
 0x4e9   : > { %v13949_v8 = vpop.eup %11694  ;;  %v4950_v6 = vmul.f32 1.442695, %v4883_v12  ;;  %v5041_v40 = vsel %vm4719_vm4, %v13946_v31, 0.0 }
 0x4ea   : > { %v4952_v47 = vmul.f32 1.442695, %v4884_v48  ;;  %v4785_v44 = vpop.xlane.xlu0 %4784  ;;  %v5044_v52 = vsel %vm4719_vm4, %v13949_v8, 0.0 }
 0x4eb   : > { %11708 = vpow2.f32 %v4950_v6  ;;  %v4885_v61 = vsub.f32 %v13736_v0, %v4785_v44  ;;  %v4788_v22 = vpop.xlane.xlu1 %4787  ;;  %5045 = vadd.xlane.f32.xlu1 %v5044_v52  ;;  %5042 = vadd.xlane.f32.xlu0 %v5041_v40 }
 0x4ec   : > { %v13956_v57 = vpop.eup %11696  ;;  %11710 = vpow2.f32 %v4952_v47  ;;  %v4886_v49 = vsub.f32 %v13740_v14, %v4788_v22 }
 0x4ed   : > { %v13959_v2 = vpop.eup %11698  ;;  %v4954_v53 = vmul.f32 1.442695, %v4885_v61  ;;  %v5047_v37 = vsel %vm4719_vm4, %v13956_v57, 0.0 }
 0x4ee   : > { %v4956_v17 = vmul.f32 1.442695, %v4886_v49  ;;  %v4791_v26 = vpop.xlane.xlu0 %4790  ;;  %v5050_v0 = vsel %vm4719_vm4, %v13959_v2, 0.0 }
 0x4ef   : > { %11712 = vpow2.f32 %v4954_v53  ;;  %v4887_v21 = vsub.f32 %v13747_v58, %v4791_v26  ;;  %v4794_v39 = vpop.xlane.xlu1 %4793  ;;  %5051 = vadd.xlane.f32.xlu1 %v5050_v0  ;;  %5048 = vadd.xlane.f32.xlu0 %v5047_v37 }
 0x4f0   : > { %v13966_v14 = vpop.eup %11700  ;;  %11714 = vpow2.f32 %v4956_v17  ;;  %v4888_v16 = vsub.f32 %v13751_v15, %v4794_v39 }
 0x4f1   : > { %v13969_v28 = vpop.eup %11702  ;;  %v4958_v12 = vmul.f32 1.442695, %v4887_v21  ;;  %v5053_v63 = vsel %vm4719_vm4, %v13966_v14, 0.0 }
 0x4f2   : > { %v4960_v48 = vmul.f32 1.442695, %v4888_v16  ;;  %v4797_v6 = vpop.xlane.xlu0 %4796  ;;  %v5056_v40 = vsel %vm4719_vm4, %v13969_v28, 0.0 }
 0x4f3   : > { %11716 = vpow2.f32 %v4958_v12  ;;  %v4889_v58 = vsub.f32 %v13757_v4, %v4797_v6  ;;  %v4800_v47 = vpop.xlane.xlu1 %4799  ;;  %5057 = vadd.xlane.f32.xlu1 %v5056_v40  ;;  %5054 = vadd.xlane.f32.xlu0 %v5053_v63 }
 0x4f4   : > { %v13976_v44 = vpop.eup %11704  ;;  %11718 = vpow2.f32 %v4960_v48  ;;  %v4890_v15 = vsub.f32 %v13761_v18, %v4800_v47 }
 0x4f5   : > { %v13979_v52 = vpop.eup %11706  ;;  %v4962_v61 = vmul.f32 1.442695, %v4889_v58  ;;  %v5059_v22 = vsel %vm4719_vm4, %v13976_v44, 0.0 }
 0x4f6   : > { %v4964_v49 = vmul.f32 1.442695, %v4890_v15  ;;  %v4803_v29 = vpop.xlane.xlu0 %4802  ;;  %v5062_v53 = vsel %vm4719_vm4, %v13979_v52, 0.0 }
 0x4f7   : > { %11720 = vpow2.f32 %v4962_v61  ;;  %v4891_v4 = vsub.f32 %v13770_v19, %v4803_v29  ;;  %v4806_v37 = vpop.xlane.xlu1 %4805  ;;  %5063 = vadd.xlane.f32.xlu1 %v5062_v53  ;;  %5060 = vadd.xlane.f32.xlu0 %v5059_v22 }
 0x4f8   : > { %v13986_v17 = vpop.eup %11708  ;;  %11722 = vpow2.f32 %v4964_v49  ;;  %v4892_v18 = vsub.f32 %v13774_v30, %v4806_v37 }
 0x4f9   : > { %v13989_v26 = vpop.eup %11710  ;;  %v4966_v0 = vmul.f32 1.442695, %v4891_v4  ;;  %v5065_v21 = vsel %vm4719_vm4, %v13986_v17, 0.0 }
 0x4fa   : > { %v4968_v39 = vmul.f32 1.442695, %v4892_v18  ;;  %v4809_v16 = vpop.xlane.xlu0 %4808  ;;  %v5068_v12 = vsel %vm4719_vm4, %v13989_v26, 0.0 }
 0x4fb   : > { %11724 = vpow2.f32 %v4966_v0  ;;  %v4893_v19 = vsub.f32 %v13782_v5, %v4809_v16  ;;  %v4812_v63 = vpop.xlane.xlu1 %4811  ;;  %5069 = vadd.xlane.f32.xlu1 %v5068_v12  ;;  %5066 = vadd.xlane.f32.xlu0 %v5065_v21 }
 0x4fc   : > { %v13996_v48 = vpop.eup %11712  ;;  %11726 = vpow2.f32 %v4968_v39  ;;  %v4894_v30 = vsub.f32 %v13786_v7, %v4812_v63 }
 0x4fd   : > { %v13999_v6 = vpop.eup %11714  ;;  %v4970_v40 = vmul.f32 1.442695, %v4893_v19  ;;  %v5071_v58 = vsel %vm4719_vm4, %v13996_v48, 0.0 }
 0x4fe   : > { %v4972_v47 = vmul.f32 1.442695, %v4894_v30  ;;  %v4815_v15 = vpop.xlane.xlu0 %4814  ;;  %v5074_v61 = vsel %vm4719_vm4, %v13999_v6, 0.0 }
 0x4ff   : > { %11728 = vpow2.f32 %v4970_v40  ;;  %v4895_v5 = vsub.f32 %v13793_v35, %v4815_v15  ;;  %v4818_v22 = vpop.xlane.xlu1 %4817  ;;  %5075 = vadd.xlane.f32.xlu1 %v5074_v61  ;;  %5072 = vadd.xlane.f32.xlu0 %v5071_v58 }
 0x500   : > { %v14006_v49 = vpop.eup %11716  ;;  %11730 = vpow2.f32 %v4972_v47  ;;  %v4896_v7 = vsub.f32 %v13797_v55, %v4818_v22 }
 0x501   : > { %v14009_v29 = vpop.eup %11718  ;;  %v4974_v53 = vmul.f32 1.442695, %v4895_v5  ;;  %v5077_v4 = vsel %vm4719_vm4, %v14006_v49, 0.0 }
 0x502   : > { %v4976_v37 = vmul.f32 1.442695, %v4896_v7  ;;  %v4821_v18 = vpop.xlane.xlu0 %4820  ;;  %v5080_v0 = vsel %vm4719_vm4, %v14009_v29, 0.0 }
 0x503   : > { %11732 = vpow2.f32 %v4974_v53  ;;  %v4897_v35 = vsub.f32 %v13805_v43, %v4821_v18  ;;  %v4824_v21 = vpop.xlane.xlu1 %4823  ;;  %5081 = vadd.xlane.f32.xlu1 %v5080_v0  ;;  %5078 = vadd.xlane.f32.xlu0 %v5077_v4 }
 0x504   : > { %v14016_v39 = vpop.eup %11720  ;;  %11734 = vpow2.f32 %v4976_v37  ;;  %v4898_v55 = vsub.f32 %v13809_v27, %v4824_v21 }
 0x505   : > { %v14019_v16 = vpop.eup %11722  ;;  %v4978_v12 = vmul.f32 1.442695, %v4897_v35  ;;  %v5083_v19 = vsel %vm4719_vm4, %v14016_v39, 0.0 }
 0x506   : > { %v4980_v63 = vmul.f32 1.442695, %v4898_v55  ;;  %v4827_v30 = vpop.xlane.xlu0 %4826  ;;  %v5086_v40 = vsel %vm4719_vm4, %v14019_v16, 0.0 }
 0x507   : > { %11736 = vpow2.f32 %v4978_v12  ;;  %v4899_v43 = vsub.f32 %v13816_v23, %v4827_v30  ;;  %v4830_v58 = vpop.xlane.xlu1 %4829  ;;  %5087 = vadd.xlane.f32.xlu1 %v5086_v40  ;;  %5084 = vadd.xlane.f32.xlu0 %v5083_v19 }
 0x508   : > { %v14026_v47 = vpop.eup %11724  ;;  %11738 = vpow2.f32 %v4980_v63  ;;  %v4900_v27 = vsub.f32 %v13820_v10, %v4830_v58 }
 0x509   : > { %v14029_v15 = vpop.eup %11726  ;;  %v4982_v61 = vmul.f32 1.442695, %v4899_v43  ;;  %v5089_v5 = vsel %vm4719_vm4, %v14026_v47, 0.0 }
 0x50a   : > { %v4984_v22 = vmul.f32 1.442695, %v4900_v27  ;;  %v4833_v7 = vpop.xlane.xlu0 %4832  ;;  %v5092_v53 = vsel %vm4719_vm4, %v14029_v15, 0.0 }
 0x50b   : > { %11740 = vpow2.f32 %v4982_v61  ;;  %v4901_v23 = vsub.f32 %v13826_v9, %v4833_v7  ;;  %v4836_v4 = vpop.xlane.xlu1 %4835  ;;  %5093 = vadd.xlane.f32.xlu1 %v5092_v53  ;;  %5090 = vadd.xlane.f32.xlu0 %v5089_v5 }
 0x50c   : > { %v14036_v37 = vpop.eup %11728  ;;  %11742 = vpow2.f32 %v4984_v22  ;;  %v4902_v10 = vsub.f32 %v13830_v45, %v4836_v4 }
 0x50d   : > { %v14039_v18 = vpop.eup %11730  ;;  %v4986_v0 = vmul.f32 1.442695, %v4901_v23  ;;  %v5095_v35 = vsel %vm4719_vm4, %v14036_v37, 0.0 }
 0x50e   : > { %v4988_v21 = vmul.f32 1.442695, %v4902_v10  ;;  %v4839_v55 = vpop.xlane.xlu0 %4838  ;;  %v5098_v12 = vsel %vm4719_vm4, %v14039_v18, 0.0 }
 0x50f   : > { %11744 = vpow2.f32 %v4986_v0  ;;  %v4903_v9 = vsub.f32 %v13837_v59, %v4839_v55  ;;  %v4842_v19 = vpop.xlane.xlu1 %4841  ;;  %5099 = vadd.xlane.f32.xlu1 %v5098_v12  ;;  %5096 = vadd.xlane.f32.xlu0 %v5095_v35 }
 0x510   : > { %v14046_v63 = vpop.eup %11732  ;;  %11746 = vpow2.f32 %v4988_v21  ;;  %v4904_v45 = vsub.f32 %v13841_v41, %v4842_v19 }
 0x511   : > { %v14049_v30 = vpop.eup %11734  ;;  %v4990_v40 = vmul.f32 1.442695, %v4903_v9  ;;  %v5101_v43 = vsel %vm4719_vm4, %v14046_v63, 0.0 }
 0x512   : > { %v4992_v58 = vmul.f32 1.442695, %v4904_v45  ;;  %v4845_v27 = vpop.xlane.xlu0 %4844  ;;  %v5104_v61 = vsel %vm4719_vm4, %v14049_v30, 0.0 }
 0x513   : > { %11748 = vpow2.f32 %v4990_v40  ;;  %v4905_v59 = vsub.f32 %v13848_v11, %v4845_v27  ;;  %v4848_v5 = vpop.xlane.xlu1 %4847  ;;  %5105 = vadd.xlane.f32.xlu1 %v5104_v61  ;;  %5102 = vadd.xlane.f32.xlu0 %v5101_v43 }
 0x514   : > { %v14056_v22 = vpop.eup %11736  ;;  %11750 = vpow2.f32 %v4992_v58  ;;  %v4906_v41 = vsub.f32 %v13852_v24, %v4848_v5 }
 0x515   : > { %v14059_v7 = vpop.eup %11738  ;;  %v4994_v53 = vmul.f32 1.442695, %v4905_v59  ;;  %v5107_v23 = vsel %vm4719_vm4, %v14056_v22, 0.0 }
 0x516   : > { %v4996_v4 = vmul.f32 1.442695, %v4906_v41  ;;  %v4851_v10 = vpop.xlane.xlu0 %4850  ;;  %v5110_v0 = vsel %vm4719_vm4, %v14059_v7, 0.0 }
 0x517   : > { %11752 = vpow2.f32 %v4994_v53  ;;  %v4907_v11 = vsub.f32 %v13858_v62, %v4851_v10  ;;  %v4854_v35 = vpop.xlane.xlu1 %4853  ;;  %5111 = vadd.xlane.f32.xlu1 %v5110_v0  ;;  %5108 = vadd.xlane.f32.xlu0 %v5107_v23 }
 0x518   : > { %v14066_v21 = vpop.eup %11740  ;;  %11754 = vpow2.f32 %v4996_v4  ;;  %v4908_v24 = vsub.f32 %v13862_v60, %v4854_v35 }
 0x519   : > { %v14069_v55 = vpop.eup %11742  ;;  %v4998_v12 = vmul.f32 1.442695, %v4907_v11  ;;  %v5113_v9 = vsel %vm4719_vm4, %v14066_v21, 0.0 }
 0x51a   : > { %v5000_v19 = vmul.f32 1.442695, %v4908_v24  ;;  %v4857_v45 = vpop.xlane.xlu0 %4856  ;;  %v5116_v40 = vsel %vm4719_vm4, %v14069_v55, 0.0 }
 0x51b   : > { %11756 = vpow2.f32 %v4998_v12  ;;  %v4909_v62 = vsub.f32 %v13868_v51, %v4857_v45  ;;  %5117 = vadd.xlane.f32.xlu1 %v5116_v40  ;;  %v4860_v43 = vpop.xlane.xlu1 %4859  ;;  %5114 = vadd.xlane.f32.xlu0 %v5113_v9 }
 0x51c   : > { %v14076_v58 = vpop.eup %11744  ;;  %11758 = vpow2.f32 %v5000_v19  ;;  %v4910_v60 = vsub.f32 %v13872_v32, %v4860_v43 }
 0x51d   : > { %v14079_v27 = vpop.eup %11746  ;;  %v5002_v61 = vmul.f32 1.442695, %v4909_v62  ;;  %v5119_v59 = vsel %vm4719_vm4, %v14076_v58, 0.0 }
 0x51e   : > { %v5004_v5 = vmul.f32 1.442695, %v4910_v60  ;;  %v4863_v41 = vpop.xlane.xlu0 %4862  ;;  %v5122_v53 = vsel %vm4719_vm4, %v14079_v27, 0.0 }
 0x51f   : > { %11760 = vpow2.f32 %v5002_v61  ;;  %v4911_v51 = vsub.f32 %v13876_v50, %v4863_v41  ;;  %5123 = vadd.xlane.f32.xlu1 %v5122_v53  ;;  %5120 = vadd.xlane.f32.xlu0 %v5119_v59  ;;  %v14130_v41 = vld [vmem:[%s17217_s8 + $0x8] sm:$0xff]  ;;  %v14139_v53 = vld [vmem:[%s17217_s8] sm:$0xff] }
 0x520   : > { %v14086_v23 = vpop.eup %11748  ;;  %11762 = vpow2.f32 %v5004_v5  ;;  %v14125_v5 = vld [vmem:[%s17217_s8 + $0x10] sm:$0xff] }
 0x521   : > { %v14088_v32 = vpop.eup %11750  ;;  %v5006_v4 = vmul.f32 1.442695, %v4911_v51  ;;  %v5125_v10 = vsel %vm4719_vm4, %v14086_v23, 0.0  ;;  %11559 = vmatprep.subr.mxu0 %v14125_v5  ;;  %v17676_v51 = vmov 0.0  }
 0x522   : > { %v5128_v0 = vsel %vm4719_vm4, %v14088_v32, 0.0  ;;  %11560 = vmatpush3.msra.mxu0 %v14125_v5 }
 0x523   : > { %11764 = vpow2.f32 %v5006_v4  ;;  %5129 = vadd.xlane.f32.xlu1 %v5128_v0  ;;  %5126 = vadd.xlane.f32.xlu0 %v5125_v10 }
 0x524   : > { %v14094_v11 = vpop.eup %11752  ;;  %11561 = vmatprep.subr.mxu0 %v14130_v41 }
 0x525   : > { %v14096_v50 = vpop.eup %11754  ;;  %v5131_v35 = vsel %vm4719_vm4, %v14094_v11, 0.0  ;;  %11562 = vmatpush3.msra.mxu0 %v14130_v41 }
 0x526   : > { %v5134_v24 = vsel %vm4719_vm4, %v14096_v50, 0.0  ;;  %11563 = vmatprep.subr.mxu0 %v14139_v53 }
 0x527   : > { %5135 = vadd.xlane.f32.xlu1 %v5134_v24  ;;  %5132 = vadd.xlane.f32.xlu0 %v5131_v35 }
 0x528   : > { %v14102_v12 = vpop.eup %11756  ;;  %11564 = vmatpush3.msra.mxu0 %v14139_v53 }
 0x529   : > { %v14104_v9 = vpop.eup %11758  ;;  %v5137_v19 = vsel %vm4719_vm4, %v14102_v12, 0.0  ;;  %11577 = vmatprep.subr.bf16.mxu0 %v17676_v51 }
 0x52a   : > { %v5140_v45 = vsel %vm4719_vm4, %v14104_v9, 0.0 }
 0x52b   : > { %5141 = vadd.xlane.f32.xlu1 %v5140_v45  ;;  %5138 = vadd.xlane.f32.xlu0 %v5137_v19 }
 0x52c   : > { %v14110_v40 = vpop.eup %11760 }
 0x52d   : > { %v14112_v62 = vpop.eup %11762  ;;  %v5143_v43 = vsel %vm4719_vm4, %v14110_v40, 0.0 }
 0x52e   : > { %v5146_v60 = vsel %vm4719_vm4, %v14112_v62, 0.0 }
 0x52f   : > { %5147 = vadd.xlane.f32.xlu1 %v5146_v60  ;;  %5144 = vadd.xlane.f32.xlu0 %v5143_v43 }
 0x530   : > { %v14118_v61 = vpop.eup %11764 }
 0x531   : > { %17675 = vst [vmem:[#allocation69_spill] sm:$0xff] %v14118_v61  ;;  %v5149_v59 = vsel %vm4719_vm4, %v14118_v61, 0.0 }
 0x533   : > { %5150 = vadd.xlane.f32.xlu0 %v5149_v59 }
 0x55b   : > { %v5010_v4 = vpop.xlane.xlu1 %5009 }
 0x55c   : > { %11766 = vrcp.f32 %v5010_v4 }
 0x55f   : > { %v5016_v10 = vpop.xlane.xlu1 %5015 }
 0x560   : > { %11768 = vrcp.f32 %v5016_v10  ;;  %v5013_v0 = vpop.xlane.xlu0 %5012 }
 0x561   : > { %11770 = vrcp.f32 %v5013_v0 }
 0x564   : > { %v5022_v35 = vpop.xlane.xlu1 %5021  ;;  %v5019_v24 = vpop.xlane.xlu0 %5018 }
 0x565   : > { %11772 = vrcp.f32 %v5019_v24 }
 0x566   : > { %11774 = vrcp.f32 %v5022_v35 }
 0x568   : > { %v5028_v19 = vpop.xlane.xlu1 %5027  ;;  %v5025_v45 = vpop.xlane.xlu0 %5024 }
 0x569   : > { %v11767_v43 = vpop.eup %11766  ;;  %11776 = vrcp.f32 %v5025_v45 }
 0x56a   : > { %v14145_v60 = vmul.f32 %v11767_v43, %v13890_v54  ;;  %11778 = vrcp.f32 %v5028_v19 }
 0x56c   : > { %5414 = vperm.xlu1 %11668, %v14145_v60   ;;  %v5034_v59 = vpop.xlane.xlu1 %5033  ;;  %v5031_v42 = vpop.xlane.xlu0 %5030 }
 0x56d   : > { %v11769_v4 = vpop.eup %11768 }
 0x56e   : > { %v11771_v33 = vpop.eup %11770  ;;  %v14149_v10 = vmul.f32 %v11769_v4, %v13896_v36 }
 0x56f   : > { %v14152_v0 = vmul.f32 %v11771_v33, %v13899_v38 }
 0x570   : > { %17677 = vst [vmem:[#allocation70_spill] sm:$0xff] %v14149_v10  ;;  %5420 = vperm.xlu1 %11668, %v14149_v10   ;;  %v5040_v35 = vpop.xlane.xlu1 %5039  ;;  %v5037_v24 = vpop.xlane.xlu0 %5036 }
 0x571   : > { %17678 = vst [vmem:[#allocation13_spill] sm:$0xff] %v14152_v0  ;;  %11780 = vrcp.f32 %v5040_v35  ;;  %5417 = vperm.xlu0 %11669, %v14152_v0  }
 0x572   : > { %v11773_v54 = vpop.eup %11772  ;;  %11782 = vrcp.f32 %v5031_v42 }
 0x573   : > { %v14157_v61 = vmul.f32 %v11773_v54, %v13906_v25  ;;  %v11775_v36 = vpop.eup %11774 }
 0x574   : > { %v5046_v45 = vpop.xlane.xlu1 %5045  ;;  %v5043_v43 = vpop.xlane.xlu0 %5042  ;;  %v14161_v19 = vmul.f32 %v11775_v36, %v13909_v13 }
 0x575   : > { %17679 = vst [vmem:[#allocation63_spill] sm:$0xff] %v14157_v61  ;;  %11784 = vrcp.f32 %v5046_v45  ;;  %5423 = vperm.xlu1 %11668, %v14157_v61  }
 0x576   : > { %11786 = vrcp.f32 %v5034_v59  ;;  %17680 = vst [vmem:[#allocation71_spill] sm:$0xff] %v14161_v19  ;;  %v11777_v4 = vpop.eup %11776 }
 0x577   : > { %v14165_v25 = vmul.f32 %v11777_v4, %v13916_v1  ;;  %v11779_v54 = vpop.eup %11778 }
 0x578   : > { %v5052_v33 = vpop.xlane.xlu1 %5051  ;;  %v5049_v38 = vpop.xlane.xlu0 %5048 }
 0x579   : > { %11788 = vrcp.f32 %v5052_v33  ;;  %5426 = vperm.xlu1 %11668, %v14161_v19   ;;  %17681 = vst [vmem:[#allocation72_spill] sm:$0xff] %v14165_v25  ;;  %v14172_v33 = vmul.f32 %v11779_v54, %v13919_v56 }
 0x57a   : > { %11790 = vrcp.f32 %v5037_v24 }
 0x57b   : > { %17683 = vst [vmem:[#allocation61_spill] sm:$0xff] %v14172_v33 }
 0x57c   : > { %v5058_v42 = vpop.xlane.xlu1 %5057  ;;  %v5055_v35 = vpop.xlane.xlu0 %5054 }
 0x57d   : > { %11792 = vrcp.f32 %v5058_v42  ;;  %5429 = vperm.xlu1 %11668, %v14165_v25  }
 0x57e   : > { %v11781_v45 = vpop.eup %11780  ;;  %11794 = vrcp.f32 %v5043_v43 }
 0x57f   : > { %v14169_v59 = vmul.f32 %v11781_v45, %v13939_v34  ;;  %v11783_v24 = vpop.eup %11782 }
 0x580   : > { %v5064_v13 = vpop.xlane.xlu1 %5063  ;;  %v5061_v36 = vpop.xlane.xlu0 %5060  ;;  %v14180_v43 = vmul.f32 %v11783_v24, %v13926_v3 }
 0x581   : > { %17682 = vst [vmem:[#allocation73_spill] sm:$0xff] %v14169_v59  ;;  %11796 = vrcp.f32 %v5064_v13  ;;  %5444 = vperm.xlu0 %11669, %v14169_v59   ;;  %5432 = vperm.xlu1 %11668, %v14172_v33  }
 0x582   : > { %v11785_v1 = vpop.eup %11784  ;;  %11798 = vrcp.f32 %v5055_v35  ;;  %17685 = vst [vmem:[#allocation75_spill] sm:$0xff] %v14180_v43 }
 0x583   : > { %v14177_v4 = vmul.f32 %v11785_v1, %v13949_v8  ;;  %11800 = vrcp.f32 %v5049_v38  ;;  %v11787_v45 = vpop.eup %11786 }
 0x584   : > { %v5070_v34 = vpop.xlane.xlu1 %5069  ;;  %v5067_v42 = vpop.xlane.xlu0 %5066  ;;  %v14188_v8 = vmul.f32 %v11787_v45, %v13929_v20 }
 0x585   : > { %17684 = vst [vmem:[#allocation74_spill] sm:$0xff] %v14177_v4  ;;  %11802 = vrcp.f32 %v5070_v34  ;;  %5450 = vperm.xlu0 %11669, %v14177_v4   ;;  %5435 = vperm.xlu1 %11668, %v14180_v43  }
 0x586   : > { %v11789_v56 = vpop.eup %11788  ;;  %17687 = vst [vmem:[#allocation11_spill] sm:$0xff] %v14188_v8 }
 0x587   : > { %v14185_v35 = vmul.f32 %v11789_v56, %v13959_v2  ;;  %v11791_v38 = vpop.eup %11790 }
 0x588   : > { %v5076_v54 = vpop.xlane.xlu1 %5075  ;;  %v5073_v13 = vpop.xlane.xlu0 %5072  ;;  %v14196_v34 = vmul.f32 %v11791_v38, %v13936_v46  ;;  %v5267_v38 = vrot.slane %v14157_v61, 7 }
 0x589   : > { %17686 = vst [vmem:[#allocation76_spill] sm:$0xff] %v14185_v35  ;;  %11804 = vrcp.f32 %v5076_v54  ;;  %5456 = vperm.xlu0 %11669, %v14185_v35   ;;  %5438 = vperm.xlu1 %11668, %v14188_v8  }
 0x58a   : > { %v11793_v3 = vpop.eup %11792  ;;  %11806 = vrcp.f32 %v5073_v13  ;;  %17689 = vst [vmem:[#allocation10_spill] sm:$0xff] %v14196_v34 }
 0x58b   : > { %v14193_v24 = vmul.f32 %v11793_v3, %v13969_v28  ;;  %11808 = vrcp.f32 %v5061_v36  ;;  %v11795_v56 = vpop.eup %11794 }
 0x58c   : > { %v5082_v1 = vpop.xlane.xlu1 %5081  ;;  %v5079_v2 = vpop.xlane.xlu0 %5078  ;;  %v14204_v36 = vmul.f32 %v11795_v56, %v13946_v31  ;;  %v5273_v31 = vrot.slane %v14196_v34, 5 }
 0x58d   : > { %17688 = vst [vmem:[#allocation62_spill] sm:$0xff] %v14193_v24  ;;  %11810 = vrcp.f32 %v5082_v1  ;;  %5462 = vperm.xlu0 %11669, %v14193_v24   ;;  %5441 = vperm.xlu1 %11668, %v14196_v34   ;;  %v5276_v24 = vrot.slane %v14177_v4, 4 }
 0x58e   : > { %v11797_v20 = vpop.eup %11796  ;;  %11812 = vrcp.f32 %v5067_v42  ;;  %17691 = vst [vmem:[#allocation20_spill] sm:$0xff] %v14204_v36 }
 0x58f   : > { %v11799_v45 = vpop.eup %11798  ;;  %v14201_v54 = vmul.f32 %v11797_v20, %v13979_v52  ;;  %v5270_v52 = vrot.slane %v14172_v33, 6 }
 0x590   : > { %v5088_v28 = vpop.xlane.xlu1 %5087  ;;  %v5085_v13 = vpop.xlane.xlu0 %5084  ;;  %v14210_v1 = vmul.f32 %v11799_v45, %v13966_v14  ;;  %v5269_v45 = vsel %vm5268_vm5, %v5267_v38, %v14145_v60 }
 0x591   : > { %17690 = vst [vmem:[#allocation22_spill] sm:$0xff] %v14201_v54  ;;  %v11801_v3 = vpop.eup %11800  ;;  %11814 = vrcp.f32 %v5088_v28  ;;  %5468 = vperm.xlu0 %11669, %v14201_v54   ;;  %5447 = vperm.xlu1 %11668, %v14204_v36  }
 0x592   : > { %v11803_v46 = vpop.eup %11802  ;;  %17692 = vst [vmem:[#allocation18_spill] sm:$0xff] %v14210_v1  ;;  %v14218_v28 = vmul.f32 %v11801_v3, %v13956_v57  ;;  %v5272_v3 = vsel %vm5271_vm6, %v5270_v52, %v5269_v45 }
 0x593   : > { %v14214_v42 = vmul.f32 %v11803_v46, %v13989_v26  ;;  %v5279_v26 = vrot.slane %v14210_v1, 3  ;;  %v5275_v38 = vsel %vm5274_vm7, %v5273_v31, %v5272_v3 }
 0x594   : > { %v5094_v56 = vpop.xlane.xlu1 %5093  ;;  %v5091_v20 = vpop.xlane.xlu0 %5090  ;;  %17694 = vst [vmem:[#allocation15_spill] sm:$0xff] %v14218_v28 }
 0x595   : > { %17693 = vst [vmem:[#allocation16_spill] sm:$0xff] %v14214_v42  ;;  %11816 = vrcp.f32 %v5094_v56  ;;  %5474 = vperm.xlu0 %11669, %v14214_v42   ;;  %5453 = vperm.xlu1 %11668, %v14218_v28   ;;  %v5282_v56 = vrot.slane %v14201_v54, 2 }
 0x596   : > { %v11805_v14 = vpop.eup %11804  ;;  %11818 = vrcp.f32 %v5079_v2 }
 0x597   : > { %v11807_v46 = vpop.eup %11806  ;;  %v14227_v57 = vmul.f32 %v11805_v14, %v13999_v6  ;;  %v5278_v6 = vsel %vm5277_vm8, %v5276_v24, %v5275_v38 }
 0x598   : > { %v5100_v42 = vpop.xlane.xlu1 %5099  ;;  %v5097_v35 = vpop.xlane.xlu0 %5096  ;;  %v14232_v4 = vmul.f32 %v11807_v46, %v13996_v48  ;;  %v5281_v2 = vsel %vm5280_vm9, %v5279_v26, %v5278_v6 }
 0x599   : > { %17695 = vst [vmem:[#allocation9_spill] sm:$0xff] %v14227_v57  ;;  %v11809_v28 = vpop.eup %11808  ;;  %11820 = vrcp.f32 %v5100_v42  ;;  %5480 = vperm.xlu0 %11669, %v14227_v57   ;;  %5459 = vperm.xlu1 %11668, %v14210_v1   ;;  %v5284_v48 = vsel %vm5283_vm10, %v5282_v56, %v5281_v2  ;;  %v17700_v2 = vld [vmem:[#allocation26_spill] sm:$0xff] }
 0x59a   : > { %17696 = vst [vmem:[#allocation8_spill] sm:$0xff] %v14232_v4  ;;  %v11811_v52 = vpop.eup %11810  ;;  %v5285_v14 = vrot.slane %v14232_v4, 1  ;;  %11822 = vrcp.f32 %v5085_v13  ;;  %v14246_v24 = vmul.f32 %v11809_v28, %v13976_v44  ;;  %v17707_v57 = vld [vmem:[#allocation46_spill] sm:$0xff] }
 0x59b   : > { %v14242_v45 = vmul.f32 %v11811_v52, %v14009_v29  ;;  %v11813_v3 = vpop.eup %11812  ;;  %vm6116_vm15 = vcmp.gt.s32.totalorder %v17707_v57, 0  ;;  %vm5884_vm0 = vcmp.eq.s32.totalorder %v17707_v57, 0 }
 0x59c   : > { %v5106_v31 = vpop.xlane.xlu1 %5105  ;;  %v5287_v42 = vsel %vm5286_vm11, %v5285_v14, %v5284_v48  ;;  %v5103_v46 = vpop.xlane.xlu0 %5102  ;;  %17697 = vst [vmem:[#allocation7_spill] sm:$0xff] %v14246_v24  ;;  %v14255_v38 = vmul.f32 %v11813_v3, %v13986_v17  ;;  %v17701_v48 = vld [vmem:[#allocation25_spill] sm:$0xff] }
 0x59d   : > { %11824 = vrcp.f32 %v5106_v31  ;;  %11565 = vmatprep.mubr.msk.f32.mxu0 %vm4719_vm4, %v5287_v42  ;;  %5486 = vperm.xlu0 %11669, %v14242_v45   ;;  %v17702_v31 = vld [vmem:[#allocation24_spill] sm:$0xff] }
 0x59e   : > { %v11815_v26 = vpop.eup %11814  ;;  %5465 = vperm.xlu1 %11668, %v14246_v24   ;;  %11826 = vrcp.f32 %v5091_v20  ;;  %17698 = vst [vmem:[#allocation17_spill] sm:$0xff] %v14255_v38  ;;  %v11293_v42 = vcombine.low %v17702_v31, %v17701_v48 }
 0x59f   : > { %v14252_v29 = vmul.f32 %v11815_v26, %v14019_v16  ;;  %v17699_v16 = vld [vmem:[#allocation27_spill] sm:$0xff] }
 0x5a0   : > { %v5112_v13 = vpop.xlane.xlu1 %5111  ;;  %v5109_v56 = vpop.xlane.xlu0 %5108  ;;  %v11294_v20 = vcombine.low %v17700_v2, %v17699_v16  ;;  %v17704_v2 = vld [vmem:[#allocation6_spill] sm:$0xff] }
 0x5a1   : > { %11828 = vrcp.f32 %v5112_v13  ;;  %5492 = vperm.xlu0 %11669, %v14252_v29  }
 0x5a2   : > { %v11817_v44 = vpop.eup %11816  ;;  %5471 = vperm.xlu1 %11668, %v14255_v38   ;;  %11830 = vrcp.f32 %v5097_v35  ;;  %11552 = vmatpush3.bf16.msra.mxu1 %v11294_v20 }
 0x5a3   : > { %v14260_v28 = vmul.f32 %v11817_v44, %v14029_v15  ;;  %v11819_v14 = vpop.eup %11818  ;;  %11553 = vmatprep.subr.bf16.mxu1 %v17676_v51 }
 0x5a4   : > { %v5118_v6 = vpop.xlane.xlu1 %5117  ;;  %v5115_v52 = vpop.xlane.xlu0 %5114  ;;  %v14273_v26 = vmul.f32 %v11819_v14, %v14006_v49 }
 0x5a5   : > { %11832 = vrcp.f32 %v5118_v6  ;;  %5498 = vperm.xlu0 %11669, %v14260_v28  }
 0x5a6   : > { %v11821_v17 = vpop.eup %11820  ;;  %5477 = vperm.xlu1 %11668, %v14232_v4   ;;  %11834 = vrcp.f32 %v5103_v46  ;;  %17703 = vst [vmem:[#allocation79_spill] sm:$0xff] %v14273_v26  ;;  %11554 = vmatpush3.bf16.msra.mxu1 %v11293_v42 }
 0x5a7   : > { %v14269_v15 = vmul.f32 %v11821_v17, %v14039_v18  ;;  %v11823_v13 = vpop.eup %11822  ;;  %11568 = vmatprep.subr.mxu1 %v14125_v5 }
 0x5a8   : > { %v5124_v35 = vpop.xlane.xlu1 %5123  ;;  %v5121_v3 = vpop.xlane.xlu0 %5120  ;;  %v14282_v16 = vmul.f32 %v11823_v13, %v14016_v39 }
 0x5a9   : > { %11836 = vrcp.f32 %v5124_v35  ;;  %5504 = vperm.xlu0 %11669, %v14269_v15   ;;  %11556 = vmatmul.mubr.msk.bf16.vlgmr.msra.gmra.mxu1 %vm626_vm3, %v17704_v2 }
 0x5aa   : > { %v11825_v44 = vpop.eup %11824  ;;  %5483 = vperm.xlu1 %11668, %v14273_v26   ;;  %11838 = vrcp.f32 %v5109_v56  ;;  %11569 = vmatpush3.msra.mxu1 %v14125_v5 }
 0x5ab   : > { %v14278_v6 = vmul.f32 %v11825_v44, %v14049_v30  ;;  %v11827_v49 = vpop.eup %11826  ;;  %11570 = vmatprep.subr.mxu1 %v14130_v41 }
 0x5ac   : > { %v5130_v18 = vpop.xlane.xlu1 %5129  ;;  %v5127_v46 = vpop.xlane.xlu0 %5126  ;;  %v14294_v14 = vmul.f32 %v11827_v49, %v14026_v47  ;;  %11571 = vmatpush3.msra.mxu1 %v14130_v41 }
 0x5ad   : > { %11840 = vrcp.f32 %v5130_v18  ;;  %5510 = vperm.xlu0 %11669, %v14278_v6   ;;  %11572 = vmatprep.subr.mxu1 %v14139_v53 }
 0x5ae   : > { %v11829_v20 = vpop.eup %11828  ;;  %5489 = vperm.xlu1 %11668, %v14282_v16   ;;  %11842 = vrcp.f32 %v5115_v52  ;;  %11573 = vmatpush3.msra.mxu1 %v14139_v53 }
 0x5af   : > { %v14290_v30 = vmul.f32 %v11829_v20, %v14059_v7  ;;  %v11831_v17 = vpop.eup %11830  ;;  %11585 = vmatprep.subr.bf16.mxu1 %v17676_v51 }
 0x5b0   : > { %v5136_v39 = vpop.xlane.xlu1 %5135  ;;  %v5133_v56 = vpop.xlane.xlu0 %5132  ;;  %v14306_v52 = vmul.f32 %v11831_v17, %v14036_v37 }
 0x5b1   : > { %11844 = vrcp.f32 %v5136_v39  ;;  %5516 = vperm.xlu0 %11669, %v14290_v30   ;;  %v5290_v39 = vrot.slane %v14269_v15, 6 }
 0x5b2   : > { %v11833_v5 = vpop.eup %11832  ;;  %11846 = vrcp.f32 %v5127_v46  ;;  %5495 = vperm.xlu1 %11668, %v14294_v14  }
 0x5b3   : > { %v14302_v7 = vmul.f32 %v11833_v5, %v14069_v55  ;;  %11848 = vrcp.f32 %v5121_v3  ;;  %v11835_v48 = vpop.eup %11834 }
 0x5b4   : > { %v5142_v47 = vpop.xlane.xlu1 %5141  ;;  %v5139_v41 = vpop.xlane.xlu0 %5138  ;;  %v14314_v35 = vmul.f32 %v11835_v48, %v14046_v63 }
 0x5b5   : > { %11850 = vrcp.f32 %v5142_v47  ;;  %5522 = vperm.xlu0 %11669, %v14302_v7   ;;  %v5294_v17 = vrot.slane %v14302_v7, 4 }
 0x5b6   : > { %v11837_v31 = vpop.eup %11836  ;;  %5501 = vperm.xlu1 %11668, %v14306_v52  }
 0x5b7   : > { %v14311_v53 = vmul.f32 %v11837_v31, %v14079_v27  ;;  %v11839_v3 = vpop.eup %11838 }
 0x5b8   : > { %v5148_v55 = vpop.xlane.xlu1 %5147  ;;  %v5145_v42 = vpop.xlane.xlu0 %5144  ;;  %v14322_v27 = vmul.f32 %v11839_v3, %v14056_v22  ;;  %v5288_v22 = vrot.slane %v14294_v14, 7 }
 0x5b9   : > { %11852 = vrcp.f32 %v5148_v55  ;;  %5528 = vperm.xlu0 %11669, %v14311_v53  }
 0x5ba   : > { %v11841_v37 = vpop.eup %11840  ;;  %11854 = vrcp.f32 %v5145_v42  ;;  %5507 = vperm.xlu1 %11668, %v14314_v35  }
 0x5bb   : > { %v14319_v13 = vmul.f32 %v11841_v37, %v14088_v32  ;;  %11856 = vrcp.f32 %v5133_v56  ;;  %v11843_v44 = vpop.eup %11842  ;;  %v5292_v56 = vrot.slane %v14322_v27, 5 }
 0x5bc   : > { %11858 = vrcp.f32 %v5139_v41  ;;  %v14330_v49 = vmul.f32 %v11843_v44, %v14066_v21  ;;  %v5151_v5 = vpop.xlane.xlu0 %5150 }
 0x5bd   : > { %5534 = vperm.xlu0 %11669, %v14319_v13   ;;  %11860 = vrcp.f32 %v5151_v5 }
 0x5be   : > { %v11845_v63 = vpop.eup %11844  ;;  %5513 = vperm.xlu1 %11668, %v14322_v27  }
 0x5bf   : > { %v11847_v18 = vpop.eup %11846  ;;  %v14327_v46 = vmul.f32 %v11845_v63, %v14096_v50 }
 0x5c0   : > { %v11849_v32 = vpop.eup %11848  ;;  %v14336_v20 = vmul.f32 %v11847_v18, %v14086_v23  ;;  %v5289_v23 = vsel %vm5268_vm5, %v5288_v22, %v14242_v45 }
 0x5c1   : > { %5540 = vperm.xlu0 %11669, %v14327_v46   ;;  %v14344_v21 = vmul.f32 %v11849_v32, %v14076_v58  ;;  %v5298_v48 = vrot.slane %v14327_v46, 2  ;;  %v5291_v58 = vsel %vm5271_vm6, %v5290_v39, %v5289_v23  ;;  %v17705_v39 = vld [vmem:[#allocation69_spill] sm:$0xff] }
 0x5c2   : > { %v11851_v2 = vpop.eup %11850  ;;  %5519 = vperm.xlu1 %11668, %v14330_v49   ;;  %v5296_v41 = vrot.slane %v14336_v20, 3  ;;  %v5293_v42 = vsel %vm5274_vm7, %v5292_v56, %v5291_v58 }
 0x5c3   : > { %v14340_v50 = vmul.f32 %v11851_v2, %v14104_v9  ;;  %v5295_v37 = vsel %vm5277_vm8, %v5294_v17, %v5293_v42 }
 0x5c4   : > { %v5297_v44 = vsel %vm5280_vm9, %v5296_v41, %v5295_v37 }
 0x5c5   : > { %5546 = vperm.xlu0 %11669, %v14340_v50   ;;  %v5299_v63 = vsel %vm5283_vm10, %v5298_v48, %v5297_v44 }
 0x5c6   : > { %v11853_v47 = vpop.eup %11852  ;;  %5525 = vperm.xlu1 %11668, %v14344_v21  }
 0x5c7   : > { %v11855_v9 = vpop.eup %11854  ;;  %v14354_v31 = vmul.f32 %v11853_v47, %v14112_v62 }
 0x5c8   : > { %v14358_v55 = vmul.f32 %v11855_v9, %v14110_v40  ;;  %v11857_v3 = vpop.eup %11856 }
 0x5c9   : > { %5552 = vperm.xlu0 %11669, %v14354_v31   ;;  %v14369_v40 = vmul.f32 %v11857_v3, %v14094_v11  ;;  %v11859_v32 = vpop.eup %11858 }
 0x5ca   : > { %5531 = vperm.xlu1 %11668, %v14336_v20   ;;  %v5300_v62 = vrot.slane %v14358_v55, 1  ;;  %v14376_v2 = vmul.f32 %v11859_v32, %v14102_v12  ;;  %v11861_v22 = vpop.eup %11860 }
 0x5cb   : > { %v14381_v56 = vmul.f32 %v11861_v22, %v17705_v39 }
 0x5cc   : > { %v5301_v18 = vsel %vm5286_vm11, %v5300_v62, %v5299_v63 }
 0x5cd   : > { %11566 = vmatmul.mubr.msk.f32.vlgmr.msra.gmra.mxu0 %vm4719_vm4, %v5301_v18  ;;  %v17706_v18 = vlaneseq }
 0x5ce   : > { %5537 = vperm.xlu1 %11668, %v14369_v40   ;;  %11581 = vmatprep.mubr.msk.bf16.mxu0 %vm11917_vm2, %v17676_v51 }
 0x5cf   : > { %v14385_v32 = vand.u32 127, %v17706_v18 }
 0x5d1   : > { %v5563_v22 = vadd.s32 4294967288, %v14385_v32  ;;  %v5570_v54 = vadd.s32 4294967280, %v14385_v32  ;;  %v14394_v1 = vsub.s32 %v14385_v32, %v17707_v57  ;;  %vm6115_vm14 = vcmp.eq.s32.totalorder %v14385_v32, 0 }
 0x5d2   : > { %5543 = vperm.xlu1 %11668, %v14376_v2   ;;  %vm14543_vm1 = vmand %vm6115_vm14, %vm6116_vm15 }
 0x5d3   : > { %v14389_v4 = vsub.s32 %v5563_v22, %v17707_v57  ;;  %v14400_v18 = vsub.s32 %v5570_v54, %v17707_v57 }
 0x5d6   : > { %5549 = vperm.xlu1 %11668, %v14358_v55  }
 0x5da   : > { %5555 = vperm.xlu1 %11668, %v14381_v56  }
 0x5e7   : > { %v5415_v11 = vpop.permute.xlu1 %5414 }
 0x5e8   : > { %v5562_v8 = vrot.slane %v5415_v11, %v14394_v1 }
 0x5eb   : > { %v5421_v17 = vpop.permute.xlu1 %5420 }
 0x5ec   : > { %v5418_v23 = vpop.permute.xlu0 %5417  ;;  %v5574_v54 = vrot.slane %v5421_v17, %v14400_v18 }
 0x5ed   : > { %v5567_v36 = vrot.slane %v5418_v23, %v14389_v4 }
 0x5ef   : > { %v5569_v25 = vsel %vm5568_vm12, %v5567_v36, %v5562_v8 }
 0x5f0   : > { %v5424_v5 = vpop.permute.xlu1 %5423 }
 0x5f1   : > { %v5580_v43 = vrot.slane %v5424_v5, %v14394_v1 }
 0x5f4   : > { %v5427_v47 = vpop.permute.xlu1 %5426 }
 0x5f5   : > { %v5584_v34 = vrot.slane %v5427_v47, %v14389_v4 }
 0x5f7   : > { %v5585_v47 = vsel %vm5568_vm12, %v5584_v34, %v5580_v43 }
 0x5f8   : > { %v5430_v41 = vpop.permute.xlu1 %5429 }
 0x5f9   : > { %v5589_v33 = vrot.slane %v5430_v41, %v14400_v18 }
 0x5fc   : > { %v5445_v9 = vpop.permute.xlu0 %5444  ;;  %v5433_v48 = vpop.permute.xlu1 %5432 }
 0x5fd   : > { %v5594_v41 = vrot.slane %v5433_v48, %v14394_v1  ;;  %v5612_v17 = vrot.slane %v5445_v9, %v14389_v4 }
 0x600   : > { %v5451_v12 = vpop.permute.xlu0 %5450  ;;  %v5436_v58 = vpop.permute.xlu1 %5435 }
 0x601   : > { %v5598_v23 = vrot.slane %v5436_v58, %v14389_v4  ;;  %v5622_v10 = vrot.slane %v5451_v12, %v14394_v1  ;;  %v5590_v58 = vsel %vm5575_vm13, %v5589_v33, %v5585_v47 }
 0x603   : > { %v5599_v34 = vsel %vm5568_vm12, %v5598_v23, %v5594_v41 }
 0x604   : > { %v5457_v42 = vpop.permute.xlu0 %5456  ;;  %v5439_v3 = vpop.permute.xlu1 %5438 }
 0x605   : > { %v5603_v0 = vrot.slane %v5439_v3, %v14400_v18 }
 0x608   : > { %v5463_v37 = vpop.permute.xlu0 %5462  ;;  %v5442_v44 = vpop.permute.xlu1 %5441 }
 0x609   : > { %v5608_v11 = vrot.slane %v5442_v44, %v14394_v1  ;;  %v5640_v33 = vrot.slane %v5463_v37, %v14389_v4 }
 0x60c   : > { %v5469_v62 = vpop.permute.xlu0 %5468  ;;  %v5448_v63 = vpop.permute.xlu1 %5447 }
 0x60d   : > { %v5617_v8 = vrot.slane %v5448_v63, %v14400_v18  ;;  %v5650_v3 = vrot.slane %v5469_v62, %v14394_v1  ;;  %v5604_v63 = vsel %vm5575_vm13, %v5603_v0, %v5599_v34 }
 0x610   : > { %v5475_v39 = vpop.permute.xlu0 %5474  ;;  %v5454_v26 = vpop.permute.xlu1 %5453 }
 0x611   : > { %v5626_v19 = vrot.slane %v5454_v26, %v14389_v4  ;;  %v5576_v26 = vsel %vm5575_vm13, %v5574_v54, %v5569_v25  ;;  %v5613_v25 = vsel %vm5568_vm12, %v5612_v17, %v5608_v11 }
 0x612   : > { %v5618_v23 = vsel %vm5575_vm13, %v5617_v8, %v5613_v25 }
 0x613   : > { %v5627_v48 = vsel %vm5568_vm12, %v5626_v19, %v5622_v10  ;;  %v5659_v19 = vrot.slane %v5475_v39, %v14400_v18 }
 0x614   : > { %v5481_v38 = vpop.permute.xlu0 %5480  ;;  %v5460_v24 = vpop.permute.xlu1 %5459 }
 0x615   : > { %v5636_v43 = vrot.slane %v5460_v24, %v14394_v1  ;;  %v5787_v24 = vsel %vm5268_vm5, %v5590_v58, %v5576_v26  ;;  %v5668_v11 = vrot.slane %v5481_v38, %v14389_v4 }
 0x618   : > { %v14397_v59 = vpop.permute.xlu0 %5486 }
 0x619   : > { %v5466_v22 = vpop.permute.xlu1 %5465 }
 0x61a   : > { %v5645_v12 = vrot.slane %v5466_v22, %v14400_v18  ;;  %v5641_v22 = vsel %vm5568_vm12, %v5640_v33, %v5636_v43 }
 0x61c   : > { %v14409_v61 = vpop.permute.xlu0 %5492  ;;  %v5646_v54 = vsel %vm5575_vm13, %v5645_v12, %v5641_v22 }
 0x61d   : > { %v5472_v5 = vpop.permute.xlu1 %5471 }
 0x61e   : > { %v5654_v36 = vrot.slane %v5472_v5, %v14389_v4  ;;  %v5631_v5 = vrot.slane %v5457_v42, %v14400_v18  ;;  %v5788_v42 = vsel %vm5271_vm6, %v5604_v63, %v5787_v24 }
 0x61f   : > { %v5789_v47 = vsel %vm5274_vm7, %v5618_v23, %v5788_v42 }
 0x620   : > { %v5499_v44 = vpop.permute.xlu0 %5498  ;;  %v5655_v62 = vsel %vm5568_vm12, %v5654_v36, %v5650_v3  ;;  %v5632_v10 = vsel %vm5575_vm13, %v5631_v5, %v5627_v48 }
 0x621   : > { %v5478_v9 = vpop.permute.xlu1 %5477  ;;  %v5660_v8 = vsel %vm5575_vm13, %v5659_v19, %v5655_v62  ;;  %v5790_v39 = vsel %vm5277_vm8, %v5632_v10, %v5789_v47  ;;  %v5678_v47 = vrot.slane %v14397_v59, %v14394_v1 }
 0x622   : > { %v5664_v0 = vrot.slane %v5478_v9, %v14394_v1  ;;  %v5791_v58 = vsel %vm5280_vm9, %v5646_v54, %v5790_v39 }
 0x623   : > { %v5792_v34 = vsel %vm5283_vm10, %v5660_v8, %v5791_v58 }
 0x624   : > { %v5505_v37 = vpop.permute.xlu0 %5504  ;;  %v5669_v26 = vsel %vm5568_vm12, %v5668_v11, %v5664_v0  ;;  %v5696_v11 = vrot.slane %v5499_v44, %v14389_v4 }
 0x625   : > { %v5484_v41 = vpop.permute.xlu1 %5483  ;;  %v5706_v8 = vrot.slane %v5505_v37, %v14394_v1 }
 0x626   : > { %v5673_v36 = vrot.slane %v5484_v41, %v14400_v18 }
 0x628   : > { %v5511_v17 = vpop.permute.xlu0 %5510  ;;  %v5674_v43 = vsel %vm5575_vm13, %v5673_v36, %v5669_v26  ;;  %v5687_v26 = vrot.slane %v14409_v61, %v14400_v18 }
 0x629   : > { %v5490_v3 = vpop.permute.xlu1 %5489  ;;  %v5793_v48 = vsel %vm5286_vm11, %v5674_v43, %v5792_v34 }
 0x62a   : > { %11574 = vmatprep.mubr.msk.f32.mxu1 %vm4719_vm4, %v5793_v48  ;;  %v5682_v22 = vrot.slane %v5490_v3, %v14389_v4 }
 0x62c   : > { %v5517_v12 = vpop.permute.xlu0 %5516  ;;  %v5683_v58 = vsel %vm5568_vm12, %v5682_v22, %v5678_v47 }
 0x62d   : > { %v5496_v38 = vpop.permute.xlu1 %5495 }
 0x62e   : > { %v5692_v0 = vrot.slane %v5496_v38, %v14394_v1  ;;  %v5715_v38 = vrot.slane %v5511_v17, %v14400_v18 }
 0x630   : > { %v5523_v5 = vpop.permute.xlu0 %5522  ;;  %v5697_v43 = vsel %vm5568_vm12, %v5696_v11, %v5692_v0 }
 0x631   : > { %v5502_v63 = vpop.permute.xlu1 %5501  ;;  %v5734_v59 = vrot.slane %v5523_v5, %v14394_v1 }
 0x632   : > { %v5701_v41 = vrot.slane %v5502_v63, %v14400_v18  ;;  %v5724_v63 = vrot.slane %v5517_v12, %v14389_v4 }
 0x634   : > { %v5529_v9 = vpop.permute.xlu0 %5528  ;;  %v5702_v61 = vsel %vm5575_vm13, %v5701_v41, %v5697_v43 }
 0x635   : > { %v5508_v25 = vpop.permute.xlu1 %5507  ;;  %v5743_v0 = vrot.slane %v5529_v9, %v14400_v18 }
 0x636   : > { %v5710_v54 = vrot.slane %v5508_v25, %v14389_v4 }
 0x638   : > { %v5535_v23 = vpop.permute.xlu0 %5534  ;;  %v5711_v44 = vsel %vm5568_vm12, %v5710_v54, %v5706_v8 }
 0x639   : > { %v5514_v33 = vpop.permute.xlu1 %5513  ;;  %v5752_v12 = vrot.slane %v5535_v23, %v14389_v4 }
 0x63a   : > { %v5720_v34 = vrot.slane %v5514_v33, %v14394_v1 }
 0x63c   : > { %v5541_v19 = vpop.permute.xlu0 %5540  ;;  %v5725_v17 = vsel %vm5568_vm12, %v5724_v63, %v5720_v34 }
 0x63d   : > { %v5520_v24 = vpop.permute.xlu1 %5519  ;;  %v5762_v33 = vrot.slane %v5541_v19, %v14394_v1 }
 0x63e   : > { %v5729_v48 = vrot.slane %v5520_v24, %v14400_v18  ;;  %v5716_v24 = vsel %vm5575_vm13, %v5715_v38, %v5711_v44 }
 0x640   : > { %v5547_v39 = vpop.permute.xlu0 %5546 }
 0x641   : > { %v5526_v62 = vpop.permute.xlu1 %5525 }
 0x642   : > { %v5738_v36 = vrot.slane %v5526_v62, %v14389_v4  ;;  %v5688_v62 = vsel %vm5575_vm13, %v5687_v26, %v5683_v58 }
 0x643   : > { %v5794_v47 = vsel %vm5268_vm5, %v5702_v61, %v5688_v62 }
 0x644   : > { %v5739_v5 = vsel %vm5568_vm12, %v5738_v36, %v5734_v59  ;;  %v5553_v11 = vpop.permute.xlu0 %5552  ;;  %v5795_v36 = vsel %vm5271_vm6, %v5716_v24, %v5794_v47  ;;  %v17710_v24 = vld [vmem:[#allocation48_spill] sm:$0xff] }
 0x645   : > { %v5532_v10 = vpop.permute.xlu1 %5531  ;;  %v5744_v41 = vsel %vm5575_vm13, %v5743_v0, %v5739_v5  ;;  %v5780_v58 = vrot.slane %v5553_v11, %v14389_v4  ;;  %v17709_v5 = vld [vmem:[#allocation47_spill] sm:$0xff] }
 0x646   : > { %v5748_v25 = vrot.slane %v5532_v10, %v14394_v1  ;;  %v5730_v10 = vsel %vm5575_vm13, %v5729_v48, %v5725_v17  ;;  %v17711_v17 = vld [vmem:[#allocation49_spill] sm:$0xff] }
 0x647   : > { %v5796_v26 = vsel %vm5274_vm7, %v5730_v10, %v5795_v36  ;;  %v17713_v10 = vld [vmem:[#allocation51_spill] sm:$0xff] }
 0x648   : > { %v5753_v8 = vsel %vm5568_vm12, %v5752_v12, %v5748_v25 }
 0x649   : > { %v5538_v42 = vpop.permute.xlu1 %5537 }
 0x64a   : > { %v5757_v22 = vrot.slane %v5538_v42, %v14400_v18  ;;  %v5771_v42 = vrot.slane %v5547_v39, %v14400_v18 }
 0x64c   : > { %v5758_v23 = vsel %vm5575_vm13, %v5757_v22, %v5753_v8 }
 0x64d   : > { %v5544_v3 = vpop.permute.xlu1 %5543 }
 0x64e   : > { %v5766_v37 = vrot.slane %v5544_v3, %v14389_v4  ;;  %v5797_v3 = vsel %vm5277_vm8, %v5744_v41, %v5796_v26 }
 0x64f   : > { %v5798_v39 = vsel %vm5280_vm9, %v5758_v23, %v5797_v3 }
 0x650   : > { %v5767_v19 = vsel %vm5568_vm12, %v5766_v37, %v5762_v33 }
 0x651   : > { %v5550_v54 = vpop.permute.xlu1 %5549  ;;  %v5772_v43 = vsel %vm5575_vm13, %v5771_v42, %v5767_v19  ;;  %v17714_v19 = vld [vmem:[#allocation52_spill] sm:$0xff]  ;;  %v17715_v42 = vld [vmem:[#allocation53_spill] sm:$0xff] }
 0x652   : > { %v5776_v9 = vrot.slane %v5550_v54, %v14394_v1  ;;  %v5799_v37 = vsel %vm5283_vm10, %v5772_v43, %v5798_v39  ;;  %v17712_v54 = vld [vmem:[#allocation50_spill] sm:$0xff] }
 0x654   : > { %v5781_v44 = vsel %vm5568_vm12, %v5780_v58, %v5776_v9  ;;  %v17716_v9 = vld [vmem:[#allocation54_spill] sm:$0xff] }
 0x655   : > { %v5556_v34 = vpop.permute.xlu1 %5555 }
 0x656   : > { %v5785_v59 = vrot.slane %v5556_v34, %v14400_v18 }
 0x658   : > { %v5786_v48 = vsel %vm5575_vm13, %v5785_v59, %v5781_v44 }
 0x659   : > { %v5800_v38 = vsel %vm5286_vm11, %v5786_v48, %v5799_v37  ;;  %v17717_v37 = vld [vmem:[#allocation68_spill] sm:$0xff] }
 0x65a   : > { %11575 = vmatmul.mubr.msk.f32.vlgmr.msra.gmra.mxu1 %vm4719_vm4, %v5800_v38 }
 0x65b   : > { %11589 = vmatprep.mubr.msk.bf16.mxu1 %vm11917_vm2, %v17676_v51 }
 0x669   : > { %v14503_v63 = vpop.f32.mrf.mxu1 }
 0x66b   : > { %v11557_v61 = vpop.f32.mrf.mxu1 }
 0x66d   : > { %v14505_v25 = vpop.f32.mrf.mxu1 }
 0x66e   : > { %17708 = vst [vmem:[#allocation57_spill] sm:$0xff] %v14505_v25 }
 0x66f   : > { %v11558_v62 = vpop.f32.mrf.mxu1 }
 0x670   : > { %v17718_v62 = vld [vmem:[#allocation56_spill] sm:$0xff] }
 0x68d   : > { %v11567_v48 = vpop.f32.mrf.mxu0 }
 0x68e   : > { %v5945_v38 = vrot.slane %v11567_v48, %v17717_v37 }
 0x690   : > { %v5953_v61 = vcombine.high %v5945_v38, %v5945_v38 }
 0x71a   : > { %v11576_v33 = vpop.f32.mrf.mxu1 }
 0x71b   : > { %v6245_v22 = vrot.slane %v11576_v33, %v17709_v5  ;;  %v6260_v0 = vrot.slane %v11576_v33, %v17710_v24  ;;  %v6275_v12 = vrot.slane %v11576_v33, %v17711_v17  ;;  %v6290_v47 = vrot.slane %v11576_v33, %v17712_v54 }
 0x71c   : > { %v6305_v11 = vrot.slane %v11576_v33, %v17713_v10  ;;  %v6320_v41 = vrot.slane %v11576_v33, %v17714_v19  ;;  %v6335_v8 = vrot.slane %v11576_v33, %v17715_v42  ;;  %v6350_v36 = vrot.slane %v11576_v33, %v17716_v9  ;;  %v5871_v23 = vpop.f32.mrf.mxu1 }
 0x71d   : > { %6251 = vbcast.lane.b32.xlu1 %v6245_v22, 264  ;;  %6247 = vbcast.lane.b32.xlu0 %v6245_v22, 256  ;;  %v6125_v26 = vrot.slane %v5871_v23, %v17709_v5  ;;  %v6140_v58 = vrot.slane %v5871_v23, %v17710_v24  ;;  %v6155_v43 = vrot.slane %v5871_v23, %v17711_v17 }
 0x71e   : > { %v6170_v34 = vrot.slane %v5871_v23, %v17712_v54  ;;  %v6185_v3 = vrot.slane %v5871_v23, %v17713_v10  ;;  %v6200_v59 = vrot.slane %v5871_v23, %v17714_v19  ;;  %v6215_v39 = vrot.slane %v5871_v23, %v17715_v42 }
 0x71f   : > { %v6230_v44 = vrot.slane %v5871_v23, %v17716_v9  ;;  %v6468_v33 = vrot.slane %v17718_v62, %v17717_v37  ;;  %v5961_v24 = vrot.slane %v5945_v38, %v17717_v37 }
 0x721   : > { %6262 = vbcast.lane.b32.xlu1 %v6260_v0, 256  ;;  %6255 = vbcast.lane.b32.xlu0 %v6245_v22, 272  ;;  %v5975_v22 = vrot.slane %v5953_v61, %v17717_v37  ;;  %v6484_v17 = vrot.slane %v6468_v33, %v17717_v37  ;;  %v6022_v10 = vrot.slane %v5961_v24, %v17709_v5 }
 0x722   : > { %v5983_v38 = vcombine.high %v5961_v24, %v5961_v24 }
 0x723   : > { %v6091_v23 = vsel %vm5884_vm0, %v6022_v10, %v14242_v45 }
 0x725   : > { %6270 = vbcast.lane.b32.xlu1 %v6260_v0, 272  ;;  %6266 = vbcast.lane.b32.xlu0 %v6260_v0, 264  ;;  %v6476_v0 = vcombine.high %v6468_v33, %v6468_v33  ;;  %v6506_v33 = vcombine.high %v6484_v17, %v6484_v17 }
 0x727   : > { %v6498_v19 = vrot.slane %v6476_v0, %v17717_v37 }
 0x729   : > { %6281 = vbcast.lane.b32.xlu1 %v6275_v12, 264  ;;  %6277 = vbcast.lane.b32.xlu0 %v6275_v12, 256 }
 0x72d   : > { %6292 = vbcast.lane.b32.xlu1 %v6290_v47, 256  ;;  %6285 = vbcast.lane.b32.xlu0 %v6275_v12, 272  ;;  %v6026_v12 = vrot.slane %v5975_v22, %v17709_v5 }
 0x72f   : > { %v6094_v9 = vsel %vm5884_vm0, %v6026_v12, %v14294_v14 }
 0x731   : > { %6300 = vbcast.lane.b32.xlu1 %v6290_v47, 272  ;;  %6296 = vbcast.lane.b32.xlu0 %v6290_v47, 264 }
 0x735   : > { %6311 = vbcast.lane.b32.xlu1 %v6305_v11, 264  ;;  %6307 = vbcast.lane.b32.xlu0 %v6305_v11, 256 }
 0x739   : > { %6322 = vbcast.lane.b32.xlu1 %v6320_v41, 256  ;;  %6315 = vbcast.lane.b32.xlu0 %v6305_v11, 272 }
 0x73d   : > { %6330 = vbcast.lane.b32.xlu1 %v6320_v41, 272  ;;  %6326 = vbcast.lane.b32.xlu0 %v6320_v41, 264  ;;  %v6545_v41 = vrot.slane %v6484_v17, %v17709_v5 }
 0x741   : > { %6341 = vbcast.lane.b32.xlu1 %v6335_v8, 264  ;;  %6337 = vbcast.lane.b32.xlu0 %v6335_v8, 256 }
 0x745   : > { %6352 = vbcast.lane.b32.xlu1 %v6350_v36, 256  ;;  %6345 = vbcast.lane.b32.xlu0 %v6335_v8, 272 }
 0x749   : > { %6360 = vbcast.lane.b32.xlu1 %v6350_v36, 272  ;;  %6356 = vbcast.lane.b32.xlu0 %v6350_v36, 264 }
 0x74d   : > { %6131 = vbcast.lane.b32.xlu1 %v6125_v26, 264  ;;  %6127 = vbcast.lane.b32.xlu0 %v6125_v26, 256 }
 0x751   : > { %6142 = vbcast.lane.b32.xlu1 %v6140_v58, 256  ;;  %6135 = vbcast.lane.b32.xlu0 %v6125_v26, 272 }
 0x755   : > { %6150 = vbcast.lane.b32.xlu1 %v6140_v58, 272  ;;  %6146 = vbcast.lane.b32.xlu0 %v6140_v58, 264  ;;  %v6549_v58 = vrot.slane %v6498_v19, %v17709_v5 }
 0x759   : > { %6161 = vbcast.lane.b32.xlu1 %v6155_v43, 264  ;;  %6157 = vbcast.lane.b32.xlu0 %v6155_v43, 256 }
 0x75d   : > { %6172 = vbcast.lane.b32.xlu1 %v6170_v34, 256  ;;  %6165 = vbcast.lane.b32.xlu0 %v6155_v43, 272 }
 0x761   : > { %6180 = vbcast.lane.b32.xlu1 %v6170_v34, 272  ;;  %6176 = vbcast.lane.b32.xlu0 %v6170_v34, 264  ;;  %v5938_v34 = vcombine.high %v11567_v48, %v11567_v48 }
 0x765   : > { %6191 = vbcast.lane.b32.xlu1 %v6185_v3, 264  ;;  %6187 = vbcast.lane.b32.xlu0 %v6185_v3, 256 }
 0x769   : > { %6202 = vbcast.lane.b32.xlu1 %v6200_v59, 256  ;;  %6195 = vbcast.lane.b32.xlu0 %v6185_v3, 272  ;;  %v5985_v3 = vcombine.high %v5975_v22, %v5975_v22  ;;  %v5952_v22 = vrot.slane %v5938_v34, %v17717_v37 }
 0x76d   : > { %6210 = vbcast.lane.b32.xlu1 %v6200_v59, 272  ;;  %6206 = vbcast.lane.b32.xlu0 %v6200_v59, 264 }
 0x771   : > { %6221 = vbcast.lane.b32.xlu1 %v6215_v39, 264  ;;  %6217 = vbcast.lane.b32.xlu0 %v6215_v39, 256 }
 0x775   : > { %6232 = vbcast.lane.b32.xlu1 %v6230_v44, 256  ;;  %6225 = vbcast.lane.b32.xlu0 %v6215_v39, 272 }
 0x779   : > { %6240 = vbcast.lane.b32.xlu1 %v6230_v44, 272  ;;  %6236 = vbcast.lane.b32.xlu0 %v6230_v44, 264 }
 0x78f   : > { %v6252_v54 = vpop.permute.xlu1 %6251  ;;  %v6248_v47 = vpop.permute.xlu0 %6247 }
 0x790   : > { %v14536_v11 = vsel %vm6115_vm14, %v6252_v54, %v14282_v16  ;;  %v14561_v43 = vsel %vm14543_vm1, %v6248_v47, %v6091_v23  ;;  %v6034_v54 = vrot.slane %v5985_v3, %v17709_v5  ;;  %v6030_v47 = vrot.slane %v5983_v38, %v17709_v5 }
 0x791   : > { %17719 = vst [vmem:[#allocation5_spill] sm:$0xff] %v14536_v11  ;;  %v6615_v16 = vmul.f32 %v6545_v41, %v14536_v11  ;;  %17723 = vst [vmem:[#allocation81_spill] sm:$0xff] %v14561_v43  ;;  %v6614_v61 = vmul.f32 %v6545_v41, %v14561_v43  ;;  %v5954_v23 = vcombine.high %v5952_v22, %v5952_v22 }
 0x792   : > { %v6100_v34 = vsel %vm5884_vm0, %v6034_v54, %v14322_v27 }
 0x793   : > { %v6263_v8 = vpop.permute.xlu1 %6262  ;;  %v6256_v36 = vpop.permute.xlu0 %6255  ;;  %v6713_v39 = vsel %vm4719_vm4, %v6615_v16, 0.0 }
 0x794   : > { %v14556_v26 = vsel %vm14543_vm1, %v6263_v8, %v6094_v9  ;;  %v14574_v48 = vsel %vm6115_vm14, %v6256_v36, %v14252_v29  ;;  %v6710_v29 = vsel %vm4719_vm4, %v6614_v61, 0.0  ;;  %v6461_v8 = vcombine.high %v17718_v62, %v17718_v62 }
 0x795   : > { %17722 = vst [vmem:[#allocation58_spill] sm:$0xff] %v14556_v26  ;;  %v6617_v44 = vmul.f32 %v6549_v58, %v14556_v26  ;;  %17725 = vst [vmem:[#allocation80_spill] sm:$0xff] %v14574_v48  ;;  %v6616_v10 = vmul.f32 %v6545_v41, %v14574_v48  ;;  %v6508_v9 = vcombine.high %v6498_v19, %v6498_v19 }
 0x796   : > { %v6553_v36 = vrot.slane %v6506_v33, %v17709_v5  ;;  %v6097_v19 = vsel %vm5884_vm0, %v6030_v47, %v14269_v15  ;;  %v6475_v27 = vrot.slane %v6461_v8, %v17717_v37  ;;  %v5982_v15 = vrot.slane %v5954_v23, %v17717_v37 }
 0x797   : > { %v6271_v14 = vpop.permute.xlu1 %6270  ;;  %v6267_v59 = vpop.permute.xlu0 %6266  ;;  %v6719_v24 = vsel %vm4719_vm4, %v6617_v44, 0.0  ;;  %v6557_v44 = vrot.slane %v6508_v9, %v17709_v5 }
 0x798   : > { %v14568_v45 = vsel %vm6115_vm14, %v6271_v14, %v14306_v52  ;;  %6714 = vadd.xlane.f32.xlu0 %v6713_v39  ;;  %v14594_v16 = vsel %vm6115_vm14, %v6267_v59, %v14260_v28  ;;  %v6716_v14 = vsel %vm4719_vm4, %v6616_v10, 0.0  ;;  %v6491_v47 = vrot.slane %v6475_v27, %v17717_v37 }
 0x799   : > { %17724 = vst [vmem:[#allocation23_spill] sm:$0xff] %v14568_v45  ;;  %v6619_v52 = vmul.f32 %v6549_v58, %v14568_v45  ;;  %17727 = vst [vmem:[#allocation65_spill] sm:$0xff] %v14594_v16  ;;  %v6618_v59 = vmul.f32 %v6549_v58, %v14594_v16 }
 0x79b   : > { %v6282_v0 = vpop.permute.xlu1 %6281  ;;  %v6278_v12 = vpop.permute.xlu0 %6277  ;;  %v6725_v41 = vsel %vm4719_vm4, %v6619_v52, 0.0  ;;  %v6477_v52 = vcombine.high %v6475_v27, %v6475_v27 }
 0x79c   : > { %v14584_v17 = vsel %vm6115_vm14, %v6282_v0, %v14314_v35  ;;  %6720 = vadd.xlane.f32.xlu0 %v6719_v24  ;;  %v14613_v39 = vsel %vm14543_vm1, %v6278_v12, %v6097_v19  ;;  %v5968_v24 = vrot.slane %v5952_v22, %v17717_v37  ;;  %v6722_v12 = vsel %vm4719_vm4, %v6618_v59, 0.0 }
 0x79d   : > { %17726 = vst [vmem:[#allocation64_spill] sm:$0xff] %v14584_v17  ;;  %6711 = vadd.xlane.f32.xlu1 %v6710_v29  ;;  %v6621_v62 = vmul.f32 %v6553_v36, %v14584_v17  ;;  %17729 = vst [vmem:[#allocation67_spill] sm:$0xff] %v14613_v39  ;;  %v6620_v54 = vmul.f32 %v6553_v36, %v14613_v39 }
 0x79e   : > { %v6038_v23 = vrot.slane %v5968_v24, %v17709_v5 }
 0x79f   : > { %v6293_v35 = vpop.permute.xlu1 %6292  ;;  %v6286_v3 = vpop.permute.xlu0 %6285  ;;  %v6731_v33 = vsel %vm4719_vm4, %v6621_v62, 0.0 }
 0x7a0   : > { %v14606_v28 = vsel %vm14543_vm1, %v6293_v35, %v6100_v34  ;;  %6726 = vadd.xlane.f32.xlu0 %v6725_v41  ;;  %v14631_v29 = vsel %vm6115_vm14, %v6286_v3, %v14278_v6  ;;  %v6728_v6 = vsel %vm4719_vm4, %v6620_v54, 0.0  ;;  %v6505_v3 = vrot.slane %v6477_v52, %v17717_v37 }
 0x7a1   : > { %17728 = vst [vmem:[#allocation66_spill] sm:$0xff] %v14606_v28  ;;  %6717 = vadd.xlane.f32.xlu1 %v6716_v14  ;;  %v6623_v0 = vmul.f32 %v6557_v44, %v14606_v28  ;;  %17731 = vst [vmem:[#allocation26_spill] sm:$0xff] %v14631_v29  ;;  %v6622_v34 = vmul.f32 %v6553_v36, %v14631_v29  ;;  %v6561_v41 = vrot.slane %v6491_v47, %v17709_v5 }
 0x7a2   : > { %v6103_v27 = vsel %vm5884_vm0, %v6038_v23, %v14302_v7 }
 0x7a3   : > { %v6301_v38 = vpop.permute.xlu1 %6300  ;;  %v6297_v61 = vpop.permute.xlu0 %6296  ;;  %v6737_v8 = vsel %vm4719_vm4, %v6623_v0, 0.0  ;;  %v5986_v0 = vcombine.high %v5982_v15, %v5982_v15 }
 0x7a4   : > { %v14623_v58 = vsel %vm6115_vm14, %v6301_v38, %v14330_v49  ;;  %6732 = vadd.xlane.f32.xlu0 %v6731_v33  ;;  %v6042_v49 = vrot.slane %v5982_v15, %v17709_v5  ;;  %v14649_v62 = vsel %vm6115_vm14, %v6297_v61, %v14290_v30  ;;  %v6734_v30 = vsel %vm4719_vm4, %v6622_v34, 0.0 }
 0x7a5   : > { %17730 = vst [vmem:[#allocation27_spill] sm:$0xff] %v14623_v58  ;;  %6723 = vadd.xlane.f32.xlu1 %v6722_v12  ;;  %v6625_v9 = vmul.f32 %v6557_v44, %v14623_v58  ;;  %17733 = vst [vmem:[#allocation24_spill] sm:$0xff] %v14649_v62  ;;  %v6624_v61 = vmul.f32 %v6557_v44, %v14649_v62  ;;  %v6565_v33 = vrot.slane %v6505_v3, %v17709_v5 }
 0x7a6   : > { %v6507_v15 = vcombine.high %v6491_v47, %v6491_v47  ;;  %v6050_v34 = vrot.slane %v5986_v0, %v17709_v5 }
 0x7a7   : > { %v6312_v22 = vpop.permute.xlu1 %6311  ;;  %v6308_v10 = vpop.permute.xlu0 %6307  ;;  %v6743_v59 = vsel %vm4719_vm4, %v6625_v9, 0.0 }
 0x7a8   : > { %v14640_v35 = vsel %vm6115_vm14, %v6312_v22, %v14344_v21  ;;  %6738 = vadd.xlane.f32.xlu0 %v6737_v8  ;;  %v6106_v21 = vsel %vm5884_vm0, %v6042_v49, %v14336_v20  ;;  %v14667_v20 = vsel %vm14543_vm1, %v6308_v10, %v6103_v27  ;;  %v5984_v22 = vcombine.high %v5968_v24, %v5968_v24  ;;  %v14672_v8 = vpop.f32.mrf.mxu0 }
 0x7a9   : > { %17732 = vst [vmem:[#allocation25_spill] sm:$0xff] %v14640_v35  ;;  %6729 = vadd.xlane.f32.xlu1 %v6728_v6  ;;  %v6627_v36 = vmul.f32 %v6561_v41, %v14640_v35  ;;  %17735 = vst [vmem:[#allocation69_spill] sm:$0xff] %v14667_v20  ;;  %v6740_v10 = vsel %vm4719_vm4, %v6624_v61, 0.0  ;;  %v6626_v49 = vmul.f32 %v6561_v41, %v14667_v20  ;;  %v17802_v20 = vld [vmem:[#allocation9_spill] sm:$0xff] }
 0x7aa   : > { %v5896_v24 = vrot.slane %v14672_v8, %v17717_v37  ;;  %v6569_v27 = vrot.slane %v6507_v15, %v17709_v5  ;;  %v6112_v61 = vsel %vm5884_vm0, %v6050_v34, %v14358_v55  ;;  %v17741_v55 = vld [vmem:[#allocation55_spill] sm:$0xff] }
 0x7ab   : > { %v6323_v19 = vpop.permute.xlu1 %6322  ;;  %v6316_v14 = vpop.permute.xlu0 %6315  ;;  %v6749_v7 = vsel %vm4719_vm4, %v6627_v36, 0.0  ;;  %v17745_v15 = vld [vmem:[#allocation59_spill] sm:$0xff] }
 0x7ac   : > { %v14661_v38 = vsel %vm14543_vm1, %v6323_v19, %v6106_v21  ;;  %6744 = vadd.xlane.f32.xlu0 %v6743_v59  ;;  %v14684_v9 = vsel %vm6115_vm14, %v6316_v14, %v14311_v53  ;;  %v6046_v53 = vrot.slane %v5984_v22, %v17709_v5  ;;  %v6746_v21 = vsel %vm4719_vm4, %v6626_v49, 0.0 }
 0x7ad   : > { %17734 = vst [vmem:[#allocation6_spill] sm:$0xff] %v14661_v38  ;;  %6735 = vadd.xlane.f32.xlu1 %v6734_v30  ;;  %v6629_v52 = vmul.f32 %v6565_v33, %v14661_v38  ;;  %17737 = vst [vmem:[#allocation47_spill] sm:$0xff] %v14684_v9  ;;  %v6628_v14 = vmul.f32 %v6561_v41, %v14684_v9  ;;  %v6509_v59 = vcombine.high %v6505_v3, %v6505_v3 }
 0x7ae   : > { %v14706_v30 = vrot.slane %v5896_v24, %v17717_v37 }
 0x7af   : > { %v6331_v12 = vpop.permute.xlu1 %6330  ;;  %v6327_v54 = vpop.permute.xlu0 %6326 }
 0x7b0   : > { %v14677_v44 = vsel %vm6115_vm14, %v6331_v12, %v14369_v40  ;;  %6750 = vadd.xlane.f32.xlu0 %v6749_v7  ;;  %v6755_v40 = vsel %vm4719_vm4, %v6629_v52, 0.0  ;;  %v14702_v36 = vsel %vm6115_vm14, %v6327_v54, %v14319_v13  ;;  %v6109_v13 = vsel %vm5884_vm0, %v6046_v53, %v14327_v46  ;;  %v17743_v46 = vld [vmem:[#allocation77_spill] sm:$0xff] }
 0x7b1   : > { %17736 = vst [vmem:[#allocation46_spill] sm:$0xff] %v14677_v44  ;;  %6741 = vadd.xlane.f32.xlu1 %v6740_v10  ;;  %v6631_v19 = vmul.f32 %v6565_v33, %v14677_v44  ;;  %17739 = vst [vmem:[#allocation49_spill] sm:$0xff] %v14702_v36  ;;  %v6752_v54 = vsel %vm4719_vm4, %v6628_v14, 0.0  ;;  %v6630_v7 = vmul.f32 %v6565_v33, %v14702_v36 }
 0x7b2   : > { %v6419_v52 = vrot.slane %v17741_v55, %v17717_v37  ;;  %v6573_v10 = vrot.slane %v6509_v59, %v17709_v5  ;;  %v14731_v49 = vrot.slane %v17743_v46, %v17717_v37  ;;  %v5990_v33 = vrot.slane %v14706_v30, %v17709_v5 }
 0x7b3   : > { %v6342_v23 = vpop.permute.xlu1 %6341  ;;  %v6338_v6 = vpop.permute.xlu0 %6337  ;;  %v6761_v41 = vsel %vm4719_vm4, %v6631_v19, 0.0  ;;  %v6758_v14 = vsel %vm4719_vm4, %v6630_v7, 0.0 }
 0x7b4   : > { %v14694_v47 = vsel %vm6115_vm14, %v6342_v23, %v14376_v2  ;;  %6756 = vadd.xlane.f32.xlu0 %v6755_v40  ;;  %v14726_v22 = vsel %vm14543_vm1, %v6338_v6, %v6109_v13  ;;  %17744 = vst [vmem:[#allocation52_spill] sm:$0xff] %v14731_v49  ;;  %v14735_v23 = vrot.slane %v17745_v15, %v17717_v37 }
 0x7b5   : > { %17738 = vst [vmem:[#allocation48_spill] sm:$0xff] %v14694_v47  ;;  %6747 = vadd.xlane.f32.xlu1 %v6746_v21  ;;  %v6633_v3 = vmul.f32 %v6569_v27, %v14694_v47  ;;  %17742 = vst [vmem:[#allocation51_spill] sm:$0xff] %v14726_v22  ;;  %v5904_v40 = vcombine.high %v5896_v24, %v5896_v24  ;;  %v6632_v59 = vmul.f32 %v6569_v27, %v14726_v22  ;;  %v17782_v22 = vld [vmem:[#allocation76_spill] sm:$0xff] }
 0x7b6   : > { %17746 = vst [vmem:[#allocation53_spill] sm:$0xff] %v14735_v23  ;;  %v14749_v24 = vrot.slane %v6419_v52, %v17717_v37 }
 0x7b7   : > { %v6353_v2 = vpop.permute.xlu1 %6352  ;;  %v6346_v0 = vpop.permute.xlu0 %6345  ;;  %v6767_v6 = vsel %vm4719_vm4, %v6633_v3, 0.0 }
 0x7b8   : > { %v14718_v12 = vsel %vm14543_vm1, %v6353_v2, %v6112_v61  ;;  %6762 = vadd.xlane.f32.xlu0 %v6761_v41  ;;  %v14754_v2 = vsel %vm6115_vm14, %v6346_v0, %v14340_v50  ;;  %v7986_v61 = vcombine.high %v14731_v49, %v14731_v49  ;;  %v14761_v41 = vrot.slane %v5904_v40, %v17717_v37 }
 0x7b9   : > { %17740 = vst [vmem:[#allocation50_spill] sm:$0xff] %v14718_v12  ;;  %6753 = vadd.xlane.f32.xlu1 %v6752_v54  ;;  %v6635_v53 = vmul.f32 %v6573_v10, %v14718_v12  ;;  %17748 = vst [vmem:[#allocation68_spill] sm:$0xff] %v14754_v2  ;;  %v6067_v54 = vsel %vm5884_vm0, %v5990_v33, %v14145_v60  ;;  %v6634_v40 = vmul.f32 %v6569_v27, %v14754_v2 }
 0x7ba   : > { %v14782_v33 = vrot.slane %v7986_v61, %v17717_v37  ;;  %v5994_v27 = vrot.slane %v14761_v41, %v17709_v5 }
 0x7bb   : > { %v6361_v34 = vpop.permute.xlu1 %6360  ;;  %v6357_v19 = vpop.permute.xlu0 %6356  ;;  %v6773_v7 = vsel %vm4719_vm4, %v6635_v53, 0.0 }
 0x7bc   : > { %v14744_v21 = vsel %vm6115_vm14, %v6361_v34, %v14381_v56  ;;  %6768 = vadd.xlane.f32.xlu0 %v6767_v6  ;;  %v8767_v56 = vcombine.high %v14735_v23, %v14735_v23  ;;  %v6764_v34 = vsel %vm4719_vm4, %v6632_v59, 0.0  ;;  %v6427_v6 = vcombine.high %v6419_v52, %v6419_v52  ;;  %17751 = vst [vmem:[#allocation77_spill] sm:$0xff] %v14782_v33 }
 0x7bd   : > { %17747 = vst [vmem:[#allocation54_spill] sm:$0xff] %v14744_v21  ;;  %6759 = vadd.xlane.f32.xlu1 %v6758_v14  ;;  %v6637_v50 = vmul.f32 %v6573_v10, %v14744_v21  ;;  %v6513_v14 = vrot.slane %v14749_v24, %v17709_v5  ;;  %v14779_v60 = vsel %vm6115_vm14, %v6357_v19, %v14354_v31  ;;  %v17753_v19 = vld [vmem:[#allocation70_spill] sm:$0xff] }
 0x7be   : > { %17750 = vst [vmem:[#allocation55_spill] sm:$0xff] %v14779_v60  ;;  %v14785_v53 = vrot.slane %v8767_v56, %v17717_v37  ;;  %v5934_v59 = vcombine.high %v14706_v30, %v14706_v30  ;;  %v6770_v56 = vsel %vm4719_vm4, %v6634_v40, 0.0  ;;  %v14801_v30 = vrot.slane %v6427_v6, %v17717_v37  ;;  %v17759_v6 = vld [vmem:[#allocation63_spill] sm:$0xff] }
 0x7bf   : > { %v6132_v3 = vpop.permute.xlu1 %6131  ;;  %v6128_v13 = vpop.permute.xlu0 %6127 }
 0x7c0   : > { %v14770_v0 = vsel %vm14543_vm1, %v6128_v13, %v6067_v54  ;;  %6774 = vadd.xlane.f32.xlu0 %v6773_v7  ;;  %17752 = vst [vmem:[#allocation59_spill] sm:$0xff] %v14785_v53  ;;  %v6779_v54 = vsel %vm4719_vm4, %v6637_v50, 0.0  ;;  %v6636_v7 = vmul.f32 %v6573_v10, %v14779_v60  ;;  %v14810_v50 = vrot.slane %v14782_v33, %v17709_v5  ;;  %v17772_v60 = vld [vmem:[#allocation10_spill] sm:$0xff] }
 0x7c1   : > { %17749 = vst [vmem:[#allocation56_spill] sm:$0xff] %v14770_v0  ;;  %6765 = vadd.xlane.f32.xlu1 %v6764_v34  ;;  %v6590_v31 = vmul.f32 %v6513_v14, %v14770_v0  ;;  %v17755_v34 = vld [vmem:[#allocation13_spill] sm:$0xff]  ;;  %v5889_v10 = vcombine.high %v14672_v8, %v14672_v8  ;;  %v5998_v40 = vrot.slane %v5934_v59, %v17709_v5 }
 0x7c2   : > { %v14806_v25 = vsel %vm6115_vm14, %v6132_v3, %v17755_v34  ;;  %17757 = vst [vmem:[#allocation82_spill] sm:$0xff] %v14810_v50  ;;  %v6776_v59 = vsel %vm4719_vm4, %v6636_v7, 0.0 }
 0x7c3   : > { %v6143_v52 = vpop.permute.xlu1 %6142  ;;  %v6136_v13 = vpop.permute.xlu0 %6135  ;;  %17756 = vst [vmem:[#allocation13_spill] sm:$0xff] %v14806_v25 }
 0x7c4   : > { %v14796_v61 = vsel %vm6115_vm14, %v6136_v13, %v17753_v19  ;;  %6780 = vadd.xlane.f32.xlu0 %v6779_v54  ;;  %v14814_v13 = vrot.slane %v14785_v53, %v17709_v5  ;;  %v6070_v54 = vsel %vm5884_vm0, %v5994_v27, %v17759_v6  ;;  %v17761_v53 = vld [vmem:[#allocation71_spill] sm:$0xff]  ;;  %v6591_v27 = vmul.f32 %v6513_v14, %v14806_v25 }
 0x7c5   : > { %17754 = vst [vmem:[#allocation70_spill] sm:$0xff] %v14796_v61  ;;  %6771 = vadd.xlane.f32.xlu1 %v6770_v56  ;;  %v6638_v56 = vsel %vm4719_vm4, %v6590_v31, 0.0  ;;  %v6592_v34 = vmul.f32 %v6513_v14, %v14796_v61  ;;  %v14826_v23 = vsel %vm14543_vm1, %v6143_v52, %v6070_v54  ;;  %v6517_v6 = vrot.slane %v14801_v30, %v17709_v5 }
 0x7c6   : > { %17758 = vst [vmem:[#allocation83_spill] sm:$0xff] %v14814_v13  ;;  %17760 = vst [vmem:[#allocation63_spill] sm:$0xff] %v14826_v23  ;;  %v6457_v31 = vcombine.high %v14749_v24, %v14749_v24  ;;  %v5903_v54 = vrot.slane %v5889_v10, %v17717_v37  ;;  %v5936_v14 = vcombine.high %v14761_v41, %v14761_v41  ;;  %v17764_v24 = vld [vmem:[#allocation72_spill] sm:$0xff]  ;;  %v6641_v10 = vsel %vm4719_vm4, %v6591_v27, 0.0 }
 0x7c7   : > { %v6151_v3 = vpop.permute.xlu1 %6150  ;;  %v6147_v19 = vpop.permute.xlu0 %6146 }
 0x7c8   : > { %v14831_v8 = vsel %vm6115_vm14, %v6147_v19, %v17761_v53  ;;  %6639 = vadd.xlane.f32.xlu0 %v6638_v56  ;;  %v6644_v56 = vsel %vm4719_vm4, %v6592_v34, 0.0  ;;  %v14855_v33 = vsel %vm6115_vm14, %v6151_v3, %v17764_v24  ;;  %v6412_v34 = vcombine.high %v17741_v55, %v17741_v55 }
 0x7c9   : > { %6777 = vadd.xlane.f32.xlu1 %v6776_v59  ;;  %v14841_v52 = vmul.f32 %v14810_v50, %v14831_v8  ;;  %v14845_v53 = vmul.f32 %v14814_v13, %v14831_v8  ;;  %v6593_v59 = vmul.f32 %v6517_v6, %v14826_v23  ;;  %17765 = vst [vmem:[#allocation72_spill] sm:$0xff] %v14855_v33 }
 0x7ca   : > { %v6594_v41 = vmul.f32 %v6517_v6, %v14831_v8  ;;  %v6521_v3 = vrot.slane %v6457_v31, %v17709_v5  ;;  %v6002_v50 = vrot.slane %v5936_v14, %v17709_v5  ;;  %v6595_v27 = vmul.f32 %v6517_v6, %v14855_v33 }
 0x7cb   : > { %17762 = vst [vmem:[#allocation71_spill] sm:$0xff] %v14841_v52  ;;  %17763 = vst [vmem:[#allocation84_spill] sm:$0xff] %v14845_v53  ;;  %v6162_v7 = vpop.permute.xlu1 %6161  ;;  %v6158_v19 = vpop.permute.xlu0 %6157  ;;  %v17766_v52 = vld [vmem:[#allocation61_spill] sm:$0xff]  ;;  %v6459_v14 = vcombine.high %v14801_v30, %v14801_v30 }
 0x7cc   : > { %v6073_v53 = vsel %vm5884_vm0, %v5998_v40, %v17766_v52  ;;  %6645 = vadd.xlane.f32.xlu0 %v6644_v56  ;;  %v6647_v40 = vsel %vm4719_vm4, %v6593_v59, 0.0  ;;  %v14873_v52 = vrot.slane %v5903_v54, %v17717_v37  ;;  %v17768_v56 = vld [vmem:[#allocation75_spill] sm:$0xff]  ;;  %v6650_v55 = vsel %vm4719_vm4, %v6594_v41, 0.0 }
 0x7cd   : > { %v14864_v13 = vsel %vm14543_vm1, %v6158_v19, %v6073_v53  ;;  %6642 = vadd.xlane.f32.xlu1 %v6641_v10  ;;  %v14878_v53 = vsel %vm6115_vm14, %v6162_v7, %v17768_v56  ;;  %v17770_v19 = vld [vmem:[#allocation11_spill] sm:$0xff]  ;;  %v6426_v59 = vrot.slane %v6412_v34, %v17717_v37  ;;  %v5905_v10 = vcombine.high %v5903_v54, %v5903_v54 }
 0x7ce   : > { %17767 = vst [vmem:[#allocation61_spill] sm:$0xff] %v14864_v13  ;;  %17769 = vst [vmem:[#allocation75_spill] sm:$0xff] %v14878_v53  ;;  %v6596_v31 = vmul.f32 %v6521_v3, %v14864_v13  ;;  %v6076_v7 = vsel %vm5884_vm0, %v6002_v50, %v17772_v60  ;;  %v6653_v56 = vsel %vm4719_vm4, %v6595_v27, 0.0  ;;  %v6597_v12 = vmul.f32 %v6521_v3, %v14878_v53 }
 0x7cf   : > { %v6173_v24 = vpop.permute.xlu1 %6172  ;;  %v6166_v21 = vpop.permute.xlu0 %6165  ;;  %v6006_v30 = vrot.slane %v14873_v52, %v17709_v5  ;;  %v6525_v50 = vrot.slane %v6459_v14, %v17709_v5  ;;  %v14910_v27 = vrot.slane %v6426_v59, %v17717_v37  ;;  %v17778_v14 = vld [vmem:[#allocation74_spill] sm:$0xff]  ;;  %v6428_v49 = vcombine.high %v6426_v59, %v6426_v59 }
 0x7d0   : > { %6648 = vadd.xlane.f32.xlu0 %v6647_v40  ;;  %v14887_v6 = vsel %vm6115_vm14, %v6166_v21, %v17770_v19  ;;  %v14899_v21 = vsel %vm14543_vm1, %v6173_v24, %v6076_v7  ;;  %v6656_v54 = vsel %vm4719_vm4, %v6596_v31, 0.0  ;;  %v7971_v24 = vcombine.high %v17743_v46, %v17743_v46 }
 0x7d1   : > { %17771 = vst [vmem:[#allocation11_spill] sm:$0xff] %v14887_v6  ;;  %6651 = vadd.xlane.f32.xlu1 %v6650_v55  ;;  %17773 = vst [vmem:[#allocation10_spill] sm:$0xff] %v14899_v21  ;;  %v6598_v34 = vmul.f32 %v6521_v3, %v14887_v6  ;;  %v17774_v55 = vld [vmem:[#allocation73_spill] sm:$0xff]  ;;  %v14915_v19 = vrot.slane %v5905_v10, %v17717_v37  ;;  %v6659_v3 = vsel %vm4719_vm4, %v6597_v12, 0.0 }
 0x7d2   : > { %v6529_v2 = vrot.slane %v14910_v27, %v17709_v5  ;;  %v5935_v59 = vcombine.high %v14873_v52, %v14873_v52  ;;  %v14950_v47 = vrot.slane %v6428_v49, %v17717_v37 }
 0x7d3   : > { %v6181_v40 = vpop.permute.xlu1 %6180  ;;  %v6177_v41 = vpop.permute.xlu0 %6176  ;;  %v6662_v46 = vsel %vm4719_vm4, %v6598_v34, 0.0 }
 0x7d4   : > { %6654 = vadd.xlane.f32.xlu0 %v6653_v56  ;;  %v14906_v60 = vsel %vm6115_vm14, %v6177_v41, %v17774_v55  ;;  %v6599_v56 = vmul.f32 %v6525_v50, %v14899_v21  ;;  %v17776_v41 = vld [vmem:[#allocation20_spill] sm:$0xff]  ;;  %v6079_v55 = vsel %vm5884_vm0, %v6006_v30, %v17778_v14  ;;  %v6010_v30 = vrot.slane %v14915_v19, %v17709_v5 }
 0x7d5   : > { %17775 = vst [vmem:[#allocation73_spill] sm:$0xff] %v14906_v60  ;;  %6657 = vadd.xlane.f32.xlu1 %v6656_v54  ;;  %v14922_v54 = vsel %vm6115_vm14, %v6181_v40, %v17776_v41  ;;  %v6600_v10 = vmul.f32 %v6525_v50, %v14906_v60  ;;  %v7985_v40 = vrot.slane %v7971_v24, %v17717_v37 }
 0x7d6   : > { %17777 = vst [vmem:[#allocation20_spill] sm:$0xff] %v14922_v54  ;;  %v6665_v34 = vsel %vm4719_vm4, %v6599_v56, 0.0  ;;  %v6601_v14 = vmul.f32 %v6525_v50, %v14922_v54 }
 0x7d7   : > { %v6192_v31 = vpop.permute.xlu1 %6191  ;;  %v6188_v7 = vpop.permute.xlu0 %6187  ;;  %v6668_v24 = vsel %vm4719_vm4, %v6600_v10, 0.0  ;;  %v7987_v52 = vcombine.high %v7985_v40, %v7985_v40  ;;  %v14958_v56 = vrot.slane %v7985_v40, %v17717_v37  ;;  %v6014_v40 = vrot.slane %v5935_v59, %v17709_v5 }
 0x7d8   : > { %6660 = vadd.xlane.f32.xlu0 %v6659_v3  ;;  %v14931_v12 = vsel %vm14543_vm1, %v6188_v7, %v6079_v55  ;;  %v17780_v7 = vld [vmem:[#allocation15_spill] sm:$0xff]  ;;  %v6671_v44 = vsel %vm4719_vm4, %v6601_v14, 0.0  ;;  %v6533_v14 = vrot.slane %v14950_v47, %v17709_v5 }
 0x7d9   : > { %17779 = vst [vmem:[#allocation74_spill] sm:$0xff] %v14931_v12  ;;  %6663 = vadd.xlane.f32.xlu1 %v6662_v46  ;;  %v14945_v55 = vsel %vm6115_vm14, %v6192_v31, %v17780_v7  ;;  %v6602_v46 = vmul.f32 %v6529_v2, %v14931_v12  ;;  %17784 = vst [vmem:[#allocation85_spill] sm:$0xff] %v14958_v56  ;;  %v17785_v31 = vld [vmem:[#allocation18_spill] sm:$0xff]  ;;  %v8017_v59 = vcombine.high %v14958_v56, %v14958_v56 }
 0x7da   : > { %17781 = vst [vmem:[#allocation15_spill] sm:$0xff] %v14945_v55  ;;  %v6603_v49 = vmul.f32 %v6529_v2, %v14945_v55 }
 0x7db   : > { %v6203_v41 = vpop.permute.xlu1 %6202  ;;  %v6196_v3 = vpop.permute.xlu0 %6195 }
 0x7dc   : > { %6666 = vadd.xlane.f32.xlu0 %v6665_v34  ;;  %v14955_v50 = vsel %vm6115_vm14, %v6196_v3, %v17782_v22  ;;  %v6082_v34 = vsel %vm5884_vm0, %v6010_v30, %v17785_v31  ;;  %v6674_v22 = vsel %vm4719_vm4, %v6602_v46, 0.0  ;;  %v5937_v46 = vcombine.high %v14915_v19, %v14915_v19 }
 0x7dd   : > { %17783 = vst [vmem:[#allocation76_spill] sm:$0xff] %v14955_v50  ;;  %6669 = vadd.xlane.f32.xlu1 %v6668_v24  ;;  %v14967_v36 = vsel %vm14543_vm1, %v6203_v41, %v6082_v34  ;;  %v6604_v3 = vmul.f32 %v6529_v2, %v14955_v50  ;;  %v17787_v24 = vld [vmem:[#allocation62_spill] sm:$0xff]  ;;  %v6458_v41 = vcombine.high %v14910_v27, %v14910_v27 }
 0x7de   : > { %17786 = vst [vmem:[#allocation18_spill] sm:$0xff] %v14967_v36  ;;  %v8752_v2 = vcombine.high %v17745_v15, %v17745_v15 }
 0x7df   : > { %v6211_v10 = vpop.permute.xlu1 %6210  ;;  %v6207_v7 = vpop.permute.xlu0 %6206  ;;  %v6680_v15 = vsel %vm4719_vm4, %v6604_v3, 0.0  ;;  %v6018_v3 = vrot.slane %v5937_v46, %v17709_v5  ;;  %v6460_v46 = vcombine.high %v14950_v47, %v14950_v47 }
 0x7e0   : > { %6672 = vadd.xlane.f32.xlu0 %v6671_v44  ;;  %v14975_v30 = vsel %vm6115_vm14, %v6207_v7, %v17787_v24  ;;  %v14982_v44 = vrot.slane %v7987_v52, %v17717_v37  ;;  %v6677_v7 = vsel %vm4719_vm4, %v6603_v49, 0.0  ;;  %v17790_v24 = vld [vmem:[#allocation7_spill] sm:$0xff]  ;;  %v17792_v52 = vld [vmem:[#allocation22_spill] sm:$0xff] }
 0x7e1   : > { %17788 = vst [vmem:[#allocation62_spill] sm:$0xff] %v14975_v30  ;;  %6675 = vadd.xlane.f32.xlu1 %v6674_v22  ;;  %v6605_v22 = vmul.f32 %v6533_v14, %v14967_v36  ;;  %v14995_v27 = vsel %vm6115_vm14, %v6211_v10, %v17790_v24  ;;  %v6085_v56 = vsel %vm5884_vm0, %v6014_v40, %v17792_v52 }
 0x7e2   : > { %17789 = vst [vmem:[#allocation86_spill] sm:$0xff] %v14982_v44  ;;  %17791 = vst [vmem:[#allocation7_spill] sm:$0xff] %v14995_v27  ;;  %v6606_v19 = vmul.f32 %v6533_v14, %v14975_v30  ;;  %v8019_v49 = vcombine.high %v14982_v44, %v14982_v44  ;;  %v6537_v10 = vrot.slane %v6458_v41, %v17709_v5  ;;  %v17797_v44 = vld [vmem:[#allocation16_spill] sm:$0xff] }
 0x7e3   : > { %v6222_v31 = vpop.permute.xlu1 %6221  ;;  %v6218_v34 = vpop.permute.xlu0 %6217  ;;  %v15010_v24 = vrot.slane %v8017_v59, %v17709_v5  ;;  %v8766_v40 = vrot.slane %v8752_v2, %v17717_v37  ;;  %v6683_v9 = vsel %vm4719_vm4, %v6605_v22, 0.0 }
 0x7e4   : > { %6678 = vadd.xlane.f32.xlu0 %v6677_v7  ;;  %v15004_v38 = vsel %vm14543_vm1, %v6218_v34, %v6085_v56  ;;  %v6607_v56 = vmul.f32 %v6533_v14, %v14995_v27  ;;  %v17795_v34 = vld [vmem:[#allocation17_spill] sm:$0xff]  ;;  %v6686_v59 = vsel %vm4719_vm4, %v6606_v19, 0.0  ;;  %v17798_v14 = vld [vmem:[#allocation19_spill] sm:$0xff] }
 0x7e5   : > { %17793 = vst [vmem:[#allocation22_spill] sm:$0xff] %v15004_v38  ;;  %6681 = vadd.xlane.f32.xlu1 %v6680_v15  ;;  %17794 = vst [vmem:[#allocation87_spill] sm:$0xff] %v15010_v24  ;;  %v15019_v15 = vsel %vm6115_vm14, %v6222_v31, %v17795_v34  ;;  %v6608_v2 = vmul.f32 %v6537_v10, %v15004_v38  ;;  %v6823_v22 = vrot.slane %v17798_v14, %v17717_v37 }
 0x7e6   : > { %17796 = vst [vmem:[#allocation17_spill] sm:$0xff] %v15019_v15  ;;  %v15037_v34 = vrot.slane %v8019_v49, %v17709_v5  ;;  %v6689_v35 = vsel %vm4719_vm4, %v6607_v56, 0.0  ;;  %v6609_v47 = vmul.f32 %v6537_v10, %v15019_v15  ;;  %v6541_v56 = vrot.slane %v6460_v46, %v17709_v5  ;;  %v17808_v46 = vld [vmem:[#allocation79_spill] sm:$0xff] }
 0x7e7   : > { %v6233_v7 = vpop.permute.xlu1 %6232  ;;  %v6226_v52 = vpop.permute.xlu0 %6225  ;;  %v6692_v49 = vsel %vm4719_vm4, %v6608_v2, 0.0  ;;  %v15058_v42 = vrot.slane %v8766_v40, %v17717_v37 }
 0x7e8   : > { %v15024_v41 = vsel %vm6115_vm14, %v6226_v52, %v17797_v44  ;;  %6684 = vadd.xlane.f32.xlu0 %v6683_v9  ;;  %v8768_v44 = vcombine.high %v8766_v40, %v8766_v40  ;;  %v17800_v9 = vld [vmem:[#allocation8_spill] sm:$0xff] }
 0x7e9   : > { %6687 = vadd.xlane.f32.xlu1 %v6686_v59  ;;  %v15034_v31 = vmul.f32 %v15010_v24, %v15024_v41  ;;  %v6088_v19 = vsel %vm5884_vm0, %v6018_v3, %v17800_v9  ;;  %v6610_v57 = vmul.f32 %v6537_v10, %v15024_v41  ;;  %v6839_v9 = vrot.slane %v6823_v22, %v17717_v37 }
 0x7ea   : > { %v15046_v59 = vsel %vm14543_vm1, %v6233_v7, %v6088_v19  ;;  %17803 = vst [vmem:[#allocation8_spill] sm:$0xff] %v15058_v42  ;;  %v17804_v7 = vld [vmem:[#allocation12_spill] sm:$0xff]  ;;  %v6695_v10 = vsel %vm4719_vm4, %v6609_v47, 0.0  ;;  %v6831_v24 = vcombine.high %v6823_v22, %v6823_v22 }
 0x7eb   : > { %17799 = vst [vmem:[#allocation16_spill] sm:$0xff] %v15034_v31  ;;  %v6237_v52 = vpop.permute.xlu0 %6236  ;;  %17801 = vst [vmem:[#allocation19_spill] sm:$0xff] %v15046_v59  ;;  %v6241_v3 = vpop.permute.xlu1 %6240  ;;  %v15062_v19 = vrot.slane %v17804_v7, %v17717_v37  ;;  %v6611_v2 = vmul.f32 %v6541_v56, %v15046_v59 }
 0x7ec   : > { %v15051_v31 = vsel %vm6115_vm14, %v6237_v52, %v17802_v20  ;;  %6690 = vadd.xlane.f32.xlu0 %v6689_v35  ;;  %v15069_v20 = vrot.slane %v8768_v44, %v17717_v37  ;;  %v15076_v40 = vsel %vm6115_vm14, %v6241_v3, %v17808_v46  ;;  %v6698_v52 = vsel %vm4719_vm4, %v6610_v57, 0.0 }
 0x7ed   : > { %6693 = vadd.xlane.f32.xlu1 %v6692_v49  ;;  %17805 = vst [vmem:[#allocation9_spill] sm:$0xff] %v15062_v19  ;;  %v15066_v35 = vmul.f32 %v15037_v34, %v15051_v31  ;;  %17809 = vst [vmem:[#allocation79_spill] sm:$0xff] %v15076_v40  ;;  %v6612_v49 = vmul.f32 %v6541_v56, %v15051_v31  ;;  %v8798_v44 = vcombine.high %v15058_v42, %v15058_v42  ;;  %vm7549_vm14 = vcmask 1043456  }
 0x7ee   : > { %17807 = vst [vmem:[#allocation88_spill] sm:$0xff] %v15069_v20  ;;  %v9548_v47 = vcombine.high %v15062_v19, %v15062_v19  ;;  %v8800_v32 = vcombine.high %v15069_v20, %v15069_v20  ;;  %v6701_v3 = vsel %vm4719_vm4, %v6611_v2, 0.0  ;;  %v6853_v46 = vrot.slane %v6831_v24, %v17717_v37 }
 0x7ef   : > { %17806 = vst [vmem:[#allocation12_spill] sm:$0xff] %v15066_v35  ;;  %v6917_v35 = vrot.slane %v6839_v9, %v17709_v5  ;;  %v6704_v57 = vsel %vm4719_vm4, %v6612_v49, 0.0  ;;  %v15096_v19 = vrot.slane %v8798_v44, %v17709_v5 }
 0x7f0   : > { %6696 = vadd.xlane.f32.xlu0 %v6695_v10  ;;  %v6613_v10 = vmul.f32 %v6541_v56, %v15076_v40  ;;  %v15101_v56 = vrot.slane %v8800_v32, %v17709_v5 }
 0x7f1   : > { %6699 = vadd.xlane.f32.xlu1 %v6698_v52  ;;  %v6994_v22 = vmul.f32 %v6917_v35, %v14770_v0  ;;  %v15093_v52 = vrot.slane %v9548_v47, %v17717_v37  ;;  %17811 = vst [vmem:[#allocation90_spill] sm:$0xff] %v15096_v19  ;;  %v6995_v2 = vmul.f32 %v6917_v35, %v14806_v25 }
 0x7f2   : > { %v6707_v20 = vsel %vm4719_vm4, %v6613_v10, 0.0  ;;  %17812 = vst [vmem:[#allocation91_spill] sm:$0xff] %v15101_v56  ;;  %v15107_v24 = vmul.f32 %v15096_v19, %v15024_v41  ;;  %v6921_v47 = vrot.slane %v6853_v46, %v17709_v5  ;;  %v15112_v44 = vmul.f32 %v15101_v56, %v15051_v31 }
 0x7f3   : > { %17810 = vst [vmem:[#allocation89_spill] sm:$0xff] %v15093_v52  ;;  %v7042_v49 = vsel %vm4719_vm4, %v6994_v22, 0.0  ;;  %v6861_v10 = vcombine.high %v6839_v9, %v6839_v9  ;;  %v15116_v32 = vrot.slane %v15093_v52, %v17709_v5  ;;  %v6816_v52 = vcombine.high %v17798_v14, %v17798_v14 }
 0x7f4   : > { %6702 = vadd.xlane.f32.xlu0 %v6701_v3  ;;  %v6996_v3 = vmul.f32 %v6917_v35, %v14796_v61  ;;  %17813 = vst [vmem:[#allocation92_spill] sm:$0xff] %v15107_v24  ;;  %17814 = vst [vmem:[#allocation93_spill] sm:$0xff] %v15112_v44  ;;  %v7045_v35 = vsel %vm4719_vm4, %v6995_v2, 0.0 }
 0x7f5   : > { %6705 = vadd.xlane.f32.xlu1 %v6704_v57  ;;  %17815 = vst [vmem:[#allocation94_spill] sm:$0xff] %v15116_v32  ;;  %v6997_v57 = vmul.f32 %v6921_v47, %v14826_v23  ;;  %v15128_v9 = vmul.f32 %v15116_v32, %v14831_v8  ;;  %v6925_v44 = vrot.slane %v6861_v10, %v17709_v5 }
 0x7f6   : > { %v7048_v22 = vsel %vm4719_vm4, %v6996_v3, 0.0  ;;  %v6863_v32 = vcombine.high %v6853_v46, %v6853_v46 }
 0x7f7   : > { %17817 = vst [vmem:[#allocation96_spill] sm:$0xff] %v15128_v9  ;;  %v7051_v24 = vsel %vm4719_vm4, %v6997_v57, 0.0  ;;  %v7000_v56 = vmul.f32 %v6925_v44, %v14864_v13 }
 0x7f8   : > { %6708 = vadd.xlane.f32.xlu0 %v6707_v20  ;;  %v15120_v20 = vrot.slane %v14503_v63, %v17717_v37 }
 0x7f9   : > { %7043 = vadd.xlane.f32.xlu1 %v7042_v49  ;;  %v6998_v49 = vmul.f32 %v6921_v47, %v14831_v8  ;;  %v7060_v57 = vsel %vm4719_vm4, %v7000_v56, 0.0 }
 0x7fa   : > { %17816 = vst [vmem:[#allocation95_spill] sm:$0xff] %v15120_v20  ;;  %v10329_v2 = vcombine.high %v15120_v20, %v15120_v20  ;;  %v7001_v20 = vmul.f32 %v6925_v44, %v14878_v53 }
 0x7fb   : > { %v7054_v3 = vsel %vm4719_vm4, %v6998_v49, 0.0 }
 0x7fc   : > { %7046 = vadd.xlane.f32.xlu0 %v7045_v35  ;;  %v6999_v35 = vmul.f32 %v6921_v47, %v14855_v33  ;;  %v15141_v14 = vrot.slane %v10329_v2, %v17717_v37  ;;  %v6929_v47 = vrot.slane %v6863_v32, %v17709_v5  ;;  %v7063_v49 = vsel %vm4719_vm4, %v7001_v20, 0.0 }
 0x7fd   : > { %7049 = vadd.xlane.f32.xlu1 %v7048_v22  ;;  %v6830_v22 = vrot.slane %v6816_v52, %v17717_v37  ;;  %v9533_v32 = vcombine.high %v17804_v7, %v17804_v7 }
 0x7fe   : > { %17818 = vst [vmem:[#allocation97_spill] sm:$0xff] %v15141_v14  ;;  %v7057_v10 = vsel %vm4719_vm4, %v6999_v35, 0.0  ;;  %v15151_v52 = vrot.slane %v15141_v14, %v17709_v5  ;;  %v7003_v2 = vmul.f32 %v6929_v47, %v14899_v21  ;;  %v7004_v56 = vmul.f32 %v6929_v47, %v14906_v60 }
 0x7ff   : > { %v6846_v46 = vrot.slane %v6830_v22, %v17717_v37  ;;  %v7005_v14 = vmul.f32 %v6929_v47, %v14922_v54 }
 0x800   : > { %7052 = vadd.xlane.f32.xlu0 %v7051_v24  ;;  %v7002_v24 = vmul.f32 %v6925_v44, %v14887_v6  ;;  %17819 = vst [vmem:[#allocation98_spill] sm:$0xff] %v15151_v52 }
 0x801   : > { %7055 = vadd.xlane.f32.xlu1 %v7054_v3  ;;  %v17820_v3 = vld [vmem:[#allocation30_spill] sm:$0xff]  ;;  %v6933_v20 = vrot.slane %v6846_v46, %v17709_v5 }
 0x802   : > { %v7066_v35 = vsel %vm4719_vm4, %v7002_v24, 0.0  ;;  %v11304_v44 = vcombine.low %v17820_v3, %v17820_v3  ;;  %v7069_v24 = vsel %vm4719_vm4, %v7003_v2, 0.0  ;;  %v17822_v3 = vld [vmem:[#allocation29_spill] sm:$0xff]  ;;  %v7075_v2 = vsel %vm4719_vm4, %v7005_v14, 0.0 }
 0x803   : > { %v7006_v7 = vmul.f32 %v6933_v20, %v14931_v12  ;;  %v7007_v47 = vmul.f32 %v6933_v20, %v14945_v55 }
 0x804   : > { %7058 = vadd.xlane.f32.xlu0 %v7057_v10  ;;  %v6832_v10 = vcombine.high %v6830_v22, %v6830_v22  ;;  %v7072_v22 = vsel %vm4719_vm4, %v7004_v56, 0.0 }
 0x805   : > { %7061 = vadd.xlane.f32.xlu1 %v7060_v57  ;;  %v15163_v57 = vmul.f32 %v15151_v52, %v14831_v8  ;;  %v9547_v8 = vrot.slane %v9533_v32, %v17717_v37  ;;  %v7078_v56 = vsel %vm4719_vm4, %v7006_v7, 0.0  ;;  %v6862_v32 = vcombine.high %v6846_v46, %v6846_v46 }
 0x807   : > { %17821 = vst [vmem:[#allocation30_spill] sm:$0xff] %v15163_v57  ;;  %v17823_v57 = vld [vmem:[#allocation28_spill] sm:$0xff]  ;;  %v15185_v14 = vrot.slane %v9547_v8, %v17717_v37  ;;  %v6941_v46 = vrot.slane %v6862_v32, %v17709_v5 }
 0x808   : > { %7064 = vadd.xlane.f32.xlu0 %v7063_v49  ;;  %v7926_v49 = vsel %vm7549_vm14, %v11304_v44, 0  ;;  %v11303_v44 = vcombine.low %v17823_v57, %v17822_v3 }
 0x809   : > { %7067 = vadd.xlane.f32.xlu1 %v7066_v35  ;;  %11586 = vmatpush3.bf16.msra.mxu1 %v7926_v49  ;;  %v6860_v35 = vrot.slane %v6832_v10, %v17717_v37  ;;  %v7008_v49 = vmul.f32 %v6933_v20, %v14955_v50  ;;  %17824 = vst [vmem:[#allocation29_spill] sm:$0xff] %v15185_v14 }
 0x80a   : > { %11587 = vmatprep.subr.bf16.mxu1 %v17676_v51 }
 0x80b   : > { %v6937_v10 = vrot.slane %v6860_v35, %v17709_v5  ;;  %v7084_v3 = vsel %vm4719_vm4, %v7008_v49, 0.0  ;;  %v7012_v49 = vmul.f32 %v6941_v46, %v15004_v38 }
 0x80c   : > { %7070 = vadd.xlane.f32.xlu0 %v7069_v24  ;;  %v9549_v24 = vcombine.high %v9547_v8, %v9547_v8  ;;  %v9579_v8 = vcombine.high %v15185_v14, %v15185_v14 }
 0x80d   : > { %7073 = vadd.xlane.f32.xlu1 %v7072_v22  ;;  %11588 = vmatpush3.bf16.msra.mxu1 %v11303_v44  ;;  %v7081_v22 = vsel %vm4719_vm4, %v7007_v47, 0.0  ;;  %v7009_v57 = vmul.f32 %v6937_v10, %v14967_v36  ;;  %v7010_v7 = vmul.f32 %v6937_v10, %v14975_v30  ;;  %v10314_v44 = vcombine.high %v14503_v63, %v14503_v63  ;;  %v17826_v63 = vld [vmem:[#allocation14_spill] sm:$0xff] }
 0x80e   : > { %11601 = vmatprep.subr.bf16.mxu1 %v17676_v51  ;;  %v15190_v20 = vrot.slane %v9549_v24, %v17717_v37  ;;  %v7011_v47 = vmul.f32 %v6937_v10, %v14995_v27  ;;  %v6864_v24 = vcombine.high %v6860_v35, %v6860_v35  ;;  %v6872_v32 = vrot.slane %v17826_v63, %v17717_v37 }
 0x80f   : > { %v15211_v35 = vrot.slane %v9579_v8, %v17709_v5 }
 0x810   : > { %7076 = vadd.xlane.f32.xlu0 %v7075_v2  ;;  %17825 = vst [vmem:[#allocation28_spill] sm:$0xff] %v15190_v20  ;;  %v7087_v2 = vsel %vm4719_vm4, %v7009_v57, 0.0  ;;  %v10328_v57 = vrot.slane %v10314_v44, %v17717_v37  ;;  %v7093_v10 = vsel %vm4719_vm4, %v7011_v47, 0.0  ;;  %v6888_v44 = vrot.slane %v6872_v32, %v17717_v37 }
 0x811   : > { %7079 = vadd.xlane.f32.xlu1 %v7078_v56  ;;  %v7090_v56 = vsel %vm4719_vm4, %v7010_v7, 0.0  ;;  %v7014_v7 = vmul.f32 %v6941_v46, %v15024_v41  ;;  %17827 = vst [vmem:[#allocation14_spill] sm:$0xff] %v15211_v35  ;;  %v15220_v47 = vmul.f32 %v15211_v35, %v15024_v41 }
 0x812   : > { %v10330_v14 = vcombine.high %v10328_v57, %v10328_v57 }
 0x813   : > { %17829 = vst [vmem:[#allocation100_spill] sm:$0xff] %v15220_v47  ;;  %v6949_v47 = vrot.slane %v6888_v44, %v17709_v5 }
 0x814   : > { %7082 = vadd.xlane.f32.xlu0 %v7081_v22  ;;  %v9581_v22 = vcombine.high %v15190_v20, %v15190_v20 }
 0x815   : > { %7085 = vadd.xlane.f32.xlu1 %v7084_v3  ;;  %v7013_v3 = vmul.f32 %v6941_v46, %v15019_v15 }
 0x816   : > { %v15215_v20 = vrot.slane %v9581_v22, %v17709_v5  ;;  %v7102_v22 = vsel %vm4719_vm4, %v7014_v7, 0.0 }
 0x817   : > { %v7099_v46 = vsel %vm4719_vm4, %v7013_v3, 0.0 }
 0x818   : > { %7088 = vadd.xlane.f32.xlu0 %v7087_v2  ;;  %v7096_v2 = vsel %vm4719_vm4, %v7012_v49, 0.0  ;;  %17828 = vst [vmem:[#allocation99_spill] sm:$0xff] %v15215_v20  ;;  %v15223_v49 = vrot.slane %v10328_v57, %v17717_v37  ;;  %v15235_v57 = vrot.slane %v10330_v14, %v17717_v37 }
 0x819   : > { %7091 = vadd.xlane.f32.xlu1 %v7090_v56  ;;  %v6945_v56 = vrot.slane %v6864_v24, %v17709_v5  ;;  %v15229_v24 = vmul.f32 %v15215_v20, %v15051_v31 }
 0x81a   : > { %17830 = vst [vmem:[#allocation101_spill] sm:$0xff] %v15223_v49  ;;  %17832 = vst [vmem:[#allocation103_spill] sm:$0xff] %v15235_v57  ;;  %v10360_v3 = vcombine.high %v15223_v49, %v15223_v49  ;;  %v10362_v14 = vcombine.high %v15235_v57, %v15235_v57  ;;  %v7019_v49 = vmul.f32 %v6949_v47, %v14536_v11 }
 0x81b   : > { %v7015_v8 = vmul.f32 %v6945_v56, %v15046_v59  ;;  %17831 = vst [vmem:[#allocation102_spill] sm:$0xff] %v15229_v24  ;;  %v7017_v24 = vmul.f32 %v6945_v56, %v15076_v40 }
 0x81c   : > { %7094 = vadd.xlane.f32.xlu0 %v7093_v10  ;;  %v7016_v10 = vmul.f32 %v6945_v56, %v15051_v31  ;;  %v15252_v56 = vrot.slane %v10360_v3, %v17709_v5  ;;  %v15263_v3 = vrot.slane %v10362_v14, %v17709_v5 }
 0x81d   : > { %7097 = vadd.xlane.f32.xlu1 %v7096_v2  ;;  %v6880_v2 = vcombine.high %v6872_v32, %v6872_v32  ;;  %v7105_v35 = vsel %vm4719_vm4, %v7015_v8, 0.0  ;;  %v7111_v8 = vsel %vm4719_vm4, %v7017_v24, 0.0 }
 0x81e   : > { %v7108_v7 = vsel %vm4719_vm4, %v7016_v10, 0.0  ;;  %17833 = vst [vmem:[#allocation104_spill] sm:$0xff] %v15252_v56  ;;  %17835 = vst [vmem:[#allocation106_spill] sm:$0xff] %v15263_v3 }
 0x81f   : > { %v15244_v32 = vrot.slane %v6880_v2, %v17717_v37 }
 0x820   : > { %7100 = vadd.xlane.f32.xlu0 %v7099_v46  ;;  %v7018_v46 = vmul.f32 %v6949_v47, %v14561_v43 }
 0x821   : > { %v6715_v52 = vpop.xlane.xlu0 %6714  ;;  %7103 = vadd.xlane.f32.xlu1 %v7102_v22  ;;  %v6953_v2 = vrot.slane %v15244_v32, %v17709_v5 }
 0x822   : > { %v7114_v10 = vsel %vm4719_vm4, %v7018_v46, 0.0 }
 0x823   : > { %v7021_v42 = vmul.f32 %v6953_v2, %v14556_v26 }
 0x824   : > { %7106 = vadd.xlane.f32.xlu0 %v7105_v35  ;;  %v7020_v35 = vmul.f32 %v6949_v47, %v14574_v48  ;;  %v7117_v47 = vsel %vm4719_vm4, %v7019_v49, 0.0 }
 0x825   : > { %v6721_v22 = vpop.xlane.xlu0 %6720  ;;  %7109 = vadd.xlane.f32.xlu1 %v7108_v7 }
 0x826   : > { %v6712_v20 = vpop.xlane.xlu1 %6711  ;;  %v7120_v46 = vsel %vm4719_vm4, %v7020_v35, 0.0  ;;  %v6865_v35 = vcombine.high %v17826_v63, %v17826_v63  ;;  %v6912_v63 = vcombine.high %v15244_v32, %v15244_v32 }
 0x827   : > { %v6798_v9 = vpack.c.bf16 %v6715_v52, %v6712_v20  ;;  %v15259_v52 = vmul.f32 %v15252_v56, %v15024_v41  ;;  %v6910_v20 = vcombine.high %v6888_v44, %v6888_v44  ;;  %v15272_v44 = vmul.f32 %v15263_v3, %v15051_v31 }
 0x828   : > { %7112 = vadd.xlane.f32.xlu0 %v7111_v8  ;;  %v7023_v56 = vmul.f32 %v6953_v2, %v14568_v45 }
 0x829   : > { %v7650_v7 = vunpack.c.l.b16 %v6798_v9  ;;  %v7651_v19 = vunpack.c.h.b16 %v6798_v9  ;;  %v6727_v57 = vpop.xlane.xlu0 %6726  ;;  %7115 = vadd.xlane.f32.xlu1 %v7114_v10  ;;  %17834 = vst [vmem:[#allocation105_spill] sm:$0xff] %v15259_v52  ;;  %v7022_v9 = vmul.f32 %v6953_v2, %v14594_v16  ;;  %17836 = vst [vmem:[#allocation107_spill] sm:$0xff] %v15272_v44 }
 0x82a   : > { %v6718_v24 = vpop.xlane.xlu1 %6717  ;;  %v6801_v41 = vpack.c.bf16 %v6727_v57, %v6727_v57  ;;  %v7123_v57 = vsel %vm4719_vm4, %v7021_v42, 0.0 }
 0x82b   : > { %v6799_v8 = vpack.c.bf16 %v6718_v24, %v6718_v24  ;;  %v7789_v10 = vrot.slane %v7650_v7, %v14394_v1  ;;  %v7793_v48 = vrot.slane %v7651_v19, %v14389_v4  ;;  %v6957_v24 = vrot.slane %v6910_v20, %v17709_v5 }
 0x82c   : > { %7118 = vadd.xlane.f32.xlu0 %v7117_v47  ;;  %v7655_v31 = vunpack.c.l.b16 %v6801_v41 }
 0x82d   : > { %v7652_v49 = vunpack.c.l.b16 %v6799_v8  ;;  %v6733_v14 = vpop.xlane.xlu0 %6732  ;;  %7121 = vadd.xlane.f32.xlu1 %v7120_v46  ;;  %v7794_v47 = vsel %vm5568_vm12, %v7793_v48, %v7789_v10  ;;  %v7126_v8 = vsel %vm4719_vm4, %v7022_v9, 0.0  ;;  %v7024_v46 = vmul.f32 %v6957_v24, %v14613_v39 }
 0x82e   : > { %v6724_v52 = vpop.xlane.xlu1 %6723  ;;  %v7129_v48 = vsel %vm4719_vm4, %v7023_v56, 0.0  ;;  %v7026_v32 = vmul.f32 %v6957_v24, %v14631_v29  ;;  %v6961_v56 = vrot.slane %v6912_v63, %v17709_v5 }
 0x82f   : > { %v7798_v7 = vrot.slane %v7652_v49, %v14400_v18  ;;  %v6800_v19 = vpack.c.bf16 %v6724_v52, %v6721_v22  ;;  %v6879_v22 = vrot.slane %v6865_v35, %v17717_v37  ;;  %v7025_v52 = vmul.f32 %v6957_v24, %v14584_v17 }
 0x830   : > { %7124 = vadd.xlane.f32.xlu0 %v7123_v57  ;;  %v7812_v49 = vrot.slane %v7655_v31, %v14400_v18 }
 0x831   : > { %v7799_v20 = vsel %vm5575_vm13, %v7798_v7, %v7794_v47  ;;  %v7653_v44 = vunpack.c.l.b16 %v6800_v19  ;;  %v7654_v2 = vunpack.c.h.b16 %v6800_v19  ;;  %v6739_v3 = vpop.xlane.xlu0 %6738  ;;  %7127 = vadd.xlane.f32.xlu1 %v7126_v8  ;;  %v7132_v7 = vsel %vm4719_vm4, %v7024_v46, 0.0 }
 0x832   : > { %v6730_v42 = vpop.xlane.xlu1 %6729  ;;  %v7135_v24 = vsel %vm4719_vm4, %v7025_v52, 0.0  ;;  %v7138_v46 = vsel %vm4719_vm4, %v7026_v32, 0.0  ;;  %v7029_v32 = vmul.f32 %v6961_v56, %v14623_v58 }
 0x833   : > { %v7803_v9 = vrot.slane %v7653_v44, %v14394_v1  ;;  %v7807_v10 = vrot.slane %v7654_v2, %v14389_v4  ;;  %v6802_v41 = vpack.c.bf16 %v6733_v14, %v6730_v42  ;;  %v15297_v44 = vrot.slane %v6879_v22, %v17717_v37 }
 0x834   : > { %7130 = vadd.xlane.f32.xlu0 %v7129_v48  ;;  %v7027_v42 = vmul.f32 %v6961_v56, %v14606_v28 }
 0x835   : > { %v7808_v19 = vsel %vm5568_vm12, %v7807_v10, %v7803_v9  ;;  %v7656_v35 = vunpack.c.l.b16 %v6802_v41  ;;  %v7657_v57 = vunpack.c.h.b16 %v6802_v41  ;;  %v6745_v47 = vpop.xlane.xlu0 %6744  ;;  %7133 = vadd.xlane.f32.xlu1 %v7132_v7  ;;  %v7028_v10 = vmul.f32 %v6961_v56, %v14649_v62 }
 0x836   : > { %v7813_v14 = vsel %vm5575_vm13, %v7812_v49, %v7808_v19  ;;  %v6736_v8 = vpop.xlane.xlu1 %6735  ;;  %v6805_v63 = vpack.c.bf16 %v6745_v47, %v6745_v47  ;;  %v6881_v41 = vcombine.high %v6879_v22, %v6879_v22  ;;  %v6965_v52 = vrot.slane %v15297_v44, %v17709_v5 }
 0x837   : > { %v6803_v31 = vpack.c.bf16 %v6736_v8, %v6736_v8  ;;  %v7905_v2 = vsel %vm5268_vm5, %v7813_v14, %v7799_v20  ;;  %v7817_v48 = vrot.slane %v7656_v35, %v14394_v1  ;;  %v7821_v9 = vrot.slane %v7657_v57, %v14389_v4  ;;  %v17837_v8 = vld [vmem:[#allocation69_spill] sm:$0xff] }
 0x838   : > { %7136 = vadd.xlane.f32.xlu0 %v7135_v24  ;;  %v7141_v35 = vsel %vm4719_vm4, %v7027_v42, 0.0  ;;  %v7661_v47 = vunpack.c.l.b16 %v6805_v63  ;;  %v7144_v22 = vsel %vm4719_vm4, %v7028_v10, 0.0  ;;  %v7030_v24 = vmul.f32 %v6965_v52, %v17837_v8 }
 0x839   : > { %v7658_v49 = vunpack.c.l.b16 %v6803_v31  ;;  %v6751_v7 = vpop.xlane.xlu0 %6750  ;;  %7139 = vadd.xlane.f32.xlu1 %v7138_v46  ;;  %v7822_v57 = vsel %vm5568_vm12, %v7821_v9, %v7817_v48  ;;  %v15316_v31 = vrot.slane %v6881_v41, %v17717_v37  ;;  %v7147_v48 = vsel %vm4719_vm4, %v7029_v32, 0.0  ;;  %v17838_v9 = vld [vmem:[#allocation25_spill] sm:$0xff]  ;;  %v17839_v41 = vld [vmem:[#allocation47_spill] sm:$0xff] }
 0x83a   : > { %v6742_v20 = vpop.xlane.xlu1 %6741  ;;  %v7031_v63 = vmul.f32 %v6965_v52, %v17838_v9 }
 0x83b   : > { %v7826_v19 = vrot.slane %v7658_v49, %v14400_v18  ;;  %v6804_v14 = vpack.c.bf16 %v6742_v20, %v6739_v3  ;;  %v6969_v32 = vrot.slane %v15316_v31, %v17709_v5 }
 0x83c   : > { %7142 = vadd.xlane.f32.xlu0 %v7141_v35  ;;  %v7032_v35 = vmul.f32 %v6965_v52, %v17839_v41  ;;  %v17841_v41 = vld [vmem:[#allocation49_spill] sm:$0xff] }
 0x83d   : > { %v7827_v46 = vsel %vm5575_vm13, %v7826_v19, %v7822_v57  ;;  %v7659_v62 = vunpack.c.l.b16 %v6804_v14  ;;  %v7660_v56 = vunpack.c.h.b16 %v6804_v14  ;;  %v6757_v58 = vpop.xlane.xlu0 %6756  ;;  %7145 = vadd.xlane.f32.xlu1 %v7144_v22  ;;  %v7840_v19 = vrot.slane %v7661_v47, %v14400_v18 }
 0x83e   : > { %v7906_v3 = vsel %vm5271_vm6, %v7827_v46, %v7905_v2  ;;  %v6748_v42 = vpop.xlane.xlu1 %6747  ;;  %v7150_v14 = vsel %vm4719_vm4, %v7030_v24, 0.0  ;;  %v7153_v47 = vsel %vm4719_vm4, %v7031_v63, 0.0 }
 0x83f   : > { %v7831_v10 = vrot.slane %v7659_v62, %v14394_v1  ;;  %v7835_v49 = vrot.slane %v7660_v56, %v14389_v4  ;;  %v6806_v20 = vpack.c.bf16 %v6751_v7, %v6748_v42  ;;  %v6911_v62 = vcombine.high %v15297_v44, %v15297_v44 }
 0x840   : > { %7148 = vadd.xlane.f32.xlu0 %v7147_v48  ;;  %v7156_v42 = vsel %vm4719_vm4, %v7032_v35, 0.0  ;;  %v17840_v48 = vld [vmem:[#allocation6_spill] sm:$0xff]  ;;  %v7034_v44 = vmul.f32 %v6969_v32, %v17841_v41 }
 0x841   : > { %v7836_v57 = vsel %vm5568_vm12, %v7835_v49, %v7831_v10  ;;  %v7662_v2 = vunpack.c.l.b16 %v6806_v20  ;;  %v7663_v22 = vunpack.c.h.b16 %v6806_v20  ;;  %v6763_v46 = vpop.xlane.xlu0 %6762  ;;  %7151 = vadd.xlane.f32.xlu1 %v7150_v14  ;;  %v7033_v10 = vmul.f32 %v6969_v32, %v17840_v48 }
 0x842   : > { %v7841_v7 = vsel %vm5575_vm13, %v7840_v19, %v7836_v57  ;;  %v6754_v52 = vpop.xlane.xlu1 %6753  ;;  %v6809_v14 = vpack.c.bf16 %v6763_v46, %v6763_v46 }
 0x843   : > { %v7907_v56 = vsel %vm5274_vm7, %v7841_v7, %v7906_v3  ;;  %v6807_v24 = vpack.c.bf16 %v6754_v52, %v6754_v52  ;;  %v7845_v49 = vrot.slane %v7662_v2, %v14394_v1  ;;  %v7849_v20 = vrot.slane %v7663_v22, %v14389_v4  ;;  %v17842_v52 = vld [vmem:[#allocation46_spill] sm:$0xff] }
 0x844   : > { %7154 = vadd.xlane.f32.xlu0 %v7153_v47  ;;  %v6973_v3 = vrot.slane %v6911_v62, %v17709_v5  ;;  %v7159_v7 = vsel %vm4719_vm4, %v7033_v10, 0.0  ;;  %v7035_v2 = vmul.f32 %v6969_v32, %v17842_v52  ;;  %v7667_v46 = vunpack.c.l.b16 %v6809_v14 }
 0x845   : > { %v7664_v9 = vunpack.c.l.b16 %v6807_v24  ;;  %v15340_v19 = vpop.xlane.xlu0 %6768  ;;  %7157 = vadd.xlane.f32.xlu1 %v7156_v42  ;;  %v7850_v22 = vsel %vm5568_vm12, %v7849_v20, %v7845_v49  ;;  %v7162_v47 = vsel %vm4719_vm4, %v7034_v44, 0.0  ;;  %v17843_v24 = vld [vmem:[#allocation51_spill] sm:$0xff]  ;;  %v6913_v42 = vcombine.high %v15316_v31, %v15316_v31  ;;  %v17844_v44 = vld [vmem:[#allocation48_spill] sm:$0xff] }
 0x846   : > { %v6760_v63 = vpop.xlane.xlu1 %6759  ;;  %v7036_v41 = vmul.f32 %v6973_v3, %v17843_v24  ;;  %v7165_v14 = vsel %vm4719_vm4, %v7035_v2, 0.0  ;;  %v7868_v31 = vrot.slane %v7667_v46, %v14400_v18 }
 0x847   : > { %v7854_v57 = vrot.slane %v7664_v9, %v14400_v18  ;;  %v6808_v35 = vpack.c.bf16 %v6760_v63, %v6757_v58  ;;  %v7037_v63 = vmul.f32 %v6973_v3, %v17844_v44 }
 0x848   : > { %7160 = vadd.xlane.f32.xlu0 %v7159_v7 }
 0x849   : > { %v7855_v62 = vsel %vm5575_vm13, %v7854_v57, %v7850_v22  ;;  %v7665_v48 = vunpack.c.l.b16 %v6808_v35  ;;  %v7666_v9 = vunpack.c.h.b16 %v6808_v35  ;;  %v15352_v58 = vpop.xlane.xlu0 %6774  ;;  %7163 = vadd.xlane.f32.xlu1 %v7162_v47  ;;  %v7168_v57 = vsel %vm4719_vm4, %v7036_v41, 0.0  ;;  %v17845_v35 = vld [vmem:[#allocation68_spill] sm:$0xff] }
 0x84a   : > { %v7908_v32 = vsel %vm5277_vm8, %v7855_v62, %v7907_v56  ;;  %v15355_v10 = vpop.xlane.xlu1 %6765  ;;  %v7038_v7 = vmul.f32 %v6973_v3, %v17845_v35  ;;  %v17846_v47 = vld [vmem:[#allocation52_spill] sm:$0xff]  ;;  %v7171_v41 = vsel %vm4719_vm4, %v7037_v63, 0.0  ;;  %v17847_v3 = vld [vmem:[#allocation50_spill] sm:$0xff] }
 0x84b   : > { %v7859_v49 = vrot.slane %v7665_v48, %v14394_v1  ;;  %v7863_v20 = vrot.slane %v7666_v9, %v14389_v4  ;;  %v6977_v48 = vrot.slane %v6913_v42, %v17709_v5  ;;  %v7994_v62 = vrot.slane %v17846_v47, %v17717_v37  ;;  %v17850_v35 = vld [vmem:[#allocation78_spill] sm:$0xff] }
 0x84c   : > { %7166 = vadd.xlane.f32.xlu0 %v7165_v14  ;;  %v8027_v44 = vrot.slane %v17850_v35, %v17717_v37 }
 0x84d   : > { %v7864_v22 = vsel %vm5568_vm12, %v7863_v20, %v7859_v49  ;;  %v15365_v56 = vpop.xlane.xlu0 %6780  ;;  %7169 = vadd.xlane.f32.xlu1 %v7168_v57  ;;  %v7039_v14 = vmul.f32 %v6977_v48, %v17847_v3  ;;  %v7174_v49 = vsel %vm4719_vm4, %v7038_v7, 0.0  ;;  %v17848_v20 = vld [vmem:[#allocation55_spill] sm:$0xff]  ;;  %v8072_v47 = vrot.slane %v7994_v62, %v17709_v5 }
 0x84e   : > { %v7869_v2 = vsel %vm5575_vm13, %v7868_v31, %v7864_v22  ;;  %v15371_v9 = vpop.xlane.xlu1 %6771  ;;  %v7040_v57 = vmul.f32 %v6977_v48, %v17848_v20 }
 0x84f   : > { %v15374_v46 = vsel %vm5280_vm9, %v7869_v2, %v7908_v32  ;;  %v7177_v22 = vsel %vm4719_vm4, %v7039_v14, 0.0  ;;  %v17849_v32 = vld [vmem:[#allocation54_spill] sm:$0xff]  ;;  %v8150_v20 = vmul.f32 %v8072_v47, %v14806_v25  ;;  %v8151_v14 = vmul.f32 %v8072_v47, %v14796_v61 }
 0x850   : > { %7172 = vadd.xlane.f32.xlu0 %v7171_v41  ;;  %v7041_v2 = vmul.f32 %v6977_v48, %v17849_v32  ;;  %v7180_v63 = vsel %vm4719_vm4, %v7040_v57, 0.0  ;;  %v8149_v41 = vmul.f32 %v8072_v47, %v14770_v0  ;;  %v15407_v25 = vrot.slane %v8027_v44, %v17717_v37 }
 0x851   : > { %v15380_v42 = vpop.xlane.xlu0 %6639  ;;  %7175 = vadd.xlane.f32.xlu1 %v7174_v49 }
 0x852   : > { %v15383_v31 = vpop.xlane.xlu1 %6777  ;;  %v7183_v49 = vsel %vm4719_vm4, %v7041_v2, 0.0  ;;  %v8197_v48 = vsel %vm4719_vm4, %v8149_v41, 0.0  ;;  %v17851_v2 = vld [vmem:[#allocation82_spill] sm:$0xff]  ;;  %v17852_v41 = vld [vmem:[#allocation77_spill] sm:$0xff] }
 0x853   : > { %v8152_v0 = vmul.f32 %v17851_v2, %v14826_v23  ;;  %v8018_v47 = vcombine.high %v17852_v41, %v17852_v41  ;;  %v8154_v23 = vmul.f32 %v17851_v2, %v14855_v33 }
 0x854   : > { %7178 = vadd.xlane.f32.xlu0 %v7177_v22  ;;  %v8016_v22 = vcombine.high %v7994_v62, %v7994_v62 }
 0x855   : > { %v15389_v3 = vpop.xlane.xlu0 %6645  ;;  %7181 = vadd.xlane.f32.xlu1 %v7180_v63  ;;  %v8200_v63 = vsel %vm4719_vm4, %v8150_v20, 0.0  ;;  %v8206_v20 = vsel %vm4719_vm4, %v8152_v0, 0.0  ;;  %v17854_v0 = vld [vmem:[#allocation85_spill] sm:$0xff] }
 0x856   : > { %v15391_v7 = vpop.xlane.xlu1 %6642  ;;  %v8080_v62 = vrot.slane %v8016_v22, %v17709_v5  ;;  %v8088_v22 = vrot.slane %v17854_v0, %v17709_v5 }
 0x858   : > { %7184 = vadd.xlane.f32.xlu0 %v7183_v49  ;;  %v8203_v49 = vsel %vm4719_vm4, %v8151_v14, 0.0  ;;  %v17853_v14 = vld [vmem:[#allocation71_spill] sm:$0xff]  ;;  %v8157_v8 = vmul.f32 %v8080_v62, %v14887_v6  ;;  %v8161_v28 = vmul.f32 %v8088_v22, %v14931_v12 }
 0x859   : > { %v15399_v57 = vpop.xlane.xlu0 %6648  ;;  %8198 = vadd.xlane.f32.xlu1 %v8197_v48  ;;  %v8035_v48 = vcombine.high %v8027_v44, %v8027_v44  ;;  %v8209_v41 = vsel %vm4719_vm4, %v17853_v14, 0.0  ;;  %v8084_v44 = vrot.slane %v8018_v47, %v17709_v5 }
 0x85a   : > { %v15401_v32 = vpop.xlane.xlu1 %6651 }
 0x85b   : > { %v15433_v2 = vrot.slane %v8035_v48, %v17717_v37  ;;  %v8159_v47 = vmul.f32 %v8084_v44, %v14906_v60  ;;  %v8160_v48 = vmul.f32 %v8084_v44, %v14922_v54  ;;  %v8163_v60 = vmul.f32 %v8088_v22, %v14955_v50 }
 0x85c   : > { %8201 = vadd.xlane.f32.xlu0 %v8200_v63  ;;  %v15422_v63 = vrot.slane %v15407_v25, %v17709_v5 }
 0x85d   : > { %v15412_v61 = vpop.xlane.xlu0 %6654  ;;  %8204 = vadd.xlane.f32.xlu1 %v8203_v49  ;;  %v8155_v49 = vmul.f32 %v8080_v62, %v14864_v13  ;;  %v8212_v13 = vsel %vm4719_vm4, %v8154_v23, 0.0  ;;  %v8227_v50 = vsel %vm4719_vm4, %v8159_v47, 0.0 }
 0x85e   : > { %v15415_v24 = vpop.xlane.xlu1 %6657  ;;  %v8173_v14 = vmul.f32 %v15422_v63, %v14561_v43 }
 0x85f   : > { %v8215_v0 = vsel %vm4719_vm4, %v8155_v49, 0.0  ;;  %v6810_v49 = vpack.c.bf16 %v15340_v19, %v15355_v10  ;;  %v8230_v19 = vsel %vm4719_vm4, %v8160_v48, 0.0  ;;  %v8233_v10 = vsel %vm4719_vm4, %v8161_v28, 0.0 }
 0x860   : > { %8207 = vadd.xlane.f32.xlu0 %v8206_v20  ;;  %v8156_v20 = vmul.f32 %v8080_v62, %v14878_v53  ;;  %v17855_v53 = vld [vmem:[#allocation86_spill] sm:$0xff]  ;;  %v8162_v62 = vmul.f32 %v8088_v22, %v14945_v55  ;;  %v15466_v12 = vsel %vm4719_vm4, %v8173_v14, 0.0 }
 0x861   : > { %v15427_v52 = vpop.xlane.xlu0 %6660  ;;  %8210 = vadd.xlane.f32.xlu1 %v8209_v41  ;;  %v8158_v41 = vmul.f32 %v8084_v44, %v14899_v21  ;;  %v8092_v29 = vrot.slane %v17855_v53, %v17709_v5  ;;  %v7668_v28 = vunpack.c.l.b16 %v6810_v49 }
 0x862   : > { %v15435_v33 = vpop.xlane.xlu1 %6663  ;;  %v8218_v53 = vsel %vm4719_vm4, %v8156_v20, 0.0 }
 0x863   : > { %v8164_v43 = vmul.f32 %v8092_v29, %v14967_v36  ;;  %v8224_v22 = vsel %vm4719_vm4, %v8158_v41, 0.0  ;;  %v8165_v55 = vmul.f32 %v8092_v29, %v14975_v30  ;;  %v8166_v20 = vmul.f32 %v8092_v29, %v14995_v27  ;;  %v17856_v36 = vld [vmem:[#allocation87_spill] sm:$0xff] }
 0x864   : > { %8213 = vadd.xlane.f32.xlu0 %v8212_v13  ;;  %v15457_v13 = vmul.f32 %v15422_v63, %v14536_v11  ;;  %v8167_v54 = vmul.f32 %v17856_v36, %v15004_v38  ;;  %v15481_v41 = vsel %vm4719_vm4, %v8163_v60, 0.0  ;;  %v8168_v47 = vmul.f32 %v17856_v36, %v15019_v15 }
 0x865   : > { %v15451_v23 = vpop.xlane.xlu0 %6666  ;;  %8216 = vadd.xlane.f32.xlu1 %v8215_v0  ;;  %v8221_v0 = vsel %vm4719_vm4, %v8157_v8, 0.0  ;;  %v8236_v8 = vsel %vm4719_vm4, %v8162_v62, 0.0  ;;  %v7669_v30 = vunpack.c.h.b16 %v6810_v49  ;;  %v6812_v29 = vpack.c.bf16 %v15383_v31, %v15352_v58 }
 0x866   : > { %v15461_v44 = vpop.xlane.xlu1 %6669  ;;  %v15490_v27 = vsel %vm4719_vm4, %v8164_v43, 0.0  ;;  %v6782_v62 = vpack.c.bf16 %v15391_v7, %v15380_v42  ;;  %v15495_v60 = vsel %vm4719_vm4, %v8165_v55, 0.0  ;;  %v8170_v36 = vmul.f32 %v15037_v34, %v15046_v59 }
 0x867   : > { %v6813_v49 = vpack.c.bf16 %v15365_v56, %v15365_v56  ;;  %v6784_v58 = vpack.c.bf16 %v15401_v32, %v15399_v57  ;;  %v15505_v43 = vsel %vm4719_vm4, %v8166_v20, 0.0  ;;  %v15508_v42 = vsel %vm4719_vm4, %v8167_v54, 0.0  ;;  %v17858_v56 = vld [vmem:[#allocation16_spill] sm:$0xff]  ;;  %v17860_v57 = vld [vmem:[#allocation31_spill] sm:$0xff] }
 0x868   : > { %8219 = vadd.xlane.f32.xlu0 %v8218_v53  ;;  %v17857_v53 = vld [vmem:[#allocation33_spill] sm:$0xff]  ;;  %v6811_v55 = vpack.c.bf16 %v15371_v9, %v15371_v9  ;;  %v15513_v7 = vsel %vm4719_vm4, %v8168_v47, 0.0  ;;  %v17859_v32 = vld [vmem:[#allocation32_spill] sm:$0xff]  ;;  %v7873_v54 = vrot.slane %v7668_v28, %v14394_v1  ;;  %v7877_v20 = vrot.slane %v7669_v30, %v14389_v4 }
 0x869   : > { %v15477_v14 = vpop.xlane.xlu0 %6672  ;;  %8222 = vadd.xlane.f32.xlu1 %v8221_v0  ;;  %v11301_v48 = vcombine.low %v17857_v53, %v17857_v53  ;;  %v15517_v53 = vsel %vm4719_vm4, %v17858_v56, 0.0  ;;  %v7672_v9 = vunpack.c.h.b16 %v6812_v29  ;;  %v7626_v47 = vunpack.c.l.b16 %v6782_v62 }
 0x86a   : > { %v6676_v38 = vpop.xlane.xlu1 %6675  ;;  %v7627_v59 = vunpack.c.h.b16 %v6782_v62  ;;  %v15527_v56 = vsel %vm4719_vm4, %v8170_v36, 0.0  ;;  %v15529_v15 = vunpack.c.l.b16 %v6813_v49  ;;  %v7629_v21 = vunpack.c.l.b16 %v6784_v58  ;;  %v17861_v62 = vld [vmem:[#allocation12_spill] sm:$0xff] }
 0x86b   : > { %v7551_v0 = vsel %vm7549_vm14, %v11301_v48, 0  ;;  %v7671_v48 = vunpack.c.l.b16 %v6812_v29  ;;  %v7630_v6 = vunpack.c.h.b16 %v6784_v58  ;;  %v6785_v28 = vpack.c.bf16 %v15412_v61, %v15412_v61 }
 0x86c   : > { %8225 = vadd.xlane.f32.xlu0 %v8224_v22  ;;  %11578 = vmatpush3.bf16.msra.mxu0 %v7551_v0  ;;  %v11300_v22 = vcombine.low %v17860_v57, %v17859_v32  ;;  %v15533_v30 = vunpack.c.l.b16 %v6811_v55  ;;  %v6786_v29 = vpack.c.bf16 %v15427_v52, %v15415_v24  ;;  %v15539_v36 = vsel %vm4719_vm4, %v17861_v62, 0.0 }
 0x86d   : > { %v6679_v31 = vpop.xlane.xlu0 %6678  ;;  %8228 = vadd.xlane.f32.xlu1 %v8227_v50  ;;  %11579 = vmatprep.subr.bf16.mxu0 %v17676_v51  ;;  %v6783_v50 = vpack.c.bf16 %v15389_v3, %v15389_v3  ;;  %v15543_v49 = vmul.f32 %v15037_v34, %v15076_v40  ;;  %v15547_v61 = vsel %vm5568_vm12, %v7877_v20, %v7873_v54  ;;  %v7631_v20 = vunpack.c.l.b16 %v6785_v28 }
 0x86e   : > { %v6682_v0 = vpop.xlane.xlu1 %6681  ;;  %v7891_v58 = vrot.slane %v7672_v9, %v14389_v4  ;;  %v6787_v52 = vpack.c.bf16 %v15435_v33, %v15435_v33  ;;  %v7677_v55 = vrot.slane %v7626_v47, %v14394_v1  ;;  %v7681_v34 = vrot.slane %v7627_v59, %v14389_v4 }
 0x86f   : > { %v6790_v32 = vpack.c.bf16 %v6679_v31, %v6676_v38  ;;  %v7695_v54 = vrot.slane %v7630_v6, %v14389_v4  ;;  %v7882_v33 = vrot.slane %v15533_v30, %v14400_v18  ;;  %v7633_v9 = vunpack.c.h.b16 %v6786_v29  ;;  %v17862_v30 = vld [vmem:[#allocation80_spill] sm:$0xff] }
 0x870   : > { %8231 = vadd.xlane.f32.xlu0 %v8230_v19  ;;  %11580 = vmatpush3.bf16.msra.mxu0 %v11300_v22  ;;  %v7887_v19 = vrot.slane %v7671_v48, %v14394_v1  ;;  %v7691_v22 = vrot.slane %v7629_v21, %v14394_v1  ;;  %v7632_v48 = vunpack.c.l.b16 %v6786_v29  ;;  %v7634_v31 = vunpack.c.l.b16 %v6787_v52 }
 0x871   : > { %8234 = vadd.xlane.f32.xlu1 %v8233_v10  ;;  %v6685_v3 = vpop.xlane.xlu0 %6684  ;;  %11593 = vmatprep.subr.bf16.mxu0 %v17676_v51  ;;  %v15553_v10 = vunpack.c.l.b16 %v6783_v50  ;;  %v6788_v50 = vpack.c.bf16 %v15461_v44, %v15451_v23  ;;  %v6789_v6 = vpack.c.bf16 %v15477_v14, %v15477_v14  ;;  %v6791_v21 = vpack.c.bf16 %v6682_v0, %v6682_v0 }
 0x872   : > { %v6688_v24 = vpop.xlane.xlu1 %6687  ;;  %v15567_v59 = vsel %vm5568_vm12, %v7891_v58, %v7887_v19  ;;  %v7682_v28 = vsel %vm5568_vm12, %v7681_v34, %v7677_v55  ;;  %v7638_v29 = vunpack.c.l.b16 %v6790_v32  ;;  %v7696_v23 = vsel %vm5568_vm12, %v7695_v54, %v7691_v22 }
 0x873   : > { %v7686_v47 = vrot.slane %v15553_v10, %v14400_v18  ;;  %v6792_v62 = vpack.c.bf16 %v6688_v24, %v6685_v3  ;;  %v7700_v44 = vrot.slane %v7631_v20, %v14400_v18  ;;  %v7705_v58 = vrot.slane %v7632_v48, %v14394_v1 }
 0x874   : > { %8237 = vadd.xlane.f32.xlu0 %v8236_v8  ;;  %v7709_v14 = vrot.slane %v7633_v9, %v14389_v4  ;;  %v7635_v0 = vunpack.c.l.b16 %v6788_v50  ;;  %v7636_v52 = vunpack.c.h.b16 %v6788_v50  ;;  %v7714_v55 = vrot.slane %v7634_v31, %v14400_v18 }
 0x875   : > { %8240 = vadd.xlane.f32.xlu1 %v15481_v41  ;;  %v6691_v38 = vpop.xlane.xlu0 %6690  ;;  %v7639_v41 = vunpack.c.h.b16 %v6790_v32  ;;  %v7637_v3 = vunpack.c.l.b16 %v6789_v6  ;;  %v7640_v24 = vunpack.c.l.b16 %v6791_v21  ;;  %v7733_v32 = vrot.slane %v7638_v29, %v14394_v1 }
 0x876   : > { %v6694_v8 = vpop.xlane.xlu1 %6693  ;;  %v6793_v19 = vpack.c.bf16 %v6691_v38, %v6691_v38  ;;  %v7641_v54 = vunpack.c.l.b16 %v6792_v62  ;;  %v7642_v20 = vunpack.c.h.b16 %v6792_v62  ;;  %v7719_v50 = vrot.slane %v7635_v0, %v14394_v1 }
 0x877   : > { %v7737_v48 = vrot.slane %v7639_v41, %v14389_v4  ;;  %v7723_v31 = vrot.slane %v7636_v52, %v14389_v4  ;;  %v7728_v29 = vrot.slane %v7637_v3, %v14400_v18  ;;  %v7687_v52 = vsel %vm5575_vm13, %v7686_v47, %v7682_v28 }
 0x878   : > { %8243 = vadd.xlane.f32.xlu0 %v15490_v27  ;;  %v7643_v38 = vunpack.c.l.b16 %v6793_v19 }
 0x879   : > { %8246 = vadd.xlane.f32.xlu1 %v15495_v60  ;;  %v6697_v10 = vpop.xlane.xlu0 %6696  ;;  %v7710_v60 = vsel %vm5568_vm12, %v7709_v14, %v7705_v58  ;;  %v7747_v58 = vrot.slane %v7641_v54, %v14394_v1  ;;  %v7751_v14 = vrot.slane %v7642_v20, %v14389_v4 }
 0x87a   : > { %v6794_v34 = vpack.c.bf16 %v6697_v10, %v6694_v8  ;;  %v6700_v22 = vpop.xlane.xlu1 %6699  ;;  %v7701_v8 = vsel %vm5575_vm13, %v7700_v44, %v7696_v23  ;;  %v7738_v23 = vsel %vm5568_vm12, %v7737_v48, %v7733_v32  ;;  %v7756_v44 = vrot.slane %v7643_v38, %v14400_v18 }
 0x87b   : > { %v6795_v27 = vpack.c.bf16 %v6700_v22, %v6700_v22  ;;  %v7898_v22 = vsel %vm5268_vm5, %v7701_v8, %v7687_v52 }
 0x87c   : > { %v7644_v9 = vunpack.c.l.b16 %v6794_v34  ;;  %v7645_v57 = vunpack.c.h.b16 %v6794_v34  ;;  %8249 = vadd.xlane.f32.xlu0 %v15505_v43  ;;  %v7742_v43 = vrot.slane %v7640_v24, %v14400_v18 }
 0x87d   : > { %v7646_v6 = vunpack.c.l.b16 %v6795_v27  ;;  %8252 = vadd.xlane.f32.xlu1 %v15508_v42  ;;  %v6703_v21 = vpop.xlane.xlu0 %6702  ;;  %v7715_v42 = vsel %vm5575_vm13, %v7714_v55, %v7710_v60 }
 0x87e   : > { %v7761_v62 = vrot.slane %v7644_v9, %v14394_v1  ;;  %v7765_v41 = vrot.slane %v7645_v57, %v14389_v4  ;;  %v6706_v19 = vpop.xlane.xlu1 %6705  ;;  %v7724_v57 = vsel %vm5568_vm12, %v7723_v31, %v7719_v50  ;;  %v7743_v54 = vsel %vm5575_vm13, %v7742_v43, %v7738_v23 }
 0x87f   : > { %v6796_v0 = vpack.c.bf16 %v6706_v19, %v6703_v21  ;;  %v7770_v10 = vrot.slane %v7646_v6, %v14400_v18  ;;  %v7729_v47 = vsel %vm5575_vm13, %v7728_v29, %v7724_v57  ;;  %v7899_v48 = vsel %vm5271_vm6, %v7715_v42, %v7898_v22 }
 0x880   : > { %8255 = vadd.xlane.f32.xlu0 %v15513_v7  ;;  %v7766_v28 = vsel %vm5568_vm12, %v7765_v41, %v7761_v62  ;;  %v7752_v7 = vsel %vm5568_vm12, %v7751_v14, %v7747_v58  ;;  %v7900_v60 = vsel %vm5274_vm7, %v7729_v47, %v7899_v48  ;;  %v8266_v6 = vsel %vm4719_vm4, %v15543_v49, 0.0 }
 0x881   : > { %v7647_v3 = vunpack.c.l.b16 %v6796_v0  ;;  %v7648_v24 = vunpack.c.h.b16 %v6796_v0  ;;  %8258 = vadd.xlane.f32.xlu1 %v15517_v53  ;;  %v6709_v34 = vpop.xlane.xlu0 %6708  ;;  %v7883_v53 = vsel %vm5575_vm13, %v7882_v33, %v15547_v61  ;;  %v7757_v38 = vsel %vm5575_vm13, %v7756_v44, %v7752_v7 }
 0x882   : > { %v6797_v55 = vpack.c.bf16 %v6709_v34, %v6709_v34  ;;  %v7044_v32 = vpop.xlane.xlu1 %7043  ;;  %v7771_v50 = vsel %vm5575_vm13, %v7770_v10, %v7766_v28  ;;  %v8175_v61 = vmul.f32 %v15422_v63, %v17862_v30  ;;  %v17863_v33 = vrot.slane %v15529_v15, %v14400_v18 }
 0x883   : > { %v7775_v20 = vrot.slane %v7647_v3, %v14394_v1  ;;  %v7779_v27 = vrot.slane %v7648_v24, %v14389_v4  ;;  %v8108_v58 = vrot.slane %v15433_v2, %v17709_v5  ;;  %v8272_v24 = vsel %vm4719_vm4, %v15457_v13, 0.0 }
 0x884   : > { %v7649_v9 = vunpack.c.l.b16 %v6797_v55  ;;  %8261 = vadd.xlane.f32.xlu0 %v15527_v56  ;;  %v7897_v21 = vsel %vm5575_vm13, %v17863_v33, %v15567_v59  ;;  %v7901_v56 = vsel %vm5277_vm8, %v7743_v54, %v7900_v60  ;;  %v8275_v47 = vsel %vm4719_vm4, %v8175_v61, 0.0 }
 0x885   : > { %8264 = vadd.xlane.f32.xlu1 %v15539_v36  ;;  %v7047_v31 = vpop.xlane.xlu0 %7046  ;;  %v7910_v36 = vsel %vm5283_vm10, %v7883_v53, %v15374_v46  ;;  %v7902_v49 = vsel %vm5280_vm9, %v7757_v38, %v7901_v56  ;;  %v7780_v41 = vsel %vm5568_vm12, %v7779_v27, %v7775_v20  ;;  %v8176_v34 = vmul.f32 %v8108_v58, %v14556_v26 }
 0x886   : > { %v7784_v8 = vrot.slane %v7649_v9, %v14400_v18  ;;  %v7186_v29 = vpack.c.bf16 %v7047_v31, %v7044_v32  ;;  %v7050_v62 = vpop.xlane.xlu1 %7049  ;;  %v7903_v19 = vsel %vm5283_vm10, %v7771_v50, %v7902_v49  ;;  %v7911_v52 = vsel %vm5286_vm11, %v7897_v21, %v7910_v36 }
 0x887   : > { %v7187_v63 = vpack.c.bf16 %v7050_v62, %v7050_v62  ;;  %v8177_v28 = vmul.f32 %v8108_v58, %v14594_v16  ;;  %v17864_v55 = vcombine.high %v15407_v25, %v15407_v25  ;;  %v8178_v53 = vmul.f32 %v8108_v58, %v14568_v45 }
 0x888   : > { %v7785_v15 = vsel %vm5575_vm13, %v7784_v8, %v7780_v41  ;;  %v7250_v43 = vunpack.c.l.b16 %v7186_v29  ;;  %v7251_v59 = vunpack.c.h.b16 %v7186_v29  ;;  %8267 = vadd.xlane.f32.xlu0 %v8266_v6  ;;  %v8278_v25 = vsel %vm4719_vm4, %v8176_v34, 0.0 }
 0x889   : > { %v7904_v14 = vsel %vm5286_vm11, %v7785_v15, %v7903_v19  ;;  %v7252_v0 = vunpack.c.l.b16 %v7187_v63  ;;  %8270 = vadd.xlane.f32.xlu1 %v15466_v12  ;;  %v7053_v46 = vpop.xlane.xlu0 %7052  ;;  %v8020_v12 = vcombine.high %v17850_v35, %v17850_v35  ;;  %v8112_v32 = vrot.slane %v17864_v55, %v17709_v5 }
 0x88a   : > { %v7301_v42 = vrot.slane %v7250_v43, %v14394_v1  ;;  %v7305_v23 = vrot.slane %v7251_v59, %v14389_v4  ;;  %v7056_v44 = vpop.xlane.xlu1 %7055  ;;  %v7912_v57 = vpack.c.b16 %v7911_v52, %v7904_v14  ;;  %v8281_v50 = vsel %vm4719_vm4, %v8177_v28, 0.0 }
 0x88b   : > { %v7310_v10 = vrot.slane %v7252_v0, %v14400_v18  ;;  %v7188_v3 = vpack.c.bf16 %v7056_v44, %v7053_v46  ;;  %v8179_v9 = vmul.f32 %v8112_v32, %v14613_v39  ;;  %v8034_v31 = vrot.slane %v8020_v12, %v17717_v37 }
 0x88c   : > { %v7306_v22 = vsel %vm5568_vm12, %v7305_v23, %v7301_v42  ;;  %8273 = vadd.xlane.f32.xlu0 %v8272_v24  ;;  %11590 = vmatmul.mubr.msk.bf16.vlgmr.msra.gmra.mxu1 %vm4719_vm4, %v7912_v57  ;;  %v8067_v6 = vcombine.high %v15433_v2, %v15433_v2  ;;  %v8284_v8 = vsel %vm4719_vm4, %v8178_v53, 0.0  ;;  %v8180_v49 = vmul.f32 %v8112_v32, %v14584_v17  ;;  %v17865_v2 = vld [vmem:[#allocation26_spill] sm:$0xff] }
 0x88d   : > { %v7311_v13 = vsel %vm5575_vm13, %v7310_v10, %v7306_v22  ;;  %v7253_v54 = vunpack.c.l.b16 %v7188_v3  ;;  %v7254_v7 = vunpack.c.h.b16 %v7188_v3  ;;  %8276 = vadd.xlane.f32.xlu1 %v8275_v47  ;;  %v7059_v35 = vpop.xlane.xlu0 %7058  ;;  %11605 = vmatprep.mubr.msk.bf16.mxu1 %vm11917_vm2, %v17676_v51  ;;  %v8287_v36 = vsel %vm4719_vm4, %v8179_v9, 0.0  ;;  %v17866_v10 = vld [vmem:[#allocation66_spill] sm:$0xff]  ;;  %v17867_v22 = vld [vmem:[#allocation24_spill] sm:$0xff]  ;;  %v17869_v9 = vld [vmem:[#allocation69_spill] sm:$0xff] }
 0x88e   : > { %v7189_v20 = vpack.c.bf16 %v7059_v35, %v7059_v35  ;;  %v7062_v27 = vpop.xlane.xlu1 %7061  ;;  %v8181_v15 = vmul.f32 %v8112_v32, %v17865_v2  ;;  %v15679_v43 = vrot.slane %v8034_v31, %v17717_v37  ;;  %v8116_v0 = vrot.slane %v8067_v6, %v17709_v5 }
 0x88f   : > { %v7315_v48 = vrot.slane %v7253_v54, %v14394_v1  ;;  %v7319_v38 = vrot.slane %v7254_v7, %v14389_v4  ;;  %v8290_v57 = vsel %vm4719_vm4, %v8180_v49, 0.0  ;;  %v8036_v24 = vcombine.high %v8034_v31, %v8034_v31  ;;  %v17870_v49 = vld [vmem:[#allocation25_spill] sm:$0xff] }
 0x890   : > { %v7255_v60 = vunpack.c.l.b16 %v7189_v20  ;;  %8279 = vadd.xlane.f32.xlu0 %v8278_v25  ;;  %v8182_v3 = vmul.f32 %v8116_v0, %v17866_v10  ;;  %v8293_v12 = vsel %vm4719_vm4, %v8181_v15, 0.0  ;;  %v8183_v47 = vmul.f32 %v8116_v0, %v17867_v22 }
 0x891   : > { %8282 = vadd.xlane.f32.xlu1 %v8281_v50  ;;  %v7065_v61 = vpop.xlane.xlu0 %7064  ;;  %v7320_v29 = vsel %vm5568_vm12, %v7319_v38, %v7315_v48  ;;  %v8120_v28 = vrot.slane %v15679_v43, %v17709_v5  ;;  %v15702_v6 = vrot.slane %v8036_v24, %v17717_v37 }
 0x892   : > { %v7324_v33 = vrot.slane %v7255_v60, %v14400_v18  ;;  %v7190_v21 = vpack.c.bf16 %v7065_v61, %v7062_v27  ;;  %v7068_v56 = vpop.xlane.xlu1 %7067  ;;  %v17868_v27 = vld [vmem:[#allocation27_spill] sm:$0xff]  ;;  %v8296_v25 = vsel %vm4719_vm4, %v8182_v3, 0.0  ;;  %v8299_v31 = vsel %vm4719_vm4, %v8183_v47, 0.0 }
 0x893   : > { %v7191_v62 = vpack.c.bf16 %v7068_v56, %v7068_v56  ;;  %v8184_v53 = vmul.f32 %v8116_v0, %v17868_v27  ;;  %v8185_v60 = vmul.f32 %v8120_v28, %v17869_v9 }
 0x894   : > { %v7325_v41 = vsel %vm5575_vm13, %v7324_v33, %v7320_v29  ;;  %v7256_v63 = vunpack.c.l.b16 %v7190_v21  ;;  %v7257_v19 = vunpack.c.h.b16 %v7190_v21  ;;  %8285 = vadd.xlane.f32.xlu0 %v8284_v8 }
 0x895   : > { %v7522_v59 = vsel %vm5268_vm5, %v7325_v41, %v7311_v13  ;;  %v7258_v58 = vunpack.c.l.b16 %v7191_v62  ;;  %8288 = vadd.xlane.f32.xlu1 %v8287_v36  ;;  %v7071_v14 = vpop.xlane.xlu0 %7070  ;;  %v8302_v8 = vsel %vm4719_vm4, %v8184_v53, 0.0  ;;  %v8305_v36 = vsel %vm4719_vm4, %v8185_v60, 0.0 }
 0x896   : > { %v7329_v46 = vrot.slane %v7256_v63, %v14394_v1  ;;  %v7333_v52 = vrot.slane %v7257_v19, %v14389_v4  ;;  %v7074_v42 = vpop.xlane.xlu1 %7073  ;;  %v8186_v41 = vmul.f32 %v8120_v28, %v17870_v49 }
 0x897   : > { %v7338_v23 = vrot.slane %v7258_v58, %v14400_v18  ;;  %v7192_v44 = vpack.c.bf16 %v7074_v42, %v7071_v14  ;;  %v8066_v42 = vcombine.high %v15679_v43, %v15679_v43 }
 0x898   : > { %v7334_v34 = vsel %vm5568_vm12, %v7333_v52, %v7329_v46  ;;  %8291 = vadd.xlane.f32.xlu0 %v8290_v57  ;;  %v8124_v52 = vrot.slane %v15702_v6, %v17709_v5  ;;  %v8308_v24 = vsel %vm4719_vm4, %v8186_v41, 0.0 }
 0x899   : > { %v7339_v55 = vsel %vm5575_vm13, %v7338_v23, %v7334_v34  ;;  %v7259_v32 = vunpack.c.l.b16 %v7192_v44  ;;  %v7260_v13 = vunpack.c.h.b16 %v7192_v44  ;;  %8294 = vadd.xlane.f32.xlu1 %v8293_v12  ;;  %v7077_v54 = vpop.xlane.xlu0 %7076  ;;  %v17872_v34 = vld [vmem:[#allocation6_spill] sm:$0xff]  ;;  %v15741_v53 = vrot.slane %v8066_v42, %v17709_v5  ;;  %v17880_v42 = vld [vmem:[#allocation13_spill] sm:$0xff] }
 0x89a   : > { %v7523_v7 = vsel %vm5271_vm6, %v7339_v55, %v7522_v59  ;;  %v7193_v35 = vpack.c.bf16 %v7077_v54, %v7077_v54  ;;  %v7080_v20 = vpop.xlane.xlu1 %7079  ;;  %v17871_v59 = vld [vmem:[#allocation47_spill] sm:$0xff]  ;;  %v8188_v12 = vmul.f32 %v8124_v52, %v17872_v34  ;;  %v17873_v55 = vld [vmem:[#allocation49_spill] sm:$0xff] }
 0x89b   : > { %v7343_v48 = vrot.slane %v7259_v32, %v14394_v1  ;;  %v7347_v38 = vrot.slane %v7260_v13, %v14389_v4  ;;  %v8187_v58 = vmul.f32 %v8120_v28, %v17871_v59  ;;  %v8189_v32 = vmul.f32 %v8124_v52, %v17873_v55  ;;  %v17874_v54 = vld [vmem:[#allocation53_spill] sm:$0xff] }
 0x89c   : > { %v7261_v50 = vunpack.c.l.b16 %v7193_v35  ;;  %8297 = vadd.xlane.f32.xlu0 %v8296_v25 }
 0x89d   : > { %8300 = vadd.xlane.f32.xlu1 %v8299_v31  ;;  %v7083_v61 = vpop.xlane.xlu0 %7082  ;;  %v7348_v29 = vsel %vm5568_vm12, %v7347_v38, %v7343_v48  ;;  %v8311_v28 = vsel %vm4719_vm4, %v8187_v58, 0.0  ;;  %v8314_v48 = vsel %vm4719_vm4, %v8188_v12, 0.0  ;;  %v17875_v38 = vld [vmem:[#allocation46_spill] sm:$0xff]  ;;  %v8317_v60 = vsel %vm4719_vm4, %v8189_v32, 0.0 }
 0x89e   : > { %v7352_v33 = vrot.slane %v7261_v50, %v14400_v18  ;;  %v7194_v21 = vpack.c.bf16 %v7083_v61, %v7080_v20  ;;  %v7086_v56 = vpop.xlane.xlu1 %7085  ;;  %v8190_v25 = vmul.f32 %v8124_v52, %v17875_v38  ;;  %v17876_v50 = vld [vmem:[#allocation51_spill] sm:$0xff] }
 0x89f   : > { %v7195_v62 = vpack.c.bf16 %v7086_v56, %v7086_v56  ;;  %v8191_v31 = vmul.f32 %v15741_v53, %v17876_v50 }
 0x8a0   : > { %v7353_v63 = vsel %vm5575_vm13, %v7352_v33, %v7348_v29  ;;  %v7262_v19 = vunpack.c.l.b16 %v7194_v21  ;;  %v7263_v15 = vunpack.c.h.b16 %v7194_v21  ;;  %8303 = vadd.xlane.f32.xlu0 %v8302_v8  ;;  %v17877_v21 = vld [vmem:[#allocation60_spill] sm:$0xff]  ;;  %v8320_v29 = vsel %vm4719_vm4, %v8190_v25, 0.0  ;;  %v17883_v25 = vld [vmem:[#allocation81_spill] sm:$0xff] }
 0x8a1   : > { %v7524_v14 = vsel %vm5274_vm7, %v7353_v63, %v7523_v7  ;;  %v7264_v0 = vunpack.c.l.b16 %v7195_v62  ;;  %8306 = vadd.xlane.f32.xlu1 %v8305_v36  ;;  %v15712_v46 = vpop.xlane.xlu0 %7088  ;;  %v15733_v7 = vrot.slane %v17874_v54, %v17717_v37  ;;  %v8808_v56 = vrot.slane %v17877_v21, %v17717_v37  ;;  %v17878_v62 = vld [vmem:[#allocation48_spill] sm:$0xff] }
 0x8a2   : > { %v7357_v23 = vrot.slane %v7262_v19, %v14394_v1  ;;  %v7361_v44 = vrot.slane %v7263_v15, %v14389_v4  ;;  %v15720_v57 = vpop.xlane.xlu1 %7091  ;;  %v8192_v36 = vmul.f32 %v15741_v53, %v17878_v62  ;;  %v8323_v41 = vsel %vm4719_vm4, %v8191_v31, 0.0  ;;  %v17879_v63 = vld [vmem:[#allocation56_spill] sm:$0xff] }
 0x8a3   : > { %v7366_v3 = vrot.slane %v7264_v0, %v14400_v18  ;;  %v8853_v33 = vrot.slane %v15733_v7, %v17709_v5  ;;  %v8816_v58 = vcombine.high %v8808_v56, %v8808_v56  ;;  %v8801_v31 = vcombine.high %v17877_v21, %v17877_v21 }
 0x8a4   : > { %v7362_v47 = vsel %vm5568_vm12, %v7361_v44, %v7357_v23  ;;  %8309 = vadd.xlane.f32.xlu0 %v8308_v24  ;;  %v8326_v52 = vsel %vm4719_vm4, %v8192_v36, 0.0  ;;  %v17882_v24 = vld [vmem:[#allocation83_spill] sm:$0xff]  ;;  %v8068_v21 = vcombine.high %v15702_v6, %v15702_v6 }
 0x8a5   : > { %v7367_v43 = vsel %vm5575_vm13, %v7366_v3, %v7362_v47  ;;  %8312 = vadd.xlane.f32.xlu1 %v8311_v28  ;;  %v15729_v13 = vpop.xlane.xlu0 %7094  ;;  %v8930_v19 = vmul.f32 %v8853_v33, %v17879_v63  ;;  %v8931_v23 = vmul.f32 %v8853_v33, %v17880_v42  ;;  %v17881_v3 = vld [vmem:[#allocation63_spill] sm:$0xff]  ;;  %v8838_v28 = vrot.slane %v8816_v58, %v17717_v37  ;;  %v17889_v42 = vld [vmem:[#allocation61_spill] sm:$0xff] }
 0x8a6   : > { %v15736_v35 = vsel %vm5277_vm8, %v7367_v43, %v7524_v14  ;;  %v15738_v20 = vpop.xlane.xlu1 %7097  ;;  %v8824_v14 = vrot.slane %v8808_v56, %v17717_v37  ;;  %v8933_v12 = vmul.f32 %v17882_v24, %v17881_v3 }
 0x8a7   : > { %v8978_v44 = vsel %vm4719_vm4, %v8930_v19, 0.0  ;;  %v8981_v54 = vsel %vm4719_vm4, %v8931_v23, 0.0 }
 0x8a8   : > { %8315 = vadd.xlane.f32.xlu0 %v8314_v48  ;;  %v8885_v32 = vrot.slane %v8824_v14, %v17709_v5  ;;  %v8987_v48 = vsel %vm4719_vm4, %v8933_v12, 0.0  ;;  %v8846_v12 = vcombine.high %v8824_v14, %v8824_v14 }
 0x8a9   : > { %8318 = vadd.xlane.f32.xlu1 %v8317_v60  ;;  %v15748_v61 = vpop.xlane.xlu0 %7100 }
 0x8aa   : > { %v15754_v8 = vpop.xlane.xlu1 %7103  ;;  %v8954_v60 = vmul.f32 %v8885_v32, %v17883_v25  ;;  %v8955_v58 = vmul.f32 %v8885_v32, %v14536_v11  ;;  %v17886_v11 = vld [vmem:[#allocation59_spill] sm:$0xff] }
 0x8ab   : > { %v8799_v14 = vcombine.high %v17886_v11, %v17886_v11  ;;  %v8956_v11 = vmul.f32 %v8885_v32, %v17862_v30 }
 0x8ac   : > { %8321 = vadd.xlane.f32.xlu0 %v8320_v29  ;;  %v8889_v29 = vrot.slane %v8838_v28, %v17709_v5 }
 0x8ad   : > { %8324 = vadd.xlane.f32.xlu1 %v8323_v41  ;;  %v15761_v15 = vpop.xlane.xlu0 %7106  ;;  %v17884_v41 = vld [vmem:[#allocation84_spill] sm:$0xff] }
 0x8ae   : > { %v15764_v0 = vpop.xlane.xlu1 %7109  ;;  %v8990_v19 = vsel %vm4719_vm4, %v17884_v41, 0.0  ;;  %v8957_v23 = vmul.f32 %v8889_v29, %v14556_v26  ;;  %v8958_v40 = vmul.f32 %v8889_v29, %v14594_v16  ;;  %v17885_v26 = vld [vmem:[#allocation70_spill] sm:$0xff]  ;;  %v8959_v16 = vmul.f32 %v8889_v29, %v14568_v45 }
 0x8af   : > { %v8865_v29 = vrot.slane %v8799_v14, %v17709_v5  ;;  %v17890_v14 = vld [vmem:[#allocation75_spill] sm:$0xff] }
 0x8b0   : > { %8327 = vadd.xlane.f32.xlu0 %v8326_v52  ;;  %v9050_v52 = vsel %vm4719_vm4, %v8954_v60, 0.0  ;;  %v9053_v60 = vsel %vm4719_vm4, %v8955_v58, 0.0  ;;  %v9059_v6 = vsel %vm4719_vm4, %v8957_v23, 0.0  ;;  %v15817_v58 = vrot.slane %v8068_v21, %v17709_v5  ;;  %v17887_v23 = vld [vmem:[#allocation8_spill] sm:$0xff] }
 0x8b1   : > { %8979 = vadd.xlane.f32.xlu1 %v8978_v44  ;;  %v15771_v47 = vpop.xlane.xlu0 %7112  ;;  %v15795_v44 = vrot.slane %v8801_v31, %v17717_v37  ;;  %v8932_v31 = vmul.f32 %v8853_v33, %v17885_v26  ;;  %v15822_v33 = vrot.slane %v17887_v23, %v17709_v5 }
 0x8b2   : > { %v15775_v43 = vpop.xlane.xlu1 %7115 }
 0x8b3   : > { %v8984_v23 = vsel %vm4719_vm4, %v8932_v31, 0.0  ;;  %v9056_v31 = vsel %vm4719_vm4, %v8956_v11, 0.0 }
 0x8b4   : > { %8982 = vadd.xlane.f32.xlu0 %v8981_v54 }
 0x8b5   : > { %8988 = vadd.xlane.f32.xlu1 %v8987_v48  ;;  %v15782_v56 = vpop.xlane.xlu0 %7118  ;;  %v8797_v48 = vcombine.high %v15733_v7, %v15733_v7  ;;  %v8893_v7 = vrot.slane %v8846_v12, %v17709_v5  ;;  %v9062_v12 = vsel %vm4719_vm4, %v8958_v40, 0.0 }
 0x8b6   : > { %v15785_v36 = vpop.xlane.xlu1 %7121 }
 0x8b7   : > { %v8960_v21 = vmul.f32 %v8893_v7, %v14613_v39  ;;  %v8961_v32 = vmul.f32 %v8893_v7, %v14584_v17  ;;  %v9065_v39 = vsel %vm4719_vm4, %v8959_v16, 0.0 }
 0x8b8   : > { %8991 = vadd.xlane.f32.xlu0 %v8990_v19  ;;  %v8848_v19 = vcombine.high %v8838_v28, %v8838_v28 }
 0x8b9   : > { %9051 = vadd.xlane.f32.xlu1 %v9050_v52  ;;  %v15797_v54 = vpop.xlane.xlu0 %7124  ;;  %v15811_v52 = vrot.slane %v15795_v44, %v17717_v37  ;;  %v9071_v11 = vsel %vm4719_vm4, %v8961_v32, 0.0  ;;  %v7198_v32 = vpack.c.bf16 %v15748_v61, %v15738_v20  ;;  %v17895_v20 = vld [vmem:[#allocation20_spill] sm:$0xff] }
 0x8ba   : > { %v15801_v41 = vpop.xlane.xlu1 %7127  ;;  %v8897_v3 = vrot.slane %v8848_v19, %v17709_v5  ;;  %v8962_v19 = vmul.f32 %v8893_v7, %v17865_v2  ;;  %v9068_v7 = vsel %vm4719_vm4, %v8960_v21, 0.0  ;;  %v17893_v2 = vld [vmem:[#allocation10_spill] sm:$0xff]  ;;  %v8941_v61 = vmul.f32 %v8865_v29, %v17895_v20 }
 0x8bb   : > { %v15840_v40 = vrot.slane %v15811_v52, %v17709_v5 }
 0x8bc   : > { %9054 = vadd.xlane.f32.xlu0 %v9053_v60  ;;  %v8861_v60 = vrot.slane %v8797_v48, %v17709_v5  ;;  %v8963_v48 = vmul.f32 %v8897_v3, %v17866_v10  ;;  %v8964_v17 = vmul.f32 %v8897_v3, %v17867_v22  ;;  %v8965_v45 = vmul.f32 %v8897_v3, %v17868_v27 }
 0x8bd   : > { %9060 = vadd.xlane.f32.xlu1 %v9059_v6  ;;  %v15814_v28 = vpop.xlane.xlu0 %7130  ;;  %v17888_v6 = vld [vmem:[#allocation72_spill] sm:$0xff]  ;;  %v8966_v16 = vmul.f32 %v15840_v40, %v17869_v9  ;;  %v8967_v3 = vmul.f32 %v15840_v40, %v17870_v49  ;;  %v17892_v49 = vld [vmem:[#allocation11_spill] sm:$0xff] }
 0x8be   : > { %v15824_v26 = vpop.xlane.xlu1 %7133  ;;  %v8935_v25 = vmul.f32 %v17882_v24, %v17888_v6  ;;  %v8936_v63 = vmul.f32 %v8861_v60, %v17889_v42  ;;  %v8937_v42 = vmul.f32 %v8861_v60, %v17890_v14  ;;  %v8938_v27 = vmul.f32 %v8861_v60, %v17892_v49 }
 0x8bf   : > { %v8939_v14 = vmul.f32 %v8865_v29, %v17893_v2 }
 0x8c0   : > { %9063 = vadd.xlane.f32.xlu0 %v9062_v12  ;;  %v8993_v30 = vsel %vm4719_vm4, %v8935_v25, 0.0  ;;  %v8996_v10 = vsel %vm4719_vm4, %v8936_v63, 0.0  ;;  %v15869_v25 = vsel %vm4719_vm4, %v8962_v19, 0.0  ;;  %v17891_v63 = vld [vmem:[#allocation68_spill] sm:$0xff] }
 0x8c1   : > { %8985 = vadd.xlane.f32.xlu1 %v8984_v23  ;;  %v15842_v24 = vpop.xlane.xlu0 %7136  ;;  %v7196_v23 = vpack.c.bf16 %v15720_v57, %v15712_v46  ;;  %v7197_v46 = vpack.c.bf16 %v15729_v13, %v15729_v13  ;;  %v8193_v21 = vmul.f32 %v15741_v53, %v17891_v63  ;;  %v15885_v13 = vsel %vm4719_vm4, %v8965_v45, 0.0  ;;  %v17894_v53 = vld [vmem:[#allocation73_spill] sm:$0xff] }
 0x8c2   : > { %v15847_v12 = vpop.xlane.xlu1 %7139  ;;  %v8940_v6 = vmul.f32 %v8865_v29, %v17894_v53  ;;  %v15892_v63 = vsel %vm4719_vm4, %v8966_v16, 0.0  ;;  %v7268_v29 = vunpack.c.l.b16 %v7198_v32  ;;  %v7269_v16 = vunpack.c.h.b16 %v7198_v32 }
 0x8c3   : > { %v7265_v19 = vunpack.c.l.b16 %v7196_v23  ;;  %v7266_v22 = vunpack.c.h.b16 %v7196_v23  ;;  %v7267_v60 = vunpack.c.l.b16 %v7197_v46  ;;  %v17896_v23 = vld [vmem:[#allocation74_spill] sm:$0xff]  ;;  %v15902_v2 = vsel %vm4719_vm4, %v8193_v21, 0.0 }
 0x8c4   : > { %8994 = vadd.xlane.f32.xlu0 %v8993_v30  ;;  %v15872_v30 = vsel %vm4719_vm4, %v8963_v48, 0.0  ;;  %v8999_v48 = vsel %vm4719_vm4, %v8937_v42, 0.0  ;;  %v8942_v42 = vmul.f32 %v15822_v33, %v17896_v23  ;;  %v7202_v21 = vpack.c.bf16 %v15782_v56, %v15775_v43  ;;  %v17898_v56 = vld [vmem:[#allocation15_spill] sm:$0xff] }
 0x8c5   : > { %8997 = vadd.xlane.f32.xlu1 %v8996_v10  ;;  %v15866_v57 = vpop.xlane.xlu0 %7142  ;;  %v15882_v10 = vsel %vm4719_vm4, %v8964_v17, 0.0  ;;  %v15895_v17 = vsel %vm4719_vm4, %v8967_v3, 0.0  ;;  %v7199_v3 = vpack.c.bf16 %v15754_v8, %v15754_v8  ;;  %v7371_v46 = vrot.slane %v7265_v19, %v14394_v1 }
 0x8c6   : > { %v15878_v9 = vpop.xlane.xlu1 %7145  ;;  %v7375_v49 = vrot.slane %v7266_v22, %v14389_v4  ;;  %v9005_v23 = vsel %vm4719_vm4, %v8939_v14, 0.0  ;;  %v7204_v32 = vpack.c.bf16 %v15801_v41, %v15797_v54  ;;  %v9008_v8 = vsel %vm4719_vm4, %v8940_v6, 0.0 }
 0x8c7   : > { %v7380_v19 = vrot.slane %v7267_v60, %v14400_v18  ;;  %v15926_v43 = vsel %vm4719_vm4, %v8942_v42, 0.0  ;;  %v8943_v14 = vmul.f32 %v15822_v33, %v17898_v56  ;;  %v7389_v54 = vrot.slane %v7269_v16, %v14389_v4 }
 0x8c8   : > { %9000 = vadd.xlane.f32.xlu0 %v8999_v48  ;;  %v17897_v48 = vld [vmem:[#allocation50_spill] sm:$0xff]  ;;  %v15936_v41 = vunpack.c.l.b16 %v7199_v3  ;;  %v7201_v6 = vpack.c.bf16 %v15771_v47, %v15771_v47  ;;  %v7274_v60 = vunpack.c.l.b16 %v7202_v21  ;;  %v7275_v42 = vunpack.c.h.b16 %v7202_v21 }
 0x8c9   : > { %9057 = vadd.xlane.f32.xlu1 %v9056_v31  ;;  %v15897_v45 = vpop.xlane.xlu0 %7148  ;;  %v15906_v53 = vmul.f32 %v15817_v58, %v17897_v48  ;;  %v9002_v31 = vsel %vm4719_vm4, %v8938_v27, 0.0  ;;  %v7200_v48 = vpack.c.bf16 %v15764_v0, %v15761_v15  ;;  %v15922_v27 = vsel %vm4719_vm4, %v8941_v61, 0.0  ;;  %v17899_v15 = vld [vmem:[#allocation55_spill] sm:$0xff] }
 0x8ca   : > { %v7152_v20 = vpop.xlane.xlu1 %7151  ;;  %v15932_v0 = vmul.f32 %v15817_v58, %v17899_v15  ;;  %v7376_v61 = vsel %vm5568_vm12, %v7375_v49, %v7371_v46  ;;  %v7203_v56 = vpack.c.bf16 %v15785_v36, %v15785_v36  ;;  %v7277_v15 = vunpack.c.l.b16 %v7204_v32 }
 0x8cb   : > { %v7271_v62 = vunpack.c.l.b16 %v7200_v48  ;;  %v7278_v50 = vunpack.c.h.b16 %v7204_v32  ;;  %v15946_v16 = vsel %vm5575_vm13, %v7380_v19, %v7376_v61  ;;  %v7272_v3 = vunpack.c.h.b16 %v7200_v48 }
 0x8cc   : > { %9066 = vadd.xlane.f32.xlu0 %v9065_v39  ;;  %v7385_v39 = vrot.slane %v7268_v29, %v14394_v1  ;;  %v7205_v29 = vpack.c.bf16 %v15814_v28, %v15814_v28  ;;  %v7206_v47 = vpack.c.bf16 %v15842_v24, %v15824_v26  ;;  %v15951_v46 = vsel %vm4719_vm4, %v8943_v14, 0.0 }
 0x8cd   : > { %9069 = vadd.xlane.f32.xlu1 %v9068_v7  ;;  %v7155_v22 = vpop.xlane.xlu0 %7154  ;;  %v15958_v28 = vunpack.c.l.b16 %v7201_v6  ;;  %v7413_v32 = vrot.slane %v7274_v60, %v14394_v1  ;;  %v7417_v26 = vrot.slane %v7275_v42, %v14389_v4  ;;  %v15964_v24 = vunpack.c.l.b16 %v7203_v56 }
 0x8ce   : > { %v7158_v7 = vpop.xlane.xlu1 %7157  ;;  %v15954_v36 = vsel %vm5568_vm12, %v7389_v54, %v7385_v39  ;;  %v15967_v19 = vrot.slane %v7271_v62, %v14394_v1  ;;  %v7427_v14 = vrot.slane %v7277_v15, %v14394_v1  ;;  %v7431_v39 = vrot.slane %v7278_v50, %v14389_v4 }
 0x8cf   : > { %v7279_v54 = vunpack.c.l.b16 %v7205_v29  ;;  %v15972_v6 = vrot.slane %v7272_v3, %v14389_v4  ;;  %v7281_v61 = vunpack.c.h.b16 %v7206_v47  ;;  %v7208_v60 = vpack.c.bf16 %v15878_v9, %v15866_v57 }
 0x8d0   : > { %9072 = vadd.xlane.f32.xlu0 %v9071_v11  ;;  %v7207_v11 = vpack.c.bf16 %v15847_v12, %v15847_v12  ;;  %v7280_v12 = vunpack.c.l.b16 %v7206_v47  ;;  %v7211_v50 = vpack.c.bf16 %v7158_v7, %v7158_v7  ;;  %v7422_v42 = vrot.slane %v15964_v24, %v14400_v18 }
 0x8d1   : > { %9003 = vadd.xlane.f32.xlu1 %v9002_v31  ;;  %v7161_v49 = vpop.xlane.xlu0 %7160  ;;  %v7210_v31 = vpack.c.bf16 %v7155_v22, %v7152_v20  ;;  %v7209_v22 = vpack.c.bf16 %v15897_v45, %v15897_v45  ;;  %v7432_v9 = vsel %vm5568_vm12, %v7431_v39, %v7427_v14  ;;  %v7436_v57 = vrot.slane %v7279_v54, %v14400_v18 }
 0x8d2   : > { %v7164_v48 = vpop.xlane.xlu1 %7163  ;;  %v7282_v20 = vunpack.c.l.b16 %v7207_v11  ;;  %v7441_v11 = vrot.slane %v7280_v12, %v14394_v1  ;;  %v7445_v45 = vrot.slane %v7281_v61, %v14389_v4  ;;  %v7283_v7 = vunpack.c.l.b16 %v7208_v60 }
 0x8d3   : > { %v7286_v29 = vunpack.c.l.b16 %v7210_v31  ;;  %v7212_v3 = vpack.c.bf16 %v7164_v48, %v7161_v49  ;;  %v7284_v62 = vunpack.c.h.b16 %v7208_v60  ;;  %v7285_v49 = vunpack.c.l.b16 %v7209_v22 }
 0x8d4   : > { %9006 = vadd.xlane.f32.xlu0 %v9005_v23  ;;  %v7418_v23 = vsel %vm5568_vm12, %v7417_v26, %v7413_v32  ;;  %v7450_v26 = vrot.slane %v7282_v20, %v14400_v18  ;;  %v7288_v48 = vunpack.c.l.b16 %v7211_v50  ;;  %v7455_v60 = vrot.slane %v7283_v7, %v14394_v1 }
 0x8d5   : > { %9009 = vadd.xlane.f32.xlu1 %v9008_v8  ;;  %v7167_v56 = vpop.xlane.xlu0 %7166  ;;  %v7287_v8 = vunpack.c.h.b16 %v7210_v31  ;;  %v7469_v31 = vrot.slane %v7286_v29, %v14394_v1  ;;  %v7289_v39 = vunpack.c.l.b16 %v7212_v3  ;;  %v7290_v54 = vunpack.c.h.b16 %v7212_v3 }
 0x8d6   : > { %v7170_v15 = vpop.xlane.xlu1 %7169  ;;  %v7213_v47 = vpack.c.bf16 %v7167_v56, %v7167_v56  ;;  %v7459_v20 = vrot.slane %v7284_v62, %v14389_v4  ;;  %v7464_v29 = vrot.slane %v7285_v49, %v14400_v18  ;;  %v7423_v7 = vsel %vm5575_vm13, %v7422_v42, %v7418_v23 }
 0x8d7   : > { %v7473_v12 = vrot.slane %v7287_v8, %v14389_v4 }
 0x8d8   : > { %9075 = vadd.xlane.f32.xlu0 %v15869_v25  ;;  %v7291_v56 = vunpack.c.l.b16 %v7213_v47 }
 0x8d9   : > { %9078 = vadd.xlane.f32.xlu1 %v15872_v30  ;;  %v7173_v32 = vpop.xlane.xlu0 %7172  ;;  %v7446_v30 = vsel %vm5568_vm12, %v7445_v45, %v7441_v11  ;;  %v7483_v11 = vrot.slane %v7289_v39, %v14394_v1  ;;  %v7487_v45 = vrot.slane %v7290_v54, %v14389_v4 }
 0x8da   : > { %v7214_v24 = vpack.c.bf16 %v7173_v32, %v7170_v15  ;;  %v7176_v14 = vpop.xlane.xlu1 %7175  ;;  %v7437_v15 = vsel %vm5575_vm13, %v7436_v57, %v7432_v9  ;;  %v7474_v9 = vsel %vm5568_vm12, %v7473_v12, %v7469_v31  ;;  %v7492_v57 = vrot.slane %v7291_v56, %v14400_v18 }
 0x8db   : > { %v7215_v25 = vpack.c.bf16 %v7176_v14, %v7176_v14  ;;  %v7529_v14 = vsel %vm5268_vm5, %v7437_v15, %v7423_v7 }
 0x8dc   : > { %v7292_v61 = vunpack.c.l.b16 %v7214_v24  ;;  %v7293_v21 = vunpack.c.h.b16 %v7214_v24  ;;  %9081 = vadd.xlane.f32.xlu0 %v15882_v10  ;;  %v7478_v10 = vrot.slane %v7288_v48, %v14400_v18 }
 0x8dd   : > { %v7294_v22 = vunpack.c.l.b16 %v7215_v25  ;;  %9012 = vadd.xlane.f32.xlu1 %v15922_v27  ;;  %v7179_v50 = vpop.xlane.xlu0 %7178  ;;  %v7451_v27 = vsel %vm5575_vm13, %v7450_v26, %v7446_v30 }
 0x8de   : > { %v7497_v3 = vrot.slane %v7292_v61, %v14394_v1  ;;  %v7501_v8 = vrot.slane %v7293_v21, %v14389_v4  ;;  %v7182_v47 = vpop.xlane.xlu1 %7181  ;;  %v7460_v21 = vsel %vm5568_vm12, %v7459_v20, %v7455_v60  ;;  %v7479_v39 = vsel %vm5575_vm13, %v7478_v10, %v7474_v9 }
 0x8df   : > { %v7216_v62 = vpack.c.bf16 %v7182_v47, %v7179_v50  ;;  %v7506_v32 = vrot.slane %v7294_v22, %v14400_v18  ;;  %v7465_v23 = vsel %vm5575_vm13, %v7464_v29, %v7460_v21  ;;  %v7530_v56 = vsel %vm5271_vm6, %v7451_v27, %v7529_v14  ;;  %v17903_v14 = vld [vmem:[#allocation76_spill] sm:$0xff] }
 0x8e0   : > { %9015 = vadd.xlane.f32.xlu0 %v15926_v43  ;;  %v7502_v42 = vsel %vm5568_vm12, %v7501_v8, %v7497_v3  ;;  %v7488_v43 = vsel %vm5568_vm12, %v7487_v45, %v7483_v11  ;;  %v7526_v60 = vsel %vm5280_vm9, %v15946_v16, %v15736_v35  ;;  %v7404_v20 = vsel %vm5568_vm12, %v15972_v6, %v15967_v19 }
 0x8e1   : > { %v7295_v49 = vunpack.c.l.b16 %v7216_v62  ;;  %v7296_v48 = vunpack.c.h.b16 %v7216_v62  ;;  %9018 = vadd.xlane.f32.xlu1 %v15951_v46  ;;  %v7185_v24 = vpop.xlane.xlu0 %7184  ;;  %v17900_v46 = vrot.slane %v15936_v41, %v14400_v18  ;;  %v7493_v61 = vsel %vm5575_vm13, %v7492_v57, %v7488_v43 }
 0x8e2   : > { %v7217_v26 = vpack.c.bf16 %v7185_v24, %v7185_v24  ;;  %v8199_v31 = vpop.xlane.xlu1 %8198  ;;  %v7531_v22 = vsel %vm5274_vm7, %v7465_v23, %v7530_v56  ;;  %v7507_v41 = vsel %vm5575_vm13, %v7506_v32, %v7502_v42  ;;  %v17901_v50 = vrot.slane %v15958_v28, %v14400_v18  ;;  %v17902_v32 = vld [vmem:[#allocation88_spill] sm:$0xff] }
 0x8e3   : > { %v7511_v54 = vrot.slane %v7295_v49, %v14394_v1  ;;  %v7515_v25 = vrot.slane %v7296_v48, %v14389_v4  ;;  %v7395_v12 = vsel %vm5575_vm13, %v17900_v46, %v15954_v36  ;;  %v7532_v15 = vsel %vm5277_vm8, %v7479_v39, %v7531_v22  ;;  %v17905_v39 = vld [vmem:[#allocation18_spill] sm:$0xff] }
 0x8e4   : > { %v7297_v30 = vunpack.c.l.b16 %v7217_v26  ;;  %9084 = vadd.xlane.f32.xlu0 %v15885_v13  ;;  %v7409_v13 = vsel %vm5575_vm13, %v17901_v50, %v7404_v20  ;;  %v7527_v19 = vsel %vm5283_vm10, %v7395_v12, %v7526_v60  ;;  %v7533_v6 = vsel %vm5280_vm9, %v7493_v61, %v7532_v15  ;;  %v17906_v12 = vld [vmem:[#allocation62_spill] sm:$0xff] }
 0x8e5   : > { %9087 = vadd.xlane.f32.xlu1 %v15892_v63  ;;  %v8202_v36 = vpop.xlane.xlu0 %8201  ;;  %v7516_v3 = vsel %vm5568_vm12, %v7515_v25, %v7511_v54  ;;  %v7534_v63 = vsel %vm5283_vm10, %v7507_v41, %v7533_v6  ;;  %v7528_v11 = vsel %vm5286_vm11, %v7409_v13, %v7527_v19  ;;  %v8873_v49 = vrot.slane %v17902_v32, %v17709_v5 }
 0x8e6   : > { %v7520_v35 = vrot.slane %v7297_v30, %v14400_v18  ;;  %v8341_v16 = vpack.c.bf16 %v8202_v36, %v8199_v31  ;;  %v8205_v29 = vpop.xlane.xlu1 %8204  ;;  %v8332_v24 = vsel %vm4719_vm4, %v15906_v53, 0.0  ;;  %v8944_v23 = vmul.f32 %v15822_v33, %v17903_v14 }
 0x8e7   : > { %v8342_v8 = vpack.c.bf16 %v8205_v29, %v8205_v29  ;;  %v8335_v31 = vsel %vm4719_vm4, %v15932_v0, 0.0  ;;  %v8945_v43 = vmul.f32 %v8873_v49, %v17905_v39  ;;  %v8946_v56 = vmul.f32 %v8873_v49, %v17906_v12 }
 0x8e8   : > { %v7521_v47 = vsel %vm5575_vm13, %v7520_v35, %v7516_v3  ;;  %v8405_v28 = vunpack.c.l.b16 %v8341_v16  ;;  %v8406_v10 = vunpack.c.h.b16 %v8341_v16  ;;  %9090 = vadd.xlane.f32.xlu0 %v15895_v17  ;;  %v9020_v0 = vsel %vm4719_vm4, %v8944_v23, 0.0 }
 0x8e9   : > { %v7535_v45 = vsel %vm5286_vm11, %v7521_v47, %v7534_v63  ;;  %v8407_v62 = vunpack.c.l.b16 %v8342_v8  ;;  %8330 = vadd.xlane.f32.xlu1 %v15902_v2  ;;  %v8208_v7 = vpop.xlane.xlu0 %8207  ;;  %v17904_v2 = vcombine.high %v15795_v44, %v15795_v44  ;;  %v8968_v60 = vmul.f32 %v15840_v40, %v17871_v59 }
 0x8ea   : > { %v8456_v27 = vrot.slane %v8405_v28, %v14394_v1  ;;  %v8460_v9 = vrot.slane %v8406_v10, %v14389_v4  ;;  %v8211_v57 = vpop.xlane.xlu1 %8210  ;;  %v7536_v21 = vpack.c.b16 %v7535_v45, %v7528_v11  ;;  %v9023_v22 = vsel %vm4719_vm4, %v8945_v43, 0.0 }
 0x8eb   : > { %v8465_v48 = vrot.slane %v8407_v62, %v14400_v18  ;;  %v8343_v17 = vpack.c.bf16 %v8211_v57, %v8208_v7  ;;  %v16064_v42 = vrot.slane %v17904_v2, %v17717_v37  ;;  %v9026_v40 = vsel %vm4719_vm4, %v8946_v56, 0.0  ;;  %v17907_v57 = vld [vmem:[#allocation54_spill] sm:$0xff] }
 0x8ec   : > { %v8461_v26 = vsel %vm5568_vm12, %v8460_v9, %v8456_v27  ;;  %8333 = vadd.xlane.f32.xlu0 %v8332_v24  ;;  %11582 = vmatmul.mubr.msk.bf16.vlgmr.msra.gmra.mxu0 %vm4719_vm4, %v7536_v21  ;;  %v9092_v19 = vsel %vm4719_vm4, %v8968_v60, 0.0  ;;  %v8196_v21 = vmul.f32 %v15817_v58, %v17907_v57  ;;  %v8847_v23 = vcombine.high %v15811_v52, %v15811_v52 }
 0x8ed   : > { %v8466_v53 = vsel %vm5575_vm13, %v8465_v48, %v8461_v26  ;;  %v8408_v54 = vunpack.c.l.b16 %v8343_v17  ;;  %v8409_v33 = vunpack.c.h.b16 %v8343_v17  ;;  %8336 = vadd.xlane.f32.xlu1 %v8335_v31  ;;  %v8214_v25 = vpop.xlane.xlu0 %8213  ;;  %11597 = vmatprep.mubr.msk.bf16.mxu0 %vm11917_vm2, %v17676_v51  ;;  %v8905_v41 = vrot.slane %v16064_v42, %v17709_v5  ;;  %v17908_v17 = vld [vmem:[#allocation7_spill] sm:$0xff] }
 0x8ee   : > { %v8344_v44 = vpack.c.bf16 %v8214_v25, %v8214_v25  ;;  %v8217_v46 = vpop.xlane.xlu1 %8216  ;;  %v8947_v24 = vmul.f32 %v8873_v49, %v17908_v17  ;;  %v17909_v49 = vld [vmem:[#allocation22_spill] sm:$0xff] }
 0x8ef   : > { %v8470_v61 = vrot.slane %v8408_v54, %v14394_v1  ;;  %v8474_v30 = vrot.slane %v8409_v33, %v14389_v4  ;;  %v8969_v35 = vmul.f32 %v8905_v41, %v17872_v34  ;;  %v8970_v63 = vmul.f32 %v8905_v41, %v17873_v55 }
 0x8f0   : > { %v8410_v20 = vunpack.c.l.b16 %v8344_v44  ;;  %9021 = vadd.xlane.f32.xlu0 %v9020_v0  ;;  %v8338_v44 = vsel %vm4719_vm4, %v8196_v21, 0.0 }
 0x8f1   : > { %9024 = vadd.xlane.f32.xlu1 %v9023_v22  ;;  %v8220_v36 = vpop.xlane.xlu0 %8219  ;;  %v8475_v16 = vsel %vm5568_vm12, %v8474_v30, %v8470_v61  ;;  %v9095_v9 = vsel %vm4719_vm4, %v8969_v35, 0.0  ;;  %v9098_v48 = vsel %vm4719_vm4, %v8970_v63, 0.0  ;;  %v9029_v61 = vsel %vm4719_vm4, %v8947_v24, 0.0  ;;  %v17911_v30 = vld [vmem:[#allocation17_spill] sm:$0xff] }
 0x8f2   : > { %v8479_v50 = vrot.slane %v8410_v20, %v14400_v18  ;;  %v8345_v13 = vpack.c.bf16 %v8220_v36, %v8217_v46  ;;  %v8223_v15 = vpop.xlane.xlu1 %8222  ;;  %v17910_v46 = vld [vmem:[#allocation90_spill] sm:$0xff]  ;;  %v8909_v20 = vrot.slane %v8847_v23, %v17709_v5 }
 0x8f3   : > { %v8346_v29 = vpack.c.bf16 %v8223_v15, %v8223_v15  ;;  %v8948_v56 = vmul.f32 %v17910_v46, %v17909_v49  ;;  %v8949_v0 = vmul.f32 %v17910_v46, %v17911_v30 }
 0x8f4   : > { %v8480_v6 = vsel %vm5575_vm13, %v8479_v50, %v8475_v16  ;;  %v8411_v3 = vunpack.c.l.b16 %v8345_v13  ;;  %v8412_v8 = vunpack.c.h.b16 %v8345_v13  ;;  %9027 = vadd.xlane.f32.xlu0 %v9026_v40  ;;  %v8971_v13 = vmul.f32 %v8905_v41, %v17875_v38 }
 0x8f5   : > { %v8677_v47 = vsel %vm5268_vm5, %v8480_v6, %v8466_v53  ;;  %v8413_v28 = vunpack.c.l.b16 %v8346_v29  ;;  %9093 = vadd.xlane.f32.xlu1 %v9092_v19  ;;  %v8226_v10 = vpop.xlane.xlu0 %8225  ;;  %v9032_v16 = vsel %vm4719_vm4, %v8948_v56, 0.0  ;;  %v17912_v29 = vld [vmem:[#allocation51_spill] sm:$0xff]  ;;  %v17916_v56 = vld [vmem:[#allocation92_spill] sm:$0xff] }
 0x8f6   : > { %v8484_v11 = vrot.slane %v8411_v3, %v14394_v1  ;;  %v8488_v45 = vrot.slane %v8412_v8, %v14389_v4  ;;  %v8229_v62 = vpop.xlane.xlu1 %8228  ;;  %v8972_v40 = vmul.f32 %v8909_v20, %v17912_v29  ;;  %v9035_v8 = vsel %vm4719_vm4, %v8949_v0, 0.0 }
 0x8f7   : > { %v8493_v7 = vrot.slane %v8413_v28, %v14400_v18  ;;  %v8347_v27 = vpack.c.bf16 %v8229_v62, %v8226_v10 }
 0x8f8   : > { %v8489_v32 = vsel %vm5568_vm12, %v8488_v45, %v8484_v11  ;;  %9096 = vadd.xlane.f32.xlu0 %v9095_v9 }
 0x8f9   : > { %v8494_v2 = vsel %vm5575_vm13, %v8493_v7, %v8489_v32  ;;  %v8414_v26 = vunpack.c.l.b16 %v8347_v27  ;;  %v8415_v31 = vunpack.c.h.b16 %v8347_v27  ;;  %9099 = vadd.xlane.f32.xlu1 %v9098_v48  ;;  %v8232_v43 = vpop.xlane.xlu0 %8231  ;;  %v9101_v7 = vsel %vm4719_vm4, %v8971_v13, 0.0  ;;  %v17913_v27 = vld [vmem:[#allocation48_spill] sm:$0xff] }
 0x8fa   : > { %v8678_v53 = vsel %vm5271_vm6, %v8494_v2, %v8677_v47  ;;  %v8348_v54 = vpack.c.bf16 %v8232_v43, %v8232_v43  ;;  %v8235_v58 = vpop.xlane.xlu1 %8234  ;;  %v8973_v9 = vmul.f32 %v8909_v20, %v17913_v27  ;;  %v9104_v32 = vsel %vm4719_vm4, %v8972_v40, 0.0 }
 0x8fb   : > { %v8498_v33 = vrot.slane %v8414_v26, %v14394_v1  ;;  %v8502_v25 = vrot.slane %v8415_v31, %v14389_v4  ;;  %v8849_v48 = vcombine.high %v16064_v42, %v16064_v42 }
 0x8fc   : > { %v8416_v52 = vunpack.c.l.b16 %v8348_v54  ;;  %8339 = vadd.xlane.f32.xlu0 %v8338_v44  ;;  %v17915_v44 = vld [vmem:[#allocation91_spill] sm:$0xff] }
 0x8fd   : > { %9030 = vadd.xlane.f32.xlu1 %v9029_v61  ;;  %v8238_v60 = vpop.xlane.xlu0 %8237  ;;  %v8503_v15 = vsel %vm5568_vm12, %v8502_v25, %v8498_v33  ;;  %v9107_v33 = vsel %vm4719_vm4, %v8973_v9, 0.0  ;;  %v17914_v25 = vld [vmem:[#allocation19_spill] sm:$0xff]  ;;  %v17917_v61 = vld [vmem:[#allocation9_spill] sm:$0xff] }
 0x8fe   : > { %v8507_v22 = vrot.slane %v8416_v52, %v14400_v18  ;;  %v8349_v36 = vpack.c.bf16 %v8238_v60, %v8235_v58  ;;  %v8241_v50 = vpop.xlane.xlu1 %8240  ;;  %v8951_v46 = vmul.f32 %v17915_v44, %v17914_v25  ;;  %v9038_v52 = vsel %vm4719_vm4, %v17916_v56, 0.0 }
 0x8ff   : > { %v8350_v35 = vpack.c.bf16 %v8241_v50, %v8241_v50  ;;  %v16141_v0 = vrot.slane %v17917_v61, %v17717_v37 }
 0x900   : > { %v8508_v19 = vsel %vm5575_vm13, %v8507_v22, %v8503_v15  ;;  %v8417_v6 = vunpack.c.l.b16 %v8349_v36  ;;  %v8418_v3 = vunpack.c.h.b16 %v8349_v36  ;;  %9033 = vadd.xlane.f32.xlu0 %v9032_v16  ;;  %v16144_v22 = vrot.slane %v8849_v48, %v17709_v5  ;;  %v17918_v36 = vld [vmem:[#allocation21_spill] sm:$0xff]  ;;  %v17919_v16 = vld [vmem:[#allocation68_spill] sm:$0xff] }
 0x901   : > { %v8679_v63 = vsel %vm5274_vm7, %v8508_v19, %v8678_v53  ;;  %v8419_v47 = vunpack.c.l.b16 %v8350_v35  ;;  %9036 = vadd.xlane.f32.xlu1 %v9035_v8  ;;  %v8244_v28 = vpop.xlane.xlu0 %8243  ;;  %v9589_v50 = vrot.slane %v17918_v36, %v17717_v37  ;;  %v8974_v40 = vmul.f32 %v8909_v20, %v17919_v16  ;;  %v17920_v8 = vld [vmem:[#allocation50_spill] sm:$0xff] }
 0x902   : > { %v8512_v41 = vrot.slane %v8417_v6, %v14394_v1  ;;  %v8516_v10 = vrot.slane %v8418_v3, %v14389_v4  ;;  %v8247_v11 = vpop.xlane.xlu1 %8246  ;;  %v9041_v3 = vsel %vm4719_vm4, %v8951_v46, 0.0 }
 0x903   : > { %v8521_v45 = vrot.slane %v8419_v47, %v14400_v18  ;;  %v8351_v62 = vpack.c.bf16 %v8247_v11, %v8244_v28  ;;  %v16163_v9 = vrot.slane %v9589_v50, %v17717_v37 }
 0x904   : > { %v8517_v21 = vsel %vm5568_vm12, %v8516_v10, %v8512_v41  ;;  %9102 = vadd.xlane.f32.xlu0 %v9101_v7  ;;  %v17921_v10 = vld [vmem:[#allocation93_spill] sm:$0xff] }
 0x905   : > { %v8522_v24 = vsel %vm5575_vm13, %v8521_v45, %v8517_v21  ;;  %v8420_v23 = vunpack.c.l.b16 %v8351_v62  ;;  %v8421_v2 = vunpack.c.h.b16 %v8351_v62  ;;  %9105 = vadd.xlane.f32.xlu1 %v9104_v32  ;;  %v8250_v26 = vpop.xlane.xlu0 %8249  ;;  %v9044_v11 = vsel %vm4719_vm4, %v17921_v10, 0.0 }
 0x906   : > { %v8680_v31 = vsel %vm5277_vm8, %v8522_v24, %v8679_v63  ;;  %v8352_v43 = vpack.c.bf16 %v8250_v26, %v8250_v26  ;;  %v8253_v53 = vpop.xlane.xlu1 %8252  ;;  %v8975_v63 = vmul.f32 %v16144_v22, %v17920_v8  ;;  %v16159_v45 = vrot.slane %v16141_v0, %v17709_v5  ;;  %v17922_v24 = vld [vmem:[#allocation36_spill] sm:$0xff] }
 0x907   : > { %v8526_v54 = vrot.slane %v8420_v23, %v14394_v1  ;;  %v8530_v58 = vrot.slane %v8421_v2, %v14389_v4  ;;  %v11307_v23 = vcombine.low %v17922_v24, %v17922_v24 }
 0x908   : > { %v8422_v42 = vunpack.c.l.b16 %v8352_v43  ;;  %9108 = vadd.xlane.f32.xlu0 %v9107_v33  ;;  %v9110_v43 = vsel %vm4719_vm4, %v8974_v40, 0.0  ;;  %v17924_v33 = vld [vmem:[#allocation56_spill] sm:$0xff]  ;;  %v9597_v40 = vcombine.high %v9589_v50, %v9589_v50  ;;  %v17928_v50 = vld [vmem:[#allocation63_spill] sm:$0xff] }
 0x909   : > { %9039 = vadd.xlane.f32.xlu1 %v9038_v52  ;;  %v8256_v60 = vpop.xlane.xlu0 %8255  ;;  %v8531_v19 = vsel %vm5568_vm12, %v8530_v58, %v8526_v54  ;;  %v9113_v58 = vsel %vm4719_vm4, %v8975_v63, 0.0  ;;  %v9711_v46 = vmul.f32 %v16159_v45, %v17924_v33 }
 0x90a   : > { %v8535_v13 = vrot.slane %v8422_v42, %v14400_v18  ;;  %v8353_v15 = vpack.c.bf16 %v8256_v60, %v8253_v53  ;;  %v8259_v35 = vpop.xlane.xlu1 %8258  ;;  %v8705_v42 = vsel %vm7549_vm14, %v11307_v23, 0 }
 0x90b   : > { %v8354_v6 = vpack.c.bf16 %v8259_v35, %v8259_v35  ;;  %11594 = vmatpush3.bf16.msra.mxu0 %v8705_v42 }
 0x90c   : > { %v8536_v47 = vsel %vm5575_vm13, %v8535_v13, %v8531_v19  ;;  %v8423_v28 = vunpack.c.l.b16 %v8353_v15  ;;  %v8424_v41 = vunpack.c.h.b16 %v8353_v15  ;;  %9042 = vadd.xlane.f32.xlu0 %v9041_v3  ;;  %v17925_v13 = vld [vmem:[#allocation35_spill] sm:$0xff]  ;;  %v17926_v15 = vld [vmem:[#allocation34_spill] sm:$0xff]  ;;  %11595 = vmatprep.subr.bf16.mxu0 %v17676_v51 }
 0x90d   : > { %v8681_v20 = vsel %vm5280_vm9, %v8536_v47, %v8680_v31  ;;  %v8425_v62 = vunpack.c.l.b16 %v8354_v6  ;;  %9045 = vadd.xlane.f32.xlu1 %v9044_v11  ;;  %v8262_v7 = vpop.xlane.xlu0 %8261  ;;  %v17923_v31 = vld [vmem:[#allocation55_spill] sm:$0xff]  ;;  %v11306_v35 = vcombine.low %v17926_v15, %v17925_v13 }
 0x90e   : > { %v8540_v21 = vrot.slane %v8423_v28, %v14394_v1  ;;  %v8544_v32 = vrot.slane %v8424_v41, %v14389_v4  ;;  %v8265_v48 = vpop.xlane.xlu1 %8264  ;;  %v8976_v53 = vmul.f32 %v16144_v22, %v17923_v31  ;;  %v17927_v41 = vld [vmem:[#allocation13_spill] sm:$0xff]  ;;  %v17952_v31 = vld [vmem:[#allocation26_spill] sm:$0xff] }
 0x90f   : > { %v8549_v2 = vrot.slane %v8425_v62, %v14400_v18  ;;  %v8355_v26 = vpack.c.bf16 %v8265_v48, %v8262_v7  ;;  %v9712_v10 = vmul.f32 %v16159_v45, %v17927_v41  ;;  %v9759_v62 = vsel %vm4719_vm4, %v9711_v46, 0.0  ;;  %v17929_v7 = vld [vmem:[#allocation94_spill] sm:$0xff]  ;;  %11596 = vmatpush3.bf16.msra.mxu0 %v11306_v35 }
 0x910   : > { %v8545_v54 = vsel %vm5568_vm12, %v8544_v32, %v8540_v21  ;;  %9111 = vadd.xlane.f32.xlu0 %v9110_v43  ;;  %v9116_v28 = vsel %vm4719_vm4, %v8976_v53, 0.0  ;;  %v16193_v21 = vrot.slane %v16163_v9, %v17709_v5  ;;  %v16196_v48 = vrot.slane %v9597_v40, %v17717_v37  ;;  %11609 = vmatprep.subr.bf16.mxu0 %v17676_v51 }
 0x911   : > { %v8550_v56 = vsel %vm5575_vm13, %v8549_v2, %v8545_v54  ;;  %v8426_v52 = vunpack.c.l.b16 %v8355_v26  ;;  %v8427_v61 = vunpack.c.h.b16 %v8355_v26  ;;  %9114 = vadd.xlane.f32.xlu1 %v9113_v58  ;;  %v8268_v60 = vpop.xlane.xlu0 %8267  ;;  %v9762_v53 = vsel %vm4719_vm4, %v9712_v10, 0.0  ;;  %v17930_v54 = vld [vmem:[#allocation81_spill] sm:$0xff] }
 0x912   : > { %v8682_v19 = vsel %vm5283_vm10, %v8550_v56, %v8681_v20  ;;  %v8356_v6 = vpack.c.bf16 %v8268_v60, %v8268_v60  ;;  %v8271_v3 = vpop.xlane.xlu1 %8270  ;;  %v9714_v20 = vmul.f32 %v17929_v7, %v17928_v50  ;;  %v9735_v58 = vmul.f32 %v16193_v21, %v17930_v54 }
 0x913   : > { %v8554_v63 = vrot.slane %v8426_v52, %v14394_v1  ;;  %v8558_v47 = vrot.slane %v8427_v61, %v14389_v4  ;;  %v16211_v15 = vrot.slane %v16196_v48, %v17709_v5 }
 0x914   : > { %v8428_v11 = vunpack.c.l.b16 %v8356_v6  ;;  %9117 = vadd.xlane.f32.xlu0 %v9116_v28  ;;  %v9768_v52 = vsel %vm4719_vm4, %v9714_v20, 0.0  ;;  %v17934_v20 = vld [vmem:[#allocation58_spill] sm:$0xff] }
 0x915   : > { %9760 = vadd.xlane.f32.xlu1 %v9759_v62  ;;  %v8274_v32 = vpop.xlane.xlu0 %8273  ;;  %v8559_v26 = vsel %vm5568_vm12, %v8558_v47, %v8554_v63  ;;  %v17932_v47 = vld [vmem:[#allocation96_spill] sm:$0xff]  ;;  %v9831_v62 = vsel %vm4719_vm4, %v9735_v58, 0.0 }
 0x916   : > { %v8563_v24 = vrot.slane %v8428_v11, %v14400_v18  ;;  %v8357_v23 = vpack.c.bf16 %v8274_v32, %v8271_v3  ;;  %v8277_v2 = vpop.xlane.xlu1 %8276  ;;  %v9771_v28 = vsel %vm4719_vm4, %v17932_v47, 0.0  ;;  %v9738_v32 = vmul.f32 %v16211_v15, %v17934_v20 }
 0x917   : > { %v8358_v43 = vpack.c.bf16 %v8277_v2, %v8277_v2 }
 0x918   : > { %v8564_v46 = vsel %vm5575_vm13, %v8563_v24, %v8559_v26  ;;  %v8429_v42 = vunpack.c.l.b16 %v8357_v23  ;;  %v8430_v56 = vunpack.c.h.b16 %v8357_v23  ;;  %9763 = vadd.xlane.f32.xlu0 %v9762_v53 }
 0x919   : > { %v16207_v61 = vsel %vm5286_vm11, %v8564_v46, %v8682_v19  ;;  %v8431_v60 = vunpack.c.l.b16 %v8358_v43  ;;  %9769 = vadd.xlane.f32.xlu1 %v9768_v52  ;;  %v8280_v13 = vpop.xlane.xlu0 %8279  ;;  %v17933_v19 = vld [vmem:[#allocation5_spill] sm:$0xff] }
 0x91a   : > { %17931 = vst [vmem:[#allocation52_spill] sm:$0xff] %v16207_v61  ;;  %v8568_v35 = vrot.slane %v8429_v42, %v14394_v1  ;;  %v8572_v40 = vrot.slane %v8430_v56, %v14389_v4  ;;  %v8283_v6 = vpop.xlane.xlu1 %8282  ;;  %v9736_v10 = vmul.f32 %v16193_v21, %v17933_v19  ;;  %v17935_v46 = vld [vmem:[#allocation65_spill] sm:$0xff]  ;;  %v17958_v61 = vld [vmem:[#allocation30_spill] sm:$0xff] }
 0x91b   : > { %v8577_v3 = vrot.slane %v8431_v60, %v14400_v18  ;;  %v8359_v63 = vpack.c.bf16 %v8283_v6, %v8280_v13  ;;  %v9739_v42 = vmul.f32 %v16211_v15, %v17935_v46  ;;  %v17936_v60 = vld [vmem:[#allocation79_spill] sm:$0xff] }
 0x91c   : > { %v8573_v11 = vsel %vm5568_vm12, %v8572_v40, %v8568_v35  ;;  %9772 = vadd.xlane.f32.xlu0 %v9771_v28  ;;  %v9834_v58 = vsel %vm4719_vm4, %v9736_v10, 0.0  ;;  %v8953_v13 = vmul.f32 %v17915_v44, %v17936_v60  ;;  %v9840_v40 = vsel %vm4719_vm4, %v9738_v32, 0.0 }
 0x91d   : > { %v8578_v24 = vsel %vm5575_vm13, %v8577_v3, %v8573_v11  ;;  %v8432_v23 = vunpack.c.l.b16 %v8359_v63  ;;  %v8433_v2 = vunpack.c.h.b16 %v8359_v63  ;;  %9832 = vadd.xlane.f32.xlu1 %v9831_v62  ;;  %v8286_v26 = vpop.xlane.xlu0 %8285  ;;  %v9578_v3 = vcombine.high %v16141_v0, %v16141_v0  ;;  %v17937_v0 = vld [vmem:[#allocation70_spill] sm:$0xff] }
 0x91e   : > { %v8360_v43 = vpack.c.bf16 %v8286_v26, %v8286_v26  ;;  %v8289_v53 = vpop.xlane.xlu1 %8288  ;;  %v8977_v11 = vmul.f32 %v16144_v22, %v17907_v57  ;;  %v9843_v44 = vsel %vm4719_vm4, %v9739_v42, 0.0 }
 0x91f   : > { %v8582_v56 = vrot.slane %v8432_v23, %v14394_v1  ;;  %v8586_v52 = vrot.slane %v8433_v2, %v14389_v4  ;;  %v9047_v23 = vsel %vm4719_vm4, %v8953_v13, 0.0 }
 0x920   : > { %v8434_v35 = vunpack.c.l.b16 %v8360_v43  ;;  %9835 = vadd.xlane.f32.xlu0 %v9834_v58  ;;  %v9713_v43 = vmul.f32 %v16159_v45, %v17937_v0 }
 0x921   : > { %9841 = vadd.xlane.f32.xlu1 %v9840_v40  ;;  %v8292_v6 = vpop.xlane.xlu0 %8291  ;;  %v8587_v10 = vsel %vm5568_vm12, %v8586_v52, %v8582_v56  ;;  %v9642_v56 = vrot.slane %v9578_v3, %v17709_v5 }
 0x922   : > { %v8591_v63 = vrot.slane %v8434_v35, %v14400_v18  ;;  %v8361_v47 = vpack.c.bf16 %v8292_v6, %v8289_v53  ;;  %v8295_v28 = vpop.xlane.xlu1 %8294  ;;  %v9119_v6 = vsel %vm4719_vm4, %v8977_v11, 0.0 }
 0x923   : > { %v8362_v62 = vpack.c.bf16 %v8295_v28, %v8295_v28  ;;  %v17939_v28 = vld [vmem:[#allocation61_spill] sm:$0xff] }
 0x924   : > { %v8592_v32 = vsel %vm5575_vm13, %v8591_v63, %v8587_v10  ;;  %v8435_v2 = vunpack.c.l.b16 %v8361_v47  ;;  %v8436_v26 = vunpack.c.h.b16 %v8361_v47  ;;  %9844 = vadd.xlane.f32.xlu0 %v9843_v44  ;;  %v17938_v63 = vld [vmem:[#allocation72_spill] sm:$0xff]  ;;  %v9765_v47 = vsel %vm4719_vm4, %v9713_v43, 0.0 }
 0x925   : > { %v8684_v53 = vsel %vm5268_vm5, %v8592_v32, %v8578_v24  ;;  %v8437_v58 = vunpack.c.l.b16 %v8362_v62  ;;  %9048 = vadd.xlane.f32.xlu1 %v9047_v23  ;;  %v8298_v22 = vpop.xlane.xlu0 %8297  ;;  %v9716_v45 = vmul.f32 %v17929_v7, %v17938_v63  ;;  %v9717_v3 = vmul.f32 %v9642_v56, %v17939_v28 }
 0x926   : > { %v8596_v52 = vrot.slane %v8435_v2, %v14394_v1  ;;  %v8600_v42 = vrot.slane %v8436_v26, %v14389_v4  ;;  %v8301_v13 = vpop.xlane.xlu1 %8300  ;;  %v9627_v10 = vcombine.high %v16163_v9, %v16163_v9 }
 0x927   : > { %v8605_v35 = vrot.slane %v8437_v58, %v14400_v18  ;;  %v8363_v40 = vpack.c.bf16 %v8301_v13, %v8298_v22  ;;  %v9774_v43 = vsel %vm4719_vm4, %v9716_v45, 0.0  ;;  %v17940_v22 = vld [vmem:[#allocation75_spill] sm:$0xff]  ;;  %v9777_v9 = vsel %vm4719_vm4, %v9717_v3, 0.0  ;;  %v17941_v13 = vld [vmem:[#allocation80_spill] sm:$0xff] }
 0x928   : > { %v8601_v24 = vsel %vm5568_vm12, %v8600_v42, %v8596_v52  ;;  %9120 = vadd.xlane.f32.xlu0 %v9119_v6  ;;  %v9718_v52 = vmul.f32 %v9642_v56, %v17940_v22  ;;  %v17943_v3 = vld [vmem:[#allocation67_spill] sm:$0xff] }
 0x929   : > { %v8606_v62 = vsel %vm5575_vm13, %v8605_v35, %v8601_v24  ;;  %v8438_v44 = vunpack.c.l.b16 %v8363_v40  ;;  %v8439_v23 = vunpack.c.h.b16 %v8363_v40  ;;  %9766 = vadd.xlane.f32.xlu1 %v9765_v47  ;;  %v8304_v32 = vpop.xlane.xlu0 %8303  ;;  %v9737_v35 = vmul.f32 %v16193_v21, %v17941_v13 }
 0x92a   : > { %v8685_v11 = vsel %vm5271_vm6, %v8606_v62, %v8684_v53  ;;  %v8364_v2 = vpack.c.bf16 %v8304_v32, %v8304_v32  ;;  %v8307_v7 = vpop.xlane.xlu1 %8306  ;;  %v9674_v40 = vrot.slane %v9627_v10, %v17709_v5  ;;  %v17942_v62 = vld [vmem:[#allocation23_spill] sm:$0xff]  ;;  %v9780_v32 = vsel %vm4719_vm4, %v9718_v52, 0.0 }
 0x92b   : > { %v8610_v26 = vrot.slane %v8438_v44, %v14394_v1  ;;  %v8614_v58 = vrot.slane %v8439_v23, %v14389_v4  ;;  %v9740_v45 = vmul.f32 %v16211_v15, %v17942_v62 }
 0x92c   : > { %v8440_v42 = vunpack.c.l.b16 %v8364_v2  ;;  %9775 = vadd.xlane.f32.xlu0 %v9774_v43  ;;  %v9741_v2 = vmul.f32 %v9674_v40, %v17943_v3  ;;  %v9743_v8 = vmul.f32 %v9674_v40, %v17952_v31 }
 0x92d   : > { %9778 = vadd.xlane.f32.xlu1 %v9777_v9  ;;  %v8310_v53 = vpop.xlane.xlu0 %8309  ;;  %v8615_v44 = vsel %vm5568_vm12, %v8614_v58, %v8610_v26  ;;  %v9837_v9 = vsel %vm4719_vm4, %v9737_v35, 0.0 }
 0x92e   : > { %v8619_v6 = vrot.slane %v8440_v42, %v14400_v18  ;;  %v8365_v24 = vpack.c.bf16 %v8310_v53, %v8307_v7  ;;  %v8313_v47 = vpop.xlane.xlu1 %8312  ;;  %v17944_v42 = vld [vmem:[#allocation89_spill] sm:$0xff] }
 0x92f   : > { %v8366_v23 = vpack.c.bf16 %v8313_v47, %v8313_v47  ;;  %v9580_v7 = vcombine.high %v17944_v42, %v17944_v42  ;;  %v9629_v42 = vcombine.high %v16196_v48, %v16196_v48 }
 0x930   : > { %v8620_v21 = vsel %vm5575_vm13, %v8619_v6, %v8615_v44  ;;  %v8441_v43 = vunpack.c.l.b16 %v8365_v24  ;;  %v8442_v10 = vunpack.c.h.b16 %v8365_v24  ;;  %9781 = vadd.xlane.f32.xlu0 %v9780_v32  ;;  %v9846_v24 = vsel %vm4719_vm4, %v9740_v45, 0.0  ;;  %v17945_v32 = vld [vmem:[#allocation64_spill] sm:$0xff] }
 0x931   : > { %v8686_v53 = vsel %vm5274_vm7, %v8620_v21, %v8685_v11  ;;  %v8443_v15 = vunpack.c.l.b16 %v8366_v23  ;;  %9838 = vadd.xlane.f32.xlu1 %v9837_v9  ;;  %v8316_v26 = vpop.xlane.xlu0 %8315  ;;  %v9742_v35 = vmul.f32 %v9674_v40, %v17945_v32  ;;  %v9849_v23 = vsel %vm4719_vm4, %v9741_v2, 0.0  ;;  %v17946_v21 = vld [vmem:[#allocation11_spill] sm:$0xff] }
 0x932   : > { %v8624_v58 = vrot.slane %v8441_v43, %v14394_v1  ;;  %v8628_v52 = vrot.slane %v8442_v10, %v14389_v4  ;;  %v8319_v47 = vpop.xlane.xlu1 %8318  ;;  %v9719_v43 = vmul.f32 %v9642_v56, %v17946_v21  ;;  %v16290_v45 = vrot.slane %v9580_v7, %v17709_v5  ;;  %v17947_v56 = vld [vmem:[#allocation10_spill] sm:$0xff] }
 0x933   : > { %v8633_v6 = vrot.slane %v8443_v15, %v14400_v18  ;;  %v8367_v44 = vpack.c.bf16 %v8319_v47, %v8316_v26  ;;  %v9852_v2 = vsel %vm4719_vm4, %v9742_v35, 0.0 }
 0x934   : > { %v8629_v11 = vsel %vm5568_vm12, %v8628_v52, %v8624_v58  ;;  %9847 = vadd.xlane.f32.xlu0 %v9846_v24 }
 0x935   : > { %v8634_v10 = vsel %vm5575_vm13, %v8633_v6, %v8629_v11  ;;  %v8444_v9 = vunpack.c.l.b16 %v8367_v44  ;;  %v8445_v57 = vunpack.c.h.b16 %v8367_v44  ;;  %9850 = vadd.xlane.f32.xlu1 %v9849_v23  ;;  %v8322_v15 = vpop.xlane.xlu0 %8321  ;;  %v9720_v6 = vmul.f32 %v16290_v45, %v17947_v56  ;;  %v17948_v11 = vld [vmem:[#allocation73_spill] sm:$0xff] }
 0x936   : > { %v8687_v26 = vsel %vm5277_vm8, %v8634_v10, %v8686_v53  ;;  %v8368_v47 = vpack.c.bf16 %v8322_v15, %v8322_v15  ;;  %v8325_v48 = vpop.xlane.xlu1 %8324  ;;  %v9783_v44 = vsel %vm4719_vm4, %v9719_v43, 0.0  ;;  %v9721_v7 = vmul.f32 %v16290_v45, %v17948_v11  ;;  %v17949_v10 = vld [vmem:[#allocation95_spill] sm:$0xff] }
 0x937   : > { %v8638_v58 = vrot.slane %v8444_v9, %v14394_v1  ;;  %v8642_v52 = vrot.slane %v8445_v57, %v14389_v4  ;;  %v16302_v23 = vrot.slane %v9629_v42, %v17709_v5  ;;  %v16306_v57 = vrot.slane %v17949_v10, %v17717_v37 }
 0x938   : > { %v8446_v24 = vunpack.c.l.b16 %v8368_v47  ;;  %9853 = vadd.xlane.f32.xlu0 %v9852_v2  ;;  %v17950_v47 = vld [vmem:[#allocation39_spill] sm:$0xff]  ;;  %v17951_v2 = vld [vmem:[#allocation57_spill] sm:$0xff]  ;;  %v9786_v42 = vsel %vm4719_vm4, %v9720_v6, 0.0 }
 0x939   : > { %9784 = vadd.xlane.f32.xlu1 %v9783_v44  ;;  %v8328_v53 = vpop.xlane.xlu0 %8327  ;;  %v11310_v43 = vcombine.low %v17950_v47, %v17950_v47  ;;  %v10370_v60 = vrot.slane %v17951_v2, %v17717_v37  ;;  %v8643_v44 = vsel %vm5568_vm12, %v8642_v52, %v8638_v58  ;;  %v17954_v58 = vld [vmem:[#allocation38_spill] sm:$0xff]  ;;  %v17955_v52 = vld [vmem:[#allocation37_spill] sm:$0xff]  ;;  %v16330_v40 = vrot.slane %v16306_v57, %v17709_v5 }
 0x93a   : > { %v8647_v35 = vrot.slane %v8446_v24, %v14400_v18  ;;  %v16309_v9 = vpack.c.bf16 %v8328_v53, %v8325_v48  ;;  %v8980_v15 = vpop.xlane.xlu1 %8979  ;;  %v9789_v24 = vsel %vm4719_vm4, %v9721_v7, 0.0  ;;  %v17953_v48 = vld [vmem:[#allocation66_spill] sm:$0xff]  ;;  %v11309_v6 = vcombine.low %v17955_v52, %v17954_v58 }
 0x93b   : > { %v9744_v53 = vmul.f32 %v16302_v23, %v17953_v48  ;;  %v9486_v16 = vsel %vm7549_vm14, %v11310_v43, 0  ;;  %v9855_v43 = vsel %vm4719_vm4, %v9743_v8, 0.0 }
 0x93c   : > { %v8648_v10 = vsel %vm5575_vm13, %v8647_v35, %v8643_v44  ;;  %9787 = vadd.xlane.f32.xlu0 %v9786_v42  ;;  %11602 = vmatpush3.bf16.msra.mxu1 %v9486_v16  ;;  %v10378_v44 = vcombine.high %v10370_v60, %v10370_v60  ;;  %v17956_v42 = vld [vmem:[#allocation24_spill] sm:$0xff] }
 0x93d   : > { %v16324_v47 = vsel %vm5280_vm9, %v8648_v10, %v8687_v26  ;;  %9790 = vadd.xlane.f32.xlu1 %v9789_v24  ;;  %v8983_v25 = vpop.xlane.xlu0 %8982  ;;  %11603 = vmatprep.subr.bf16.mxu1 %v17676_v51  ;;  %v9745_v26 = vmul.f32 %v16302_v23, %v17956_v42  ;;  %v9858_v16 = vsel %vm4719_vm4, %v9744_v53, 0.0  ;;  %v10492_v10 = vmul.f32 %v16330_v40, %v17924_v33 }
 0x93e   : > { %v9122_v35 = vpack.c.bf16 %v8983_v25, %v8980_v15  ;;  %v8989_v7 = vpop.xlane.xlu1 %8988  ;;  %v16340_v25 = vrot.slane %v10370_v60, %v17717_v37  ;;  %v16344_v8 = vrot.slane %v10378_v44, %v17717_v37  ;;  %v10493_v53 = vmul.f32 %v16330_v40, %v17927_v41 }
 0x93f   : > { %v9861_v52 = vsel %vm4719_vm4, %v9745_v26, 0.0  ;;  %v10540_v33 = vsel %vm4719_vm4, %v10492_v10, 0.0  ;;  %v9582_v60 = vcombine.high %v17918_v36, %v17918_v36 }
 0x940   : > { %9856 = vadd.xlane.f32.xlu0 %v9855_v43  ;;  %11604 = vmatpush3.bf16.msra.mxu1 %v11309_v6  ;;  %v17957_v6 = vld [vmem:[#allocation98_spill] sm:$0xff]  ;;  %v16356_v44 = vrot.slane %v16340_v25, %v17709_v5  ;;  %v16362_v41 = vrot.slane %v16344_v8, %v17709_v5  ;;  %v10543_v10 = vsel %vm4719_vm4, %v10493_v53, 0.0 }
 0x941   : > { %9859 = vadd.xlane.f32.xlu1 %v9858_v16  ;;  %v8992_v24 = vpop.xlane.xlu0 %8991  ;;  %11617 = vmatprep.subr.bf16.mxu1 %v17676_v51  ;;  %v10495_v43 = vmul.f32 %v17957_v6, %v17928_v50  ;;  %v9187_v50 = vunpack.c.h.b16 %v9122_v35 }
 0x942   : > { %v9124_v15 = vpack.c.bf16 %v8992_v24, %v8989_v7  ;;  %v9052_v58 = vpop.xlane.xlu1 %9051  ;;  %v9186_v24 = vunpack.c.l.b16 %v9122_v35  ;;  %v10517_v27 = vmul.f32 %v16356_v44, %v17933_v19  ;;  %v10519_v35 = vmul.f32 %v16362_v41, %v17934_v20 }
 0x943   : > { %v10549_v36 = vsel %vm4719_vm4, %v10495_v43, 0.0 }
 0x944   : > { %9862 = vadd.xlane.f32.xlu0 %v9861_v52  ;;  %v10516_v52 = vmul.f32 %v16356_v44, %v17930_v54  ;;  %v9189_v53 = vunpack.c.l.b16 %v9124_v15  ;;  %v10552_v54 = vsel %vm4719_vm4, %v17958_v61, 0.0  ;;  %v17961_v61 = vld [vmem:[#allocation29_spill] sm:$0xff] }
 0x945   : > { %10541 = vadd.xlane.f32.xlu1 %v10540_v33  ;;  %v9055_v7 = vpop.xlane.xlu0 %9054  ;;  %v16369_v33 = vrot.slane %v9582_v60, %v17717_v37  ;;  %v9237_v60 = vrot.slane %v9186_v24, %v14394_v1  ;;  %v16392_v24 = vrot.slane %v17961_v61, %v17709_v5 }
 0x946   : > { %v16358_v16 = vpack.c.bf16 %v9055_v7, %v9052_v58  ;;  %v9061_v26 = vpop.xlane.xlu1 %9060  ;;  %v9251_v2 = vrot.slane %v9189_v53, %v14394_v1 }
 0x947   : > { %v16386_v19 = vrot.slane %v16369_v33, %v17717_v37 }
 0x948   : > { %10544 = vadd.xlane.f32.xlu0 %v10543_v10  ;;  %v9190_v10 = vunpack.c.h.b16 %v9124_v15  ;;  %v9210_v61 = vunpack.c.l.b16 %v16358_v16 }
 0x949   : > { %10550 = vadd.xlane.f32.xlu1 %v10549_v36  ;;  %v9064_v58 = vpop.xlane.xlu0 %9063  ;;  %v9241_v36 = vrot.slane %v9187_v50, %v14389_v4  ;;  %17960 = vst [vmem:[#allocation82_spill] sm:$0xff] %v16386_v19 }
 0x94a   : > { %v16371_v7 = vpack.c.bf16 %v9064_v58, %v9061_v26  ;;  %v8986_v51 = vpop.xlane.xlu1 %8985  ;;  %v10612_v26 = vsel %vm4719_vm4, %v10516_v52, 0.0  ;;  %v17962_v52 = vld [vmem:[#allocation20_spill] sm:$0xff] }
 0x94b   : > { %v9123_v43 = vpack.c.bf16 %v8986_v51, %v8986_v51  ;;  %v10520_v51 = vmul.f32 %v16362_v41, %v17935_v46  ;;  %v9722_v38 = vmul.f32 %v16290_v45, %v17962_v52  ;;  %v10621_v46 = vsel %vm4719_vm4, %v10519_v35, 0.0 }
 0x94c   : > { %v16381_v29 = vpop.f32.mrf.mxu1  ;;  %10553 = vadd.xlane.f32.xlu0 %v10552_v54  ;;  %v10615_v54 = vsel %vm4719_vm4, %v10517_v27, 0.0  ;;  %v9242_v30 = vsel %vm5568_vm12, %v9241_v36, %v9237_v60  ;;  %v16408_v27 = vrot.slane %v16386_v19, %v17709_v5  ;;  %v9213_v19 = vunpack.c.l.b16 %v16371_v7 }
 0x94d   : > { %17959 = vst [vmem:[#allocation78_spill] sm:$0xff] %v16381_v29  ;;  %v9188_v20 = vunpack.c.l.b16 %v9123_v43  ;;  %10613 = vadd.xlane.f32.xlu1 %v10612_v26  ;;  %v8995_v15 = vpop.xlane.xlu0 %8994  ;;  %v9255_v43 = vrot.slane %v9190_v10, %v14389_v4  ;;  %v10624_v35 = vsel %vm4719_vm4, %v10520_v51, 0.0  ;;  %v9349_v51 = vrot.slane %v9210_v61, %v14394_v1  ;;  %v17967_v61 = vld [vmem:[#allocation69_spill] sm:$0xff] }
 0x94e   : > { %v9125_v50 = vpack.c.bf16 %v8995_v15, %v8995_v15  ;;  %v8998_v58 = vpop.xlane.xlu1 %8997  ;;  %v11591_v29 = vpop.f32.mrf.mxu1  ;;  %v9211_v15 = vunpack.c.h.b16 %v16358_v16  ;;  %v17964_v16 = vld [vmem:[#allocation74_spill] sm:$0xff] }
 0x94f   : > { %v9246_v26 = vrot.slane %v9188_v20, %v14400_v18  ;;  %v9256_v52 = vsel %vm5568_vm12, %v9255_v43, %v9251_v2 }
 0x950   : > { %v9191_v29 = vunpack.c.l.b16 %v9125_v50  ;;  %v16404_v49 = vpop.f32.mrf.mxu1  ;;  %10616 = vadd.xlane.f32.xlu0 %v10615_v54  ;;  %v9723_v50 = vmul.f32 %v16392_v24, %v17964_v16 }
 0x951   : > { %17963 = vst [vmem:[#allocation77_spill] sm:$0xff] %v16404_v49  ;;  %v9247_v45 = vsel %vm5575_vm13, %v9246_v26, %v9242_v30  ;;  %10622 = vadd.xlane.f32.xlu1 %v10621_v46  ;;  %v9001_v53 = vpop.xlane.xlu0 %9000  ;;  %v17965_v49 = vld [vmem:[#allocation15_spill] sm:$0xff]  ;;  %v9214_v30 = vunpack.c.h.b16 %v16371_v7  ;;  %v9353_v46 = vrot.slane %v9211_v15, %v14389_v4  ;;  %v9747_v15 = vmul.f32 %v16408_v27, %v17967_v61 }
 0x952   : > { %v9260_v10 = vrot.slane %v9191_v29, %v14400_v18  ;;  %v9126_v60 = vpack.c.bf16 %v9001_v53, %v8998_v58  ;;  %v9058_v36 = vpop.xlane.xlu1 %9057  ;;  %v11592_v20 = vpop.f32.mrf.mxu1  ;;  %v9724_v54 = vmul.f32 %v16392_v24, %v17965_v49  ;;  %v9792_v29 = vsel %vm4719_vm4, %v9722_v38, 0.0  ;;  %v17966_v7 = vld [vmem:[#allocation27_spill] sm:$0xff] }
 0x953   : > { %v9139_v26 = vpack.c.bf16 %v9058_v36, %v9058_v36  ;;  %v9795_v16 = vsel %vm4719_vm4, %v9723_v50, 0.0  ;;  %v9746_v36 = vmul.f32 %v16302_v23, %v17966_v7 }
 0x954   : > { %v9261_v58 = vsel %vm5575_vm13, %v9260_v10, %v9256_v52  ;;  %10625 = vadd.xlane.f32.xlu0 %v10624_v35  ;;  %v9363_v52 = vrot.slane %v9213_v19, %v14394_v1  ;;  %v9367_v35 = vrot.slane %v9214_v30, %v14389_v4  ;;  %v9354_v10 = vsel %vm5568_vm12, %v9353_v46, %v9349_v51 }
 0x955   : > { %v9458_v53 = vsel %vm5268_vm5, %v9261_v58, %v9247_v45  ;;  %v9212_v20 = vunpack.c.l.b16 %v9139_v26  ;;  %9793 = vadd.xlane.f32.xlu1 %v9792_v29  ;;  %v9067_v49 = vpop.xlane.xlu0 %9066  ;;  %v9798_v45 = vsel %vm4719_vm4, %v9724_v54, 0.0  ;;  %v9193_v26 = vunpack.c.h.b16 %v9126_v60 }
 0x956   : > { %v9141_v2 = vpack.c.bf16 %v9067_v49, %v9067_v49  ;;  %v9070_v43 = vpop.xlane.xlu1 %9069  ;;  %v9192_v49 = vunpack.c.l.b16 %v9126_v60  ;;  %v10359_v29 = vcombine.high %v16306_v57, %v16306_v57  ;;  %v9368_v51 = vsel %vm5568_vm12, %v9367_v35, %v9363_v52 }
 0x957   : > { %v9358_v38 = vrot.slane %v9212_v20, %v14400_v18  ;;  %v17968_v20 = vld [vmem:[#allocation25_spill] sm:$0xff]  ;;  %v9864_v60 = vsel %vm4719_vm4, %v9746_v36, 0.0 }
 0x958   : > { %v9215_v58 = vunpack.c.l.b16 %v9141_v2  ;;  %9796 = vadd.xlane.f32.xlu0 %v9795_v16  ;;  %v9748_v54 = vmul.f32 %v16408_v27, %v17968_v20  ;;  %v10494_v16 = vmul.f32 %v16330_v40, %v17937_v0  ;;  %v9265_v2 = vrot.slane %v9192_v49, %v14394_v1 }
 0x959   : > { %v9359_v50 = vsel %vm5575_vm13, %v9358_v38, %v9354_v10  ;;  %9799 = vadd.xlane.f32.xlu1 %v9798_v45  ;;  %v9073_v23 = vpop.xlane.xlu0 %9072  ;;  %v9269_v38 = vrot.slane %v9193_v26, %v14389_v4  ;;  %v10497_v40 = vmul.f32 %v17957_v6, %v17938_v63 }
 0x95a   : > { %v9372_v19 = vrot.slane %v9215_v58, %v14400_v18  ;;  %v9142_v30 = vpack.c.bf16 %v9073_v23, %v9070_v43  ;;  %v9004_v61 = vpop.xlane.xlu1 %9003  ;;  %v9867_v43 = vsel %vm4719_vm4, %v9747_v15, 0.0  ;;  %v9870_v0 = vsel %vm4719_vm4, %v9748_v54, 0.0 }
 0x95b   : > { %v9127_v46 = vpack.c.bf16 %v9004_v61, %v9004_v61  ;;  %v16451_v61 = vrot.slane %v10359_v29, %v17709_v5  ;;  %v9270_v15 = vsel %vm5568_vm12, %v9269_v38, %v9265_v2  ;;  %v10408_v29 = vcombine.high %v16340_v25, %v16340_v25 }
 0x95c   : > { %v9373_v57 = vsel %vm5575_vm13, %v9372_v19, %v9368_v51  ;;  %9865 = vadd.xlane.f32.xlu0 %v9864_v60  ;;  %v9216_v35 = vunpack.c.l.b16 %v9142_v30  ;;  %v9217_v49 = vunpack.c.h.b16 %v9142_v30  ;;  %v10518_v25 = vmul.f32 %v16356_v44, %v17941_v13 }
 0x95d   : > { %v9465_v45 = vsel %vm5268_vm5, %v9373_v57, %v9359_v50  ;;  %v9194_v10 = vunpack.c.l.b16 %v9127_v46  ;;  %9868 = vadd.xlane.f32.xlu1 %v9867_v43  ;;  %v9007_v52 = vpop.xlane.xlu0 %9006  ;;  %v10546_v50 = vsel %vm4719_vm4, %v10494_v16, 0.0  ;;  %v10498_v23 = vmul.f32 %v16451_v61, %v17939_v28 }
 0x95e   : > { %v9010_v36 = vpop.xlane.xlu1 %9009  ;;  %v10499_v51 = vmul.f32 %v16451_v61, %v17940_v22  ;;  %v9377_v46 = vrot.slane %v9216_v35, %v14394_v1  ;;  %v9381_v60 = vrot.slane %v9217_v49, %v14389_v4  ;;  %v10555_v28 = vsel %vm4719_vm4, %v10497_v40, 0.0 }
 0x95f   : > { %v9274_v26 = vrot.slane %v9194_v10, %v14400_v18  ;;  %v9128_v58 = vpack.c.bf16 %v9010_v36, %v9007_v52  ;;  %v16474_v57 = vrot.slane %v10408_v29, %v17709_v5  ;;  %v10521_v36 = vmul.f32 %v16362_v41, %v17942_v62 }
 0x960   : > { %9871 = vadd.xlane.f32.xlu0 %v9870_v0  ;;  %v9382_v13 = vsel %vm5568_vm12, %v9381_v60, %v9377_v46  ;;  %v10561_v0 = vsel %vm4719_vm4, %v10499_v51, 0.0  ;;  %v9598_v62 = vcombine.high %v16369_v33, %v16369_v33  ;;  %v17969_v46 = vld [vmem:[#allocation28_spill] sm:$0xff] }
 0x961   : > { %v9275_v19 = vsel %vm5575_vm13, %v9274_v26, %v9270_v15  ;;  %10547 = vadd.xlane.f32.xlu1 %v10546_v50  ;;  %v9076_v63 = vpop.xlane.xlu0 %9075  ;;  %v9195_v16 = vunpack.c.l.b16 %v9128_v58  ;;  %v9196_v2 = vunpack.c.h.b16 %v9128_v58  ;;  %v10522_v40 = vmul.f32 %v16474_v57, %v17943_v3 }
 0x962   : > { %v9459_v6 = vsel %vm5271_vm6, %v9275_v19, %v9458_v53  ;;  %v9143_v30 = vpack.c.bf16 %v9076_v63, %v9076_v63  ;;  %v9079_v54 = vpop.xlane.xlu1 %9078  ;;  %v10558_v53 = vsel %vm4719_vm4, %v10498_v23, 0.0  ;;  %v10618_v58 = vsel %vm4719_vm4, %v10518_v25, 0.0 }
 0x963   : > { %v9279_v35 = vrot.slane %v9195_v16, %v14394_v1  ;;  %v9283_v49 = vrot.slane %v9196_v2, %v14389_v4  ;;  %v10627_v3 = vsel %vm4719_vm4, %v10521_v36, 0.0  ;;  %v10523_v29 = vmul.f32 %v16474_v57, %v17945_v32 }
 0x964   : > { %v9218_v38 = vunpack.c.l.b16 %v9143_v30  ;;  %10556 = vadd.xlane.f32.xlu0 %v10555_v28  ;;  %v10630_v33 = vsel %vm4719_vm4, %v10522_v40, 0.0  ;;  %v16502_v60 = vrot.slane %v17969_v46, %v17709_v5  ;;  %v16505_v32 = vrot.slane %v9598_v62, %v17717_v37 }
 0x965   : > { %10559 = vadd.xlane.f32.xlu1 %v10558_v53  ;;  %v9082_v22 = vpop.xlane.xlu0 %9081  ;;  %v9284_v51 = vsel %vm5568_vm12, %v9283_v49, %v9279_v35  ;;  %v9749_v49 = vmul.f32 %v16408_v27, %v17871_v59 }
 0x966   : > { %v9386_v43 = vrot.slane %v9218_v38, %v14400_v18  ;;  %v9144_v10 = vpack.c.bf16 %v9082_v22, %v9079_v54  ;;  %v9013_v52 = vpop.xlane.xlu1 %9012 }
 0x967   : > { %v9129_v44 = vpack.c.bf16 %v9013_v52, %v9013_v52  ;;  %v8447_v52 = vunpack.c.l.b16 %v16309_v9 }
 0x968   : > { %v9387_v26 = vsel %vm5575_vm13, %v9386_v43, %v9382_v13  ;;  %10562 = vadd.xlane.f32.xlu0 %v10561_v0  ;;  %v9219_v19 = vunpack.c.l.b16 %v9144_v10  ;;  %v9220_v63 = vunpack.c.h.b16 %v9144_v10  ;;  %v10633_v43 = vsel %vm4719_vm4, %v10523_v29, 0.0  ;;  %v17970_v29 = vld [vmem:[#allocation97_spill] sm:$0xff] }
 0x969   : > { %v9466_v41 = vsel %vm5271_vm6, %v9387_v26, %v9465_v45  ;;  %v9197_v15 = vunpack.c.l.b16 %v9129_v44  ;;  %10619 = vadd.xlane.f32.xlu1 %v10618_v58  ;;  %v9016_v50 = vpop.xlane.xlu0 %9015  ;;  %v9725_v45 = vmul.f32 %v16392_v24, %v17903_v14  ;;  %v9726_v24 = vmul.f32 %v16502_v60, %v17905_v39 }
 0x96a   : > { %v9019_v23 = vpop.xlane.xlu1 %9018  ;;  %v9391_v53 = vrot.slane %v9219_v19, %v14394_v1  ;;  %v9395_v22 = vrot.slane %v9220_v63, %v14389_v4  ;;  %v9727_v10 = vmul.f32 %v16502_v60, %v17906_v12  ;;  %v16527_v0 = vrot.slane %v16505_v32, %v17709_v5 }
 0x96b   : > { %v9288_v30 = vrot.slane %v9197_v15, %v14400_v18  ;;  %v16494_v54 = vpack.c.bf16 %v9019_v23, %v9016_v50  ;;  %v9801_v13 = vsel %vm4719_vm4, %v9725_v45, 0.0  ;;  %v9804_v58 = vsel %vm4719_vm4, %v9726_v24, 0.0 }
 0x96c   : > { %10628 = vadd.xlane.f32.xlu0 %v10627_v3  ;;  %v9396_v26 = vsel %vm5568_vm12, %v9395_v22, %v9391_v53  ;;  %v9750_v62 = vmul.f32 %v16527_v0, %v17872_v34  ;;  %v8652_v15 = vrot.slane %v8447_v52, %v14394_v1  ;;  %v9807_v3 = vsel %vm4719_vm4, %v9727_v10, 0.0 }
 0x96d   : > { %v9289_v28 = vsel %vm5575_vm13, %v9288_v30, %v9284_v51  ;;  %10631 = vadd.xlane.f32.xlu1 %v10630_v33  ;;  %v9085_v25 = vpop.xlane.xlu0 %9084  ;;  %v10361_v27 = vcombine.high %v17970_v29, %v17970_v29  ;;  %v9751_v33 = vmul.f32 %v16527_v0, %v17873_v55  ;;  %v9198_v45 = vunpack.c.l.b16 %v16494_v54 }
 0x96e   : > { %v16509_v16 = vsel %vm5274_vm7, %v9289_v28, %v9459_v6  ;;  %v9145_v2 = vpack.c.bf16 %v9085_v25, %v9085_v25  ;;  %v16511_v38 = vpop.xlane.xlu1 %9087  ;;  %v8448_v6 = vunpack.c.h.b16 %v16309_v9  ;;  %v9199_v46 = vunpack.c.h.b16 %v16494_v54 }
 0x96f   : > { %v9873_v25 = vsel %vm4719_vm4, %v9749_v49, 0.0  ;;  %v10500_v24 = vmul.f32 %v16451_v61, %v17946_v21  ;;  %v10410_v54 = vcombine.high %v16344_v8, %v16344_v8  ;;  %v9879_v61 = vsel %vm4719_vm4, %v9751_v33, 0.0  ;;  %v17971_v33 = vld [vmem:[#allocation82_spill] sm:$0xff] }
 0x970   : > { %v9221_v36 = vunpack.c.l.b16 %v9145_v2  ;;  %10634 = vadd.xlane.f32.xlu0 %v10633_v43  ;;  %v8656_v50 = vrot.slane %v8448_v6, %v14389_v4  ;;  %v16557_v43 = vrot.slane %v10361_v27, %v17709_v5  ;;  %v9297_v21 = vrot.slane %v9199_v46, %v14389_v4 }
 0x971   : > { %9802 = vadd.xlane.f32.xlu1 %v9801_v13  ;;  %v16523_v44 = vpop.xlane.xlu0 %9090  ;;  %v10564_v8 = vsel %vm4719_vm4, %v10500_v24, 0.0  ;;  %v17973_v24 = vld [vmem:[#allocation14_spill] sm:$0xff] }
 0x972   : > { %v9400_v40 = vrot.slane %v9221_v36, %v14400_v18  ;;  %v8331_v35 = vpop.xlane.xlu1 %8330  ;;  %v8657_v2 = vsel %vm5568_vm12, %v8656_v50, %v8652_v15  ;;  %v9293_v36 = vrot.slane %v9198_v45, %v14394_v1  ;;  %v10501_v13 = vmul.f32 %v16557_v43, %v17947_v56 }
 0x973   : > { %v8370_v9 = vpack.c.bf16 %v8331_v35, %v8331_v35  ;;  %v10524_v15 = vmul.f32 %v16474_v57, %v17952_v31  ;;  %v9628_v45 = vcombine.high %v17971_v33, %v17971_v33 }
 0x974   : > { %v9401_v23 = vsel %vm5575_vm13, %v9400_v40, %v9396_v26  ;;  %9805 = vadd.xlane.f32.xlu0 %v9804_v58  ;;  %v9298_v58 = vsel %vm5568_vm12, %v9297_v21, %v9293_v36  ;;  %v17975_v36 = vld [vmem:[#allocation57_spill] sm:$0xff] }
 0x975   : > { %v16543_v19 = vsel %vm5274_vm7, %v9401_v23, %v9466_v41  ;;  %v8449_v63 = vunpack.c.l.b16 %v8370_v9  ;;  %9808 = vadd.xlane.f32.xlu1 %v9807_v3  ;;  %v8334_v30 = vpop.xlane.xlu0 %8333  ;;  %v9876_v41 = vsel %vm4719_vm4, %v9750_v62, 0.0  ;;  %v16581_v9 = vrot.slane %v10410_v54, %v17709_v5  ;;  %v17974_v54 = vld [vmem:[#allocation17_spill] sm:$0xff] }
 0x976   : > { %v8337_v51 = vpop.xlane.xlu1 %8336  ;;  %v10567_v62 = vsel %vm4719_vm4, %v10501_v13, 0.0  ;;  %v10636_v31 = vsel %vm4719_vm4, %v10524_v15, 0.0  ;;  %v10363_v21 = vcombine.high %v17975_v36, %v17975_v36 }
 0x977   : > { %v8661_v28 = vrot.slane %v8449_v63, %v14400_v18  ;;  %v8371_v56 = vpack.c.bf16 %v8337_v51, %v8334_v30  ;;  %v10525_v23 = vmul.f32 %v16581_v9, %v17953_v48  ;;  %v10526_v57 = vmul.f32 %v16581_v9, %v17956_v42 }
 0x978   : > { %9874 = vadd.xlane.f32.xlu0 %v9873_v25  ;;  %v9728_v48 = vmul.f32 %v16502_v60, %v17908_v17 }
 0x979   : > { %v8662_v53 = vsel %vm5575_vm13, %v8661_v28, %v8657_v2  ;;  %9877 = vadd.xlane.f32.xlu1 %v9876_v41  ;;  %v9022_v22 = vpop.xlane.xlu0 %9021  ;;  %v8450_v63 = vunpack.c.l.b16 %v8371_v56  ;;  %v8451_v30 = vunpack.c.h.b16 %v8371_v56  ;;  %v10639_v51 = vsel %vm4719_vm4, %v10525_v23, 0.0  ;;  %v17972_v41 = vld [vmem:[#allocation22_spill] sm:$0xff] }
 0x97a   : > { %v16563_v10 = vsel %vm5283_vm10, %v8662_v53, %v16324_v47  ;;  %v9131_v52 = vpack.c.bf16 %v9022_v22, %v9022_v22  ;;  %v16565_v6 = vpop.xlane.xlu1 %9024  ;;  %v10502_v47 = vmul.f32 %v16557_v43, %v17948_v11  ;;  %v10642_v42 = vsel %vm4719_vm4, %v10526_v57, 0.0  ;;  %v17978_v57 = vld [vmem:[#allocation52_spill] sm:$0xff] }
 0x97b   : > { %v8666_v25 = vrot.slane %v8450_v63, %v14394_v1  ;;  %v8670_v2 = vrot.slane %v8451_v30, %v14389_v4  ;;  %v9729_v53 = vmul.f32 %v17973_v24, %v17972_v41  ;;  %v9810_v60 = vsel %vm4719_vm4, %v9728_v48, 0.0  ;;  %v17979_v48 = vld [vmem:[#allocation48_spill] sm:$0xff] }
 0x97c   : > { %v9200_v40 = vunpack.c.l.b16 %v9131_v52  ;;  %9880 = vadd.xlane.f32.xlu0 %v9879_v61  ;;  %v10570_v50 = vsel %vm4719_vm4, %v10502_v47, 0.0  ;;  %v9730_v52 = vmul.f32 %v17973_v24, %v17974_v54  ;;  %v10377_v23 = vrot.slane %v10363_v21, %v17717_v37 }
 0x97d   : > { %10565 = vadd.xlane.f32.xlu1 %v10564_v8  ;;  %v16575_v35 = vpop.xlane.xlu0 %9027  ;;  %v9690_v8 = vrot.slane %v9628_v45, %v17709_v5  ;;  %v8671_v47 = vsel %vm5568_vm12, %v8670_v2, %v8666_v25  ;;  %v17980_v45 = vld [vmem:[#allocation20_spill] sm:$0xff] }
 0x97e   : > { %v9302_v49 = vrot.slane %v9200_v40, %v14400_v18  ;;  %v16578_v26 = vpop.xlane.xlu1 %9093  ;;  %v9816_v15 = vsel %vm4719_vm4, %v9730_v52, 0.0  ;;  %v10379_v2 = vcombine.high %v10377_v23, %v10377_v23  ;;  %v17983_v52 = vld [vmem:[#allocation74_spill] sm:$0xff] }
 0x980   : > { %v9303_v11 = vsel %vm5575_vm13, %v9302_v49, %v9298_v58  ;;  %10568 = vadd.xlane.f32.xlu0 %v10567_v62  ;;  %v9813_v49 = vsel %vm4719_vm4, %v9729_v53, 0.0  ;;  %v17976_v58 = vld [vmem:[#allocation46_spill] sm:$0xff]  ;;  %v17982_v53 = vmov 0.0  }
 0x981   : > { %v16593_v3 = vsel %vm5277_vm8, %v9303_v11, %v16509_v16  ;;  %10571 = vadd.xlane.f32.xlu1 %v10570_v50  ;;  %v16595_v29 = vpop.xlane.xlu0 %9096  ;;  %v9752_v56 = vmul.f32 %v16527_v0, %v17976_v58  ;;  %v17977_v11 = vld [vmem:[#allocation51_spill] sm:$0xff] }
 0x982   : > { %v16597_v27 = vpop.xlane.xlu1 %9099  ;;  %v9753_v50 = vmul.f32 %v9690_v8, %v17977_v11 }
 0x983   : > { %v9882_v0 = vsel %vm4719_vm4, %v9752_v56, 0.0 }
 0x984   : > { %10637 = vadd.xlane.f32.xlu0 %v10636_v31  ;;  %v9885_v33 = vsel %vm4719_vm4, %v9753_v50, 0.0  ;;  %v10527_v50 = vmul.f32 %v16581_v9, %v17966_v7  ;;  %v17988_v9 = vld [vmem:[#allocation103_spill] sm:$0xff] }
 0x985   : > { %10640 = vadd.xlane.f32.xlu1 %v10639_v51  ;;  %v8340_v16 = vpop.xlane.xlu0 %8339 }
 0x986   : > { %v8372_v46 = vpack.c.bf16 %v8340_v16, %v8340_v16  ;;  %v16607_v28 = vpop.xlane.xlu1 %9030  ;;  %v9754_v16 = vmul.f32 %v9690_v8, %v17979_v48 }
 0x988   : > { %v8452_v22 = vunpack.c.l.b16 %v8372_v46  ;;  %10643 = vadd.xlane.f32.xlu0 %v10642_v42  ;;  %v10503_v46 = vmul.f32 %v16557_v43, %v17980_v45  ;;  %v16649_v42 = vrot.slane %v10377_v23, %v17717_v37  ;;  %v9630_v43 = vcombine.high %v16505_v32, %v16505_v32  ;;  %v17985_v23 = vld [vmem:[#allocation69_spill] sm:$0xff]  ;;  %v17987_v45 = vld [vmem:[#allocation99_spill] sm:$0xff] }
 0x989   : > { %9811 = vadd.xlane.f32.xlu1 %v9810_v60  ;;  %v16619_v61 = vpop.xlane.xlu0 %9033  ;;  %v9888_v60 = vsel %vm4719_vm4, %v9754_v16, 0.0 }
 0x98a   : > { %v8675_v13 = vrot.slane %v8452_v22, %v14400_v18  ;;  %v16622_v40 = vpop.xlane.xlu1 %9036  ;;  %v10573_v21 = vsel %vm4719_vm4, %v10503_v46, 0.0  ;;  %v10463_v56 = vrot.slane %v16649_v42, %v17709_v5  ;;  %v10435_v46 = vrot.slane %v17988_v9, %v17709_v5 }
 0x98b   : > { %v9146_v9 = vpack.c.bf16 %v16523_v44, %v16511_v38  ;;  %v9147_v44 = vpack.c.bf16 %v16578_v26, %v16578_v26 }
 0x98c   : > { %v8676_v62 = vsel %vm5575_vm13, %v8675_v13, %v8671_v47  ;;  %9814 = vadd.xlane.f32.xlu0 %v9813_v49  ;;  %v17984_v13 = vld [vmem:[#allocation15_spill] sm:$0xff]  ;;  %v16664_v49 = vrot.slane %v10379_v2, %v17717_v37  ;;  %v10529_v37 = vmul.f32 %v10463_v56, %v17968_v20  ;;  %v10645_v20 = vsel %vm4719_vm4, %v10527_v50, 0.0 }
 0x98d   : > { %v8690_v63 = vsel %vm5286_vm11, %v8676_v62, %v16563_v10  ;;  %9817 = vadd.xlane.f32.xlu1 %v9816_v15  ;;  %v16635_v30 = vpop.xlane.xlu0 %9102  ;;  %v17981_v10 = vld [vmem:[#allocation101_spill] sm:$0xff] }
 0x98e   : > { %v16637_v31 = vpop.xlane.xlu1 %9105  ;;  %v8691_v51 = vpack.c.b16 %v8690_v63, %v17978_v57  ;;  %v10431_v25 = vrot.slane %v17981_v10, %v17709_v5  ;;  %v10528_v63 = vmul.f32 %v10463_v56, %v17985_v23  ;;  %v16689_v10 = vrot.slane %v16664_v49, %v17709_v5 }
 0x98f   : > { %v10507_v23 = vmul.f32 %v10435_v46, %v17905_v39  ;;  %v10651_v50 = vsel %vm4719_vm4, %v10529_v37, 0.0 }
 0x990   : > { %9883 = vadd.xlane.f32.xlu0 %v9882_v0  ;;  %11598 = vmatmul.mubr.msk.bf16.vlgmr.msra.gmra.mxu0 %vm4719_vm4, %v8691_v51  ;;  %v10504_v36 = vmul.f32 %v10431_v25, %v17983_v52  ;;  %v10505_v47 = vmul.f32 %v10431_v25, %v17984_v13  ;;  %v9694_v51 = vrot.slane %v9630_v43, %v17709_v5 }
 0x991   : > { %9886 = vadd.xlane.f32.xlu1 %v9885_v33  ;;  %v16651_v24 = vpop.xlane.xlu0 %9108  ;;  %11613 = vmatprep.mubr.msk.bf16.mxu0 %vm11917_vm2, %v17982_v53  ;;  %v17986_v33 = vld [vmem:[#allocation19_spill] sm:$0xff]  ;;  %v10531_v0 = vmul.f32 %v16689_v10, %v17872_v34  ;;  %v16725_v37 = vsel %vm4719_vm4, %v10507_v23, 0.0  ;;  %v10532_v26 = vmul.f32 %v16689_v10, %v17873_v55  ;;  %v9224_v55 = vunpack.c.l.b16 %v9147_v44 }
 0x992   : > { %v16655_v22 = vpop.xlane.xlu1 %9039  ;;  %v10576_v32 = vsel %vm4719_vm4, %v10504_v36, 0.0  ;;  %v10579_v57 = vsel %vm4719_vm4, %v10505_v47, 0.0  ;;  %v9732_v7 = vmul.f32 %v17987_v45, %v17986_v33  ;;  %v17990_v36 = vld [vmem:[#allocation50_spill] sm:$0xff]  ;;  %v10648_v47 = vsel %vm4719_vm4, %v10528_v63, 0.0 }
 0x993   : > { %v9756_v43 = vmul.f32 %v9694_v51, %v17990_v36  ;;  %v9132_v63 = vpack.c.bf16 %v16575_v35, %v16565_v6 }
 0x994   : > { %9889 = vadd.xlane.f32.xlu0 %v9888_v60  ;;  %v17989_v60 = vld [vmem:[#allocation68_spill] sm:$0xff] }
 0x995   : > { %10574 = vadd.xlane.f32.xlu1 %v10573_v21  ;;  %v16668_v62 = vpop.xlane.xlu0 %9042  ;;  %v9755_v52 = vmul.f32 %v9690_v8, %v17989_v60  ;;  %v17991_v21 = vld [vmem:[#allocation55_spill] sm:$0xff]  ;;  %v10530_v8 = vmul.f32 %v10463_v56, %v17871_v59  ;;  %v9894_v34 = vsel %vm4719_vm4, %v9756_v43, 0.0  ;;  %v16736_v43 = vsel %vm4719_vm4, %v10531_v0, 0.0 }
 0x996   : > { %v16670_v15 = vpop.xlane.xlu1 %9045  ;;  %v9757_v13 = vmul.f32 %v9694_v51, %v17991_v21  ;;  %v17993_v21 = vld [vmem:[#allocation102_spill] sm:$0xff]  ;;  %v9202_v23 = vunpack.c.h.b16 %v9132_v63  ;;  %v16748_v0 = vmul.f32 %v10435_v46, %v17908_v17  ;;  %v9135_v17 = vpack.c.bf16 %v16655_v22, %v16655_v22 }
 0x997   : > { %v9825_v38 = vsel %vm4719_vm4, %v17993_v21, 0.0  ;;  %v9891_v56 = vsel %vm4719_vm4, %v9755_v52, 0.0  ;;  %v16733_v52 = vsel %vm4719_vm4, %v10530_v8, 0.0  ;;  %v17994_v21 = vld [vmem:[#allocation79_spill] sm:$0xff] }
 0x998   : > { %10577 = vadd.xlane.f32.xlu0 %v10576_v32  ;;  %v10506_v32 = vmul.f32 %v10431_v25, %v17903_v14  ;;  %v17992_v25 = vld [vmem:[#allocation100_spill] sm:$0xff]  ;;  %v16719_v6 = vsel %vm4719_vm4, %v9757_v13, 0.0  ;;  %v9734_v13 = vmul.f32 %v17987_v45, %v17994_v21  ;;  %v9133_v45 = vpack.c.bf16 %v16607_v28, %v16607_v28 }
 0x999   : > { %10580 = vadd.xlane.f32.xlu1 %v10579_v57  ;;  %v16681_v16 = vpop.xlane.xlu0 %9111  ;;  %v10508_v57 = vmul.f32 %v10435_v46, %v17906_v12  ;;  %v9819_v39 = vsel %vm4719_vm4, %v17992_v25, 0.0  ;;  %v9822_v12 = vsel %vm4719_vm4, %v9732_v7, 0.0  ;;  %v17995_v25 = vld [vmem:[#allocation54_spill] sm:$0xff] }
 0x99a   : > { %v16691_v2 = vpop.xlane.xlu1 %9114  ;;  %v16722_v35 = vsel %vm4719_vm4, %v10506_v32, 0.0  ;;  %v9201_v32 = vunpack.c.l.b16 %v9132_v63  ;;  %v16741_v36 = vmul.f32 %v9694_v51, %v17995_v25  ;;  %v9149_v51 = vpack.c.bf16 %v16635_v30, %v16635_v30 }
 0x99b   : > { %v16728_v7 = vsel %vm4719_vm4, %v10508_v57, 0.0  ;;  %v16757_v63 = vsel %vm4719_vm4, %v10532_v26, 0.0  ;;  %v16765_v28 = vsel %vm4719_vm4, %v9734_v13, 0.0  ;;  %v9311_v30 = vrot.slane %v9202_v23, %v14389_v4 }
 0x99c   : > { %10646 = vadd.xlane.f32.xlu0 %v10645_v20  ;;  %v9222_v20 = vunpack.c.l.b16 %v9146_v9  ;;  %v9151_v46 = vpack.c.bf16 %v16681_v16, %v16681_v16  ;;  %v9227_v13 = vunpack.c.l.b16 %v9149_v51  ;;  %v9136_v23 = vpack.c.bf16 %v16670_v15, %v16668_v62 }
 0x99d   : > { %10649 = vadd.xlane.f32.xlu1 %v10648_v47  ;;  %v9118_v14 = vpop.xlane.xlu0 %9117  ;;  %v9223_v47 = vunpack.c.h.b16 %v9146_v9  ;;  %v9134_v9 = vpack.c.bf16 %v16622_v40, %v16619_v61  ;;  %v9307_v40 = vrot.slane %v9201_v32, %v14394_v1 }
 0x99e   : > { %v9761_v59 = vpop.xlane.xlu1 %9760 }
 0x99f   : > { %v9409_v61 = vrot.slane %v9223_v47, %v14389_v4  ;;  %v9204_v26 = vunpack.c.l.b16 %v9134_v9 }
 0x9a0   : > { %10652 = vadd.xlane.f32.xlu0 %v10651_v50  ;;  %v9148_v50 = vpack.c.bf16 %v16597_v27, %v16595_v29  ;;  %v9405_v29 = vrot.slane %v9222_v20, %v14394_v1  ;;  %v9150_v27 = vpack.c.bf16 %v16651_v24, %v16637_v31  ;;  %v9414_v31 = vrot.slane %v9224_v55, %v14400_v18 }
 0x9a1   : > { %9820 = vadd.xlane.f32.xlu1 %v9819_v39  ;;  %v9764_v57 = vpop.xlane.xlu0 %9763  ;;  %v9205_v20 = vunpack.c.h.b16 %v9134_v9  ;;  %v9230_v55 = vunpack.c.l.b16 %v9151_v46  ;;  %v9321_v15 = vrot.slane %v9204_v26, %v14394_v1  ;;  %v9208_v46 = vunpack.c.h.b16 %v9136_v23 }
 0x9a2   : > { %v16745_v8 = vpack.c.bf16 %v9764_v57, %v9761_v59  ;;  %v9770_v60 = vpop.xlane.xlu1 %9769  ;;  %v9225_v24 = vunpack.c.l.b16 %v9148_v50  ;;  %v9226_v44 = vunpack.c.h.b16 %v9148_v50  ;;  %v9203_v59 = vunpack.c.l.b16 %v9133_v45 }
 0x9a3   : > { %v9228_v47 = vunpack.c.l.b16 %v9150_v27  ;;  %v9229_v32 = vunpack.c.h.b16 %v9150_v27  ;;  %v9206_v57 = vunpack.c.l.b16 %v9135_v17  ;;  %v9410_v16 = vsel %vm5568_vm12, %v9409_v61, %v9405_v29 }
 0x9a4   : > { %9823 = vadd.xlane.f32.xlu0 %v9822_v12  ;;  %v9415_v45 = vsel %vm5575_vm13, %v9414_v31, %v9410_v16  ;;  %v9419_v9 = vrot.slane %v9225_v24, %v14394_v1  ;;  %v9423_v51 = vrot.slane %v9226_v44, %v14389_v4  ;;  %v9316_v62 = vrot.slane %v9203_v59, %v14400_v18 }
 0x9a5   : > { %9826 = vadd.xlane.f32.xlu1 %v9825_v38  ;;  %v9773_v39 = vpop.xlane.xlu0 %9772  ;;  %v9312_v38 = vsel %vm5568_vm12, %v9311_v30, %v9307_v40  ;;  %v9428_v29 = vrot.slane %v9227_v13, %v14400_v18  ;;  %v9207_v61 = vunpack.c.l.b16 %v9136_v23  ;;  %v9468_v30 = vsel %vm5277_vm8, %v9415_v45, %v16543_v19 }
 0x9a6   : > { %v16773_v22 = vpack.c.bf16 %v9773_v39, %v9770_v60  ;;  %v9833_v12 = vpop.xlane.xlu1 %9832  ;;  %v9152_v60 = vpack.c.bf16 %v9118_v14, %v16691_v2  ;;  %v9433_v2 = vrot.slane %v9228_v47, %v14394_v1  ;;  %v9437_v14 = vrot.slane %v9229_v32, %v14389_v4 }
 0x9a7   : > { %v9442_v39 = vrot.slane %v9230_v55, %v14400_v18  ;;  %v9968_v59 = vunpack.c.h.b16 %v16745_v8  ;;  %v9317_v19 = vsel %vm5575_vm13, %v9316_v62, %v9312_v38  ;;  %v9335_v16 = vrot.slane %v9207_v61, %v14394_v1 }
 0x9a8   : > { %9892 = vadd.xlane.f32.xlu0 %v9891_v56  ;;  %v9325_v56 = vrot.slane %v9205_v20, %v14389_v4  ;;  %v9231_v31 = vunpack.c.l.b16 %v9152_v60  ;;  %v9232_v44 = vunpack.c.h.b16 %v9152_v60  ;;  %v9339_v55 = vrot.slane %v9208_v46, %v14389_v4  ;;  %v17996_v46 = vld [vmem:[#allocation104_spill] sm:$0xff] }
 0x9a9   : > { %9895 = vadd.xlane.f32.xlu1 %v9894_v34  ;;  %v9836_v50 = vpop.xlane.xlu0 %9835  ;;  %v9330_v34 = vrot.slane %v9206_v57, %v14400_v18 }
 0x9aa   : > { %v16783_v27 = vpack.c.bf16 %v9836_v50, %v9833_v12  ;;  %v9842_v17 = vpop.xlane.xlu1 %9841  ;;  %v9967_v12 = vunpack.c.l.b16 %v16745_v8  ;;  %v9326_v47 = vsel %vm5568_vm12, %v9325_v56, %v9321_v15  ;;  %v9447_v38 = vrot.slane %v9231_v31, %v14394_v1 }
 0x9ab   : > { %v9331_v23 = vsel %vm5575_vm13, %v9330_v34, %v9326_v47 }
 0x9ac   : > { %v16792_v40 = vpop.f32.mrf.mxu0  ;;  %9898 = vadd.xlane.f32.xlu0 %v16719_v6  ;;  %v9424_v6 = vsel %vm5568_vm12, %v9423_v51, %v9419_v9  ;;  %v9451_v9 = vrot.slane %v9232_v44, %v14389_v4  ;;  %v10018_v51 = vrot.slane %v9967_v12, %v14394_v1  ;;  %v9991_v47 = vunpack.c.l.b16 %v16783_v27 }
 0x9ad   : > { %10583 = vadd.xlane.f32.xlu1 %v16722_v35  ;;  %v9845_v24 = vpop.xlane.xlu0 %9844  ;;  %v9429_v57 = vsel %vm5575_vm13, %v9428_v29, %v9424_v6  ;;  %v9438_v35 = vsel %vm5568_vm12, %v9437_v14, %v9433_v2  ;;  %v9971_v29 = vunpack.c.h.b16 %v16773_v22 }
 0x9ae   : > { %v16801_v26 = vpack.c.bf16 %v9845_v24, %v9842_v17  ;;  %v9049_v20 = vpop.xlane.xlu1 %9048  ;;  %v11583_v13 = vpop.f32.mrf.mxu0  ;;  %v9443_v60 = vsel %vm5575_vm13, %v9442_v39, %v9438_v35  ;;  %v10022_v17 = vrot.slane %v9968_v59, %v14389_v4  ;;  %v9469_v34 = vsel %vm5280_vm9, %v9429_v57, %v9468_v30 }
 0x9af   : > { %v9137_v32 = vpack.c.bf16 %v9049_v20, %v9049_v20  ;;  %v10510_v39 = vmul.f32 %v17996_v46, %v17972_v41  ;;  %v9470_v24 = vsel %vm5283_vm10, %v9443_v60, %v9469_v34  ;;  %v9452_v30 = vsel %vm5568_vm12, %v9451_v9, %v9447_v38 }
 0x9b0   : > { %v16810_v8 = vpop.f32.mrf.mxu0  ;;  %10586 = vadd.xlane.f32.xlu0 %v16725_v37  ;;  %v9970_v37 = vunpack.c.l.b16 %v16773_v22  ;;  %v9340_v22 = vsel %vm5568_vm12, %v9339_v55, %v9335_v16  ;;  %v10023_v41 = vsel %vm5568_vm12, %v10022_v17, %v10018_v51  ;;  %v10036_v6 = vrot.slane %v9971_v29, %v14389_v4 }
 0x9b1   : > { %v9209_v50 = vunpack.c.l.b16 %v9137_v32  ;;  %10589 = vadd.xlane.f32.xlu1 %v16728_v7  ;;  %v9121_v45 = vpop.xlane.xlu0 %9120  ;;  %v9462_v7 = vsel %vm5280_vm9, %v9317_v19, %v16593_v3  ;;  %v10511_v60 = vmul.f32 %v17996_v46, %v17974_v54  ;;  %v9994_v51 = vunpack.c.l.b16 %v16801_v26 }
 0x9b2   : > { %v9153_v62 = vpack.c.bf16 %v9121_v45, %v9121_v45  ;;  %v9767_v15 = vpop.xlane.xlu1 %9766  ;;  %v11584_v56 = vpop.f32.mrf.mxu0  ;;  %v9463_v31 = vsel %vm5283_vm10, %v9331_v23, %v9462_v7  ;;  %v10032_v13 = vrot.slane %v9970_v37, %v14394_v1  ;;  %v9995_v17 = vunpack.c.h.b16 %v16801_v26 }
 0x9b3   : > { %v9344_v2 = vrot.slane %v9209_v50, %v14400_v18  ;;  %v9904_v14 = vpack.c.bf16 %v9767_v15, %v9767_v15  ;;  %v10591_v56 = vsel %vm4719_vm4, %v16748_v0, 0.0  ;;  %v17997_v26 = vcombine.high %v16649_v42, %v16649_v42 }
 0x9b4   : > { %v9233_v61 = vunpack.c.l.b16 %v9153_v62  ;;  %10655 = vadd.xlane.f32.xlu0 %v16733_v52  ;;  %v10037_v9 = vsel %vm5568_vm12, %v10036_v6, %v10032_v13  ;;  %v10594_v34 = vsel %vm4719_vm4, %v10510_v39, 0.0  ;;  %v10533_v0 = vmul.f32 %v16689_v10, %v17976_v58 }
 0x9b5   : > { %v9969_v44 = vunpack.c.l.b16 %v9904_v14  ;;  %10658 = vadd.xlane.f32.xlu1 %v16736_v43  ;;  %v9776_v12 = vpop.xlane.xlu0 %9775  ;;  %v9345_v3 = vsel %vm5575_vm13, %v9344_v2, %v9340_v22  ;;  %v9992_v43 = vunpack.c.h.b16 %v16783_v27  ;;  %v10471_v2 = vrot.slane %v17997_v26, %v17709_v5 }
 0x9b6   : > { %v9456_v59 = vrot.slane %v9233_v61, %v14400_v18  ;;  %v9906_v52 = vpack.c.bf16 %v9776_v12, %v9776_v12  ;;  %v9779_v20 = vpop.xlane.xlu1 %9778  ;;  %v9464_v35 = vsel %vm5286_vm11, %v9345_v3, %v9463_v31  ;;  %v10597_v61 = vsel %vm4719_vm4, %v10511_v60, 0.0 }
 0x9b7   : > { %v10027_v19 = vrot.slane %v9969_v44, %v14400_v18  ;;  %v10134_v15 = vrot.slane %v9992_v43, %v14389_v4  ;;  %v10144_v46 = vrot.slane %v9994_v51, %v14394_v1  ;;  %v10148_v31 = vrot.slane %v9995_v17, %v14389_v4 }
 0x9b8   : > { %v9457_v32 = vsel %vm5575_vm13, %v9456_v59, %v9452_v30  ;;  %v9972_v57 = vunpack.c.l.b16 %v9906_v52  ;;  %10661 = vadd.xlane.f32.xlu0 %v16757_v63  ;;  %v9900_v63 = vsel %vm4719_vm4, %v16741_v36, 0.0  ;;  %v10534_v42 = vmul.f32 %v10471_v2, %v17977_v11 }
 0x9b9   : > { %v9471_v23 = vsel %vm5286_vm11, %v9457_v32, %v9470_v24  ;;  %v10028_v16 = vsel %vm5575_vm13, %v10027_v19, %v10023_v41  ;;  %9829 = vadd.xlane.f32.xlu1 %v16765_v28  ;;  %v9782_v55 = vpop.xlane.xlu0 %9781  ;;  %v10130_v28 = vrot.slane %v9991_v47, %v14394_v1  ;;  %v10535_v52 = vmul.f32 %v10471_v2, %v17979_v48 }
 0x9ba   : > { %v9472_v38 = vpack.c.b16 %v9471_v23, %v9464_v35  ;;  %v10041_v27 = vrot.slane %v9972_v57, %v14400_v18  ;;  %v9907_v50 = vpack.c.bf16 %v9782_v55, %v9779_v20  ;;  %v9839_v45 = vpop.xlane.xlu1 %9838  ;;  %v10149_v20 = vsel %vm5568_vm12, %v10148_v31, %v10144_v46  ;;  %v18003_v31 = vld [vmem:[#allocation42_spill] sm:$0xff] }
 0x9bb   : > { %v9920_v62 = vpack.c.bf16 %v9839_v45, %v9839_v45  ;;  %v10135_v22 = vsel %vm5568_vm12, %v10134_v15, %v10130_v28  ;;  %v10663_v11 = vsel %vm4719_vm4, %v10533_v0, 0.0  ;;  %v10666_v47 = vsel %vm4719_vm4, %v10534_v42, 0.0 }
 0x9bc   : > { %v10042_v54 = vsel %vm5575_vm13, %v10041_v27, %v10037_v9  ;;  %9901 = vadd.xlane.f32.xlu0 %v9900_v63  ;;  %11606 = vmatmul.mubr.msk.bf16.vlgmr.msra.gmra.mxu1 %vm4719_vm4, %v9472_v38  ;;  %v9973_v44 = vunpack.c.l.b16 %v9907_v50  ;;  %v9974_v12 = vunpack.c.h.b16 %v9907_v50  ;;  %v10411_v48 = vcombine.high %v16664_v49, %v16664_v49  ;;  %v17999_v63 = vld [vmem:[#allocation105_spill] sm:$0xff] }
 0x9bd   : > { %v10239_v36 = vsel %vm5268_vm5, %v10042_v54, %v10028_v16  ;;  %v9993_v37 = vunpack.c.l.b16 %v9920_v62  ;;  %10592 = vadd.xlane.f32.xlu1 %v10591_v56  ;;  %v9848_v29 = vpop.xlane.xlu0 %9847  ;;  %11621 = vmatprep.mubr.msk.bf16.mxu1 %vm11917_vm2, %v17982_v53  ;;  %v10669_v23 = vsel %vm4719_vm4, %v10535_v52, 0.0  ;;  %v17998_v16 = vld [vmem:[#allocation106_spill] sm:$0xff]  ;;  %v10600_v9 = vsel %vm4719_vm4, %v17999_v63, 0.0  ;;  %v18006_v52 = vld [vmem:[#allocation40_spill] sm:$0xff] }
 0x9be   : > { %v9922_v14 = vpack.c.bf16 %v9848_v29, %v9848_v29  ;;  %v9851_v7 = vpop.xlane.xlu1 %9850  ;;  %v10046_v13 = vrot.slane %v9973_v44, %v14394_v1  ;;  %v10050_v6 = vrot.slane %v9974_v12, %v14389_v4  ;;  %v10513_v55 = vmul.f32 %v17998_v16, %v17986_v33 }
 0x9bf   : > { %v10139_v24 = vrot.slane %v9993_v37, %v14400_v18  ;;  %v10475_v28 = vrot.slane %v10411_v48, %v17709_v5  ;;  %v18000_v37 = vld [vmem:[#allocation68_spill] sm:$0xff] }
 0x9c0   : > { %v9996_v3 = vunpack.c.l.b16 %v9922_v14  ;;  %10595 = vadd.xlane.f32.xlu0 %v10594_v34  ;;  %v10051_v45 = vsel %vm5568_vm12, %v10050_v6, %v10046_v13  ;;  %v10603_v56 = vsel %vm4719_vm4, %v10513_v55, 0.0  ;;  %v10536_v29 = vmul.f32 %v10471_v2, %v18000_v37  ;;  %v18001_v14 = vld [vmem:[#allocation107_spill] sm:$0xff]  ;;  %v18002_v34 = vld [vmem:[#allocation50_spill] sm:$0xff] }
 0x9c1   : > { %v10140_v39 = vsel %vm5575_vm13, %v10139_v24, %v10135_v22  ;;  %10598 = vadd.xlane.f32.xlu1 %v10597_v61  ;;  %v9854_v30 = vpop.xlane.xlu0 %9853  ;;  %v11313_v24 = vcombine.low %v18003_v31, %v18003_v31  ;;  %v18004_v22 = vld [vmem:[#allocation55_spill] sm:$0xff]  ;;  %v10539_v6 = vmul.f32 %v10475_v28, %v17995_v25  ;;  %v18007_v31 = vld [vmem:[#allocation45_spill] sm:$0xff] }
 0x9c2   : > { %v10153_v58 = vrot.slane %v9996_v3, %v14400_v18  ;;  %v9923_v10 = vpack.c.bf16 %v9854_v30, %v9851_v7  ;;  %v9785_v59 = vpop.xlane.xlu1 %9784  ;;  %v10606_v7 = vsel %vm4719_vm4, %v18001_v14, 0.0  ;;  %v10672_v2 = vsel %vm4719_vm4, %v10536_v29, 0.0 }
 0x9c3   : > { %v9908_v41 = vpack.c.bf16 %v9785_v59, %v9785_v59  ;;  %v10538_v44 = vmul.f32 %v10475_v28, %v18004_v22  ;;  %v10267_v30 = vsel %vm7549_vm14, %v11313_v24, 0  ;;  %v18005_v59 = vld [vmem:[#allocation41_spill] sm:$0xff]  ;;  %v11316_v24 = vcombine.low %v18007_v31, %v18007_v31 }
 0x9c4   : > { %v10154_v19 = vsel %vm5575_vm13, %v10153_v58, %v10149_v20  ;;  %10664 = vadd.xlane.f32.xlu0 %v10663_v11  ;;  %v9997_v60 = vunpack.c.l.b16 %v9923_v10  ;;  %v9998_v38 = vunpack.c.h.b16 %v9923_v10  ;;  %11610 = vmatpush3.bf16.msra.mxu0 %v10267_v30  ;;  %v11312_v20 = vcombine.low %v18006_v52, %v18005_v59  ;;  %v18008_v52 = vld [vmem:[#allocation44_spill] sm:$0xff] }
 0x9c5   : > { %v10246_v43 = vsel %vm5268_vm5, %v10154_v19, %v10140_v39  ;;  %v9975_v32 = vunpack.c.l.b16 %v9908_v41  ;;  %10667 = vadd.xlane.f32.xlu1 %v10666_v47  ;;  %v9788_v57 = vpop.xlane.xlu0 %9787  ;;  %v10515_v39 = vmul.f32 %v17998_v16, %v17994_v21  ;;  %11611 = vmatprep.subr.bf16.mxu0 %v17982_v53  ;;  %v10678_v13 = vsel %vm4719_vm4, %v10538_v44, 0.0 }
 0x9c6   : > { %v9791_v35 = vpop.xlane.xlu1 %9790  ;;  %v10158_v15 = vrot.slane %v9997_v60, %v14394_v1  ;;  %v10162_v54 = vrot.slane %v9998_v38, %v14389_v4 }
 0x9c7   : > { %v10055_v27 = vrot.slane %v9975_v32, %v14400_v18  ;;  %v16894_v50 = vpack.c.bf16 %v9791_v35, %v9788_v57  ;;  %v10609_v21 = vsel %vm4719_vm4, %v10515_v39, 0.0  ;;  %v10681_v32 = vsel %vm4719_vm4, %v10539_v6, 0.0 }
 0x9c8   : > { %10670 = vadd.xlane.f32.xlu0 %v10669_v23  ;;  %v10163_v42 = vsel %vm5568_vm12, %v10162_v54, %v10158_v15  ;;  %11612 = vmatpush3.bf16.msra.mxu0 %v11312_v20  ;;  %v11048_v39 = vsel %vm7549_vm14, %v11316_v24, 0  ;;  %v18009_v20 = vld [vmem:[#allocation43_spill] sm:$0xff] }
 0x9c9   : > { %v10056_v49 = vsel %vm5575_vm13, %v10055_v27, %v10051_v45  ;;  %10601 = vadd.xlane.f32.xlu1 %v10600_v9  ;;  %v9857_v51 = vpop.xlane.xlu0 %9856  ;;  %v9976_v23 = vunpack.c.l.b16 %v16894_v50  ;;  %v9977_v16 = vunpack.c.h.b16 %v16894_v50  ;;  %11618 = vmatpush3.bf16.msra.mxu1 %v11048_v39 }
 0x9ca   : > { %v16901_v17 = vsel %vm5271_vm6, %v10056_v49, %v10239_v36  ;;  %v9924_v33 = vpack.c.bf16 %v9857_v51, %v9857_v51  ;;  %v9860_v62 = vpop.xlane.xlu1 %9859  ;;  %v10537_v36 = vmul.f32 %v10475_v28, %v18002_v34  ;;  %11619 = vmatprep.subr.bf16.mxu1 %v17982_v53 }
 0x9cb   : > { %v10060_v27 = vrot.slane %v9976_v23, %v14394_v1  ;;  %v10064_v45 = vrot.slane %v9977_v16, %v14389_v4 }
 0x9cc   : > { %v9999_v26 = vunpack.c.l.b16 %v9924_v33  ;;  %10604 = vadd.xlane.f32.xlu0 %v10603_v56  ;;  %v10675_v3 = vsel %vm4719_vm4, %v10537_v36, 0.0 }
 0x9cd   : > { %10607 = vadd.xlane.f32.xlu1 %v10606_v7  ;;  %v9863_v61 = vpop.xlane.xlu0 %9862  ;;  %v10065_v50 = vsel %vm5568_vm12, %v10064_v45, %v10060_v27 }
 0x9ce   : > { %v10167_v0 = vrot.slane %v9999_v26, %v14400_v18  ;;  %v9925_v5 = vpack.c.bf16 %v9863_v61, %v9860_v62  ;;  %v10542_v46 = vpop.xlane.xlu1 %10541 }
 0x9d0   : > { %v10168_v12 = vsel %vm5575_vm13, %v10167_v0, %v10163_v42  ;;  %10673 = vadd.xlane.f32.xlu0 %v10672_v2  ;;  %v10000_v51 = vunpack.c.l.b16 %v9925_v5  ;;  %v10001_v33 = vunpack.c.h.b16 %v9925_v5 }
 0x9d1   : > { %v10247_v58 = vsel %vm5271_vm6, %v10168_v12, %v10246_v43  ;;  %10676 = vadd.xlane.f32.xlu1 %v10675_v3  ;;  %v10545_v10 = vpop.xlane.xlu0 %10544 }
 0x9d2   : > { %v10684_v41 = vpack.c.bf16 %v10545_v10, %v10542_v46  ;;  %v10551_v11 = vpop.xlane.xlu1 %10550  ;;  %v10172_v26 = vrot.slane %v10000_v51, %v14394_v1  ;;  %v10176_v14 = vrot.slane %v10001_v33, %v14389_v4 }
 0x9d4   : > { %10679 = vadd.xlane.f32.xlu0 %v10678_v13  ;;  %v10748_v7 = vunpack.c.l.b16 %v10684_v41  ;;  %v10749_v34 = vunpack.c.h.b16 %v10684_v41  ;;  %v11315_v41 = vcombine.low %v18009_v20, %v18008_v52 }
 0x9d5   : > { %10610 = vadd.xlane.f32.xlu1 %v10609_v21  ;;  %v10554_v19 = vpop.xlane.xlu0 %10553 }
 0x9d6   : > { %v10686_v47 = vpack.c.bf16 %v10554_v19, %v10551_v11  ;;  %v10614_v43 = vpop.xlane.xlu1 %10613  ;;  %v10799_v44 = vrot.slane %v10748_v7, %v14394_v1  ;;  %v10803_v12 = vrot.slane %v10749_v34, %v14389_v4  ;;  %11620 = vmatpush3.bf16.msra.mxu1 %v11315_v41 }
 0x9d8   : > { %10682 = vadd.xlane.f32.xlu0 %v10681_v32  ;;  %v10751_v42 = vunpack.c.l.b16 %v10686_v47  ;;  %v10752_v2 = vunpack.c.h.b16 %v10686_v47  ;;  %v10804_v47 = vsel %vm5568_vm12, %v10803_v12, %v10799_v44 }
 0x9d9   : > { %v10617_v57 = vpop.xlane.xlu0 %10616 }
 0x9da   : > { %v16930_v48 = vpack.c.bf16 %v10617_v57, %v10614_v43  ;;  %v10623_v35 = vpop.xlane.xlu1 %10622  ;;  %v10813_v6 = vrot.slane %v10751_v42, %v14394_v1  ;;  %v10817_v21 = vrot.slane %v10752_v2, %v14389_v4 }
 0x9dc   : > { %v10773_v43 = vunpack.c.h.b16 %v16930_v48 }
 0x9dd   : > { %v10626_v25 = vpop.xlane.xlu0 %10625 }
 0x9de   : > { %v16934_v55 = vpack.c.bf16 %v10626_v25, %v10623_v35  ;;  %v9794_v60 = vpop.xlane.xlu1 %9793  ;;  %v10818_v25 = vsel %vm5568_vm12, %v10817_v21, %v10813_v6 }
 0x9df   : > { %v9910_v38 = vpack.c.bf16 %v9794_v60, %v9794_v60 }
 0x9e0   : > { %v10775_v60 = vunpack.c.l.b16 %v16934_v55 }
 0x9e1   : > { %v9978_v63 = vunpack.c.l.b16 %v9910_v38  ;;  %v9797_v9 = vpop.xlane.xlu0 %9796  ;;  %v10776_v38 = vunpack.c.h.b16 %v16934_v55 }
 0x9e2   : > { %v9800_v49 = vpop.xlane.xlu1 %9799 }
 0x9e3   : > { %v10069_v62 = vrot.slane %v9978_v63, %v14400_v18  ;;  %v16939_v28 = vpack.c.bf16 %v9800_v49, %v9797_v9 }
 0x9e5   : > { %v10070_v15 = vsel %vm5575_vm13, %v10069_v62, %v10065_v50  ;;  %v9866_v54 = vpop.xlane.xlu0 %9865  ;;  %v10925_v50 = vrot.slane %v10775_v60, %v14394_v1 }
 0x9e6   : > { %v16945_v56 = vsel %vm5274_vm7, %v10070_v15, %v16901_v17  ;;  %v9926_v37 = vpack.c.bf16 %v9866_v54, %v9866_v54  ;;  %v9869_v29 = vpop.xlane.xlu1 %9868  ;;  %v10177_v17 = vsel %vm5568_vm12, %v10176_v14, %v10172_v26  ;;  %v10929_v15 = vrot.slane %v10776_v38, %v14389_v4 }
 0x9e8   : > { %v10002_v36 = vunpack.c.l.b16 %v9926_v37  ;;  %v9979_v37 = vunpack.c.l.b16 %v16939_v28 }
 0x9e9   : > { %v9872_v61 = vpop.xlane.xlu0 %9871 }
 0x9ea   : > { %v10181_v0 = vrot.slane %v10002_v36, %v14400_v18  ;;  %v16950_v5 = vpack.c.bf16 %v9872_v61, %v9869_v29  ;;  %v10548_v46 = vpop.xlane.xlu1 %10547  ;;  %v9980_v29 = vunpack.c.h.b16 %v16939_v28  ;;  %v10074_v31 = vrot.slane %v9979_v37, %v14394_v1 }
 0x9eb   : > { %v10685_v22 = vpack.c.bf16 %v10548_v46, %v10548_v46 }
 0x9ec   : > { %v10182_v3 = vsel %vm5575_vm13, %v10181_v0, %v10177_v17  ;;  %v10930_v0 = vsel %vm5568_vm12, %v10929_v15, %v10925_v50  ;;  %v10078_v24 = vrot.slane %v9980_v29, %v14389_v4  ;;  %v10003_v44 = vunpack.c.l.b16 %v16950_v5 }
 0x9ed   : > { %v16960_v30 = vsel %vm5274_vm7, %v10182_v3, %v10247_v58  ;;  %v10750_v10 = vunpack.c.l.b16 %v10685_v22  ;;  %v10557_v59 = vpop.xlane.xlu0 %10556  ;;  %v10772_v58 = vunpack.c.l.b16 %v16930_v48  ;;  %v10915_v48 = vrot.slane %v10773_v43, %v14389_v4 }
 0x9ee   : > { %v10687_v11 = vpack.c.bf16 %v10557_v59, %v10557_v59  ;;  %v10560_v13 = vpop.xlane.xlu1 %10559  ;;  %v10004_v12 = vunpack.c.h.b16 %v16950_v5 }
 0x9ef   : > { %v10808_v19 = vrot.slane %v10750_v10, %v14400_v18  ;;  %v10911_v45 = vrot.slane %v10772_v58, %v14394_v1  ;;  %v10079_v10 = vsel %vm5568_vm12, %v10078_v24, %v10074_v31 }
 0x9f0   : > { %v10753_v32 = vunpack.c.l.b16 %v10687_v11  ;;  %v10190_v6 = vrot.slane %v10004_v12, %v14389_v4 }
 0x9f1   : > { %v10809_v57 = vsel %vm5575_vm13, %v10808_v19, %v10804_v47  ;;  %v10563_v35 = vpop.xlane.xlu0 %10562  ;;  %v10916_v55 = vsel %vm5568_vm12, %v10915_v48, %v10911_v45 }
 0x9f2   : > { %v10822_v23 = vrot.slane %v10753_v32, %v14400_v18  ;;  %v10688_v53 = vpack.c.bf16 %v10563_v35, %v10560_v13  ;;  %v10620_v16 = vpop.xlane.xlu1 %10619  ;;  %v10186_v13 = vrot.slane %v10003_v44, %v14394_v1 }
 0x9f3   : > { %v10701_v27 = vpack.c.bf16 %v10620_v16, %v10620_v16 }
 0x9f4   : > { %v10823_v63 = vsel %vm5575_vm13, %v10822_v23, %v10818_v25  ;;  %v10754_v21 = vunpack.c.l.b16 %v10688_v53  ;;  %v10755_v5 = vunpack.c.h.b16 %v10688_v53  ;;  %v10191_v32 = vsel %vm5568_vm12, %v10190_v6, %v10186_v13 }
 0x9f5   : > { %v11020_v9 = vsel %vm5268_vm5, %v10823_v63, %v10809_v57  ;;  %v10774_v49 = vunpack.c.l.b16 %v10701_v27  ;;  %v10629_v51 = vpop.xlane.xlu0 %10628 }
 0x9f6   : > { %v10703_v33 = vpack.c.bf16 %v10629_v51, %v10629_v51  ;;  %v10632_v62 = vpop.xlane.xlu1 %10631  ;;  %v10831_v35 = vrot.slane %v10755_v5, %v14389_v4 }
 0x9f7   : > { %v10920_v54 = vrot.slane %v10774_v49, %v14400_v18 }
 0x9f8   : > { %v10777_v26 = vunpack.c.l.b16 %v10703_v33 }
 0x9f9   : > { %v10921_v14 = vsel %vm5575_vm13, %v10920_v54, %v10916_v55  ;;  %v10635_v7 = vpop.xlane.xlu0 %10634 }
 0x9fa   : > { %v10934_v34 = vrot.slane %v10777_v26, %v14400_v18  ;;  %v10704_v36 = vpack.c.bf16 %v10635_v7, %v10632_v62  ;;  %v9803_v61 = vpop.xlane.xlu1 %9802 }
 0x9fb   : > { %v9912_v46 = vpack.c.bf16 %v9803_v61, %v9803_v61 }
 0x9fc   : > { %v10935_v17 = vsel %vm5575_vm13, %v10934_v34, %v10930_v0  ;;  %v10778_v38 = vunpack.c.l.b16 %v10704_v36  ;;  %v10779_v27 = vunpack.c.h.b16 %v10704_v36 }
 0x9fd   : > { %v11027_v42 = vsel %vm5268_vm5, %v10935_v17, %v10921_v14  ;;  %v9981_v28 = vunpack.c.l.b16 %v9912_v46  ;;  %v9806_v2 = vpop.xlane.xlu0 %9805 }
 0x9fe   : > { %v9809_v22 = vpop.xlane.xlu1 %9808  ;;  %v10943_v15 = vrot.slane %v10779_v27, %v14389_v4 }
 0x9ff   : > { %v10083_v3 = vrot.slane %v9981_v28, %v14400_v18  ;;  %v9913_v39 = vpack.c.bf16 %v9809_v22, %v9806_v2 }
 0xa01   : > { %v10084_v59 = vsel %vm5575_vm13, %v10083_v3, %v10079_v10  ;;  %v9875_v52 = vpop.xlane.xlu0 %9874  ;;  %v9982_v54 = vunpack.c.l.b16 %v9913_v39  ;;  %v9983_v55 = vunpack.c.h.b16 %v9913_v39 }
 0xa02   : > { %v10242_v20 = vsel %vm5277_vm8, %v10084_v59, %v16945_v56  ;;  %v9928_v41 = vpack.c.bf16 %v9875_v52, %v9875_v52  ;;  %v17000_v11 = vpop.xlane.xlu1 %9877  ;;  %v10827_v56 = vrot.slane %v10754_v21, %v14394_v1 }
 0xa03   : > { %v10088_v61 = vrot.slane %v9982_v54, %v14394_v1 }
 0xa04   : > { %v10005_v19 = vunpack.c.l.b16 %v9928_v41  ;;  %v10832_v63 = vsel %vm5568_vm12, %v10831_v35, %v10827_v56 }
 0xa05   : > { %v17004_v47 = vpop.xlane.xlu0 %9880 }
 0xa06   : > { %v10195_v58 = vrot.slane %v10005_v19, %v14400_v18  ;;  %v10566_v43 = vpop.xlane.xlu1 %10565 }
 0xa07   : > { %v10689_v57 = vpack.c.bf16 %v10566_v43, %v10566_v43 }
 0xa08   : > { %v10196_v23 = vsel %vm5575_vm13, %v10195_v58, %v10191_v32 }
 0xa09   : > { %v17013_v16 = vsel %vm5277_vm8, %v10196_v23, %v16960_v30  ;;  %v10756_v53 = vunpack.c.l.b16 %v10689_v57  ;;  %v10569_v25 = vpop.xlane.xlu0 %10568  ;;  %v10939_v30 = vrot.slane %v10778_v38, %v14394_v1 }
 0xa0a   : > { %v10572_v60 = vpop.xlane.xlu1 %10571 }
 0xa0b   : > { %v10836_v45 = vrot.slane %v10756_v53, %v14400_v18  ;;  %v10690_v48 = vpack.c.bf16 %v10572_v60, %v10569_v25  ;;  %v10944_v34 = vsel %vm5568_vm12, %v10943_v15, %v10939_v30 }
 0xa0d   : > { %v10837_v49 = vsel %vm5575_vm13, %v10836_v45, %v10832_v63  ;;  %v10638_v51 = vpop.xlane.xlu0 %10637  ;;  %v10757_v39 = vunpack.c.l.b16 %v10690_v48  ;;  %v10758_v10 = vunpack.c.h.b16 %v10690_v48 }
 0xa0e   : > { %v11021_v33 = vsel %vm5271_vm6, %v10837_v49, %v11020_v9  ;;  %v10705_v62 = vpack.c.bf16 %v10638_v51, %v10638_v51  ;;  %v10641_v50 = vpop.xlane.xlu1 %10640  ;;  %v10092_v9 = vrot.slane %v9983_v55, %v14389_v4  ;;  %v9929_v55 = vpack.c.bf16 %v17004_v47, %v17000_v11 }
 0xa0f   : > { %v10845_v13 = vrot.slane %v10758_v10, %v14389_v4 }
 0xa10   : > { %v10780_v37 = vunpack.c.l.b16 %v10705_v62  ;;  %v10093_v2 = vsel %vm5568_vm12, %v10092_v9, %v10088_v61  ;;  %v10006_v9 = vunpack.c.l.b16 %v9929_v55 }
 0xa11   : > { %v10644_v29 = vpop.xlane.xlu0 %10643 }
 0xa12   : > { %v10948_v26 = vrot.slane %v10780_v37, %v14400_v18  ;;  %v10706_v14 = vpack.c.bf16 %v10644_v29, %v10641_v50  ;;  %v9812_v7 = vpop.xlane.xlu1 %9811  ;;  %v10200_v10 = vrot.slane %v10006_v9, %v14394_v1 }
 0xa13   : > { %v9914_v36 = vpack.c.bf16 %v9812_v7, %v9812_v7 }
 0xa14   : > { %v10949_v0 = vsel %vm5575_vm13, %v10948_v26, %v10944_v34  ;;  %v10781_v19 = vunpack.c.l.b16 %v10706_v14  ;;  %v10782_v58 = vunpack.c.h.b16 %v10706_v14 }
 0xa15   : > { %v11028_v46 = vsel %vm5271_vm6, %v10949_v0, %v11027_v42  ;;  %v9984_v31 = vunpack.c.l.b16 %v9914_v36  ;;  %v9815_v24 = vpop.xlane.xlu0 %9814  ;;  %v10841_v42 = vrot.slane %v10757_v39, %v14394_v1  ;;  %v10007_v0 = vunpack.c.h.b16 %v9929_v55 }
 0xa16   : > { %v9818_v17 = vpop.xlane.xlu1 %9817  ;;  %v10953_v53 = vrot.slane %v10781_v19, %v14394_v1  ;;  %v10957_v25 = vrot.slane %v10782_v58, %v14389_v4 }
 0xa17   : > { %v10097_v28 = vrot.slane %v9984_v31, %v14400_v18  ;;  %v10846_v43 = vsel %vm5568_vm12, %v10845_v13, %v10841_v42  ;;  %v9915_v37 = vpack.c.bf16 %v9818_v17, %v9815_v24 }
 0xa18   : > { %v10958_v48 = vsel %vm5568_vm12, %v10957_v25, %v10953_v53 }
 0xa19   : > { %v10098_v22 = vsel %vm5575_vm13, %v10097_v28, %v10093_v2  ;;  %v9884_v44 = vpop.xlane.xlu0 %9883  ;;  %v9986_v28 = vunpack.c.h.b16 %v9915_v37 }
 0xa1a   : > { %v17031_v12 = vsel %vm5280_vm9, %v10098_v22, %v10242_v20  ;;  %v9887_v3 = vpop.xlane.xlu1 %9886  ;;  %v9930_v26 = vpack.c.bf16 %v9884_v44, %v9884_v44 }
 0xa1b   : > { %v10106_v42 = vrot.slane %v9986_v28, %v14389_v4 }
 0xa1c   : > { %v10008_v22 = vunpack.c.l.b16 %v9930_v26 }
 0xa1d   : > { %v9890_v59 = vpop.xlane.xlu0 %9889 }
 0xa1e   : > { %v10575_v52 = vpop.xlane.xlu1 %10574  ;;  %v9931_v14 = vpack.c.bf16 %v9890_v59, %v9887_v3  ;;  %v10204_v59 = vrot.slane %v10007_v0, %v14389_v4  ;;  %v10209_v58 = vrot.slane %v10008_v22, %v14400_v18 }
 0xa1f   : > { %v10691_v41 = vpack.c.bf16 %v10575_v52, %v10575_v52 }
 0xa20   : > { %v10009_v39 = vunpack.c.l.b16 %v9931_v14  ;;  %v10010_v11 = vunpack.c.h.b16 %v9931_v14 }
 0xa21   : > { %v10759_v6 = vunpack.c.l.b16 %v10691_v41  ;;  %v17035_v21 = vpop.xlane.xlu0 %10577 }
 0xa22   : > { %v17037_v5 = vpop.xlane.xlu1 %10580 }
 0xa23   : > { %v10850_v20 = vrot.slane %v10759_v6, %v14400_v18 }
 0xa25   : > { %v10851_v32 = vsel %vm5575_vm13, %v10850_v20, %v10846_v43  ;;  %v10647_v57 = vpop.xlane.xlu0 %10646  ;;  %v10214_v20 = vrot.slane %v10009_v39, %v14394_v1  ;;  %v10218_v43 = vrot.slane %v10010_v11, %v14389_v4 }
 0xa26   : > { %v17043_v56 = vsel %vm5274_vm7, %v10851_v32, %v11021_v33  ;;  %v10707_v35 = vpack.c.bf16 %v10647_v57, %v10647_v57  ;;  %v17045_v23 = vpop.xlane.xlu1 %10649 }
 0xa28   : > { %v10783_v60 = vunpack.c.l.b16 %v10707_v35 }
 0xa29   : > { %v17049_v38 = vpop.xlane.xlu0 %10652 }
 0xa2a   : > { %v10962_v27 = vrot.slane %v10783_v60, %v14400_v18  ;;  %v9821_v45 = vpop.xlane.xlu1 %9820 }
 0xa2b   : > { %v9916_v7 = vpack.c.bf16 %v9821_v45, %v9821_v45 }
 0xa2c   : > { %v10963_v63 = vsel %vm5575_vm13, %v10962_v27, %v10958_v48  ;;  %v10205_v48 = vsel %vm5568_vm12, %v10204_v59, %v10200_v10 }
 0xa2d   : > { %v17055_v49 = vsel %vm5274_vm7, %v10963_v63, %v11028_v46  ;;  %v9824_v51 = vpop.xlane.xlu0 %9823  ;;  %v9985_v46 = vunpack.c.l.b16 %v9915_v37  ;;  %v9987_v47 = vunpack.c.l.b16 %v9916_v7 }
 0xa2e   : > { %v9827_v33 = vpop.xlane.xlu1 %9826 }
 0xa2f   : > { %v9917_v34 = vpack.c.bf16 %v9827_v33, %v9824_v51  ;;  %v10102_v52 = vrot.slane %v9985_v46, %v14394_v1  ;;  %v10111_v32 = vrot.slane %v9987_v47, %v14400_v18  ;;  %v10692_v46 = vpack.c.bf16 %v17037_v5, %v17035_v21 }
 0xa31   : > { %v9893_v62 = vpop.xlane.xlu0 %9892  ;;  %v9988_v24 = vunpack.c.l.b16 %v9917_v34  ;;  %v9989_v17 = vunpack.c.h.b16 %v9917_v34  ;;  %v10761_v10 = vunpack.c.h.b16 %v10692_v46 }
 0xa32   : > { %v9896_v50 = vpop.xlane.xlu1 %9895  ;;  %v9932_v36 = vpack.c.bf16 %v9893_v62, %v9893_v62  ;;  %v10107_v62 = vsel %vm5568_vm12, %v10106_v42, %v10102_v52 }
 0xa33   : > { %v10116_v57 = vrot.slane %v9988_v24, %v14394_v1  ;;  %v10120_v35 = vrot.slane %v9989_v17, %v14389_v4  ;;  %v10112_v37 = vsel %vm5575_vm13, %v10111_v32, %v10107_v62 }
 0xa34   : > { %v10011_v44 = vunpack.c.l.b16 %v9932_v36  ;;  %v10244_v22 = vsel %vm5283_vm10, %v10112_v37, %v17031_v12 }
 0xa35   : > { %v9899_v30 = vpop.xlane.xlu0 %9898  ;;  %v10121_v26 = vsel %vm5568_vm12, %v10120_v35, %v10116_v57 }
 0xa36   : > { %v17057_v15 = vpop.xlane.xlu1 %10583  ;;  %v9933_v2 = vpack.c.bf16 %v9899_v30, %v9896_v50  ;;  %v10223_v53 = vrot.slane %v10011_v44, %v14400_v18  ;;  %v10210_v50 = vsel %vm5575_vm13, %v10209_v58, %v10205_v48  ;;  %v10219_v30 = vsel %vm5568_vm12, %v10218_v43, %v10214_v20  ;;  %v18010_v44 = vld [vmem:[#allocation78_spill] sm:$0xff] }
 0xa37   : > { %v10250_v0 = vsel %vm5280_vm9, %v10210_v50, %v17013_v16  ;;  %v10693_v47 = vpack.c.bf16 %v17057_v15, %v17057_v15  ;;  %v10859_v43 = vrot.slane %v10761_v10, %v14389_v4 }
 0xa38   : > { %v10012_v13 = vunpack.c.l.b16 %v9933_v2  ;;  %v10013_v6 = vunpack.c.h.b16 %v9933_v2  ;;  %v10224_v14 = vsel %vm5575_vm13, %v10223_v53, %v10219_v30  ;;  %v10708_v2 = vpack.c.bf16 %v17049_v38, %v17045_v23 }
 0xa39   : > { %v17059_v54 = vpop.xlane.xlu0 %10586  ;;  %v10251_v39 = vsel %vm5283_vm10, %v10224_v14, %v10250_v0  ;;  %v7963_v23 = vadd.f32 %v18010_v44, %v16792_v40  ;;  %v10760_v38 = vunpack.c.l.b16 %v10692_v46 }
 0xa3a   : > { %v17063_v29 = vpop.xlane.xlu1 %10589  ;;  %v10228_v63 = vrot.slane %v10012_v13, %v14394_v1  ;;  %v10232_v51 = vrot.slane %v10013_v6, %v14389_v4  ;;  %v10784_v12 = vunpack.c.l.b16 %v10708_v2  ;;  %v10785_v52 = vunpack.c.h.b16 %v10708_v2 }
 0xa3b   : > { %v10694_v20 = vpack.c.bf16 %v17063_v29, %v17059_v54  ;;  %v10855_v40 = vrot.slane %v10760_v38, %v14394_v1 }
 0xa3c   : > { %v10233_v28 = vsel %vm5568_vm12, %v10232_v51, %v10228_v63  ;;  %v10967_v32 = vrot.slane %v10784_v12, %v14394_v1  ;;  %v10971_v53 = vrot.slane %v10785_v52, %v14389_v4 }
 0xa3d   : > { %v17065_v61 = vpop.xlane.xlu0 %10655  ;;  %v10763_v51 = vunpack.c.l.b16 %v10694_v20  ;;  %v10860_v62 = vsel %vm5568_vm12, %v10859_v43, %v10855_v40  ;;  %v10764_v50 = vunpack.c.h.b16 %v10694_v20 }
 0xa3e   : > { %v17067_v31 = vpop.xlane.xlu1 %10658  ;;  %v10709_v57 = vpack.c.bf16 %v17065_v61, %v17065_v61  ;;  %v10972_v37 = vsel %vm5568_vm12, %v10971_v53, %v10967_v32 }
 0xa3f   : > { %v10869_v0 = vrot.slane %v10763_v51, %v14394_v1 }
 0xa40   : > { %v10786_v30 = vunpack.c.l.b16 %v10709_v57 }
 0xa41   : > { %v17069_v3 = vpop.xlane.xlu0 %10661 }
 0xa42   : > { %v9830_v41 = vpop.xlane.xlu1 %9829 }
 0xa43   : > { %v9918_v19 = vpack.c.bf16 %v9830_v41, %v9830_v41  ;;  %v10762_v41 = vunpack.c.l.b16 %v10693_v47 }
 0xa45   : > { %v9990_v25 = vunpack.c.l.b16 %v9918_v19  ;;  %v9902_v60 = vpop.xlane.xlu0 %9901  ;;  %v18011_v19 = vld [vmem:[#allocation77_spill] sm:$0xff] }
 0xa46   : > { %v9934_v27 = vpack.c.bf16 %v9902_v60, %v9902_v60  ;;  %v17082_v45 = vpop.xlane.xlu1 %10592  ;;  %v7966_v58 = vadd.f32 %v18011_v19, %v16810_v8  ;;  %v10710_v8 = vpack.c.bf16 %v17069_v3, %v17067_v31 }
 0xa47   : > { %v10125_v33 = vrot.slane %v9990_v25, %v14400_v18  ;;  %v10864_v25 = vrot.slane %v10762_v41, %v14400_v18  ;;  %v10695_v29 = vpack.c.bf16 %v17082_v45, %v17082_v45 }
 0xa48   : > { %v10014_v55 = vunpack.c.l.b16 %v9934_v27  ;;  %v10787_v3 = vunpack.c.l.b16 %v10710_v8 }
 0xa49   : > { %v10596_v7 = vpop.xlane.xlu0 %10595  ;;  %v10126_v34 = vsel %vm5575_vm13, %v10125_v33, %v10121_v26  ;;  %v10865_v31 = vsel %vm5575_vm13, %v10864_v25, %v10860_v62  ;;  %v10765_v45 = vunpack.c.l.b16 %v10695_v29 }
 0xa4a   : > { %v10237_v36 = vrot.slane %v10014_v55, %v14400_v18  ;;  %v10599_v9 = vpop.xlane.xlu1 %10598  ;;  %v10245_v16 = vsel %vm5286_vm11, %v10126_v34, %v10244_v22  ;;  %v10788_v34 = vunpack.c.h.b16 %v10710_v8  ;;  %v10873_v22 = vrot.slane %v10764_v50, %v14389_v4 }
 0xa4b   : > { %v10696_v27 = vpack.c.bf16 %v10599_v9, %v10596_v7 }
 0xa4c   : > { %v10238_v11 = vsel %vm5575_vm13, %v10237_v36, %v10233_v28  ;;  %v10985_v44 = vrot.slane %v10788_v34, %v14389_v4 }
 0xa4d   : > { %v10252_v24 = vsel %vm5286_vm11, %v10238_v11, %v10251_v39  ;;  %v10665_v21 = vpop.xlane.xlu0 %10664  ;;  %v10766_v7 = vunpack.c.l.b16 %v10696_v27  ;;  %v10767_v46 = vunpack.c.h.b16 %v10696_v27  ;;  %v10976_v39 = vrot.slane %v10786_v30, %v14400_v18 }
 0xa4e   : > { %v10253_v5 = vpack.c.b16 %v10252_v24, %v10245_v16  ;;  %v10668_v17 = vpop.xlane.xlu1 %10667  ;;  %v10711_v33 = vpack.c.bf16 %v10665_v21, %v10665_v21  ;;  %v10981_v16 = vrot.slane %v10787_v3, %v14394_v1 }
 0xa4f   : > { %v10883_v38 = vrot.slane %v10766_v7, %v14394_v1  ;;  %v10977_v53 = vsel %vm5575_vm13, %v10976_v39, %v10972_v37 }
 0xa50   : > { %v8741_v59 = vpop.f32.mrf.mxu0  ;;  %11614 = vmatmul.mubr.msk.bf16.vlgmr.msra.gmra.mxu0 %vm4719_vm4, %v10253_v5  ;;  %v10789_v28 = vunpack.c.l.b16 %v10711_v33  ;;  %v10986_v25 = vsel %vm5568_vm12, %v10985_v44, %v10981_v16 }
 0xa51   : > { %v17114_v42 = vadd.f32 %v8741_v59, %v7963_v23  ;;  %v10671_v15 = vpop.xlane.xlu0 %10670  ;;  %v10878_v23 = vrot.slane %v10765_v45, %v14400_v18  ;;  %v10887_v59 = vrot.slane %v10767_v46, %v14389_v4 }
 0xa52   : > { %v10602_v13 = vpop.xlane.xlu1 %10601  ;;  %v11599_v6 = vpop.f32.mrf.mxu0  ;;  %v10712_v61 = vpack.c.bf16 %v10671_v15, %v10668_v17  ;;  %v10990_v52 = vrot.slane %v10789_v28, %v14400_v18 }
 0xa53   : > { %v10697_v55 = vpack.c.bf16 %v10602_v13, %v10602_v13 }
 0xa54   : > { %v8744_v35 = vpop.f32.mrf.mxu0  ;;  %v10790_v2 = vunpack.c.l.b16 %v10712_v61  ;;  %v10791_v11 = vunpack.c.h.b16 %v10712_v61  ;;  %v10991_v51 = vsel %vm5575_vm13, %v10990_v52, %v10986_v25 }
 0xa55   : > { %v17129_v60 = vadd.f32 %v8744_v35, %v7966_v58  ;;  %v10605_v54 = vpop.xlane.xlu0 %10604  ;;  %v10768_v47 = vunpack.c.l.b16 %v10697_v55  ;;  %v10874_v35 = vsel %vm5568_vm12, %v10873_v22, %v10869_v0 }
 0xa56   : > { %v10608_v48 = vpop.xlane.xlu1 %10607  ;;  %v11600_v63 = vpop.f32.mrf.mxu0  ;;  %v10995_v41 = vrot.slane %v10790_v2, %v14394_v1  ;;  %v10999_v13 = vrot.slane %v10791_v11, %v14389_v4 }
 0xa57   : > { %v10698_v26 = vpack.c.bf16 %v10608_v48, %v10605_v54  ;;  %v10892_v6 = vrot.slane %v10768_v47, %v14400_v18  ;;  %v10879_v54 = vsel %vm5575_vm13, %v10878_v23, %v10874_v35  ;;  %v10888_v63 = vsel %vm5568_vm12, %v10887_v59, %v10883_v38  ;;  %v11094_v38 = vld [vmem:[#allocation2 + $0x8] sm:$0xff] }
 0xa58   : > { %v11000_v33 = vsel %vm5568_vm12, %v10999_v13, %v10995_v41 }
 0xa59   : > { %v10674_v14 = vpop.xlane.xlu0 %10673  ;;  %v10769_v24 = vunpack.c.l.b16 %v10698_v26  ;;  %v10770_v21 = vunpack.c.h.b16 %v10698_v26  ;;  %v10893_v62 = vsel %vm5575_vm13, %v10892_v6, %v10888_v63 }
 0xa5a   : > { %v10713_v36 = vpack.c.bf16 %v10674_v14, %v10674_v14  ;;  %v10677_v9 = vpop.xlane.xlu1 %10676 }
 0xa5b   : > { %v10897_v20 = vrot.slane %v10769_v24, %v14394_v1  ;;  %v10901_v40 = vrot.slane %v10770_v21, %v14389_v4  ;;  %v11093_v24 = vld [vmem:[#allocation2] sm:$0xff] }
 0xa5c   : > { %v10792_v5 = vunpack.c.l.b16 %v10713_v36 }
 0xa5d   : > { %v10680_v17 = vpop.xlane.xlu0 %10679  ;;  %v10902_v30 = vsel %vm5568_vm12, %v10901_v40, %v10897_v20 }
 0xa5e   : > { %v10714_v10 = vpack.c.bf16 %v10680_v17, %v10677_v9  ;;  %v10611_v12 = vpop.xlane.xlu1 %10610  ;;  %v11004_v43 = vrot.slane %v10792_v5, %v14400_v18 }
 0xa5f   : > { %v10699_v15 = vpack.c.bf16 %v10611_v12, %v10611_v12 }
 0xa60   : > { %v10793_v19 = vunpack.c.l.b16 %v10714_v10  ;;  %v10794_v58 = vunpack.c.h.b16 %v10714_v10  ;;  %v11005_v50 = vsel %vm5575_vm13, %v11004_v43, %v11000_v33 }
 0xa61   : > { %v10771_v32 = vunpack.c.l.b16 %v10699_v15  ;;  %v10683_v57 = vpop.xlane.xlu0 %10682 }
 0xa62   : > { %v10715_v8 = vpack.c.bf16 %v10683_v57, %v10683_v57  ;;  %v11009_v29 = vrot.slane %v10793_v19, %v14394_v1  ;;  %v11013_v27 = vrot.slane %v10794_v58, %v14389_v4  ;;  %v11023_v1 = vsel %vm5277_vm8, %v10865_v31, %v17043_v56 }
 0xa63   : > { %v10906_v48 = vrot.slane %v10771_v32, %v14400_v18  ;;  %v11030_v4 = vsel %vm5277_vm8, %v10977_v53, %v17055_v49  ;;  %v11024_v3 = vsel %vm5280_vm9, %v10879_v54, %v11023_v1 }
 0xa64   : > { %v10795_v61 = vunpack.c.l.b16 %v10715_v8  ;;  %v11031_v26 = vsel %vm5280_vm9, %v10991_v51, %v11030_v4  ;;  %v11014_v14 = vsel %vm5568_vm12, %v11013_v27, %v11009_v29  ;;  %v11025_v34 = vsel %vm5283_vm10, %v10893_v62, %v11024_v3 }
 0xa65   : > { %v10907_v55 = vsel %vm5575_vm13, %v10906_v48, %v10902_v30  ;;  %v11032_v45 = vsel %vm5283_vm10, %v11005_v50, %v11031_v26 }
 0xa66   : > { %v11018_v37 = vrot.slane %v10795_v61, %v14400_v18  ;;  %v11026_v56 = vsel %vm5286_vm11, %v10907_v55, %v11025_v34 }
 0xa68   : > { %v11019_v7 = vsel %vm5575_vm13, %v11018_v37, %v11014_v14 }
 0xa69   : > { %v11033_v49 = vsel %vm5286_vm11, %v11019_v7, %v11032_v45 }
 0xa6a   : > { %v11034_v31 = vpack.c.b16 %v11033_v49, %v11026_v56 }
 0xa6c   : > { %11622 = vmatmul.mubr.msk.bf16.vlgmr.msra.gmra.mxu1 %vm4719_vm4, %v11034_v31 }
 0xa7c   : > { %v9522_v18 = vpop.f32.mrf.mxu1 }
 0xa7d   : > { %v9529_v36 = vadd.f32 %v9522_v18, %v17114_v42 }
 0xa7e   : > { %v11607_v9 = vpop.f32.mrf.mxu1 }
 0xa80   : > { %v9525_v0 = vpop.f32.mrf.mxu1 }
 0xa81   : > { %v9530_v46 = vadd.f32 %v9525_v0, %v17129_v60 }
 0xa82   : > { %v11608_v28 = vpop.f32.mrf.mxu1 }
 0xb10   : > { %v10303_v2 = vpop.f32.mrf.mxu0 }
 0xb11   : > { %v10310_v47 = vadd.f32 %v10303_v2, %v9529_v36 }
 0xb12   : > { %v11615_v22 = vpop.f32.mrf.mxu0 }
 0xb14   : > { %v10306_v39 = vpop.f32.mrf.mxu0 }
 0xb15   : > { %v10311_v17 = vadd.f32 %v10306_v39, %v9530_v46 }
 0xb16   : > { %v11616_v11 = vpop.f32.mrf.mxu0 }
 0xb2c   : > { %v11084_v16 = vpop.f32.mrf.mxu1 }
 0xb2d   : > { %v11091_v21 = vadd.f32 %v11084_v16, %v10310_v47 }
 0xb2e   : > { %v11623_v5 = vpop.f32.mrf.mxu1 }
 0xb2f   : > { %v11095_v44 = vadd.f32 %v11093_v24, %v11091_v21 }
 0xb30   : > { %v11087_v23 = vpop.f32.mrf.mxu1 }
 0xb31   : > { %11097 = vst.msk [vmem:[#allocation2] sm:$0xff] %vm626_vm3, %v11095_v44  ;;  %v11092_v42 = vadd.f32 %v11087_v23, %v10311_v17 }
 0xb32   : > { %v11624_v60 = vpop.f32.mrf.mxu1 }
 0xb33   : > { %v11096_v10 = vadd.f32 %v11094_v38, %v11092_v42 }
 0xb35   : > { %11098 = vst.msk [vmem:[#allocation2 + $0x8] sm:$0xff] %vm626_vm3, %v11096_v10 }
 0xb36   : > { %11875 = shalt.err (!%p11872_p13)
}
 0xb37   : > { %s11921_s20 = smov 128   ;;  %s11922_s12 = smov 8  }
 0xb38   : > { %11628 = dma.vmem_to_hbm [thread:$0]  (%p17184_p6), %s11109_s17, 256, %s17218_s9, [#allocation3], %s11921_s20, %s11921_s20, %s11922_s12  }
 0xb39   : > { %11899 = dma.done.wait (%p17184_p6), [#allocation3], 256  }
 0xb3a   : > { %11901 = vsyncadd (%p17184_p6), [#allocation3], 4294967040 }
 0xb3b PF: > { %s20_s11 = sadd.s32 1, %s11912_s11   ;;  %s18013_s30 = smov %s11908_s10 }
 0xb3c   : > { %p17_p0 = scmp.ge.s32.totalorder %s20_s11, 6   ;;  %s18014_s10 = smov %s18016_s13 }
 0xb3e   :  { %19 = sbr.rel (!%p17_p0) target bundleno = 2 (0x2), region = 103 }
 0xb43   :  { %11124 = vsyncpa [#allocation3], 1 }
 0xb44   :  { %11126 = vsyncpa [#allocation3 + $0x1], 1 }

</bundles_post_ra>
